<compile_context>
chip_gen: v5e
topology: v5e:2x2
jax: 0.10.0
libtpu: 0.0.40
codegen_flags: <defaults>
</compile_context>

<pallas_src>
import functools

import jax
import jax.numpy as jnp
from jax import lax
from jax.experimental import pallas as pl
from jax.experimental.pallas import tpu as pltpu

_BN_EPS = 1e-5
_NEG_SLOPE = 0.2
_LANE = 128


def _round_up(n, m):
    return ((n + m - 1) // m) * m


# ----------------------------------------------------------------------------
# Fused kernel: whole network (2 conv blocks + 3 linear layers) for one
# row-tile of 8x8 blocks.  Weights are VMEM-resident (constant index_map).
# ----------------------------------------------------------------------------
def _vae_fused_kernel(*refs, n_layers, n_conv, bias_segs):
    it = iter(refs)
    x_ref = next(it)
    w_refs = [next(it) for _ in range(n_layers)]
    b_ref = next(it)                      # packed shifts / biases, f32 (1, total)
    o_ref = next(it)

    h = x_ref[...]                        # (tile_b, in_dim) f32
    for li in range(n_layers):
        w = w_refs[li][...]               # bf16 (or f32) operator
        start, width = bias_segs[li]      # static, 128-aligned
        bias = b_ref[:, start:start + width]
        # MXU matmul in the weight dtype, f32 accumulation.
        h = jnp.dot(h.astype(w.dtype), w,
                    preferred_element_type=jnp.float32) + bias
        if li < n_conv:
            h = jnp.where(h >= 0.0, h, _NEG_SLOPE * h)   # LeakyReLU(0.2), f32 VPU
        elif li < n_layers - 1:
            h = jnp.maximum(h, 0.0)                      # ReLU (Dropout p=0 -> id)
    o_ref[...] = h.astype(o_ref.dtype)


def vae_forward(fused, x, *, tile_b=256):
    """x: (B, C, H, W) or (B, H, W) float32 in NCHW layout, like the PyTorch module."""
    if x.ndim == 3:
        x = x[:, None, :, :]                       # unsqueeze channel, like torch
    B = x.shape[0]
    # NCHW flatten is a free metadata reshape; the first conv operator's rows
    # are already permuted to consume it, so no transpose happens at runtime.
    x2 = x.reshape(B, -1).astype(jnp.float32)
    in_dim = x2.shape[1]
    assert in_dim == fused["mats"][0].shape[0], "input size mismatch"

    nsp = fused["nsp"]
    out_pad = fused["out_pad"]

    # Row tiling: pad B to a multiple of the row tile (>= 8 sublanes).
    tb = min(tile_b, _round_up(B, 8))
    b_pad = _round_up(B, tb)
    if b_pad != B:
        x2 = jnp.pad(x2, ((0, b_pad - B), (0, 0)))
    grid = (b_pad // tb,)

    in_specs = (
        [pl.BlockSpec((tb, in_dim), lambda i: (i, 0))]                     # activations
        + [pl.BlockSpec(m.shape, lambda i: (0, 0)) for m in fused["mats"]]  # weights
        + [pl.BlockSpec(fused["bias"].shape, lambda i: (0, 0))]            # packed biases
    )
    out_spec = pl.BlockSpec((tb, out_pad), lambda i: (i, 0))

    nbytes = lambda a: int(a.size) * jnp.dtype(a.dtype).itemsize
    flops = 2 * b_pad * sum(int(m.shape[0]) * int(m.shape[1]) for m in fused["mats"])
    bytes_accessed = (b_pad * in_dim * 4
                      + sum(nbytes(m) for m in fused["mats"])
                      + nbytes(fused["bias"])
                      + b_pad * out_pad * 4)

    kernel = functools.partial(_vae_fused_kernel,
                               n_layers=len(fused["mats"]),
                               n_conv=fused["n_conv"],
                               bias_segs=fused["bias_segs"])
    out = pl.pallas_call(
        kernel,
        grid=grid,
        in_specs=in_specs,
        out_specs=out_spec,
        out_shape=jax.ShapeDtypeStruct((b_pad, out_pad), jnp.float32),
        compiler_params=pltpu.CompilerParams(
            dimension_semantics=("parallel",),       # 2 TCs on v7x split the rows
            vmem_limit_bytes=32 * 1024 * 1024),      # sized for v7x (64 MiB phys)
        cost_estimate=pl.CostEstimate(flops=flops, transcendentals=0,
                                      bytes_accessed=bytes_accessed),
    )(x2, *fused["mats"], fused["bias"])

    out = out[:B]
    return out[:, :nsp], out[:, nsp:2 * nsp]        # (means, log-variances)


# ----------------------------------------------------------------------------
# Host-side operator construction (done once at init, not per forward pass).
# ----------------------------------------------------------------------------
def _shift_matrix(H, W, di, dj):
    """S[p_out, p_in] = 1 iff p_in == (i_out+di, j_out+dj) and it is in-bounds."""
    p = jnp.arange(H * W)
    i, j = p // W, p % W
    s = (i[None, :] == i[:, None] + di) & (j[None, :] == j[:, None] + dj)
    return s.astype(jnp.float32)


def _expand_conv(w_torch, H, W):
    """Dense (HW*Cin, HW*Cout) operator equal to a 3x3 / stride 1 / pad 1 conv
    acting on the NHWC-flat activation (row index p*Cin + cin)."""
    cout, cin, _, _ = w_torch.shape
    K = jnp.zeros((H * W * cin, H * W * cout), jnp.float32)
    for di in (-1, 0, 1):
        for dj in (-1, 0, 1):
            S = _shift_matrix(H, W, di, dj)
            W_t = w_torch[:, :, di + 1, dj + 1].T        # (Cin, Cout)
            K = K + jnp.kron(S.T, W_t)
    return K


def build_fused(raw, H, W, weight_dtype=jnp.bfloat16):
    """Fold conv weights, conv bias, eval-mode BN (scale into operator columns),
    all NCHW layout permutations and lane padding into: a list of matmul
    operators (weight_dtype) + one packed f32 bias/shift vector."""
    HW = H * W
    mats, bias_chunks, segs = [], [], []
    off = 0
    prev_w = None

    def pad_cols(m, b):
        w = m.shape[1]
        wp = _round_up(w, _LANE)
        if wp != w:
            m = jnp.pad(m, ((0, 0), (0, wp - w)))
            b = jnp.pad(b, ((0, wp - w),))
        return m, b, wp

    def pad_rows(m, rows_needed):
        if m.shape[0] != rows_needed:
            m = jnp.pad(m, ((0, rows_needed - m.shape[0]), (0, 0)))
        return m

    # Conv blocks: pre-expanded operator, BN scale folded into columns.
    for li, layer in enumerate(raw["conv"]):
        cout, cin = layer["w"].shape[0], layer["w"].shape[1]
        K = _expand_conv(layer["w"], H, W)
        if li == 0:
            # Fold the NCHW input flatten (r = cin*HW + p) into the operator rows.
            r = jnp.arange(cin * HW)
            K = K[(r % HW) * cin + r // HW, :]
        if "gamma" in layer:                              # eval-mode BatchNorm2d
            scale = layer["gamma"] / jnp.sqrt(layer["var"] + _BN_EPS)
            shift = layer["beta"] + (layer["b"] - layer["mean"]) * scale
        else:
            scale = jnp.ones((cout,), jnp.float32)
            shift = layer["b"]
        K = K * jnp.tile(scale, HW)[None, :]              # fold scale into columns
        b = jnp.tile(shift, HW)
        if prev_w is not None:
            K = pad_rows(K, prev_w)
        K, b, wp = pad_cols(K, b)
        mats.append(K.astype(weight_dtype))
        bias_chunks.append(b)
        segs.append((off, wp))
        off += wp
        prev_w = wp

    # Linear head: fold torch Flatten's NCHW ordering into lin-1's rows, pad
    # every hidden / output width to a lane multiple (128).
    c_last = raw["conv"][-1]["w"].shape[0]
    for li, layer in enumerate(raw["lin"]):
        wmat = layer["w"].T.astype(jnp.float32)           # torch (out,in) -> (in,out)
        if li == 0:
            q = jnp.arange(c_last * HW)
            wmat = wmat[(q % c_last) * HW + q // c_last, :]
        wmat = pad_rows(wmat, prev_w)
        wmat, b, wp = pad_cols(wmat, layer["b"])
        mats.append(wmat.astype(weight_dtype))
        bias_chunks.append(b)
        segs.append((off, wp))
        off += wp
        prev_w = wp

    bias = jnp.concatenate(bias_chunks)[None, :].astype(jnp.float32)
    return {"nsp": raw["nsp"], "n_conv": len(raw["conv"]),
            "mats": mats, "bias": bias, "bias_segs": tuple(segs),
            "out_pad": prev_w}


# ----------------------------------------------------------------------------
# Deterministic parameters (torch-convention shapes, mirrors TorchSMoE_VAE).
# ----------------------------------------------------------------------------
def init_raw_params(key, *, n_kernels=4, block_size=8, n_channels=1,
                    conv_channels=(8, 16), lin_features=(32, 16),
                    conv_batchnorm=True):
    nsp = 7 * n_kernels
    conv_sizes = [n_channels] + list(conv_channels)
    lin_sizes = [conv_sizes[-1] * block_size ** 2] + list(lin_features)
    raw = {"nsp": nsp, "conv": [], "lin": []}

    for cin, cout in zip(conv_sizes[:-1], conv_sizes[1:]):
        key, kw, kb, k1, k2, k3, k4 = jax.random.split(key, 7)
        layer = {"w": 0.1 * jax.random.normal(kw, (cout, cin, 3, 3), jnp.float32),
                 "b": 0.1 * jax.random.normal(kb, (cout,), jnp.float32)}
        if conv_batchnorm:
            layer["gamma"] = 1.0 + 0.1 * jax.random.normal(k1, (cout,), jnp.float32)
            layer["beta"] = 0.1 * jax.random.normal(k2, (cout,), jnp.float32)
            layer["mean"] = 0.1 * jax.random.normal(k3, (cout,), jnp.float32)
            layer["var"] = jax.random.uniform(k4, (cout,), jnp.float32,
                                              minval=0.5, maxval=1.5)
        raw["conv"].append(layer)

    for fin, fout in zip(lin_sizes[:-1], lin_sizes[1:]):
        key, kw, kb = jax.random.split(key, 3)
        raw["lin"].append({"w": 0.1 * jax.random.normal(kw, (fout, fin), jnp.float32),
                           "b": 0.1 * jax.random.normal(kb, (fout,), jnp.float32)})

    key, kw, kb = jax.random.split(key, 3)
    raw["lin"].append({"w": 0.1 * jax.random.normal(kw, (2 * nsp, lin_sizes[-1]), jnp.float32),
                       "b": 0.1 * jax.random.normal(kb, (2 * nsp,), jnp.float32)})
    return raw


# ----------------------------------------------------------------------------
# Plain-JAX reference (torch-faithful, eval mode) for the numerical self-check.
# ----------------------------------------------------------------------------
def reference_forward(raw, x):
    if x.ndim == 3:
        x = x[:, None, :, :]
    h = x.astype(jnp.float32)
    for layer in raw["conv"]:
        h = lax.conv_general_dilated(h, layer["w"], window_strides=(1, 1),
                                     padding=((1, 1), (1, 1)),
                                     dimension_numbers=("NCHW", "OIHW", "NCHW"),
                                     precision=lax.Precision.HIGHEST)
        h = h + layer["b"][None, :, None, None]
        if "gamma" in layer:
            scale = layer["gamma"] / jnp.sqrt(layer["var"] + _BN_EPS)
            h = (h - layer["mean"][None, :, None, None]) * scale[None, :, None, None] \
                + layer["beta"][None, :, None, None]
        h = jnp.where(h >= 0.0, h, _NEG_SLOPE * h)
    h = h.reshape(h.shape[0], -1)                          # NCHW flatten, like torch
    for layer in raw["lin"][:-1]:
        h = jnp.maximum(jnp.dot(h, layer["w"].T, precision=lax.Precision.HIGHEST)
                        + layer["b"], 0.0)
    last = raw["lin"][-1]
    h = jnp.dot(h, last["w"].T, precision=lax.Precision.HIGHEST) + last["b"]
    nsp = raw["nsp"]
    return h[:, :nsp], h[:, nsp:]


if __name__ == "__main__":
    key = jax.random.PRNGKey(0)
    pkey, xkey = jax.random.split(key)

    # Small but structurally faithful config: n_kernels=4 -> 28 SMoE params,
    # block_size=8, 1 input channel, conv channels [1, 8, 16], lin [1024, 32, 16].
    # Batch = 512 8x8 blocks per call (one 181x181-ish image's worth) so the
    # MXU M dimension is actually used, per the performance review.
    C, S = 1, 8
    B = 512
    raw = init_raw_params(pkey, n_kernels=4, block_size=S, n_channels=C,
                          conv_channels=(8, 16), lin_features=(32, 16))
    x = jax.random.normal(xkey, (B, C, S, S), dtype=jnp.float32)   # NCHW, like PyTorch

    ref_means, ref_logv = reference_forward(raw, x)

    # --- bf16-weight build (production path) --------------------------------
    fused = build_fused(raw, S, S, weight_dtype=jnp.bfloat16)
    fwd = jax.jit(functools.partial(vae_forward, fused))
    means, log_vars = fwd(x)
    jax.block_until_ready((means, log_vars))

    assert means.shape == (B, 28), means.shape
    assert log_vars.shape == (B, 28), log_vars.shape
    assert bool(jnp.all(jnp.isfinite(means))) and bool(jnp.all(jnp.isfinite(log_vars)))

    err_bf16 = max(float(jnp.max(jnp.abs(means - ref_means))),
                   float(jnp.max(jnp.abs(log_vars - ref_logv))))
    # bf16 operands into the MXU (f32 accumulation): ~2^-8 relative rounding per
    # layer over 5 matmul layers on O(1) activations -> expected ~1e-2 max abs.
    assert err_bf16 < 7e-2, f"bf16 path mismatch vs reference: {err_bf16}"

    # --- f32-weight build: tighter check of operator construction / folding ---
    fused32 = build_fused(raw, S, S, weight_dtype=jnp.float32)
    m32, v32 = jax.jit(functools.partial(vae_forward, fused32))(x)
    err_f32 = max(float(jnp.max(jnp.abs(m32 - ref_means))),
                  float(jnp.max(jnp.abs(v32 - ref_logv))))
    # Expected ~1e-5 for exact f32 MXU passes; 1e-2 leaves headroom for
    # reduced-precision default f32 matmul passes while staying 2x tighter
    # than the previous 2e-2 check.
    assert err_f32 < 1e-2, f"f32 path mismatch vs reference: {err_f32}"

    # --- tiny / ragged batch exercises the row-padding path (B=2 -> pad to 8) --
    m2, v2 = jax.jit(functools.partial(vae_forward, fused))(x[:2])
    err_small = max(float(jnp.max(jnp.abs(m2 - means[:2]))),
                    float(jnp.max(jnp.abs(v2 - log_vars[:2]))))
    assert err_small < 1e-5, f"small-batch path mismatch: {err_small}"

    print("KERNEL_OK")
</pallas_src>

<mosaic_0001>
module attributes {stable_mosaic.version = 11 : i64} {
  func.func @_vae_fused_kernel(%arg0: i32, %arg1: memref<256x64xf32, #tpu.memory_space<vmem>>, %arg2: memref<64x512xbf16, #tpu.memory_space<vmem>>, %arg3: memref<512x1024xbf16, #tpu.memory_space<vmem>>, %arg4: memref<1024x128xbf16, #tpu.memory_space<vmem>>, %arg5: memref<128x128xbf16, #tpu.memory_space<vmem>>, %arg6: memref<128x128xbf16, #tpu.memory_space<vmem>>, %arg7: memref<1x1920xf32, #tpu.memory_space<vmem>>, %arg8: memref<256x128xf32, #tpu.memory_space<vmem>>) attributes {dimension_semantics = [#tpu.dimension_semantics<parallel>], iteration_bounds = array<i64: 2>, scalar_prefetch = 0 : i64, scratch_operands = 0 : i64, tpu.core_type = #tpu.core_type<tc>, window_params = [{transform_indices = @transform_0, window_bounds = array<i64: 256, 64>}, {pipeline_mode = #tpu.pipeline_mode<synchronous>, transform_indices = @transform_1, window_bounds = array<i64: 64, 512>}, {pipeline_mode = #tpu.pipeline_mode<synchronous>, transform_indices = @transform_2, window_bounds = array<i64: 512, 1024>}, {pipeline_mode = #tpu.pipeline_mode<synchronous>, transform_indices = @transform_3, window_bounds = array<i64: 1024, 128>}, {pipeline_mode = #tpu.pipeline_mode<synchronous>, transform_indices = @transform_4, window_bounds = array<i64: 128, 128>}, {pipeline_mode = #tpu.pipeline_mode<synchronous>, transform_indices = @transform_5, window_bounds = array<i64: 128, 128>}, {pipeline_mode = #tpu.pipeline_mode<synchronous>, transform_indices = @transform_6, window_bounds = array<i64: 1, 1920>}, {transform_indices = @transform_7, window_bounds = array<i64: 256, 128>}]} {
    %c0 = arith.constant 0 : index
    %c0_0 = arith.constant 0 : index
    %0 = vector.load %arg1[%c0, %c0_0] : memref<256x64xf32, #tpu.memory_space<vmem>>, vector<256x64xf32>
    %c0_1 = arith.constant 0 : index
    %c0_2 = arith.constant 0 : index
    %1 = vector.load %arg2[%c0_1, %c0_2] : memref<64x512xbf16, #tpu.memory_space<vmem>>, vector<64x512xbf16>
    %c0_3 = arith.constant 0 : index
    %c0_4 = arith.constant 0 : index
    %2 = vector.load %arg7[%c0_3, %c0_4] : memref<1x1920xf32, #tpu.memory_space<vmem>>, vector<1x512xf32>
    %3 = arith.truncf %0 : vector<256x64xf32> to vector<256x64xbf16>
    %cst = arith.constant dense<0.000000e+00> : vector<256x512xf32>
    %4 = tpu.matmul %3, %1, %cst {dimension_numbers = #tpu.dot_dimension_numbers<[1], [0], [0], [1], [0, 0, 1, 1], [], []>} : vector<256x64xbf16>, vector<64x512xbf16>, vector<256x512xf32> -> vector<256x512xf32>
    %5 = vector.broadcast %2 : vector<1x512xf32> to vector<256x512xf32>
    %6 = arith.addf %4, %5 : vector<256x512xf32>
    %cst_5 = arith.constant 0.000000e+00 : f32
    %7 = vector.broadcast %cst_5 : f32 to vector<256x512xf32>
    %8 = arith.cmpf oge, %6, %7 : vector<256x512xf32>
    %cst_6 = arith.constant 2.000000e-01 : f32
    %9 = vector.broadcast %cst_6 : f32 to vector<256x512xf32>
    %10 = arith.mulf %9, %6 : vector<256x512xf32>
    %11 = arith.select %8, %6, %10 : vector<256x512xi1>, vector<256x512xf32>
    %c0_7 = arith.constant 0 : index
    %c0_8 = arith.constant 0 : index
    %12 = vector.load %arg3[%c0_7, %c0_8] : memref<512x1024xbf16, #tpu.memory_space<vmem>>, vector<512x1024xbf16>
    %c0_9 = arith.constant 0 : index
    %c512 = arith.constant 512 : index
    %13 = vector.load %arg7[%c0_9, %c512] : memref<1x1920xf32, #tpu.memory_space<vmem>>, vector<1x1024xf32>
    %14 = arith.truncf %11 : vector<256x512xf32> to vector<256x512xbf16>
    %cst_10 = arith.constant dense<0.000000e+00> : vector<256x1024xf32>
    %15 = tpu.matmul %14, %12, %cst_10 {dimension_numbers = #tpu.dot_dimension_numbers<[1], [0], [0], [1], [0, 0, 1, 1], [], []>} : vector<256x512xbf16>, vector<512x1024xbf16>, vector<256x1024xf32> -> vector<256x1024xf32>
    %16 = vector.broadcast %13 : vector<1x1024xf32> to vector<256x1024xf32>
    %17 = arith.addf %15, %16 : vector<256x1024xf32>
    %cst_11 = arith.constant 0.000000e+00 : f32
    %18 = vector.broadcast %cst_11 : f32 to vector<256x1024xf32>
    %19 = arith.cmpf oge, %17, %18 : vector<256x1024xf32>
    %cst_12 = arith.constant 2.000000e-01 : f32
    %20 = vector.broadcast %cst_12 : f32 to vector<256x1024xf32>
    %21 = arith.mulf %20, %17 : vector<256x1024xf32>
    %22 = arith.select %19, %17, %21 : vector<256x1024xi1>, vector<256x1024xf32>
    %c0_13 = arith.constant 0 : index
    %c0_14 = arith.constant 0 : index
    %23 = vector.load %arg4[%c0_13, %c0_14] : memref<1024x128xbf16, #tpu.memory_space<vmem>>, vector<1024x128xbf16>
    %c0_15 = arith.constant 0 : index
    %c1536 = arith.constant 1536 : index
    %24 = vector.load %arg7[%c0_15, %c1536] : memref<1x1920xf32, #tpu.memory_space<vmem>>, vector<1x128xf32>
    %25 = arith.truncf %22 : vector<256x1024xf32> to vector<256x1024xbf16>
    %cst_16 = arith.constant dense<0.000000e+00> : vector<256x128xf32>
    %26 = tpu.matmul %25, %23, %cst_16 {dimension_numbers = #tpu.dot_dimension_numbers<[1], [0], [0], [1], [0, 0, 1, 1], [], []>} : vector<256x1024xbf16>, vector<1024x128xbf16>, vector<256x128xf32> -> vector<256x128xf32>
    %27 = vector.broadcast %24 : vector<1x128xf32> to vector<256x128xf32>
    %28 = arith.addf %26, %27 : vector<256x128xf32>
    %cst_17 = arith.constant 0.000000e+00 : f32
    %29 = vector.broadcast %cst_17 : f32 to vector<256x128xf32>
    %30 = arith.maximumf %28, %29 : vector<256x128xf32>
    %c0_18 = arith.constant 0 : index
    %c0_19 = arith.constant 0 : index
    %31 = vector.load %arg5[%c0_18, %c0_19] : memref<128x128xbf16, #tpu.memory_space<vmem>>, vector<128x128xbf16>
    %c0_20 = arith.constant 0 : index
    %c1664 = arith.constant 1664 : index
    %32 = vector.load %arg7[%c0_20, %c1664] : memref<1x1920xf32, #tpu.memory_space<vmem>>, vector<1x128xf32>
    %33 = arith.truncf %30 : vector<256x128xf32> to vector<256x128xbf16>
    %cst_21 = arith.constant dense<0.000000e+00> : vector<256x128xf32>
    %34 = tpu.matmul %33, %31, %cst_21 {dimension_numbers = #tpu.dot_dimension_numbers<[1], [0], [0], [1], [0, 0, 1, 1], [], []>} : vector<256x128xbf16>, vector<128x128xbf16>, vector<256x128xf32> -> vector<256x128xf32>
    %35 = vector.broadcast %32 : vector<1x128xf32> to vector<256x128xf32>
    %36 = arith.addf %34, %35 : vector<256x128xf32>
    %cst_22 = arith.constant 0.000000e+00 : f32
    %37 = vector.broadcast %cst_22 : f32 to vector<256x128xf32>
    %38 = arith.maximumf %36, %37 : vector<256x128xf32>
    %c0_23 = arith.constant 0 : index
    %c0_24 = arith.constant 0 : index
    %39 = vector.load %arg6[%c0_23, %c0_24] : memref<128x128xbf16, #tpu.memory_space<vmem>>, vector<128x128xbf16>
    %c0_25 = arith.constant 0 : index
    %c1792 = arith.constant 1792 : index
    %40 = vector.load %arg7[%c0_25, %c1792] : memref<1x1920xf32, #tpu.memory_space<vmem>>, vector<1x128xf32>
    %41 = arith.truncf %38 : vector<256x128xf32> to vector<256x128xbf16>
    %cst_26 = arith.constant dense<0.000000e+00> : vector<256x128xf32>
    %42 = tpu.matmul %41, %39, %cst_26 {dimension_numbers = #tpu.dot_dimension_numbers<[1], [0], [0], [1], [0, 0, 1, 1], [], []>} : vector<256x128xbf16>, vector<128x128xbf16>, vector<256x128xf32> -> vector<256x128xf32>
    %43 = vector.broadcast %40 : vector<1x128xf32> to vector<256x128xf32>
    %44 = arith.addf %42, %43 : vector<256x128xf32>
    %c0_27 = arith.constant 0 : index
    %c0_28 = arith.constant 0 : index
    %45 = vector.load %arg8[%c0_27, %c0_28] : memref<256x128xf32, #tpu.memory_space<vmem>>, vector<256x128xf32>
    tpu.vector_store %arg8[%c0_27, %c0_28], %44 {strides = array<i32>} : memref<256x128xf32, #tpu.memory_space<vmem>>, vector<256x128xf32>,
    return
  }
  func.func @transform_0(%arg0: i32) -> (i32, i32) {
    %c0_i32 = arith.constant 0 : i32
    %c0_i32_0 = arith.constant 0 : i32
    return %arg0, %c0_i32 : i32, i32
  }
  func.func @transform_1(%arg0: i32) -> (i32, i32) {
    %c0_i32 = arith.constant 0 : i32
    %c0_i32_0 = arith.constant 0 : i32
    %c0_i32_1 = arith.constant 0 : i32
    return %c0_i32, %c0_i32_0 : i32, i32
  }
  func.func @transform_2(%arg0: i32) -> (i32, i32) {
    %c0_i32 = arith.constant 0 : i32
    %c0_i32_0 = arith.constant 0 : i32
    %c0_i32_1 = arith.constant 0 : i32
    return %c0_i32, %c0_i32_0 : i32, i32
  }
  func.func @transform_3(%arg0: i32) -> (i32, i32) {
    %c0_i32 = arith.constant 0 : i32
    %c0_i32_0 = arith.constant 0 : i32
    %c0_i32_1 = arith.constant 0 : i32
    return %c0_i32, %c0_i32_0 : i32, i32
  }
  func.func @transform_4(%arg0: i32) -> (i32, i32) {
    %c0_i32 = arith.constant 0 : i32
    %c0_i32_0 = arith.constant 0 : i32
    %c0_i32_1 = arith.constant 0 : i32
    return %c0_i32, %c0_i32_0 : i32, i32
  }
  func.func @transform_5(%arg0: i32) -> (i32, i32) {
    %c0_i32 = arith.constant 0 : i32
    %c0_i32_0 = arith.constant 0 : i32
    %c0_i32_1 = arith.constant 0 : i32
    return %c0_i32, %c0_i32_0 : i32, i32
  }
  func.func @transform_6(%arg0: i32) -> (i32, i32) {
    %c0_i32 = arith.constant 0 : i32
    %c0_i32_0 = arith.constant 0 : i32
    %c0_i32_1 = arith.constant 0 : i32
    return %c0_i32, %c0_i32_0 : i32, i32
  }
  func.func @transform_7(%arg0: i32) -> (i32, i32) {
    %c0_i32 = arith.constant 0 : i32
    %c0_i32_0 = arith.constant 0 : i32
    return %arg0, %c0_i32 : i32, i32
  }
}

</mosaic_0001>

<bundles_post_ra>
// kernel: vae_forward.1
= control target key start
LH: loop header
LB: loop body
LE: loop exit
PB: predicated region body
PF: predicated region fallthrough
CT: control target
= control target key end

     0   :  { %12 = vsyncpa [#allocation3], 0  ;;  %s14310_s0 = inlined_call_operand.vmem [shape: f32[512,64], index: 0, kind: input, shape index: {}]   ;;  %s14311_s1 = inlined_call_operand.vmem [shape: bf16[64,512], index: 1, kind: input, shape index: {}]   ;;  %s14312_s2 = inlined_call_operand.hbm [shape: bf16[512,1024], index: 2, kind: input, shape index: {}]   ;;  %s14313_s3 = inlined_call_operand.vmem [shape: bf16[1024,128], index: 3, kind: input, shape index: {}]   ;;  %s14314_s4 = inlined_call_operand.vmem [shape: bf16[128,128], index: 4, kind: input, shape index: {}]   ;;  %s14315_s5 = inlined_call_operand.vmem [shape: bf16[128,128], index: 5, kind: input, shape index: {}]   ;;  %s14316_s6 = inlined_call_operand.hbm [shape: f32[1,1920], index: 6, kind: input, shape index: {}]   ;;  %s14317_s7 = inlined_call_operand.vmem [shape: f32[512,128], index: 7, kind: output, shape index: {}]  }
   0x1   :  { %13 = vsyncpa [#allocation5], 0  ;;  %s10376_s24 = smov 0  }
   0x2 LB: > { %s216_s27 = sshll.u32 %s14312_s2, 4  ;;  %s8368_s28 = sadd.s32 4294967295, %s10330_s24   ;;  %s10330_s24 = sphi %s10376_s24, %s19_s24   ;;  %s217_s27 = int_to_ptr.hbm [resolvable:$true] %s216_s27 }
   0x3   : > { %p8370_p0 = scmp.ge.s32.totalorder %s10330_s24, 1  ;;  %p202_p1 = scmp.lt.s32.totalorder %s10330_s24, 3 }
   0x4   : > { %p10387_p2 = scmp.eq.s32.totalorder %s8368_s28, 0  ;;  %s10332_s8 = smov [#allocation2]  }
   0x5   : > { %p10391_p3 = pnand %p8370_p0, %p202_p1  ;;  %s218_s9 = sshll.u32 %s10332_s8, 4  ;;  %s219_s9 = int_to_ptr.vmem [resolvable:$true] %s218_s9 }
   0x6   : > { %s240_s12 = sshll.u32 %s14316_s6, 4  ;;  %s10333_s13 = smov [#allocation4]   ;;  %s241_s12 = int_to_ptr.hbm [resolvable:$true] %s240_s12 }
   0x7   : > { %p10223_p4 = pneg %p10391_p3  ;;  %s242_s14 = sshll.u32 %s10333_s13, 4  ;;  %s243_s14 = int_to_ptr.vmem [resolvable:$true] %s242_s14 }
   0x8   : > { %s10334_s15 = smov 512   ;;  %s10335_s16 = smov 32  }
   0x9   : > { %p10224_p5 = pnand %p10387_p2, %p10223_p4  ;;  %264 = sbr.rel (%p10391_p3) target bundleno = 3390 (0xd3e), region = 48 }
   0xb   : > { %10226 = dma.hbm_to_vmem [thread:$0]  (!%p10224_p5), %s217_s27, 32768, %s219_s9, [#allocation3], %s10334_s15, %s10334_s15, %s10335_s16  }
   0xc   : > { %10229 = dma.hbm_to_vmem [thread:$0]  (!%p10224_p5), %s241_s12, 240, %s243_s14, [#allocation5]  }
   0xe   : > { %10321 = dma.done.wait (%p10387_p2), [#allocation3], 32768  }
   0xf   : > { %10323 = vsyncadd (%p10387_p2), [#allocation3], 4294934528 }
  0x10   : > { %10325 = dma.done.wait (%p10387_p2), [#allocation5], 240  }
  0x11   : > { %10327 = vsyncadd (%p10387_p2), [#allocation5], 4294967056  ;;  %s8377_s17 = sshll.u32 %s8368_s28, 5  ;;  %v8431_v0 = vld [vmem:[%s14311_s1 + $0x60] sm:$0xf]  ;;  %vm469_vm0 = vcmask 523264  }
  0x12   : > { %p303_p6 = scmp.lt.s32.totalorder %s8377_s17, 63  ;;  %v9869_v1 = vld [vmem:[%s14311_s1 + $0x6c] sm:$0xf0]  ;;  %v9867_v2 = vld [vmem:[%s14311_s1 + $0x64] sm:$0xf] }
  0x13   : > { %v8432_v3 = vor.u32 %v9869_v1, %v8431_v0  ;;  %v8433_v4 = vld [vmem:[%s14311_s1 + $0x70] sm:$0xf0]  ;;  %v8415_v5 = vld [vmem:[%s14311_s1 + $0x40] sm:$0xf]  ;;  %v9865_v6 = vld [vmem:[%s14311_s1 + $0x4c] sm:$0xf0] }
  0x14   : > { %s15779_s17 = smov (!%p303_p6, %s8377_s17), 63  ;;  %v8436_v7 = vor.u32 %v9867_v2, %v8433_v4  ;;  %v9863_v8 = vld [vmem:[%s14311_s1 + $0x44] sm:$0xf]  ;;  %v8417_v9 = vld [vmem:[%s14311_s1 + $0x50] sm:$0xf0]  ;;  %v8416_v10 = vor.u32 %v9865_v6, %v8415_v5 }
  0x15   : > { %522 = vmatpush.bf16.msra.mxu0 %v8432_v3  ;;  %10207 = vmatpush.bf16.msra.mxu2 %v8432_v3  ;;  %s8378_s12 = sshll.u32 %s15779_s17, 3  ;;  %v8420_v11 = vor.u32 %v9863_v8, %v8417_v9  ;;  %v8399_v12 = vld [vmem:[%s14311_s1 + $0x20] sm:$0xf]  ;;  %v9861_v13 = vld [vmem:[%s14311_s1 + $0x2c] sm:$0xf0] }
  0x16   : > { %611 = vmatpush.bf16.msra.mxu1 %v8436_v7  ;;  %10211 = vmatpush.bf16.msra.mxu3 %v8436_v7  ;;  %v9859_v14 = vld [vmem:[%s14311_s1 + $0x24] sm:$0xf]  ;;  %v8401_v15 = vld [vmem:[%s14311_s1 + $0x30] sm:$0xf0]  ;;  %s10456_s25 = scalar_lea.vmem %s14310_s0, %s8378_s12  ;;  %v8400_v16 = vor.u32 %v9861_v13, %v8399_v12  ;;  %v8383_v17 = vld [vmem:[%s14311_s1] sm:$0xf]  ;;  %s14227_s29 = scalar_lea.vmem %s14317_s7, %s8378_s12 }
  0x17   : > { %v9857_v18 = vld [vmem:[%s14311_s1 + $0xc] sm:$0xf0]  ;;  %v8404_v19 = vor.u32 %v9859_v14, %v8401_v15  ;;  %v9855_v20 = vld [vmem:[%s14311_s1 + $0x4] sm:$0xf]  ;;  %v8385_v21 = vld [vmem:[%s14311_s1 + $0x10] sm:$0xf0] }
  0x18   : > { %v8439_v22 = vld [vmem:[%s14311_s1 + $0x68] sm:$0xf]  ;;  %v315_v23 = vld [vmem:[%s10456_s25] sm:$0xff]  ;;  %v9870_v24 = vld [vmem:[%s14311_s1 + $0x74] sm:$0xf0]  ;;  %v8384_v27 = vor.u32 %v9857_v18, %v8383_v17  ;;  %v8388_v31 = vor.u32 %v9855_v20, %v8385_v21 }
  0x19   : > { %523 = vmatpush.bf16.msra.mxu0 %v8416_v10  ;;  %10208 = vmatpush.bf16.msra.mxu2 %v8416_v10  ;;  %v9868_v25 = vld [vmem:[%s14311_s1 + $0x6c] sm:$0xf]  ;;  %v8441_v26 = vld [vmem:[%s14311_s1 + $0x78] sm:$0xf0]  ;;  %v331_v29 = vld [vmem:[%s10456_s25 + $0x80] sm:$0xff]  ;;  %v8440_v32 = vor.u32 %v9870_v24, %v8439_v22 }
  0x1a   : > { %612 = vmatpush.bf16.msra.mxu1 %v8420_v11  ;;  %10212 = vmatpush.bf16.msra.mxu3 %v8420_v11  ;;  %v316_v28 = vld [vmem:[%s10456_s25 + $0x8] sm:$0xff]  ;;  %v8444_v33 = vor.u32 %v9868_v25, %v8441_v26  ;;  %v9866_v37 = vld [vmem:[%s14311_s1 + $0x54] sm:$0xf0]  ;;  %v8425_v40 = vld [vmem:[%s14311_s1 + $0x58] sm:$0xf0] }
  0x1b   : > { %v332_v30 = vld [vmem:[%s10456_s25 + $0x88] sm:$0xff]  ;;  %v10486_v34 = vpack.c.bf16 %v316_v28, %v315_v23  ;;  %v317_v42 = vld [vmem:[%s10456_s25 + $0x10] sm:$0xff]  ;;  %v318_v43 = vld [vmem:[%s10456_s25 + $0x18] sm:$0xff] }
  0x1c   : > { %v10488_v35 = vpack.c.bf16 %v332_v30, %v331_v29  ;;  %v8423_v36 = vld [vmem:[%s14311_s1 + $0x48] sm:$0xf]  ;;  %v9864_v38 = vld [vmem:[%s14311_s1 + $0x4c] sm:$0xf]  ;;  %v333_v44 = vld [vmem:[%s10456_s25 + $0x90] sm:$0xff]  ;;  %v10514_v46 = vpack.c.bf16 %v318_v43, %v317_v42 }
  0x1d   : > { %524 = vmatpush.bf16.msra.mxu0 %v8400_v16  ;;  %10209 = vmatpush.bf16.msra.mxu2 %v8400_v16  ;;  %v8424_v39 = vor.u32 %v9866_v37, %v8423_v36  ;;  %v8428_v41 = vor.u32 %v9864_v38, %v8425_v40  ;;  %v334_v45 = vld [vmem:[%s10456_s25 + $0x98] sm:$0xff]  ;;  %v319_v48 = vld [vmem:[%s10456_s25 + $0x20] sm:$0xff]  ;;  %v320_v49 = vld [vmem:[%s10456_s25 + $0x28] sm:$0xff] }
  0x1e   : > { %613 = vmatpush.bf16.msra.mxu1 %v8404_v19  ;;  %10213 = vmatpush.bf16.msra.mxu3 %v8404_v19  ;;  %v10516_v47 = vpack.c.bf16 %v334_v45, %v333_v44  ;;  %v335_v50 = vld [vmem:[%s10456_s25 + $0xa0] sm:$0xff]  ;;  %v336_v51 = vld [vmem:[%s10456_s25 + $0xa8] sm:$0xff]  ;;  %v10530_v52 = vpack.c.bf16 %v320_v49, %v319_v48  ;;  %v9862_v55 = vld [vmem:[%s14311_s1 + $0x34] sm:$0xf0] }
  0x1f   : > { %v10532_v53 = vpack.c.bf16 %v336_v51, %v335_v50  ;;  %v8407_v54 = vld [vmem:[%s14311_s1 + $0x28] sm:$0xf]  ;;  %v9860_v56 = vld [vmem:[%s14311_s1 + $0x2c] sm:$0xf]  ;;  %v8409_v58 = vld [vmem:[%s14311_s1 + $0x38] sm:$0xf0] }
  0x20   : > { %v8408_v57 = vor.u32 %v9862_v55, %v8407_v54  ;;  %v8412_v59 = vor.u32 %v9860_v56, %v8409_v58  ;;  %v321_v60 = vld [vmem:[%s10456_s25 + $0x30] sm:$0xff]  ;;  %v322_v61 = vld [vmem:[%s10456_s25 + $0x38] sm:$0xff]  ;;  %v323_v2 = vld [vmem:[%s10456_s25 + $0x40] sm:$0xff] }
  0x21   : > { %525 = vmatpush.bf16.msra.mxu0 %v8384_v27  ;;  %10210 = vmatpush.bf16.msra.mxu2 %v8384_v27  ;;  %v337_v62 = vld [vmem:[%s10456_s25 + $0xb0] sm:$0xff]  ;;  %v338_v63 = vld [vmem:[%s10456_s25 + $0xb8] sm:$0xff]  ;;  %v10558_v0 = vpack.c.bf16 %v322_v61, %v321_v60  ;;  %v324_v3 = vld [vmem:[%s10456_s25 + $0x48] sm:$0xff] }
  0x22   : > { %614 = vmatpush.bf16.msra.mxu1 %v8388_v31  ;;  %10214 = vmatpush.bf16.msra.mxu3 %v8388_v31  ;;  %v10560_v1 = vpack.c.bf16 %v338_v63, %v337_v62  ;;  %v339_v4 = vld [vmem:[%s10456_s25 + $0xc0] sm:$0xff]  ;;  %v340_v5 = vld [vmem:[%s10456_s25 + $0xc8] sm:$0xff]  ;;  %v10574_v6 = vpack.c.bf16 %v324_v3, %v323_v2  ;;  %v9858_v9 = vld [vmem:[%s14311_s1 + $0x14] sm:$0xf0] }
  0x23   : > { %v10576_v7 = vpack.c.bf16 %v340_v5, %v339_v4  ;;  %v8391_v8 = vld [vmem:[%s14311_s1 + $0x8] sm:$0xf]  ;;  %v9856_v10 = vld [vmem:[%s14311_s1 + $0xc] sm:$0xf]  ;;  %v8393_v12 = vld [vmem:[%s14311_s1 + $0x18] sm:$0xf0] }
  0x24   : > { %8445 = vmatmul.msk.bf16.vlgmr.msra.gmra.mxu0 %vm469_vm0, %v10486_v34  ;;  %8453 = vmatmul.msk.bf16.vlgmr.msra.gmra.mxu2 %vm469_vm0, %v10488_v35  ;;  %v8392_v11 = vor.u32 %v9858_v9, %v8391_v8  ;;  %v8735_v13 = vld [vmem:[#allocation2 + $0x1c0] sm:$0xf]  ;;  %v8396_v15 = vor.u32 %v9856_v10, %v8393_v12  ;;  %v325_v20 = vld [vmem:[%s10456_s25 + $0x50] sm:$0xff]  ;;  %v326_v21 = vld [vmem:[%s10456_s25 + $0x58] sm:$0xff] }
  0x25   : > { %700 = vmatpush.bf16.msrb.mxu2 %v8440_v32  ;;  %8461 = vmatmul.msk.bf16.vlgmr.msra.gmra.mxu1 %vm469_vm0, %v10486_v34  ;;  %v9931_v14 = vld [vmem:[#allocation2 + $0x1dc] sm:$0xf0]  ;;  %v341_v22 = vld [vmem:[%s10456_s25 + $0xd0] sm:$0xff]  ;;  %v342_v23 = vld [vmem:[%s10456_s25 + $0xd8] sm:$0xff]  ;;  %v10602_v24 = vpack.c.bf16 %v326_v21, %v325_v20 }
  0x26   : > { %789 = vmatpush.bf16.msrb.mxu3 %v8444_v33  ;;  %v8736_v16 = vor.u32 %v9931_v14, %v8735_v13  ;;  %v8991_v17 = vld [vmem:[#allocation2 + $0x3c0] sm:$0xf]  ;;  %v10604_v25 = vpack.c.bf16 %v342_v23, %v341_v22  ;;  %v328_v49 = vld [vmem:[%s10456_s25 + $0x68] sm:$0xff]  ;;  %v329_v20 = vld [vmem:[%s10456_s25 + $0x70] sm:$0xff] }
  0x27   : > { %8469 = vmatmul.msk.bf16.vlgmr.msra.gmra.mxu3 %vm469_vm0, %v10488_v35  ;;  %v9995_v18 = vld [vmem:[#allocation2 + $0x3dc] sm:$0xf0]  ;;  %v344_v51 = vld [vmem:[%s10456_s25 + $0xe8] sm:$0xff]  ;;  %v330_v21 = vld [vmem:[%s10456_s25 + $0x78] sm:$0xff] }
  0x28   : > { %v8992_v19 = vor.u32 %v9995_v18, %v8991_v17  ;;  %2876 = vmatpush.bf16.msrb.mxu0 %v8736_v16  ;;  %v8703_v26 = vld [vmem:[#allocation2 + $0x180] sm:$0xf] }
  0x29   : > { %701 = vmatpush.bf16.msrb.mxu2 %v8424_v39  ;;  %v9923_v27 = vld [vmem:[#allocation2 + $0x19c] sm:$0xf0] }
  0x2a   : > { %790 = vmatpush.bf16.msrb.mxu3 %v8428_v41  ;;  %2965 = vmatpush.bf16.msrb.mxu1 %v8992_v19  ;;  %v8959_v28 = vld [vmem:[#allocation2 + $0x380] sm:$0xf]  ;;  %v8704_v29 = vor.u32 %v9923_v27, %v8703_v26  ;;  %v345_v27 = vld [vmem:[%s10456_s25 + $0xf0] sm:$0xff] }
  0x2b   : > { %v9987_v30 = vld [vmem:[#allocation2 + $0x39c] sm:$0xf0] }
  0x2c   : > { %v8671_v31 = vld [vmem:[#allocation2 + $0x140] sm:$0xf]  ;;  %v8960_v33 = vor.u32 %v9987_v30, %v8959_v28  ;;  %2877 = vmatpush.bf16.msrb.mxu0 %v8704_v29  ;;  %v346_v28 = vld [vmem:[%s10456_s25 + $0xf8] sm:$0xff] }
  0x2d   : > { %702 = vmatpush.bf16.msrb.mxu2 %v8408_v57  ;;  %v9915_v32 = vld [vmem:[#allocation2 + $0x15c] sm:$0xf0] }
  0x2e   : > { %791 = vmatpush.bf16.msrb.mxu3 %v8412_v59  ;;  %v8927_v36 = vld [vmem:[#allocation2 + $0x340] sm:$0xf]  ;;  %v8672_v38 = vor.u32 %v9915_v32, %v8671_v31  ;;  %2966 = vmatpush.bf16.msrb.mxu1 %v8960_v33  ;;  %v10634_v32 = vpack.c.bf16 %v330_v21, %v329_v20  ;;  %v10636_v33 = vpack.c.bf16 %v346_v28, %v345_v27 }
  0x2f   : > { %v9979_v37 = vld [vmem:[#allocation2 + $0x35c] sm:$0xf0] }
  0x30   : > { %v8928_v39 = vor.u32 %v9979_v37, %v8927_v36  ;;  %v8639_v40 = vld [vmem:[#allocation2 + $0x100] sm:$0xf]  ;;  %2878 = vmatpush.bf16.msrb.mxu0 %v8672_v38 }
  0x31   : > { %703 = vmatpush.bf16.msrb.mxu2 %v8392_v11  ;;  %v9907_v41 = vld [vmem:[#allocation2 + $0x11c] sm:$0xf0] }
  0x32   : > { %792 = vmatpush.bf16.msrb.mxu3 %v8396_v15  ;;  %v8895_v42 = vld [vmem:[#allocation2 + $0x300] sm:$0xf]  ;;  %v8640_v44 = vor.u32 %v9907_v41, %v8639_v40  ;;  %2967 = vmatpush.bf16.msrb.mxu1 %v8928_v39 }
  0x33   : > { %v9971_v43 = vld [vmem:[#allocation2 + $0x31c] sm:$0xf0] }
  0x34   : > { %8446 = vmatmul.msk.bf16.gmra.mxu0 %vm469_vm0, %v10514_v46  ;;  %8454 = vmatmul.msk.bf16.gmra.mxu2 %vm469_vm0, %v10516_v47  ;;  %v327_v45 = vld [vmem:[%s10456_s25 + $0x60] sm:$0xff]  ;;  %v8896_v48 = vor.u32 %v9971_v43, %v8895_v42 }
  0x35   : > { %8462 = vmatmul.msk.bf16.gmra.mxu1 %vm469_vm0, %v10514_v46  ;;  %v343_v50 = vld [vmem:[%s10456_s25 + $0xe0] sm:$0xff]  ;;  %2879 = vmatpush.bf16.msrb.mxu0 %v8640_v44  ;;  %v10618_v54 = vpack.c.bf16 %v328_v49, %v327_v45 }
  0x36   : > { %v10620_v55 = vpack.c.bf16 %v344_v51, %v343_v50  ;;  %2968 = vmatpush.bf16.msrb.mxu1 %v8896_v48  ;;  %v8607_v56 = vld [vmem:[#allocation2 + $0xc0] sm:$0xf] }
  0x37   : > { %8470 = vmatmul.msk.bf16.gmra.mxu3 %vm469_vm0, %v10516_v47  ;;  %v9899_v57 = vld [vmem:[#allocation2 + $0xdc] sm:$0xf0] }
  0x38   : > { %v8863_v58 = vld [vmem:[#allocation2 + $0x2c0] sm:$0xf]  ;;  %v8608_v59 = vor.u32 %v9899_v57, %v8607_v56 }
  0x39   : > { %v9963_v60 = vld [vmem:[#allocation2 + $0x2dc] sm:$0xf0] }
  0x3a   : > { %v8864_v61 = vor.u32 %v9963_v60, %v8863_v58  ;;  %2880 = vmatpush.bf16.msrb.mxu0 %v8608_v59  ;;  %v8575_v62 = vld [vmem:[#allocation2 + $0x80] sm:$0xf] }
  0x3b   : > { %v9891_v63 = vld [vmem:[#allocation2 + $0x9c] sm:$0xf0] }
  0x3c   : > { %v8831_v2 = vld [vmem:[#allocation2 + $0x280] sm:$0xf]  ;;  %v8576_v3 = vor.u32 %v9891_v63, %v8575_v62  ;;  %2969 = vmatpush.bf16.msrb.mxu1 %v8864_v61 }
  0x3d   : > { %v9955_v4 = vld [vmem:[#allocation2 + $0x29c] sm:$0xf0] }
  0x3e   : > { %v8832_v5 = vor.u32 %v9955_v4, %v8831_v2  ;;  %v9247_v8 = vld [vmem:[#allocation2 + $0x5c0] sm:$0xf]  ;;  %2881 = vmatpush.bf16.msrb.mxu0 %v8576_v3 }
  0x3f   : > { %v10059_v9 = vld [vmem:[#allocation2 + $0x5dc] sm:$0xf0] }
  0x40   : > { %v9503_v10 = vld [vmem:[#allocation2 + $0x7c0] sm:$0xf]  ;;  %v9248_v11 = vor.u32 %v10059_v9, %v9247_v8  ;;  %2970 = vmatpush.bf16.msrb.mxu1 %v8832_v5 }
  0x41   : > { %v10123_v12 = vld [vmem:[#allocation2 + $0x7dc] sm:$0xf0] }
  0x42   : > { %v8543_v13 = vld [vmem:[#allocation2 + $0x40] sm:$0xf]  ;;  %v9504_v15 = vor.u32 %v10123_v12, %v9503_v10  ;;  %3054 = vmatpush.bf16.msra.mxu2 %v9248_v11 }
  0x43   : > { %v9883_v14 = vld [vmem:[#allocation2 + $0x5c] sm:$0xf0] }
  0x44   : > { %8447 = vmatmul.msk.bf16.gmra.mxu0 %vm469_vm0, %v10530_v52  ;;  %8455 = vmatmul.msk.bf16.gmra.mxu2 %vm469_vm0, %v10532_v53  ;;  %v8544_v16 = vor.u32 %v9883_v14, %v8543_v13  ;;  %v8799_v17 = vld [vmem:[#allocation2 + $0x240] sm:$0xf] }
  0x45   : > { %8463 = vmatmul.msk.bf16.gmra.mxu1 %vm469_vm0, %v10530_v52  ;;  %v9947_v18 = vld [vmem:[#allocation2 + $0x25c] sm:$0xf0]  ;;  %3143 = vmatpush.bf16.msra.mxu3 %v9504_v15 }
  0x46   : > { %v8800_v19 = vor.u32 %v9947_v18, %v8799_v17  ;;  %2882 = vmatpush.bf16.msrb.mxu0 %v8544_v16  ;;  %v8511_v22 = vld [vmem:[#allocation2] sm:$0xf] }
  0x47   : > { %8471 = vmatmul.msk.bf16.gmra.mxu3 %vm469_vm0, %v10532_v53  ;;  %v9875_v23 = vld [vmem:[#allocation2 + $0x1c] sm:$0xf0] }
  0x48   : > { %v8767_v26 = vld [vmem:[#allocation2 + $0x200] sm:$0xf]  ;;  %v8512_v29 = vor.u32 %v9875_v23, %v8511_v22  ;;  %2971 = vmatpush.bf16.msrb.mxu1 %v8800_v19 }
  0x49   : > { %v9939_v30 = vld [vmem:[#allocation2 + $0x21c] sm:$0xf0] }
  0x4a   : > { %v8768_v31 = vor.u32 %v9939_v30, %v8767_v26  ;;  %2883 = vmatpush.bf16.msrb.mxu0 %v8512_v29  ;;  %v10646_v36 = vld [vmem:[#allocation4] sm:$0xf] }
  0x4b   : > { %v10649_v38 = vperm.slane %v10646_v36, 0  ;;  %v10652_v40 = vperm.slane %v10646_v36, 1  ;;  %v9215_v44 = vld [vmem:[#allocation2 + $0x580] sm:$0xf] }
  0x4c   : > { %2972 = vmatpush.bf16.msrb.mxu1 %v8768_v31  ;;  %v10051_v45 = vld [vmem:[#allocation2 + $0x59c] sm:$0xf0] }
  0x4d   : > { %v9471_v48 = vld [vmem:[#allocation2 + $0x780] sm:$0xf]  ;;  %v9216_v51 = vor.u32 %v10051_v45, %v9215_v44 }
  0x4e   : > { %v10115_v56 = vld [vmem:[#allocation2 + $0x79c] sm:$0xf0] }
  0x4f   : > { %v9472_v59 = vor.u32 %v10115_v56, %v9471_v48  ;;  %3055 = vmatpush.bf16.msra.mxu2 %v9216_v51 }
  0x51   : > { %3144 = vmatpush.bf16.msra.mxu3 %v9472_v59 }
  0x54   : > { %8448 = vmatmul.msk.bf16.gmra.mxu0 %vm469_vm0, %v10558_v0  ;;  %8456 = vmatmul.msk.bf16.gmra.mxu2 %vm469_vm0, %v10560_v1 }
  0x55   : > { %8464 = vmatmul.msk.bf16.gmra.mxu1 %vm469_vm0, %v10558_v0 }
  0x57   : > { %8472 = vmatmul.msk.bf16.gmra.mxu3 %vm469_vm0, %v10560_v1 }
  0x64   : > { %8449 = vmatmul.msk.bf16.gmra.mxu0 %vm469_vm0, %v10574_v6  ;;  %8457 = vmatmul.msk.bf16.gmra.mxu2 %vm469_vm0, %v10576_v7 }
  0x65   : > { %8465 = vmatmul.msk.bf16.gmra.mxu1 %vm469_vm0, %v10574_v6 }
  0x67   : > { %8473 = vmatmul.msk.bf16.gmra.mxu3 %vm469_vm0, %v10576_v7 }
  0x74   : > { %8450 = vmatmul.msk.bf16.gmra.mxu0 %vm469_vm0, %v10602_v24  ;;  %8458 = vmatmul.msk.bf16.gmra.mxu2 %vm469_vm0, %v10604_v25 }
  0x75   : > { %8466 = vmatmul.msk.bf16.gmra.mxu1 %vm469_vm0, %v10602_v24 }
  0x77   : > { %8474 = vmatmul.msk.bf16.gmra.mxu3 %vm469_vm0, %v10604_v25 }
  0x84   : > { %8451 = vmatmul.msk.bf16.gmra.mxu0 %vm469_vm0, %v10618_v54  ;;  %8459 = vmatmul.msk.bf16.gmra.mxu2 %vm469_vm0, %v10620_v55 }
  0x85   : > { %8467 = vmatmul.msk.bf16.gmra.mxu1 %vm469_vm0, %v10618_v54 }
  0x87   : > { %8475 = vmatmul.msk.bf16.gmra.mxu3 %vm469_vm0, %v10620_v55 }
  0x94   : > { %8452 = vmatmul.msk.bf16.gmra.mxu0 %vm469_vm0, %v10634_v32  ;;  %8460 = vmatmul.msk.bf16.gmra.mxu2 %vm469_vm0, %v10636_v33 }
  0x95   : > { %8468 = vmatmul.msk.bf16.gmra.mxu1 %vm469_vm0, %v10634_v32 }
  0x97   : > { %8476 = vmatmul.msk.bf16.gmra.mxu3 %vm469_vm0, %v10636_v33 }
  0xa1   : > { %v527_v37 = vpop.f32.mrf.mxu0 }
  0xa2   : > { %v616_v39 = vpop.f32.mrf.mxu1  ;;  %v528_v41 = vadd.f32 %v527_v37, %v10649_v38 }
  0xa3   : > { %v617_v42 = vadd.f32 %v616_v39, %v10652_v40 }
  0xa4   : > { %8477 = vmatmul.msk.bf16.vlgmr.msrb.gmra.mxu2 %vm469_vm0, %v10486_v34  ;;  %v1002_v49 = vmul.f32 0.2, %v528_v41  ;;  %vm874_vm1 = vcmp.ge.f32.partialorder %v528_v41, 0.0 }
  0xa5   : > { %v1003_v57 = vmul.f32 0.2, %v617_v42  ;;  %vm875_vm2 = vcmp.ge.f32.partialorder %v617_v42, 0.0 }
  0xa7   : > { %8493 = vmatmul.msk.bf16.vlgmr.msrb.gmra.mxu3 %vm469_vm0, %v10486_v34  ;;  %v567_v43 = vpop.f32.mrf.mxu2  ;;  %v1130_v34 = vsel %vm874_vm1, %v528_v41, %v1002_v49  ;;  %v1131_v3 = vsel %vm875_vm2, %v617_v42, %v1003_v57 }
  0xa8   : > { %v568_v63 = vadd.f32 %v567_v43, %v10649_v38 }
  0xa9   : > { %v529_v58 = vpop.f32.mrf.mxu0 }
  0xaa   : > { %v656_v50 = vpop.f32.mrf.mxu3  ;;  %v530_v60 = vadd.f32 %v529_v58, %v10649_v38  ;;  %v618_v61 = vpop.f32.mrf.mxu1  ;;  %v1066_v12 = vmul.f32 0.2, %v568_v63  ;;  %vm938_vm5 = vcmp.ge.f32.partialorder %v568_v63, 0.0 }
  0xab   : > { %v619_v62 = vadd.f32 %v618_v61, %v10652_v40  ;;  %v657_v4 = vadd.f32 %v656_v50, %v10652_v40 }
  0xac   : > { %vm878_vm3 = vcmp.ge.f32.partialorder %v530_v60, 0.0  ;;  %v1006_v2 = vmul.f32 0.2, %v530_v60  ;;  %v1194_v22 = vsel %vm938_vm5, %v568_v63, %v1066_v12 }
  0xad   : > { %vm879_vm4 = vcmp.ge.f32.partialorder %v619_v62, 0.0  ;;  %v1007_v5 = vmul.f32 0.2, %v619_v62  ;;  %v1067_v16 = vmul.f32 0.2, %v657_v4  ;;  %vm939_vm6 = vcmp.ge.f32.partialorder %v657_v4, 0.0 }
  0xae   : > { %v1134_v8 = vsel %vm878_vm3, %v530_v60, %v1006_v2 }
  0xaf   : > { %v10664_v9 = vpack.c.bf16 %v1134_v8, %v1130_v34  ;;  %v1135_v10 = vsel %vm879_vm4, %v619_v62, %v1007_v5  ;;  %v569_v11 = vpop.f32.mrf.mxu2  ;;  %v1195_v27 = vsel %vm939_vm6, %v657_v4, %v1067_v16 }
  0xb0   : > { %v10666_v13 = vpack.c.bf16 %v1135_v10, %v1131_v3  ;;  %v570_v14 = vadd.f32 %v569_v11, %v10649_v38 }
  0xb1   : > { %14682 = vst [vmem:[#allocation8_spill] sm:$0xff] %v10664_v9  ;;  %v532_v18 = vpop.f32.mrf.mxu0  ;;  %2884 = vmatmul.bf16.vlgmr.msrb.gmra.mxu0 %v10664_v9 }
  0xb2   : > { %14683 = vst [vmem:[#allocation9_spill] sm:$0xff] %v10666_v13  ;;  %v658_v15 = vpop.f32.mrf.mxu3  ;;  %vm942_vm7 = vcmp.ge.f32.partialorder %v570_v14, 0.0  ;;  %v1070_v19 = vmul.f32 0.2, %v570_v14  ;;  %v621_v20 = vpop.f32.mrf.mxu1  ;;  %2973 = vmatmul.bf16.vlgmr.msrb.gmra.mxu1 %v10666_v13  ;;  %v533_v26 = vadd.f32 %v532_v18, %v10649_v38 }
  0xb3   : > { %v659_v17 = vadd.f32 %v658_v15, %v10652_v40  ;;  %v622_v30 = vadd.f32 %v621_v20, %v10652_v40 }
  0xb4   : > { %v1198_v23 = vsel %vm942_vm7, %v570_v14, %v1070_v19  ;;  %8478 = vmatmul.msk.bf16.gmra.mxu2 %vm469_vm0, %v10514_v46  ;;  %v1010_v39 = vmul.f32 0.2, %v533_v26  ;;  %vm882_vm9 = vcmp.ge.f32.partialorder %v533_v26, 0.0 }
  0xb5   : > { %vm943_vm8 = vcmp.ge.f32.partialorder %v659_v17, 0.0  ;;  %v1071_v21 = vmul.f32 0.2, %v659_v17  ;;  %v10675_v28 = vpack.c.bf16 %v1198_v23, %v1194_v22  ;;  %v1011_v42 = vmul.f32 0.2, %v622_v30 }
  0xb6   : > { %vm883_vm10 = vcmp.ge.f32.partialorder %v622_v30, 0.0  ;;  %v1138_v49 = vsel %vm882_vm9, %v533_v26, %v1010_v39  ;;  %v9183_v22 = vld [vmem:[#allocation2 + $0x540] sm:$0xf] }
  0xb7   : > { %14684 = vst [vmem:[#allocation10_spill] sm:$0xff] %v10675_v28  ;;  %v1199_v29 = vsel %vm943_vm8, %v659_v17, %v1071_v21  ;;  %8494 = vmatmul.msk.bf16.gmra.mxu3 %vm469_vm0, %v10514_v46  ;;  %v572_v37 = vpop.f32.mrf.mxu2  ;;  %v1139_v46 = vsel %vm883_vm10, %v622_v30, %v1011_v42  ;;  %v10043_v23 = vld [vmem:[#allocation2 + $0x55c] sm:$0xf0] }
  0xb8   : > { %v10680_v31 = vpack.c.bf16 %v1199_v29, %v1195_v27  ;;  %v573_v50 = vadd.f32 %v572_v37, %v10649_v38  ;;  %v9439_v26 = vld [vmem:[#allocation2 + $0x740] sm:$0xf]  ;;  %v9184_v30 = vor.u32 %v10043_v23, %v9183_v22 }
  0xb9   : > { %v534_v43 = vpop.f32.mrf.mxu0  ;;  %v10107_v37 = vld [vmem:[#allocation2 + $0x75c] sm:$0xf0] }
  0xba   : > { %14685 = vst [vmem:[#allocation11_spill] sm:$0xff] %v10680_v31  ;;  %v661_v41 = vpop.f32.mrf.mxu3  ;;  %v535_v44 = vadd.f32 %v534_v43, %v10649_v38  ;;  %v623_v45 = vpop.f32.mrf.mxu1  ;;  %v1074_v62 = vmul.f32 0.2, %v573_v50  ;;  %vm946_vm13 = vcmp.ge.f32.partialorder %v573_v50, 0.0  ;;  %v9440_v42 = vor.u32 %v10107_v37, %v9439_v26  ;;  %3056 = vmatpush.bf16.msra.mxu2 %v9184_v30 }
  0xbb   : > { %v624_v48 = vadd.f32 %v623_v45, %v10652_v40  ;;  %v662_v56 = vadd.f32 %v661_v41, %v10652_v40 }
  0xbc   : > { %vm886_vm11 = vcmp.ge.f32.partialorder %v535_v44, 0.0  ;;  %v1014_v51 = vmul.f32 0.2, %v535_v44  ;;  %v1202_v12 = vsel %vm946_vm13, %v573_v50, %v1074_v62  ;;  %3145 = vmatpush.bf16.msra.mxu3 %v9440_v42 }
  0xbd   : > { %vm887_vm12 = vcmp.ge.f32.partialorder %v624_v48, 0.0  ;;  %v1015_v57 = vmul.f32 0.2, %v624_v48  ;;  %v1075_v3 = vmul.f32 0.2, %v662_v56  ;;  %vm947_vm14 = vcmp.ge.f32.partialorder %v662_v56, 0.0 }
  0xbe   : > { %v1142_v58 = vsel %vm886_vm11, %v535_v44, %v1014_v51 }
  0xbf   : > { %v10686_v59 = vpack.c.bf16 %v1142_v58, %v1138_v49  ;;  %v1143_v60 = vsel %vm887_vm12, %v624_v48, %v1015_v57  ;;  %v574_v61 = vpop.f32.mrf.mxu2  ;;  %v1203_v16 = vsel %vm947_vm14, %v662_v56, %v1075_v3 }
  0xc0   : > { %v10688_v34 = vpack.c.bf16 %v1143_v60, %v1139_v46  ;;  %v575_v63 = vadd.f32 %v574_v61, %v10649_v38 }
  0xc1   : > { %14686 = vst [vmem:[#allocation12_spill] sm:$0xff] %v10686_v59  ;;  %v537_v5 = vpop.f32.mrf.mxu0  ;;  %2889 = vmatmul.bf16.gmra.mxu0 %v10686_v59 }
  0xc2   : > { %14687 = vst [vmem:[#allocation13_spill] sm:$0xff] %v10688_v34  ;;  %v663_v2 = vpop.f32.mrf.mxu3  ;;  %vm950_vm15 = vcmp.ge.f32.partialorder %v575_v63, 0.0  ;;  %v1078_v8 = vmul.f32 0.2, %v575_v63  ;;  %v626_v10 = vpop.f32.mrf.mxu1  ;;  %2978 = vmatmul.bf16.gmra.mxu1 %v10688_v34  ;;  %v538_v15 = vadd.f32 %v537_v5, %v10649_v38 }
  0xc3   : > { %v664_v4 = vadd.f32 %v663_v2, %v10652_v40  ;;  %v627_v19 = vadd.f32 %v626_v10, %v10652_v40 }
  0xc4   : > { %v1206_v14 = vsel %vm950_vm15, %v575_v63, %v1078_v8  ;;  %8479 = vmatmul.msk.bf16.gmra.mxu2 %vm469_vm0, %v10530_v52  ;;  %v1018_v27 = vmul.f32 0.2, %v538_v15  ;;  %vm890_vm2 = vcmp.ge.f32.partialorder %v538_v15, 0.0 }
  0xc5   : > { %vm951_vm1 = vcmp.ge.f32.partialorder %v664_v4, 0.0  ;;  %v1079_v11 = vmul.f32 0.2, %v664_v4  ;;  %v10697_v17 = vpack.c.bf16 %v1206_v14, %v1202_v12  ;;  %v1019_v39 = vmul.f32 0.2, %v627_v19 }
  0xc6   : > { %vm891_vm3 = vcmp.ge.f32.partialorder %v627_v19, 0.0  ;;  %v1146_v45 = vsel %vm890_vm2, %v538_v15, %v1018_v27 }
  0xc7   : > { %14688 = vst [vmem:[#allocation14_spill] sm:$0xff] %v10697_v17  ;;  %v1207_v18 = vsel %vm951_vm1, %v664_v4, %v1079_v11  ;;  %8495 = vmatmul.msk.bf16.gmra.mxu3 %vm469_vm0, %v10530_v52  ;;  %v577_v21 = vpop.f32.mrf.mxu2  ;;  %v1147_v50 = vsel %vm891_vm3, %v627_v19, %v1019_v39 }
  0xc8   : > { %v10702_v20 = vpack.c.bf16 %v1207_v18, %v1203_v16  ;;  %v578_v48 = vadd.f32 %v577_v21, %v10649_v38 }
  0xc9   : > { %v539_v41 = vpop.f32.mrf.mxu0 }
  0xca   : > { %14689 = vst [vmem:[#allocation15_spill] sm:$0xff] %v10702_v20  ;;  %v666_v29 = vpop.f32.mrf.mxu3  ;;  %v540_v43 = vadd.f32 %v539_v41, %v10649_v38  ;;  %v628_v44 = vpop.f32.mrf.mxu1  ;;  %v1082_v61 = vmul.f32 0.2, %v578_v48  ;;  %vm954_vm6 = vcmp.ge.f32.partialorder %v578_v48, 0.0 }
  0xcb   : > { %v629_v52 = vadd.f32 %v628_v44, %v10652_v40  ;;  %v667_v51 = vadd.f32 %v666_v29, %v10652_v40 }
  0xcc   : > { %vm894_vm4 = vcmp.ge.f32.partialorder %v540_v43, 0.0  ;;  %v1022_v49 = vmul.f32 0.2, %v540_v43  ;;  %v1210_v12 = vsel %vm954_vm6, %v578_v48, %v1082_v61 }
  0xcd   : > { %vm895_vm5 = vcmp.ge.f32.partialorder %v629_v52, 0.0  ;;  %v1023_v46 = vmul.f32 0.2, %v629_v52  ;;  %v1083_v3 = vmul.f32 0.2, %v667_v51  ;;  %vm955_vm7 = vcmp.ge.f32.partialorder %v667_v51, 0.0 }
  0xce   : > { %v1150_v56 = vsel %vm894_vm4, %v540_v43, %v1022_v49 }
  0xcf   : > { %v10708_v57 = vpack.c.bf16 %v1150_v56, %v1146_v45  ;;  %v1151_v58 = vsel %vm895_vm5, %v629_v52, %v1023_v46  ;;  %v579_v60 = vpop.f32.mrf.mxu2  ;;  %v1211_v16 = vsel %vm955_vm7, %v667_v51, %v1083_v3 }
  0xd0   : > { %v10710_v62 = vpack.c.bf16 %v1151_v58, %v1147_v50  ;;  %v580_v63 = vadd.f32 %v579_v60, %v10649_v38 }
  0xd1   : > { %14690 = vst [vmem:[#allocation16_spill] sm:$0xff] %v10708_v57  ;;  %v542_v5 = vpop.f32.mrf.mxu0  ;;  %2894 = vmatmul.bf16.gmra.mxu0 %v10708_v57 }
  0xd2   : > { %14691 = vst [vmem:[#allocation17_spill] sm:$0xff] %v10710_v62  ;;  %v668_v2 = vpop.f32.mrf.mxu3  ;;  %vm958_vm8 = vcmp.ge.f32.partialorder %v580_v63, 0.0  ;;  %v1086_v8 = vmul.f32 0.2, %v580_v63  ;;  %v631_v10 = vpop.f32.mrf.mxu1  ;;  %2983 = vmatmul.bf16.gmra.mxu1 %v10710_v62  ;;  %v543_v15 = vadd.f32 %v542_v5, %v10649_v38 }
  0xd3   : > { %v669_v4 = vadd.f32 %v668_v2, %v10652_v40  ;;  %v632_v21 = vadd.f32 %v631_v10, %v10652_v40 }
  0xd4   : > { %v1214_v14 = vsel %vm958_vm8, %v580_v63, %v1086_v8  ;;  %8480 = vmatmul.msk.bf16.gmra.mxu2 %vm469_vm0, %v10558_v0  ;;  %v1026_v26 = vmul.f32 0.2, %v543_v15  ;;  %vm898_vm10 = vcmp.ge.f32.partialorder %v543_v15, 0.0 }
  0xd5   : > { %vm959_vm9 = vcmp.ge.f32.partialorder %v669_v4, 0.0  ;;  %v1087_v11 = vmul.f32 0.2, %v669_v4  ;;  %v10719_v18 = vpack.c.bf16 %v1214_v14, %v1210_v12  ;;  %v1027_v29 = vmul.f32 0.2, %v632_v21 }
  0xd6   : > { %vm899_vm11 = vcmp.ge.f32.partialorder %v632_v21, 0.0  ;;  %v1154_v42 = vsel %vm898_vm10, %v543_v15, %v1026_v26  ;;  %v10035_v26 = vld [vmem:[#allocation2 + $0x51c] sm:$0xf0] }
  0xd7   : > { %14692 = vst [vmem:[#allocation18_spill] sm:$0xff] %v10719_v18  ;;  %v1215_v19 = vsel %vm959_vm9, %v669_v4, %v1087_v11  ;;  %8496 = vmatmul.msk.bf16.gmra.mxu3 %vm469_vm0, %v10558_v0  ;;  %v582_v23 = vpop.f32.mrf.mxu2  ;;  %v1155_v0 = vsel %vm899_vm11, %v632_v21, %v1027_v29 }
  0xd8   : > { %v10724_v22 = vpack.c.bf16 %v1215_v19, %v1211_v16  ;;  %v583_v43 = vadd.f32 %v582_v23, %v10649_v38  ;;  %v9151_v23 = vld [vmem:[#allocation2 + $0x500] sm:$0xf] }
  0xd9   : > { %v544_v30 = vpop.f32.mrf.mxu0 }
  0xda   : > { %14693 = vst [vmem:[#allocation19_spill] sm:$0xff] %v10724_v22  ;;  %v671_v27 = vpop.f32.mrf.mxu3  ;;  %v545_v37 = vadd.f32 %v544_v30, %v10649_v38  ;;  %v633_v39 = vpop.f32.mrf.mxu1  ;;  %v1090_v46 = vmul.f32 0.2, %v583_v43  ;;  %vm962_vm14 = vcmp.ge.f32.partialorder %v583_v43, 0.0 }
  0xdb   : > { %v634_v41 = vadd.f32 %v633_v39, %v10652_v40  ;;  %v672_v52 = vadd.f32 %v671_v27, %v10652_v40  ;;  %v9407_v27 = vld [vmem:[#allocation2 + $0x700] sm:$0xf] }
  0xdc   : > { %vm902_vm12 = vcmp.ge.f32.partialorder %v545_v37, 0.0  ;;  %v1030_v44 = vmul.f32 0.2, %v545_v37  ;;  %v1218_v8 = vsel %vm962_vm14, %v583_v43, %v1090_v46  ;;  %v10099_v39 = vld [vmem:[#allocation2 + $0x71c] sm:$0xf0] }
  0xdd   : > { %vm903_vm13 = vcmp.ge.f32.partialorder %v634_v41, 0.0  ;;  %v1031_v45 = vmul.f32 0.2, %v634_v41  ;;  %v1091_v61 = vmul.f32 0.2, %v672_v52  ;;  %vm963_vm15 = vcmp.ge.f32.partialorder %v672_v52, 0.0 }
  0xde   : > { %v1158_v48 = vsel %vm902_vm12, %v545_v37, %v1030_v44  ;;  %v9152_v37 = vor.u32 %v10035_v26, %v9151_v23  ;;  %v9408_v43 = vor.u32 %v10099_v39, %v9407_v27 }
  0xdf   : > { %v10730_v49 = vpack.c.bf16 %v1158_v48, %v1154_v42  ;;  %v1159_v50 = vsel %vm903_vm13, %v634_v41, %v1031_v45  ;;  %v584_v51 = vpop.f32.mrf.mxu2  ;;  %v1219_v12 = vsel %vm963_vm15, %v672_v52, %v1091_v61 }
  0xe0   : > { %v10732_v56 = vpack.c.bf16 %v1159_v50, %v1155_v0  ;;  %v585_v58 = vadd.f32 %v584_v51, %v10649_v38  ;;  %3057 = vmatpush.bf16.msra.mxu2 %v9152_v37  ;;  %3146 = vmatpush.bf16.msra.mxu3 %v9408_v43 }
  0xe1   : > { %14694 = vst [vmem:[#allocation20_spill] sm:$0xff] %v10730_v49  ;;  %v547_v2 = vpop.f32.mrf.mxu0  ;;  %2899 = vmatmul.bf16.gmra.mxu0 %v10730_v49 }
  0xe2   : > { %14695 = vst [vmem:[#allocation21_spill] sm:$0xff] %v10732_v56  ;;  %v673_v60 = vpop.f32.mrf.mxu3  ;;  %vm966_vm1 = vcmp.ge.f32.partialorder %v585_v58, 0.0  ;;  %v1094_v3 = vmul.f32 0.2, %v585_v58  ;;  %v636_v4 = vpop.f32.mrf.mxu1  ;;  %2988 = vmatmul.bf16.gmra.mxu1 %v10732_v56  ;;  %v548_v11 = vadd.f32 %v547_v2, %v10649_v38 }
  0xe3   : > { %v674_v63 = vadd.f32 %v673_v60, %v10652_v40  ;;  %v637_v16 = vadd.f32 %v636_v4, %v10652_v40 }
  0xe4   : > { %v1222_v10 = vsel %vm966_vm1, %v585_v58, %v1094_v3  ;;  %8481 = vmatmul.msk.bf16.gmra.mxu2 %vm469_vm0, %v10574_v6  ;;  %v1034_v29 = vmul.f32 0.2, %v548_v11  ;;  %vm906_vm3 = vcmp.ge.f32.partialorder %v548_v11, 0.0 }
  0xe5   : > { %vm967_vm2 = vcmp.ge.f32.partialorder %v674_v63, 0.0  ;;  %v1095_v5 = vmul.f32 0.2, %v674_v63  ;;  %v10741_v14 = vpack.c.bf16 %v1222_v10, %v1218_v8  ;;  %v1035_v41 = vmul.f32 0.2, %v637_v16 }
  0xe6   : > { %vm907_vm4 = vcmp.ge.f32.partialorder %v637_v16, 0.0  ;;  %v1162_v52 = vsel %vm906_vm3, %v548_v11, %v1034_v29 }
  0xe7   : > { %14696 = vst [vmem:[#allocation22_spill] sm:$0xff] %v10741_v14  ;;  %v1223_v15 = vsel %vm967_vm2, %v674_v63, %v1095_v5  ;;  %8497 = vmatmul.msk.bf16.gmra.mxu3 %vm469_vm0, %v10574_v6  ;;  %v587_v21 = vpop.f32.mrf.mxu2  ;;  %v1163_v50 = vsel %vm907_vm4, %v637_v16, %v1035_v41 }
  0xe8   : > { %v10746_v19 = vpack.c.bf16 %v1223_v15, %v1219_v12  ;;  %v588_v45 = vadd.f32 %v587_v21, %v10649_v38 }
  0xe9   : > { %v549_v42 = vpop.f32.mrf.mxu0 }
  0xea   : > { %14697 = vst [vmem:[#allocation23_spill] sm:$0xff] %v10746_v19  ;;  %v676_v30 = vpop.f32.mrf.mxu3  ;;  %v550_v44 = vadd.f32 %v549_v42, %v10649_v38  ;;  %v638_v0 = vpop.f32.mrf.mxu1  ;;  %v1098_v2 = vmul.f32 0.2, %v588_v45  ;;  %vm970_vm7 = vcmp.ge.f32.partialorder %v588_v45, 0.0 }
  0xeb   : > { %v639_v6 = vadd.f32 %v638_v0, %v10652_v40  ;;  %v677_v51 = vadd.f32 %v676_v30, %v10652_v40 }
  0xec   : > { %vm910_vm5 = vcmp.ge.f32.partialorder %v550_v44, 0.0  ;;  %v1038_v48 = vmul.f32 0.2, %v550_v44  ;;  %v1226_v21 = vsel %vm970_vm7, %v588_v45, %v1098_v2 }
  0xed   : > { %vm911_vm6 = vcmp.ge.f32.partialorder %v639_v6, 0.0  ;;  %v1039_v46 = vmul.f32 0.2, %v639_v6  ;;  %v1099_v8 = vmul.f32 0.2, %v677_v51  ;;  %vm971_vm8 = vcmp.ge.f32.partialorder %v677_v51, 0.0 }
  0xee   : > { %v1166_v58 = vsel %vm910_vm5, %v550_v44, %v1038_v48 }
  0xef   : > { %v10752_v60 = vpack.c.bf16 %v1166_v58, %v1162_v52  ;;  %v1167_v61 = vsel %vm911_vm6, %v639_v6, %v1039_v46  ;;  %v589_v63 = vpop.f32.mrf.mxu2  ;;  %v1227_v27 = vsel %vm971_vm8, %v677_v51, %v1099_v8 }
  0xf0   : > { %v10754_v3 = vpack.c.bf16 %v1167_v61, %v1163_v50  ;;  %v590_v4 = vadd.f32 %v589_v63, %v10649_v38 }
  0xf1   : > { %14698 = vst [vmem:[#allocation24_spill] sm:$0xff] %v10752_v60  ;;  %v552_v11 = vpop.f32.mrf.mxu0  ;;  %2904 = vmatmul.bf16.gmra.mxu0 %v10752_v60 }
  0xf2   : > { %14699 = vst [vmem:[#allocation25_spill] sm:$0xff] %v10754_v3  ;;  %v678_v5 = vpop.f32.mrf.mxu3  ;;  %vm974_vm9 = vcmp.ge.f32.partialorder %v590_v4, 0.0  ;;  %v1102_v12 = vmul.f32 0.2, %v590_v4  ;;  %v641_v15 = vpop.f32.mrf.mxu1  ;;  %2993 = vmatmul.bf16.gmra.mxu1 %v10754_v3  ;;  %v553_v26 = vadd.f32 %v552_v11, %v10649_v38 }
  0xf3   : > { %v679_v10 = vadd.f32 %v678_v5, %v10652_v40  ;;  %v642_v37 = vadd.f32 %v641_v15, %v10652_v40 }
  0xf4   : > { %v1230_v23 = vsel %vm974_vm9, %v590_v4, %v1102_v12  ;;  %8482 = vmatmul.msk.bf16.gmra.mxu2 %vm469_vm0, %v10602_v24  ;;  %v1042_v42 = vmul.f32 0.2, %v553_v26  ;;  %vm914_vm11 = vcmp.ge.f32.partialorder %v553_v26, 0.0 }
  0xf5   : > { %vm975_vm10 = vcmp.ge.f32.partialorder %v679_v10, 0.0  ;;  %v1103_v16 = vmul.f32 0.2, %v679_v10  ;;  %v10763_v29 = vpack.c.bf16 %v1230_v23, %v1226_v21  ;;  %v1043_v44 = vmul.f32 0.2, %v642_v37 }
  0xf6   : > { %vm915_vm12 = vcmp.ge.f32.partialorder %v642_v37, 0.0  ;;  %v1170_v48 = vsel %vm914_vm11, %v553_v26, %v1042_v42 }
  0xf7   : > { %14700 = vst [vmem:[#allocation26_spill] sm:$0xff] %v10763_v29  ;;  %v1231_v30 = vsel %vm975_vm10, %v679_v10, %v1103_v16  ;;  %8498 = vmatmul.msk.bf16.gmra.mxu3 %vm469_vm0, %v10602_v24  ;;  %v592_v41 = vpop.f32.mrf.mxu2  ;;  %v1171_v24 = vsel %vm915_vm12, %v642_v37, %v1043_v44 }
  0xf8   : > { %v10768_v39 = vpack.c.bf16 %v1231_v30, %v1227_v27  ;;  %v593_v50 = vadd.f32 %v592_v41, %v10649_v38 }
  0xf9   : > { %v554_v0 = vpop.f32.mrf.mxu0 }
  0xfa   : > { %14701 = vst [vmem:[#allocation27_spill] sm:$0xff] %v10768_v39  ;;  %v681_v43 = vpop.f32.mrf.mxu3  ;;  %v555_v6 = vadd.f32 %v554_v0, %v10649_v38  ;;  %v643_v52 = vpop.f32.mrf.mxu1  ;;  %v1106_v5 = vmul.f32 0.2, %v593_v50  ;;  %vm978_vm15 = vcmp.ge.f32.partialorder %v593_v50, 0.0 }
  0xfb   : > { %v644_v45 = vadd.f32 %v643_v52, %v10652_v40  ;;  %v682_v46 = vadd.f32 %v681_v43, %v10652_v40  ;;  %v10027_v52 = vld [vmem:[#allocation2 + $0x4dc] sm:$0xf0] }
  0xfc   : > { %vm918_vm13 = vcmp.ge.f32.partialorder %v555_v6, 0.0  ;;  %v1046_v51 = vmul.f32 0.2, %v555_v6  ;;  %v1234_v27 = vsel %vm978_vm15, %v593_v50, %v1106_v5 }
  0xfd   : > { %vm919_vm14 = vcmp.ge.f32.partialorder %v644_v45, 0.0  ;;  %v1047_v58 = vmul.f32 0.2, %v644_v45  ;;  %v1107_v12 = vmul.f32 0.2, %v682_v46  ;;  %vm979_vm1 = vcmp.ge.f32.partialorder %v682_v46, 0.0 }
  0xfe   : > { %v1174_v61 = vsel %vm918_vm13, %v555_v6, %v1046_v51  ;;  %v9119_v6 = vld [vmem:[#allocation2 + $0x4c0] sm:$0xf] }
  0xff   : > { %v10774_v63 = vpack.c.bf16 %v1174_v61, %v1170_v48  ;;  %v1175_v2 = vsel %vm919_vm14, %v644_v45, %v1047_v58  ;;  %v594_v4 = vpop.f32.mrf.mxu2  ;;  %v1235_v41 = vsel %vm979_vm1, %v682_v46, %v1107_v12  ;;  %v9375_v45 = vld [vmem:[#allocation2 + $0x6c0] sm:$0xf]  ;;  %v9120_v50 = vor.u32 %v10027_v52, %v9119_v6 }
 0x100   : > { %v10776_v8 = vpack.c.bf16 %v1175_v2, %v1171_v24  ;;  %v595_v10 = vadd.f32 %v594_v4, %v10649_v38  ;;  %v10091_v51 = vld [vmem:[#allocation2 + $0x6dc] sm:$0xf0] }
 0x101   : > { %14702 = vst [vmem:[#allocation28_spill] sm:$0xff] %v10774_v63  ;;  %v557_v16 = vpop.f32.mrf.mxu0  ;;  %2909 = vmatmul.bf16.gmra.mxu0 %v10774_v63  ;;  %v9376_v61 = vor.u32 %v10091_v51, %v9375_v45  ;;  %3058 = vmatpush.bf16.msra.mxu2 %v9120_v50 }
 0x102   : > { %14703 = vst [vmem:[#allocation29_spill] sm:$0xff] %v10776_v8  ;;  %v683_v11 = vpop.f32.mrf.mxu3  ;;  %vm982_vm2 = vcmp.ge.f32.partialorder %v595_v10, 0.0  ;;  %v1110_v21 = vmul.f32 0.2, %v595_v10  ;;  %v646_v23 = vpop.f32.mrf.mxu1  ;;  %2998 = vmatmul.bf16.gmra.mxu1 %v10776_v8  ;;  %v558_v37 = vadd.f32 %v557_v16, %v10649_v38 }
 0x103   : > { %v684_v15 = vadd.f32 %v683_v11, %v10652_v40  ;;  %v647_v44 = vadd.f32 %v646_v23, %v10652_v40  ;;  %3147 = vmatpush.bf16.msra.mxu3 %v9376_v61 }
 0x104   : > { %v1238_v30 = vsel %vm982_vm2, %v595_v10, %v1110_v21  ;;  %8483 = vmatmul.msk.bf16.gmra.mxu2 %vm469_vm0, %v10618_v54  ;;  %v1050_v24 = vmul.f32 0.2, %v558_v37  ;;  %vm922_vm4 = vcmp.ge.f32.partialorder %v558_v37, 0.0 }
 0x105   : > { %vm983_vm3 = vcmp.ge.f32.partialorder %v684_v15, 0.0  ;;  %v1111_v26 = vmul.f32 0.2, %v684_v15  ;;  %v10785_v42 = vpack.c.bf16 %v1238_v30, %v1234_v27  ;;  %v1051_v46 = vmul.f32 0.2, %v647_v44 }
 0x106   : > { %vm923_vm5 = vcmp.ge.f32.partialorder %v647_v44, 0.0  ;;  %v1178_v10 = vsel %vm922_vm4, %v558_v37, %v1050_v24 }
 0x107   : > { %14704 = vst [vmem:[#allocation30_spill] sm:$0xff] %v10785_v42  ;;  %v1239_v43 = vsel %vm983_vm3, %v684_v15, %v1111_v26  ;;  %8499 = vmatmul.msk.bf16.gmra.mxu3 %vm469_vm0, %v10618_v54  ;;  %v597_v48 = vpop.f32.mrf.mxu2  ;;  %v1179_v15 = vsel %vm923_vm5, %v647_v44, %v1051_v46 }
 0x108   : > { %v10790_v0 = vpack.c.bf16 %v1239_v43, %v1235_v41  ;;  %v598_v11 = vadd.f32 %v597_v48, %v10649_v38 }
 0x109   : > { %v559_v2 = vpop.f32.mrf.mxu0 }
 0x10a   : > { %14705 = vst [vmem:[#allocation31_spill] sm:$0xff] %v10790_v0  ;;  %v686_v58 = vpop.f32.mrf.mxu3  ;;  %v560_v4 = vadd.f32 %v559_v2, %v10649_v38  ;;  %v648_v5 = vpop.f32.mrf.mxu1  ;;  %v1114_v41 = vmul.f32 0.2, %v598_v11  ;;  %vm986_vm8 = vcmp.ge.f32.partialorder %v598_v11, 0.0 }
 0x10b   : > { %v649_v54 = vadd.f32 %v648_v5, %v10652_v40  ;;  %v687_v16 = vadd.f32 %v686_v58, %v10652_v40 }
 0x10c   : > { %vm926_vm6 = vcmp.ge.f32.partialorder %v560_v4, 0.0  ;;  %v1054_v12 = vmul.f32 0.2, %v560_v4  ;;  %v1242_v24 = vsel %vm986_vm8, %v598_v11, %v1114_v41 }
 0x10d   : > { %vm927_vm7 = vcmp.ge.f32.partialorder %v649_v54, 0.0  ;;  %v1055_v21 = vmul.f32 0.2, %v649_v54  ;;  %v1115_v52 = vmul.f32 0.2, %v687_v16  ;;  %vm987_vm9 = vcmp.ge.f32.partialorder %v687_v16, 0.0 }
 0x10e   : > { %v1182_v23 = vsel %vm926_vm6, %v560_v4, %v1054_v12 }
 0x10f   : > { %v10796_v26 = vpack.c.bf16 %v1182_v23, %v1178_v10  ;;  %v1183_v27 = vsel %vm927_vm7, %v649_v54, %v1055_v21  ;;  %v599_v30 = vpop.f32.mrf.mxu2  ;;  %v1243_v46 = vsel %vm987_vm9, %v687_v16, %v1115_v52 }
 0x110   : > { %v10798_v43 = vpack.c.bf16 %v1183_v27, %v1179_v15  ;;  %v600_v6 = vadd.f32 %v599_v30, %v10649_v38 }
 0x111   : > { %14706 = vst [vmem:[#allocation32_spill] sm:$0xff] %v10796_v26  ;;  %v562_v44 = vpop.f32.mrf.mxu0  ;;  %2914 = vmatmul.bf16.gmra.mxu0 %v10796_v26 }
 0x112   : > { %14707 = vst [vmem:[#allocation33_spill] sm:$0xff] %v10798_v43  ;;  %v688_v37 = vpop.f32.mrf.mxu3  ;;  %vm990_vm10 = vcmp.ge.f32.partialorder %v600_v6, 0.0  ;;  %v1118_v48 = vmul.f32 0.2, %v600_v6  ;;  %v651_v50 = vpop.f32.mrf.mxu1  ;;  %3003 = vmatmul.bf16.gmra.mxu1 %v10798_v43  ;;  %v563_v61 = vadd.f32 %v562_v44, %v10649_v38 }
 0x113   : > { %v689_v45 = vadd.f32 %v688_v37, %v10652_v40  ;;  %v652_v5 = vadd.f32 %v651_v50, %v10652_v40 }
 0x114   : > { %v1246_v58 = vsel %vm990_vm10, %v600_v6, %v1118_v48  ;;  %8484 = vmatmul.msk.bf16.gmra.mxu2 %vm469_vm0, %v10634_v32  ;;  %v1058_v12 = vmul.f32 0.2, %v563_v61  ;;  %vm930_vm12 = vcmp.ge.f32.partialorder %v563_v61, 0.0  ;;  %v8737_v48 = vld [vmem:[#allocation2 + $0x1e0] sm:$0xf0] }
 0x115   : > { %vm991_vm11 = vcmp.ge.f32.partialorder %v689_v45, 0.0  ;;  %v1119_v51 = vmul.f32 0.2, %v689_v45  ;;  %v10807_v2 = vpack.c.bf16 %v1246_v58, %v1242_v24  ;;  %v1059_v15 = vmul.f32 0.2, %v652_v5 }
 0x116   : > { %vm931_vm13 = vcmp.ge.f32.partialorder %v652_v5, 0.0  ;;  %v1186_v30 = vsel %vm930_vm12, %v563_v61, %v1058_v12 }
 0x117   : > { %v1247_v4 = vsel %vm991_vm11, %v689_v45, %v1119_v51  ;;  %8500 = vmatmul.msk.bf16.gmra.mxu3 %vm469_vm0, %v10634_v32  ;;  %v602_v10 = vpop.f32.mrf.mxu2  ;;  %v1187_v32 = vsel %vm931_vm13, %v652_v5, %v1059_v15  ;;  %v9927_v45 = vld [vmem:[#allocation2 + $0x1c4] sm:$0xf] }
 0x118   : > { %v10812_v54 = vpack.c.bf16 %v1247_v4, %v1243_v46  ;;  %v603_v41 = vadd.f32 %v602_v10, %v10649_v38  ;;  %v8740_v58 = vor.u32 %v9927_v45, %v8737_v48  ;;  %v10835_v45 = vperm.slane %v10646_v36, 2 }
 0x119   : > { %v564_v21 = vpop.f32.mrf.mxu0  ;;  %v10838_v48 = vperm.slane %v10646_v36, 3 }
 0x11a   : > { %14708 = vst [vmem:[#allocation34_spill] sm:$0xff] %v10812_v54  ;;  %v691_v11 = vpop.f32.mrf.mxu3  ;;  %v565_v23 = vadd.f32 %v564_v21, %v10649_v38  ;;  %v653_v16 = vpop.f32.mrf.mxu1  ;;  %v1122_v46 = vmul.f32 0.2, %v603_v41  ;;  %vm994_vm1 = vcmp.ge.f32.partialorder %v603_v41, 0.0  ;;  %3232 = vmatpush.bf16.msra.mxu0 %v8740_v58 }
 0x11b   : > { %v654_v27 = vadd.f32 %v653_v16, %v10652_v40  ;;  %v692_v37 = vadd.f32 %v691_v11, %v10652_v40 }
 0x11c   : > { %vm934_vm14 = vcmp.ge.f32.partialorder %v565_v23, 0.0  ;;  %v1062_v6 = vmul.f32 0.2, %v565_v23  ;;  %v1250_v21 = vsel %vm994_vm1, %v603_v41, %v1122_v46 }
 0x11d   : > { %vm935_vm15 = vcmp.ge.f32.partialorder %v654_v27, 0.0  ;;  %v1063_v52 = vmul.f32 0.2, %v654_v27  ;;  %v1123_v5 = vmul.f32 0.2, %v692_v37  ;;  %vm995_vm2 = vcmp.ge.f32.partialorder %v692_v37, 0.0 }
 0x11e   : > { %v1190_v44 = vsel %vm934_vm14, %v565_v23, %v1062_v6  ;;  %v10019_v6 = vld [vmem:[#allocation2 + $0x49c] sm:$0xf0] }
 0x11f   : > { %v10818_v50 = vpack.c.bf16 %v1190_v44, %v1186_v30  ;;  %v1191_v51 = vsel %vm935_vm15, %v654_v27, %v1063_v52  ;;  %v604_v24 = vpop.f32.mrf.mxu2  ;;  %v9087_v30 = vld [vmem:[#allocation2 + $0x480] sm:$0xf]  ;;  %v1514_v44 = vld [vmem:[#allocation4 + $0x4] sm:$0xff] }
 0x120   : > { %v10820_v4 = vpack.c.bf16 %v1191_v51, %v1187_v32  ;;  %v605_v61 = vadd.f32 %v604_v24, %v10649_v38  ;;  %v1251_v38 = vsel %vm995_vm2, %v692_v37, %v1123_v5  ;;  %v9088_v52 = vor.u32 %v10019_v6, %v9087_v30  ;;  %v9343_v37 = vld [vmem:[#allocation2 + $0x680] sm:$0xf] }
 0x121   : > { %14709 = vst [vmem:[#allocation35_spill] sm:$0xff] %v10818_v50  ;;  %2919 = vmatmul.bf16.gmra.mxu0 %v10818_v50  ;;  %v10083_v51 = vld [vmem:[#allocation2 + $0x69c] sm:$0xf0]  ;;  %v10840_v58 = vperm.slane %v1514_v44, 0 }
 0x122   : > { %14710 = vst [vmem:[#allocation36_spill] sm:$0xff] %v10820_v4  ;;  %v693_v10 = vpop.f32.mrf.mxu3  ;;  %vm998_vm3 = vcmp.ge.f32.partialorder %v605_v61, 0.0  ;;  %v1126_v11 = vmul.f32 0.2, %v605_v61  ;;  %3008 = vmatmul.bf16.gmra.mxu1 %v10820_v4  ;;  %3059 = vmatpush.bf16.msra.mxu2 %v9088_v52  ;;  %v9344_v24 = vor.u32 %v10083_v51, %v9343_v37 }
 0x123   : > { %v694_v12 = vadd.f32 %v693_v10, %v10652_v40 }
 0x124   : > { %v1254_v23 = vsel %vm998_vm3, %v605_v61, %v1126_v11  ;;  %8485 = vmatmul.msk.bf16.gmra.mxu2 %vm469_vm0, %v10488_v35  ;;  %3148 = vmatpush.bf16.msra.mxu3 %v9344_v24 }
 0x125   : > { %vm999_vm4 = vcmp.ge.f32.partialorder %v694_v12, 0.0  ;;  %v1127_v15 = vmul.f32 0.2, %v694_v12  ;;  %v10828_v16 = vpack.c.bf16 %v1254_v23, %v1250_v21 }
 0x127   : > { %14711 = vst [vmem:[#allocation37_spill] sm:$0xff] %v10828_v16  ;;  %v1255_v27 = vsel %vm999_vm4, %v694_v12, %v1127_v15  ;;  %8501 = vmatmul.msk.bf16.gmra.mxu3 %vm469_vm0, %v10488_v35  ;;  %v705_v32 = vpop.f32.mrf.mxu2 }
 0x128   : > { %v10832_v40 = vpack.c.bf16 %v1255_v27, %v1251_v38  ;;  %v706_v35 = vadd.f32 %v705_v32, %v10835_v45 }
 0x12a   : > { %14712 = vst [vmem:[#allocation38_spill] sm:$0xff] %v10832_v40  ;;  %v794_v41 = vpop.f32.mrf.mxu3  ;;  %v1004_v11 = vmul.f32 0.2, %v706_v35  ;;  %vm876_vm5 = vcmp.ge.f32.partialorder %v706_v35, 0.0 }
 0x12b   : > { %v795_v46 = vadd.f32 %v794_v41, %v10838_v48 }
 0x12c   : > { %v1132_v6 = vsel %vm876_vm5, %v706_v35, %v1004_v11  ;;  %v9919_v11 = vld [vmem:[#allocation2 + $0x184] sm:$0xf] }
 0x12d   : > { %v1005_v21 = vmul.f32 0.2, %v795_v46  ;;  %vm877_vm6 = vcmp.ge.f32.partialorder %v795_v46, 0.0 }
 0x12e   : > { %v2885_v61 = vpop.f32.mrf.mxu0 }
 0x12f   : > { %v2886_v10 = vadd.f32 %v2885_v61, %v10840_v58  ;;  %v2974_v5 = vpop.f32.mrf.mxu1  ;;  %v707_v12 = vpop.f32.mrf.mxu2  ;;  %v1133_v52 = vsel %vm877_vm6, %v795_v46, %v1005_v21 }
 0x130   : > { %v708_v36 = vadd.f32 %v707_v12, %v10835_v45 }
 0x131   : > { %v10846_v23 = vadd.f32 %v2974_v5, %v2886_v10  ;;  %2924 = vmatmul.bf16.gmra.mxu0 %v10675_v28 }
 0x132   : > { %v796_v15 = vpop.f32.mrf.mxu3  ;;  %vm880_vm7 = vcmp.ge.f32.partialorder %v708_v36, 0.0  ;;  %v1008_v27 = vmul.f32 0.2, %v708_v36  ;;  %3013 = vmatmul.bf16.gmra.mxu1 %v10680_v31 }
 0x133   : > { %v797_v38 = vadd.f32 %v796_v15, %v10838_v48 }
 0x134   : > { %v1136_v32 = vsel %vm880_vm7, %v708_v36, %v1008_v27  ;;  %8486 = vmatmul.msk.bf16.gmra.mxu2 %vm469_vm0, %v10516_v47  ;;  %v8705_v36 = vld [vmem:[#allocation2 + $0x1a0] sm:$0xf0] }
 0x135   : > { %vm881_vm8 = vcmp.ge.f32.partialorder %v797_v38, 0.0  ;;  %v1009_v30 = vmul.f32 0.2, %v797_v38  ;;  %v10853_v41 = vpack.c.bf16 %v1136_v32, %v1132_v6  ;;  %v8708_v21 = vor.u32 %v9919_v11, %v8705_v36 }
 0x136   : > { %v2887_v51 = vpop.f32.mrf.mxu0 }
 0x137   : > { %14713 = vst [vmem:[#allocation39_spill] sm:$0xff] %v10853_v41  ;;  %v1137_v44 = vsel %vm881_vm8, %v797_v38, %v1009_v30  ;;  %8502 = vmatmul.msk.bf16.gmra.mxu3 %vm469_vm0, %v10516_v47  ;;  %v2888_v24 = vadd.f32 %v2887_v51, %v10840_v58  ;;  %v2976_v61 = vpop.f32.mrf.mxu1  ;;  %v710_v10 = vpop.f32.mrf.mxu2  ;;  %3233 = vmatpush.bf16.msra.mxu0 %v8708_v21 }
 0x138   : > { %v10857_v37 = vpack.c.bf16 %v1137_v44, %v1133_v52  ;;  %v711_v12 = vadd.f32 %v710_v10, %v10835_v45 }
 0x139   : > { %v10860_v35 = vadd.f32 %v2976_v61, %v2888_v24 }
 0x13a   : > { %14714 = vst [vmem:[#allocation40_spill] sm:$0xff] %v10857_v37  ;;  %v799_v5 = vpop.f32.mrf.mxu3  ;;  %v1012_v30 = vmul.f32 0.2, %v711_v12  ;;  %vm884_vm9 = vcmp.ge.f32.partialorder %v711_v12, 0.0 }
 0x13b   : > { %v800_v46 = vadd.f32 %v799_v5, %v10838_v48 }
 0x13c   : > { %v1140_v10 = vsel %vm884_vm9, %v711_v12, %v1012_v30 }
 0x13d   : > { %v1013_v52 = vmul.f32 0.2, %v800_v46  ;;  %vm885_vm10 = vcmp.ge.f32.partialorder %v800_v46, 0.0 }
 0x13e   : > { %v2890_v15 = vpop.f32.mrf.mxu0 }
 0x13f   : > { %v2891_v47 = vadd.f32 %v2890_v15, %v10840_v58  ;;  %v2979_v38 = vpop.f32.mrf.mxu1  ;;  %v712_v27 = vpop.f32.mrf.mxu2  ;;  %v1141_v11 = vsel %vm885_vm10, %v800_v46, %v1013_v52  ;;  %v9311_v46 = vld [vmem:[#allocation2 + $0x640] sm:$0xf] }
 0x140   : > { %v713_v6 = vadd.f32 %v712_v27, %v10835_v45  ;;  %v10011_v27 = vld [vmem:[#allocation2 + $0x45c] sm:$0xf0] }
 0x141   : > { %v10866_v44 = vadd.f32 %v2979_v38, %v2891_v47  ;;  %2929 = vmatmul.bf16.gmra.mxu0 %v10697_v17  ;;  %v9055_v38 = vld [vmem:[#allocation2 + $0x440] sm:$0xf] }
 0x142   : > { %v801_v32 = vpop.f32.mrf.mxu3  ;;  %vm888_vm11 = vcmp.ge.f32.partialorder %v713_v6, 0.0  ;;  %v1016_v24 = vmul.f32 0.2, %v713_v6  ;;  %3018 = vmatmul.bf16.gmra.mxu1 %v10702_v20  ;;  %v9056_v30 = vor.u32 %v10011_v27, %v9055_v38  ;;  %v10075_v52 = vld [vmem:[#allocation2 + $0x65c] sm:$0xf0] }
 0x143   : > { %v802_v51 = vadd.f32 %v801_v32, %v10838_v48 }
 0x144   : > { %v1144_v5 = vsel %vm888_vm11, %v713_v6, %v1016_v24  ;;  %8487 = vmatmul.msk.bf16.gmra.mxu2 %vm469_vm0, %v10532_v53 }
 0x145   : > { %vm889_vm12 = vcmp.ge.f32.partialorder %v802_v51, 0.0  ;;  %v1017_v61 = vmul.f32 0.2, %v802_v51  ;;  %v10873_v36 = vpack.c.bf16 %v1144_v5, %v1140_v10  ;;  %3060 = vmatpush.bf16.msra.mxu2 %v9056_v30 }
 0x146   : > { %v2892_v47 = vpop.f32.mrf.mxu0 }
 0x147   : > { %14715 = vst [vmem:[#allocation41_spill] sm:$0xff] %v10873_v36  ;;  %v1145_v15 = vsel %vm889_vm12, %v802_v51, %v1017_v61  ;;  %8503 = vmatmul.msk.bf16.gmra.mxu3 %vm469_vm0, %v10532_v53  ;;  %v2893_v32 = vadd.f32 %v2892_v47, %v10840_v58  ;;  %v2981_v20 = vpop.f32.mrf.mxu1  ;;  %v715_v12 = vpop.f32.mrf.mxu2  ;;  %v9312_v51 = vor.u32 %v10075_v52, %v9311_v46 }
 0x148   : > { %v10877_v21 = vpack.c.bf16 %v1145_v15, %v1141_v11  ;;  %v716_v61 = vadd.f32 %v715_v12, %v10835_v45 }
 0x149   : > { %v10880_v24 = vadd.f32 %v2981_v20, %v2893_v32  ;;  %3149 = vmatpush.bf16.msra.mxu3 %v9312_v51 }
 0x14a   : > { %14716 = vst [vmem:[#allocation42_spill] sm:$0xff] %v10877_v21  ;;  %v804_v6 = vpop.f32.mrf.mxu3  ;;  %v1020_v47 = vmul.f32 0.2, %v716_v61  ;;  %vm892_vm13 = vcmp.ge.f32.partialorder %v716_v61, 0.0 }
 0x14b   : > { %v805_v53 = vadd.f32 %v804_v6, %v10838_v48 }
 0x14c   : > { %v1148_v46 = vsel %vm892_vm13, %v716_v61, %v1020_v47 }
 0x14d   : > { %v1021_v20 = vmul.f32 0.2, %v805_v53  ;;  %vm893_vm14 = vcmp.ge.f32.partialorder %v805_v53, 0.0 }
 0x14e   : > { %v2895_v10 = vpop.f32.mrf.mxu0 }
 0x14f   : > { %v2896_v5 = vadd.f32 %v2895_v10, %v10840_v58  ;;  %v2984_v11 = vpop.f32.mrf.mxu1  ;;  %v717_v15 = vpop.f32.mrf.mxu2  ;;  %v1149_v51 = vsel %vm893_vm14, %v805_v53, %v1021_v20  ;;  %v8673_v20 = vld [vmem:[#allocation2 + $0x160] sm:$0xf0] }
 0x150   : > { %v718_v38 = vadd.f32 %v717_v15, %v10835_v45 }
 0x151   : > { %v10886_v32 = vadd.f32 %v2984_v11, %v2896_v5  ;;  %2934 = vmatmul.bf16.gmra.mxu0 %v10719_v18 }
 0x152   : > { %v806_v27 = vpop.f32.mrf.mxu3  ;;  %vm896_vm15 = vcmp.ge.f32.partialorder %v718_v38, 0.0  ;;  %v1024_v12 = vmul.f32 0.2, %v718_v38  ;;  %3023 = vmatmul.bf16.gmra.mxu1 %v10724_v22 }
 0x153   : > { %14717 = vst [vmem:[#allocation43_spill] sm:$0xff] %v10886_v32  ;;  %v807_v30 = vadd.f32 %v806_v27, %v10838_v48 }
 0x154   : > { %v1152_v52 = vsel %vm896_vm15, %v718_v38, %v1024_v12  ;;  %8488 = vmatmul.msk.bf16.gmra.mxu2 %vm469_vm0, %v10560_v1  ;;  %v9911_v38 = vld [vmem:[#allocation2 + $0x144] sm:$0xf] }
 0x155   : > { %vm897_vm1 = vcmp.ge.f32.partialorder %v807_v30, 0.0  ;;  %v1025_v6 = vmul.f32 0.2, %v807_v30  ;;  %v10893_v10 = vpack.c.bf16 %v1152_v52, %v1148_v46  ;;  %v8676_v12 = vor.u32 %v9911_v38, %v8673_v20 }
 0x156   : > { %v2897_v15 = vpop.f32.mrf.mxu0 }
 0x157   : > { %14718 = vst [vmem:[#allocation44_spill] sm:$0xff] %v10893_v10  ;;  %v1153_v5 = vsel %vm897_vm1, %v807_v30, %v1025_v6  ;;  %8504 = vmatmul.msk.bf16.gmra.mxu3 %vm469_vm0, %v10560_v1  ;;  %v2898_v27 = vadd.f32 %v2897_v15, %v10840_v58  ;;  %v2986_v22 = vpop.f32.mrf.mxu1  ;;  %v720_v18 = vpop.f32.mrf.mxu2  ;;  %3234 = vmatpush.bf16.msra.mxu0 %v8676_v12 }
 0x158   : > { %v10897_v11 = vpack.c.bf16 %v1153_v5, %v1149_v51  ;;  %v721_v47 = vadd.f32 %v720_v18, %v10835_v45 }
 0x159   : > { %v10900_v61 = vadd.f32 %v2986_v22, %v2898_v27 }
 0x15a   : > { %14719 = vst [vmem:[#allocation45_spill] sm:$0xff] %v10897_v11  ;;  %v809_v32 = vpop.f32.mrf.mxu3  ;;  %v1028_v52 = vmul.f32 0.2, %v721_v47  ;;  %vm900_vm2 = vcmp.ge.f32.partialorder %v721_v47, 0.0 }
 0x15b   : > { %14720 = vst [vmem:[#allocation46_spill] sm:$0xff] %v10900_v61  ;;  %v810_v53 = vadd.f32 %v809_v32, %v10838_v48 }
 0x15c   : > { %v1156_v38 = vsel %vm900_vm2, %v721_v47, %v1028_v52 }
 0x15d   : > { %v1029_v22 = vmul.f32 0.2, %v810_v53  ;;  %vm901_vm3 = vcmp.ge.f32.partialorder %v810_v53, 0.0 }
 0x15e   : > { %v2900_v30 = vpop.f32.mrf.mxu0 }
 0x15f   : > { %v2901_v1 = vadd.f32 %v2900_v30, %v10840_v58  ;;  %v2989_v6 = vpop.f32.mrf.mxu1  ;;  %v722_v46 = vpop.f32.mrf.mxu2  ;;  %v1157_v30 = vsel %vm901_vm3, %v810_v53, %v1029_v22  ;;  %v9279_v53 = vld [vmem:[#allocation2 + $0x600] sm:$0xf] }
 0x160   : > { %v723_v51 = vadd.f32 %v722_v46, %v10835_v45  ;;  %v10067_v22 = vld [vmem:[#allocation2 + $0x61c] sm:$0xf0] }
 0x161   : > { %v10906_v15 = vadd.f32 %v2989_v6, %v2901_v1  ;;  %2939 = vmatmul.bf16.gmra.mxu0 %v10741_v14  ;;  %v10003_v14 = vld [vmem:[#allocation2 + $0x41c] sm:$0xf0] }
 0x162   : > { %v811_v5 = vpop.f32.mrf.mxu3  ;;  %vm904_vm4 = vcmp.ge.f32.partialorder %v723_v51, 0.0  ;;  %v1032_v32 = vmul.f32 0.2, %v723_v51  ;;  %3028 = vmatmul.bf16.gmra.mxu1 %v10746_v19 }
 0x163   : > { %14721 = vst [vmem:[#allocation47_spill] sm:$0xff] %v10906_v15  ;;  %v812_v18 = vadd.f32 %v811_v5, %v10838_v48  ;;  %v9023_v5 = vld [vmem:[#allocation2 + $0x400] sm:$0xf] }
 0x164   : > { %v1160_v20 = vsel %vm904_vm4, %v723_v51, %v1032_v32  ;;  %8489 = vmatmul.msk.bf16.gmra.mxu2 %vm469_vm0, %v10576_v7  ;;  %v9024_v52 = vor.u32 %v10003_v14, %v9023_v5  ;;  %v8993_v5 = vld [vmem:[#allocation2 + $0x3e0] sm:$0xf0] }
 0x165   : > { %vm905_vm5 = vcmp.ge.f32.partialorder %v812_v18, 0.0  ;;  %v1033_v27 = vmul.f32 0.2, %v812_v18  ;;  %v10913_v12 = vpack.c.bf16 %v1160_v20, %v1156_v38 }
 0x166   : > { %v2902_v46 = vpop.f32.mrf.mxu0  ;;  %3061 = vmatpush.bf16.msra.mxu2 %v9024_v52 }
 0x167   : > { %14722 = vst [vmem:[#allocation48_spill] sm:$0xff] %v10913_v12  ;;  %v1161_v1 = vsel %vm905_vm5, %v812_v18, %v1033_v27  ;;  %8505 = vmatmul.msk.bf16.gmra.mxu3 %vm469_vm0, %v10576_v7  ;;  %v2903_v19 = vadd.f32 %v2902_v46, %v10840_v58  ;;  %v2991_v15 = vpop.f32.mrf.mxu1  ;;  %v725_v47 = vpop.f32.mrf.mxu2  ;;  %v9280_v18 = vor.u32 %v10067_v22, %v9279_v53 }
 0x168   : > { %v10917_v6 = vpack.c.bf16 %v1161_v1, %v1157_v30  ;;  %v726_v27 = vadd.f32 %v725_v47, %v10835_v45 }
 0x169   : > { %v10920_v32 = vadd.f32 %v2991_v15, %v2903_v19  ;;  %3150 = vmatpush.bf16.msra.mxu3 %v9280_v18  ;;  %v9991_v15 = vld [vmem:[#allocation2 + $0x3c4] sm:$0xf] }
 0x16a   : > { %14723 = vst [vmem:[#allocation49_spill] sm:$0xff] %v10917_v6  ;;  %v814_v51 = vpop.f32.mrf.mxu3  ;;  %vm908_vm6 = vcmp.ge.f32.partialorder %v726_v27, 0.0  ;;  %v1036_v46 = vmul.f32 0.2, %v726_v27 }
 0x16b   : > { %14724 = vst [vmem:[#allocation50_spill] sm:$0xff] %v10920_v32  ;;  %v815_v7 = vadd.f32 %v814_v51, %v10838_v48  ;;  %v8996_v51 = vor.u32 %v9991_v15, %v8993_v5 }
 0x16c   : > { %v1164_v18 = vsel %vm908_vm6, %v726_v27, %v1036_v46 }
 0x16d   : > { %v1037_v52 = vmul.f32 0.2, %v815_v7  ;;  %vm909_vm7 = vcmp.ge.f32.partialorder %v815_v7, 0.0  ;;  %3321 = vmatpush.bf16.msra.mxu1 %v8996_v51 }
 0x16e   : > { %v2905_v38 = vpop.f32.mrf.mxu0 }
 0x16f   : > { %v2906_v20 = vadd.f32 %v2905_v38, %v10840_v58  ;;  %v2994_v30 = vpop.f32.mrf.mxu1  ;;  %v727_v1 = vpop.f32.mrf.mxu2 }
 0x170   : > { %v728_v14 = vadd.f32 %v727_v1, %v10835_v45  ;;  %v1165_v1 = vsel %vm909_vm7, %v815_v7, %v1037_v52 }
 0x171   : > { %v10926_v32 = vadd.f32 %v2994_v30, %v2906_v20  ;;  %2944 = vmatmul.bf16.gmra.mxu0 %v10763_v29  ;;  %v9983_v20 = vld [vmem:[#allocation2 + $0x384] sm:$0xf] }
 0x172   : > { %v816_v19 = vpop.f32.mrf.mxu3  ;;  %vm912_vm8 = vcmp.ge.f32.partialorder %v728_v14, 0.0  ;;  %v1040_v53 = vmul.f32 0.2, %v728_v14  ;;  %3033 = vmatmul.bf16.gmra.mxu1 %v10768_v39  ;;  %v8961_v30 = vld [vmem:[#allocation2 + $0x3a0] sm:$0xf0] }
 0x173   : > { %14725 = vst [vmem:[#allocation51_spill] sm:$0xff] %v10926_v32  ;;  %v817_v47 = vadd.f32 %v816_v19, %v10838_v48  ;;  %v8964_v5 = vor.u32 %v9983_v20, %v8961_v30  ;;  %v8929_v32 = vld [vmem:[#allocation2 + $0x360] sm:$0xf0] }
 0x174   : > { %v1168_v38 = vsel %vm912_vm8, %v728_v14, %v1040_v53  ;;  %8490 = vmatmul.msk.bf16.gmra.mxu2 %vm469_vm0, %v10604_v25  ;;  %v9975_v53 = vld [vmem:[#allocation2 + $0x344] sm:$0xf] }
 0x175   : > { %vm913_vm9 = vcmp.ge.f32.partialorder %v817_v47, 0.0  ;;  %v1041_v22 = vmul.f32 0.2, %v817_v47  ;;  %v10934_v19 = vpack.c.bf16 %v1168_v38, %v1164_v18  ;;  %3322 = vmatpush.bf16.msra.mxu1 %v8964_v5  ;;  %v8932_v7 = vor.u32 %v9975_v53, %v8929_v32  ;;  %v8897_v20 = vld [vmem:[#allocation2 + $0x320] sm:$0xf0] }
 0x176   : > { %v2907_v29 = vpop.f32.mrf.mxu0  ;;  %v8609_v53 = vld [vmem:[#allocation2 + $0xe0] sm:$0xf0] }
 0x177   : > { %14726 = vst [vmem:[#allocation52_spill] sm:$0xff] %v10934_v19  ;;  %v1169_v15 = vsel %vm913_vm9, %v817_v47, %v1041_v22  ;;  %8506 = vmatmul.msk.bf16.gmra.mxu3 %vm469_vm0, %v10604_v25  ;;  %v2908_v51 = vadd.f32 %v2907_v29, %v10840_v58  ;;  %v2996_v27 = vpop.f32.mrf.mxu1  ;;  %v730_v46 = vpop.f32.mrf.mxu2  ;;  %v9903_v47 = vld [vmem:[#allocation2 + $0x104] sm:$0xf] }
 0x178   : > { %v10938_v39 = vpack.c.bf16 %v1169_v15, %v1165_v1  ;;  %v731_v52 = vadd.f32 %v730_v46, %v10835_v45  ;;  %v8641_v25 = vld [vmem:[#allocation2 + $0x120] sm:$0xf0] }
 0x179   : > { %v10941_v61 = vadd.f32 %v2996_v27, %v2908_v51  ;;  %3323 = vmatpush.bf16.msra.mxu1 %v8932_v7  ;;  %v9967_v22 = vld [vmem:[#allocation2 + $0x304] sm:$0xf]  ;;  %v8644_v38 = vor.u32 %v9903_v47, %v8641_v25 }
 0x17a   : > { %14727 = vst [vmem:[#allocation53_spill] sm:$0xff] %v10938_v39  ;;  %v819_v14 = vpop.f32.mrf.mxu3  ;;  %v8900_v30 = vor.u32 %v9967_v22, %v8897_v20  ;;  %vm916_vm10 = vcmp.ge.f32.partialorder %v731_v52, 0.0  ;;  %v1044_v1 = vmul.f32 0.2, %v731_v52  ;;  %v9895_v46 = vld [vmem:[#allocation2 + $0xc4] sm:$0xf] }
 0x17b   : > { %14728 = vst [vmem:[#allocation54_spill] sm:$0xff] %v10941_v61  ;;  %v820_v18 = vadd.f32 %v819_v14, %v10838_v48  ;;  %3235 = vmatpush.bf16.msra.mxu0 %v8644_v38  ;;  %v9959_v7 = vld [vmem:[#allocation2 + $0x2c4] sm:$0xf]  ;;  %v8612_v25 = vor.u32 %v9895_v46, %v8609_v53 }
 0x17c   : > { %v8865_v22 = vld [vmem:[#allocation2 + $0x2e0] sm:$0xf0] }
 0x17d   : > { %3324 = vmatpush.bf16.msra.mxu1 %v8900_v30  ;;  %v1045_v61 = vmul.f32 0.2, %v820_v18  ;;  %vm917_vm11 = vcmp.ge.f32.partialorder %v820_v18, 0.0  ;;  %v8868_v38 = vor.u32 %v9959_v7, %v8865_v22  ;;  %v1172_v30 = vsel %vm916_vm10, %v731_v52, %v1044_v1  ;;  %v8833_v22 = vld [vmem:[#allocation2 + $0x2a0] sm:$0xf0] }
 0x17e   : > { %v2910_v29 = vpop.f32.mrf.mxu0  ;;  %v10055_v1 = vld [vmem:[#allocation2 + $0x5c4] sm:$0xf] }
 0x17f   : > { %v2911_v15 = vadd.f32 %v2910_v29, %v10840_v58  ;;  %v2999_v5 = vpop.f32.mrf.mxu1  ;;  %v732_v51 = vpop.f32.mrf.mxu2  ;;  %3236 = vmatpush.bf16.msra.mxu0 %v8612_v25  ;;  %v1173_v46 = vsel %vm917_vm11, %v820_v18, %v1045_v61  ;;  %v9879_v18 = vld [vmem:[#allocation2 + $0x44] sm:$0xf] }
 0x180   : > { %v733_v32 = vadd.f32 %v732_v51, %v10835_v45 }
 0x181   : > { %v10947_v14 = vadd.f32 %v2999_v5, %v2911_v15  ;;  %2949 = vmatmul.bf16.gmra.mxu0 %v10785_v42  ;;  %3325 = vmatpush.bf16.msra.mxu1 %v8868_v38  ;;  %v9887_v15 = vld [vmem:[#allocation2 + $0x84] sm:$0xf] }
 0x182   : > { %v821_v27 = vpop.f32.mrf.mxu3  ;;  %vm920_vm12 = vcmp.ge.f32.partialorder %v733_v32, 0.0  ;;  %v1048_v20 = vmul.f32 0.2, %v733_v32  ;;  %3038 = vmatmul.bf16.gmra.mxu1 %v10790_v0  ;;  %v8577_v5 = vld [vmem:[#allocation2 + $0xa0] sm:$0xf0] }
 0x183   : > { %14729 = vst [vmem:[#allocation55_spill] sm:$0xff] %v10947_v14  ;;  %v822_v47 = vadd.f32 %v821_v27, %v10838_v48  ;;  %v9951_v27 = vld [vmem:[#allocation2 + $0x284] sm:$0xf]  ;;  %v8580_v7 = vor.u32 %v9887_v15, %v8577_v5 }
 0x184   : > { %v1176_v51 = vsel %vm920_vm12, %v733_v32, %v1048_v20  ;;  %8491 = vmatmul.msk.bf16.gmra.mxu2 %vm469_vm0, %v10620_v55  ;;  %v9249_v32 = vld [vmem:[#allocation2 + $0x5e0] sm:$0xf0]  ;;  %v8836_v20 = vor.u32 %v9951_v27, %v8833_v22 }
 0x185   : > { %vm921_vm13 = vcmp.ge.f32.partialorder %v822_v47, 0.0  ;;  %v1049_v29 = vmul.f32 0.2, %v822_v47  ;;  %v10955_v53 = vpack.c.bf16 %v1176_v51, %v1172_v30  ;;  %v9252_v17 = vor.u32 %v10055_v1, %v9249_v32  ;;  %3237 = vmatpush.bf16.msra.mxu0 %v8580_v7  ;;  %v9505_v30 = vld [vmem:[#allocation2 + $0x7e0] sm:$0xf0] }
 0x186   : > { %v2912_v52 = vpop.f32.mrf.mxu0  ;;  %3326 = vmatpush.bf16.msra.mxu1 %v8836_v20  ;;  %v8801_v15 = vld [vmem:[#allocation2 + $0x260] sm:$0xf0] }
 0x187   : > { %14730 = vst [vmem:[#allocation56_spill] sm:$0xff] %v10955_v53  ;;  %v1177_v42 = vsel %vm921_vm13, %v822_v47, %v1049_v29  ;;  %8507 = vmatmul.msk.bf16.gmra.mxu3 %vm469_vm0, %v10620_v55  ;;  %v2913_v38 = vadd.f32 %v2912_v52, %v10840_v58  ;;  %v3001_v0 = vpop.f32.mrf.mxu1  ;;  %v735_v14 = vpop.f32.mrf.mxu2  ;;  %v8545_v47 = vld [vmem:[#allocation2 + $0x60] sm:$0xf0]  ;;  %3410 = vmatpush.bf16.msrb.mxu2 %v9252_v17 }
 0x188   : > { %v10959_v25 = vpack.c.bf16 %v1177_v42, %v1173_v46  ;;  %v9943_v29 = vld [vmem:[#allocation2 + $0x244] sm:$0xf]  ;;  %v8548_v51 = vor.u32 %v9879_v18, %v8545_v47  ;;  %v736_v46 = vadd.f32 %v735_v14, %v10835_v45 }
 0x189   : > { %v10962_v55 = vadd.f32 %v3001_v0, %v2913_v38  ;;  %v10119_v42 = vld [vmem:[#allocation2 + $0x7c4] sm:$0xf]  ;;  %v8804_v27 = vor.u32 %v9943_v29, %v8801_v15 }
 0x18a   : > { %14731 = vst [vmem:[#allocation57_spill] sm:$0xff] %v10959_v25  ;;  %v824_v61 = vpop.f32.mrf.mxu3  ;;  %v9508_v5 = vor.u32 %v10119_v42, %v9505_v30  ;;  %3238 = vmatpush.bf16.msra.mxu0 %v8548_v51  ;;  %v9871_v7 = vld [vmem:[#allocation2 + $0x4] sm:$0xf]  ;;  %v1052_v29 = vmul.f32 0.2, %v736_v46  ;;  %vm924_vm14 = vcmp.ge.f32.partialorder %v736_v46, 0.0 }
 0x18b   : > { %3327 = vmatpush.bf16.msra.mxu1 %v8804_v27  ;;  %v8513_v22 = vld [vmem:[#allocation2 + $0x20] sm:$0xf0]  ;;  %v825_v1 = vadd.f32 %v824_v61, %v10838_v48 }
 0x18c   : > { %3499 = vmatpush.bf16.msrb.mxu3 %v9508_v5  ;;  %v9935_v52 = vld [vmem:[#allocation2 + $0x204] sm:$0xf]  ;;  %v8516_v32 = vor.u32 %v9871_v7, %v8513_v22  ;;  %v1180_v27 = vsel %vm924_vm14, %v736_v46, %v1052_v29 }
 0x18d   : > { %v8769_v0 = vld [vmem:[#allocation2 + $0x220] sm:$0xf0]  ;;  %v1053_v30 = vmul.f32 0.2, %v825_v1  ;;  %vm925_vm15 = vcmp.ge.f32.partialorder %v825_v1, 0.0 }
 0x18e   : > { %v2915_v20 = vpop.f32.mrf.mxu0  ;;  %v8772_v17 = vor.u32 %v9935_v52, %v8769_v0  ;;  %3239 = vmatpush.bf16.msra.mxu0 %v8516_v32 }
 0x18f   : > { %v2916_v38 = vadd.f32 %v2915_v20, %v10840_v58  ;;  %v3004_v18 = vpop.f32.mrf.mxu1  ;;  %v737_v47 = vpop.f32.mrf.mxu2  ;;  %v1181_v22 = vsel %vm925_vm15, %v825_v1, %v1053_v30 }
 0x190   : > { %v738_v42 = vadd.f32 %v737_v47, %v10835_v45  ;;  %3328 = vmatpush.bf16.msra.mxu1 %v8772_v17 }
 0x191   : > { %v10968_v51 = vadd.f32 %v3004_v18, %v2916_v38  ;;  %2954 = vmatmul.bf16.gmra.mxu0 %v10807_v2 }
 0x192   : > { %v826_v14 = vpop.f32.mrf.mxu3  ;;  %vm928_vm1 = vcmp.ge.f32.partialorder %v738_v42, 0.0  ;;  %v1056_v15 = vmul.f32 0.2, %v738_v42  ;;  %3043 = vmatmul.bf16.gmra.mxu1 %v10812_v54 }
 0x193   : > { %v827_v61 = vadd.f32 %v826_v14, %v10838_v48 }
 0x194   : > { %v1184_v7 = vsel %vm928_vm1, %v738_v42, %v1056_v15  ;;  %8492 = vmatmul.msk.bf16.gmra.mxu2 %vm469_vm0, %v10636_v33 }
 0x195   : > { %vm929_vm2 = vcmp.ge.f32.partialorder %v827_v61, 0.0  ;;  %v1057_v5 = vmul.f32 0.2, %v827_v61  ;;  %v10975_v52 = vpack.c.bf16 %v1184_v7, %v1180_v27 }
 0x196   : > { %v2917_v20 = vpop.f32.mrf.mxu0 }
 0x197   : > { %14732 = vst [vmem:[#allocation58_spill] sm:$0xff] %v10975_v52  ;;  %v1185_v32 = vsel %vm929_vm2, %v827_v61, %v1057_v5  ;;  %8508 = vmatmul.msk.bf16.gmra.mxu3 %vm469_vm0, %v10636_v33  ;;  %v2918_v17 = vadd.f32 %v2917_v20, %v10840_v58  ;;  %v3006_v38 = vpop.f32.mrf.mxu1  ;;  %v740_v18 = vpop.f32.mrf.mxu2 }
 0x198   : > { %v10979_v0 = vpack.c.bf16 %v1185_v32, %v1181_v22  ;;  %v741_v29 = vadd.f32 %v740_v18, %v10835_v45 }
 0x199   : > { %v10982_v46 = vadd.f32 %v3006_v38, %v2918_v17 }
 0x19a   : > { %14733 = vst [vmem:[#allocation59_spill] sm:$0xff] %v10979_v0  ;;  %v829_v47 = vpop.f32.mrf.mxu3  ;;  %v1060_v33 = vmul.f32 0.2, %v741_v29  ;;  %vm932_vm0 = vcmp.ge.f32.partialorder %v741_v29, 0.0 }
 0x19b   : > { %v830_v1 = vadd.f32 %v829_v47, %v10838_v48 }
 0x19c   : > { %v1188_v17 = vsel %vm932_vm0, %v741_v29, %v1060_v33 }
 0x19d   : > { %v1061_v27 = vmul.f32 0.2, %v830_v1  ;;  %vm933_vm3 = vcmp.ge.f32.partialorder %v830_v1, 0.0 }
 0x19e   : > { %v2920_v42 = vpop.f32.mrf.mxu0 }
 0x19f   : > { %v2921_v14 = vadd.f32 %v2920_v42, %v10840_v58  ;;  %v3009_v30 = vpop.f32.mrf.mxu1  ;;  %v742_v61 = vpop.f32.mrf.mxu2  ;;  %v1189_v18 = vsel %vm933_vm3, %v830_v1, %v1061_v27  ;;  %v10111_v1 = vld [vmem:[#allocation2 + $0x784] sm:$0xf] }
 0x1a0   : > { %v743_v15 = vadd.f32 %v742_v61, %v10835_v45  ;;  %v10047_v61 = vld [vmem:[#allocation2 + $0x584] sm:$0xf] }
 0x1a1   : > { %v10988_v7 = vadd.f32 %v3009_v30, %v2921_v14  ;;  %2959 = vmatmul.bf16.gmra.mxu0 %v10828_v16 }
 0x1a2   : > { %v831_v5 = vpop.f32.mrf.mxu3  ;;  %vm936_vm4 = vcmp.ge.f32.partialorder %v743_v15, 0.0  ;;  %v1064_v32 = vmul.f32 0.2, %v743_v15  ;;  %3048 = vmatmul.bf16.gmra.mxu1 %v10832_v40 }
 0x1a3   : > { %14734 = vst [vmem:[#allocation60_spill] sm:$0xff] %v10988_v7  ;;  %v832_v22 = vadd.f32 %v831_v5, %v10838_v48  ;;  %v9217_v5 = vld [vmem:[#allocation2 + $0x5a0] sm:$0xf0] }
 0x1a4   : > { %v1192_v38 = vsel %vm936_vm4, %v743_v15, %v1064_v32  ;;  %3062 = vmatmul.bf16.vlgmr.msra.gmra.mxu2 %v10853_v41  ;;  %v9220_v54 = vor.u32 %v10047_v61, %v9217_v5  ;;  %v9473_v15 = vld [vmem:[#allocation2 + $0x7a0] sm:$0xf0] }
 0x1a5   : > { %vm937_vm5 = vcmp.ge.f32.partialorder %v832_v22, 0.0  ;;  %v1065_v20 = vmul.f32 0.2, %v832_v22  ;;  %v10994_v47 = vpack.c.bf16 %v1192_v38, %v1188_v17  ;;  %v9476_v27 = vor.u32 %v10111_v1, %v9473_v15 }
 0x1a6   : > { %v2922_v30 = vpop.f32.mrf.mxu0  ;;  %3411 = vmatpush.bf16.msrb.mxu2 %v9220_v54 }
 0x1a7   : > { %14735 = vst [vmem:[#allocation61_spill] sm:$0xff] %v10994_v47  ;;  %v1193_v42 = vsel %vm937_vm5, %v832_v22, %v1065_v20  ;;  %3151 = vmatmul.bf16.vlgmr.msra.gmra.mxu3 %v10857_v37  ;;  %v2923_v16 = vadd.f32 %v2922_v30, %v10840_v58  ;;  %v3011_v40 = vpop.f32.mrf.mxu1  ;;  %v745_v7 = vpop.f32.mrf.mxu2 }
 0x1a8   : > { %v10997_v14 = vpack.c.bf16 %v1193_v42, %v1189_v18  ;;  %v746_v22 = vadd.f32 %v745_v7, %v10835_v45  ;;  %3500 = vmatpush.bf16.msrb.mxu3 %v9476_v27 }
 0x1a9   : > { %v11000_v33 = vadd.f32 %v3011_v40, %v2923_v16 }
 0x1aa   : > { %14736 = vst [vmem:[#allocation62_spill] sm:$0xff] %v10997_v14  ;;  %v834_v29 = vpop.f32.mrf.mxu3  ;;  %v1068_v42 = vmul.f32 0.2, %v746_v22  ;;  %vm940_vm6 = vcmp.ge.f32.partialorder %v746_v22, 0.0 }
 0x1ab   : > { %v835_v32 = vadd.f32 %v834_v29, %v10838_v48 }
 0x1ac   : > { %v1196_v29 = vsel %vm940_vm6, %v746_v22, %v1068_v42 }
 0x1ad   : > { %v1069_v16 = vmul.f32 0.2, %v835_v32  ;;  %vm941_vm7 = vcmp.ge.f32.partialorder %v835_v32, 0.0 }
 0x1ae   : > { %v2925_v20 = vpop.f32.mrf.mxu0 }
 0x1af   : > { %v2926_v17 = vadd.f32 %v2925_v20, %v10840_v58  ;;  %v3014_v38 = vpop.f32.mrf.mxu1  ;;  %v747_v18 = vpop.f32.mrf.mxu2  ;;  %v1197_v15 = vsel %vm941_vm7, %v835_v32, %v1069_v16 }
 0x1b0   : > { %v748_v30 = vadd.f32 %v747_v18, %v10835_v45 }
 0x1b1   : > { %v11006_v54 = vadd.f32 %v3014_v38, %v2926_v17  ;;  %3240 = vmatmul.bf16.vlgmr.msra.gmra.mxu0 %v10664_v9 }
 0x1b2   : > { %v836_v61 = vpop.f32.mrf.mxu3  ;;  %vm944_vm8 = vcmp.ge.f32.partialorder %v748_v30, 0.0  ;;  %v1072_v7 = vmul.f32 0.2, %v748_v30  ;;  %3329 = vmatmul.bf16.vlgmr.msra.gmra.mxu1 %v10666_v13 }
 0x1b3   : > { %14737 = vst [vmem:[#allocation63_spill] sm:$0xff] %v11006_v54  ;;  %v837_v40 = vadd.f32 %v836_v61, %v10838_v48 }
 0x1b4   : > { %v1200_v1 = vsel %vm944_vm8, %v748_v30, %v1072_v7  ;;  %3067 = vmatmul.bf16.gmra.mxu2 %v10873_v36 }
 0x1b5   : > { %vm945_vm9 = vcmp.ge.f32.partialorder %v837_v40, 0.0  ;;  %v1073_v5 = vmul.f32 0.2, %v837_v40  ;;  %v11012_v27 = vpack.c.bf16 %v1200_v1, %v1196_v29 }
 0x1b6   : > { %v2927_v38 = vpop.f32.mrf.mxu0 }
 0x1b7   : > { %v1201_v20 = vsel %vm945_vm9, %v837_v40, %v1073_v5  ;;  %3156 = vmatmul.bf16.gmra.mxu3 %v10877_v21  ;;  %v2928_v18 = vadd.f32 %v2927_v38, %v10840_v58  ;;  %v3016_v61 = vpop.f32.mrf.mxu1  ;;  %v750_v9 = vpop.f32.mrf.mxu2 }
 0x1b8   : > { %v11015_v17 = vpack.c.bf16 %v1201_v20, %v1197_v15  ;;  %v751_v22 = vadd.f32 %v750_v9, %v10835_v45 }
 0x1b9   : > { %v11018_v54 = vadd.f32 %v3016_v61, %v2928_v18 }
 0x1ba   : > { %14738 = vst [vmem:[#allocation64_spill] sm:$0xff] %v11015_v17  ;;  %v839_v13 = vpop.f32.mrf.mxu3  ;;  %v1076_v7 = vmul.f32 0.2, %v751_v22  ;;  %vm948_vm10 = vcmp.ge.f32.partialorder %v751_v22, 0.0 }
 0x1bb   : > { %v840_v42 = vadd.f32 %v839_v13, %v10838_v48 }
 0x1bc   : > { %v1204_v38 = vsel %vm948_vm10, %v751_v22, %v1076_v7 }
 0x1bd   : > { %v1077_v1 = vmul.f32 0.2, %v840_v42  ;;  %vm949_vm11 = vcmp.ge.f32.partialorder %v840_v42, 0.0 }
 0x1be   : > { %v2930_v32 = vpop.f32.mrf.mxu0 }
 0x1bf   : > { %v2931_v30 = vadd.f32 %v2930_v32, %v10840_v58  ;;  %v3019_v16 = vpop.f32.mrf.mxu1  ;;  %v752_v40 = vpop.f32.mrf.mxu2  ;;  %v1205_v61 = vsel %vm949_vm11, %v840_v42, %v1077_v1  ;;  %v10103_v42 = vld [vmem:[#allocation2 + $0x744] sm:$0xf] }
 0x1c0   : > { %v753_v5 = vadd.f32 %v752_v40, %v10835_v45 }
 0x1c1   : > { %v11024_v15 = vadd.f32 %v3019_v16, %v2931_v30  ;;  %3245 = vmatmul.bf16.gmra.mxu0 %v10686_v59  ;;  %v9185_v59 = vld [vmem:[#allocation2 + $0x560] sm:$0xf0] }
 0x1c2   : > { %v841_v29 = vpop.f32.mrf.mxu3  ;;  %vm952_vm12 = vcmp.ge.f32.partialorder %v753_v5, 0.0  ;;  %v1080_v9 = vmul.f32 0.2, %v753_v5  ;;  %3334 = vmatmul.bf16.gmra.mxu1 %v10688_v34 }
 0x1c3   : > { %14739 = vst [vmem:[#allocation65_spill] sm:$0xff] %v11024_v15  ;;  %v842_v20 = vadd.f32 %v841_v29, %v10838_v48  ;;  %v10039_v29 = vld [vmem:[#allocation2 + $0x544] sm:$0xf] }
 0x1c4   : > { %v1208_v18 = vsel %vm952_vm12, %v753_v5, %v1080_v9  ;;  %3072 = vmatmul.bf16.gmra.mxu2 %v10893_v10  ;;  %v9188_v36 = vor.u32 %v10039_v29, %v9185_v59  ;;  %v9441_v5 = vld [vmem:[#allocation2 + $0x760] sm:$0xf0] }
 0x1c5   : > { %vm953_vm13 = vcmp.ge.f32.partialorder %v842_v20, 0.0  ;;  %v1081_v13 = vmul.f32 0.2, %v842_v20  ;;  %v11030_v32 = vpack.c.bf16 %v1208_v18, %v1204_v38  ;;  %v9444_v1 = vor.u32 %v10103_v42, %v9441_v5 }
 0x1c6   : > { %v2932_v40 = vpop.f32.mrf.mxu0  ;;  %3412 = vmatpush.bf16.msrb.mxu2 %v9188_v36 }
 0x1c7   : > { %14740 = vst [vmem:[#allocation66_spill] sm:$0xff] %v11030_v32  ;;  %v1209_v30 = vsel %vm953_vm13, %v842_v20, %v1081_v13  ;;  %3161 = vmatmul.bf16.gmra.mxu3 %v10897_v11  ;;  %v2933_v15 = vadd.f32 %v2932_v40, %v10840_v58  ;;  %v3021_v34 = vpop.f32.mrf.mxu1  ;;  %v755_v21 = vpop.f32.mrf.mxu2 }
 0x1c8   : > { %v11033_v16 = vpack.c.bf16 %v1209_v30, %v1205_v61  ;;  %v756_v20 = vadd.f32 %v755_v21, %v10835_v45  ;;  %3501 = vmatpush.bf16.msrb.mxu3 %v9444_v1 }
 0x1c9   : > { %v11036_v7 = vadd.f32 %v3021_v34, %v2933_v15 }
 0x1ca   : > { %14741 = vst [vmem:[#allocation67_spill] sm:$0xff] %v11033_v16  ;;  %v844_v22 = vpop.f32.mrf.mxu3  ;;  %v1084_v30 = vmul.f32 0.2, %v756_v20  ;;  %vm956_vm14 = vcmp.ge.f32.partialorder %v756_v20, 0.0 }
 0x1cb   : > { %v845_v9 = vadd.f32 %v844_v22, %v10838_v48 }
 0x1cc   : > { %v1212_v22 = vsel %vm956_vm14, %v756_v20, %v1084_v30 }
 0x1cd   : > { %v1085_v34 = vmul.f32 0.2, %v845_v9  ;;  %vm957_vm15 = vcmp.ge.f32.partialorder %v845_v9, 0.0 }
 0x1ce   : > { %v2935_v13 = vpop.f32.mrf.mxu0 }
 0x1cf   : > { %v2936_v38 = vadd.f32 %v2935_v13, %v10840_v58  ;;  %v3024_v18 = vpop.f32.mrf.mxu1  ;;  %v757_v61 = vpop.f32.mrf.mxu2  ;;  %v1213_v5 = vsel %vm957_vm15, %v845_v9, %v1085_v34 }
 0x1d0   : > { %v758_v59 = vadd.f32 %v757_v61, %v10835_v45 }
 0x1d1   : > { %v11042_v36 = vadd.f32 %v3024_v18, %v2936_v38  ;;  %3250 = vmatmul.bf16.gmra.mxu0 %v10708_v57 }
 0x1d2   : > { %v846_v40 = vpop.f32.mrf.mxu3  ;;  %vm960_vm1 = vcmp.ge.f32.partialorder %v758_v59, 0.0  ;;  %v1088_v21 = vmul.f32 0.2, %v758_v59  ;;  %3339 = vmatmul.bf16.gmra.mxu1 %v10710_v62 }
 0x1d3   : > { %14742 = vst [vmem:[#allocation68_spill] sm:$0xff] %v11042_v36  ;;  %v847_v15 = vadd.f32 %v846_v40, %v10838_v48 }
 0x1d4   : > { %v1216_v42 = vsel %vm960_vm1, %v758_v59, %v1088_v21  ;;  %3077 = vmatmul.bf16.gmra.mxu2 %v10913_v12 }
 0x1d5   : > { %vm961_vm2 = vcmp.ge.f32.partialorder %v847_v15, 0.0  ;;  %v1089_v29 = vmul.f32 0.2, %v847_v15  ;;  %v11048_v1 = vpack.c.bf16 %v1216_v42, %v1212_v22 }
 0x1d6   : > { %v2937_v18 = vpop.f32.mrf.mxu0 }
 0x1d7   : > { %14743 = vst [vmem:[#allocation69_spill] sm:$0xff] %v11048_v1  ;;  %v1217_v13 = vsel %vm961_vm2, %v847_v15, %v1089_v29  ;;  %3166 = vmatmul.bf16.gmra.mxu3 %v10917_v6  ;;  %v2938_v61 = vadd.f32 %v2937_v18, %v10840_v58  ;;  %v3026_v40 = vpop.f32.mrf.mxu1  ;;  %v760_v57 = vpop.f32.mrf.mxu2 }
 0x1d8   : > { %v11051_v38 = vpack.c.bf16 %v1217_v13, %v1213_v5  ;;  %v761_v20 = vadd.f32 %v760_v57, %v10835_v45 }
 0x1d9   : > { %v11054_v36 = vadd.f32 %v3026_v40, %v2938_v61 }
 0x1da   : > { %14744 = vst [vmem:[#allocation70_spill] sm:$0xff] %v11051_v38  ;;  %v849_v62 = vpop.f32.mrf.mxu3  ;;  %v1092_v21 = vmul.f32 0.2, %v761_v20  ;;  %vm964_vm0 = vcmp.ge.f32.partialorder %v761_v20, 0.0 }
 0x1db   : > { %v850_v30 = vadd.f32 %v849_v62, %v10838_v48 }
 0x1dc   : > { %v1220_v18 = vsel %vm964_vm0, %v761_v20, %v1092_v21 }
 0x1dd   : > { %v1093_v42 = vmul.f32 0.2, %v850_v30  ;;  %vm965_vm3 = vcmp.ge.f32.partialorder %v850_v30, 0.0 }
 0x1de   : > { %v2940_v9 = vpop.f32.mrf.mxu0 }
 0x1df   : > { %v2941_v59 = vadd.f32 %v2940_v9, %v10840_v58  ;;  %v3029_v34 = vpop.f32.mrf.mxu1  ;;  %v762_v15 = vpop.f32.mrf.mxu2  ;;  %v1221_v40 = vsel %vm965_vm3, %v850_v30, %v1093_v42  ;;  %v10095_v30 = vld [vmem:[#allocation2 + $0x704] sm:$0xf] }
 0x1e0   : > { %v763_v29 = vadd.f32 %v762_v15, %v10835_v45 }
 0x1e1   : > { %v11060_v5 = vadd.f32 %v3029_v34, %v2941_v59  ;;  %3255 = vmatmul.bf16.gmra.mxu0 %v10730_v49  ;;  %v9153_v49 = vld [vmem:[#allocation2 + $0x520] sm:$0xf0] }
 0x1e2   : > { %v851_v22 = vpop.f32.mrf.mxu3  ;;  %vm968_vm4 = vcmp.ge.f32.partialorder %v763_v29, 0.0  ;;  %v1096_v57 = vmul.f32 0.2, %v763_v29  ;;  %3344 = vmatmul.bf16.gmra.mxu1 %v10732_v56 }
 0x1e3   : > { %14745 = vst [vmem:[#allocation71_spill] sm:$0xff] %v11060_v5  ;;  %v852_v13 = vadd.f32 %v851_v22, %v10838_v48  ;;  %v10031_v22 = vld [vmem:[#allocation2 + $0x504] sm:$0xf] }
 0x1e4   : > { %v1224_v61 = vsel %vm968_vm4, %v763_v29, %v1096_v57  ;;  %3082 = vmatmul.bf16.gmra.mxu2 %v10934_v19  ;;  %v9156_v12 = vor.u32 %v10031_v22, %v9153_v49  ;;  %v9409_v29 = vld [vmem:[#allocation2 + $0x720] sm:$0xf0] }
 0x1e5   : > { %vm969_vm5 = vcmp.ge.f32.partialorder %v852_v13, 0.0  ;;  %v1097_v62 = vmul.f32 0.2, %v852_v13  ;;  %v11066_v9 = vpack.c.bf16 %v1224_v61, %v1220_v18  ;;  %v9412_v42 = vor.u32 %v10095_v30, %v9409_v29 }
 0x1e6   : > { %v2942_v15 = vpop.f32.mrf.mxu0  ;;  %3413 = vmatpush.bf16.msrb.mxu2 %v9156_v12 }
 0x1e7   : > { %14746 = vst [vmem:[#allocation72_spill] sm:$0xff] %v11066_v9  ;;  %v1225_v59 = vsel %vm969_vm5, %v852_v13, %v1097_v62  ;;  %3171 = vmatmul.bf16.gmra.mxu3 %v10938_v39  ;;  %v2943_v5 = vadd.f32 %v2942_v15, %v10840_v58  ;;  %v3031_v56 = vpop.f32.mrf.mxu1  ;;  %v765_v6 = vpop.f32.mrf.mxu2 }
 0x1e8   : > { %v11069_v34 = vpack.c.bf16 %v1225_v59, %v1221_v40  ;;  %v766_v13 = vadd.f32 %v765_v6, %v10835_v45  ;;  %3502 = vmatpush.bf16.msrb.mxu3 %v9412_v42 }
 0x1e9   : > { %v11072_v21 = vadd.f32 %v3031_v56, %v2943_v5 }
 0x1ea   : > { %14747 = vst [vmem:[#allocation73_spill] sm:$0xff] %v11069_v34  ;;  %v854_v20 = vpop.f32.mrf.mxu3  ;;  %v1100_v59 = vmul.f32 0.2, %v766_v13  ;;  %vm972_vm6 = vcmp.ge.f32.partialorder %v766_v13, 0.0 }
 0x1eb   : > { %v855_v57 = vadd.f32 %v854_v20, %v10838_v48 }
 0x1ec   : > { %v1228_v20 = vsel %vm972_vm6, %v766_v13, %v1100_v59 }
 0x1ed   : > { %v1101_v56 = vmul.f32 0.2, %v855_v57  ;;  %vm973_vm7 = vcmp.ge.f32.partialorder %v855_v57, 0.0 }
 0x1ee   : > { %v2945_v62 = vpop.f32.mrf.mxu0 }
 0x1ef   : > { %v2946_v18 = vadd.f32 %v2945_v62, %v10840_v58  ;;  %v3034_v61 = vpop.f32.mrf.mxu1  ;;  %v767_v40 = vpop.f32.mrf.mxu2  ;;  %v1229_v29 = vsel %vm973_vm7, %v855_v57, %v1101_v56 }
 0x1f0   : > { %v768_v49 = vadd.f32 %v767_v40, %v10835_v45 }
 0x1f1   : > { %v11078_v12 = vadd.f32 %v3034_v61, %v2946_v18  ;;  %3260 = vmatmul.bf16.gmra.mxu0 %v10752_v60 }
 0x1f2   : > { %v856_v15 = vpop.f32.mrf.mxu3  ;;  %vm976_vm8 = vcmp.ge.f32.partialorder %v768_v49, 0.0  ;;  %v1104_v6 = vmul.f32 0.2, %v768_v49  ;;  %3349 = vmatmul.bf16.gmra.mxu1 %v10754_v3 }
 0x1f3   : > { %14748 = vst [vmem:[#allocation74_spill] sm:$0xff] %v11078_v12  ;;  %v857_v5 = vadd.f32 %v856_v15, %v10838_v48 }
 0x1f4   : > { %v1232_v30 = vsel %vm976_vm8, %v768_v49, %v1104_v6  ;;  %3087 = vmatmul.bf16.gmra.mxu2 %v10955_v53 }
 0x1f5   : > { %vm977_vm9 = vcmp.ge.f32.partialorder %v857_v5, 0.0  ;;  %v1105_v22 = vmul.f32 0.2, %v857_v5  ;;  %v11084_v42 = vpack.c.bf16 %v1232_v30, %v1228_v20 }
 0x1f6   : > { %v2947_v61 = vpop.f32.mrf.mxu0 }
 0x1f7   : > { %14749 = vst [vmem:[#allocation75_spill] sm:$0xff] %v11084_v42  ;;  %v1233_v62 = vsel %vm977_vm9, %v857_v5, %v1105_v22  ;;  %3176 = vmatmul.bf16.gmra.mxu3 %v10959_v25  ;;  %v2948_v40 = vadd.f32 %v2947_v61, %v10840_v58  ;;  %v3036_v15 = vpop.f32.mrf.mxu1  ;;  %v770_v60 = vpop.f32.mrf.mxu2 }
 0x1f8   : > { %v11087_v18 = vpack.c.bf16 %v1233_v62, %v1229_v29  ;;  %v771_v13 = vadd.f32 %v770_v60, %v10835_v45 }
 0x1f9   : > { %v11090_v12 = vadd.f32 %v3036_v15, %v2948_v40 }
 0x1fa   : > { %14750 = vst [vmem:[#allocation76_spill] sm:$0xff] %v11087_v18  ;;  %v859_v3 = vpop.f32.mrf.mxu3  ;;  %v1108_v6 = vmul.f32 0.2, %v771_v13  ;;  %vm980_vm10 = vcmp.ge.f32.partialorder %v771_v13, 0.0 }
 0x1fb   : > { %v860_v59 = vadd.f32 %v859_v3, %v10838_v48 }
 0x1fc   : > { %v1236_v61 = vsel %vm980_vm10, %v771_v13, %v1108_v6 }
 0x1fd   : > { %v1109_v30 = vmul.f32 0.2, %v860_v59  ;;  %vm981_vm11 = vcmp.ge.f32.partialorder %v860_v59, 0.0 }
 0x1fe   : > { %v2950_v57 = vpop.f32.mrf.mxu0 }
 0x1ff   : > { %v2951_v49 = vadd.f32 %v2950_v57, %v10840_v58  ;;  %v3039_v56 = vpop.f32.mrf.mxu1  ;;  %v772_v5 = vpop.f32.mrf.mxu2  ;;  %v1237_v15 = vsel %vm981_vm11, %v860_v59, %v1109_v30  ;;  %v10087_v59 = vld [vmem:[#allocation2 + $0x6c4] sm:$0xf] }
 0x200   : > { %v773_v22 = vadd.f32 %v772_v5, %v10835_v45 }
 0x201   : > { %v11096_v29 = vadd.f32 %v3039_v56, %v2951_v49  ;;  %3265 = vmatmul.bf16.gmra.mxu0 %v10774_v63  ;;  %v9121_v63 = vld [vmem:[#allocation2 + $0x4e0] sm:$0xf0] }
 0x202   : > { %v861_v20 = vpop.f32.mrf.mxu3  ;;  %vm984_vm12 = vcmp.ge.f32.partialorder %v773_v22, 0.0  ;;  %v1112_v60 = vmul.f32 0.2, %v773_v22  ;;  %3354 = vmatmul.bf16.gmra.mxu1 %v10776_v8 }
 0x203   : > { %14751 = vst [vmem:[#allocation77_spill] sm:$0xff] %v11096_v29  ;;  %v862_v62 = vadd.f32 %v861_v20, %v10838_v48  ;;  %v10023_v20 = vld [vmem:[#allocation2 + $0x4c4] sm:$0xf] }
 0x204   : > { %v1240_v40 = vsel %vm984_vm12, %v773_v22, %v1112_v60  ;;  %3092 = vmatmul.bf16.gmra.mxu2 %v10975_v52  ;;  %v9124_v53 = vor.u32 %v10023_v20, %v9121_v63  ;;  %v9377_v22 = vld [vmem:[#allocation2 + $0x6e0] sm:$0xf0] }
 0x205   : > { %vm985_vm13 = vcmp.ge.f32.partialorder %v862_v62, 0.0  ;;  %v1113_v3 = vmul.f32 0.2, %v862_v62  ;;  %v11102_v57 = vpack.c.bf16 %v1240_v40, %v1236_v61  ;;  %v9380_v30 = vor.u32 %v10087_v59, %v9377_v22 }
 0x206   : > { %v2952_v5 = vpop.f32.mrf.mxu0  ;;  %3414 = vmatpush.bf16.msrb.mxu2 %v9124_v53 }
 0x207   : > { %14752 = vst [vmem:[#allocation78_spill] sm:$0xff] %v11102_v57  ;;  %v1241_v49 = vsel %vm985_vm13, %v862_v62, %v1113_v3  ;;  %3181 = vmatmul.bf16.gmra.mxu3 %v10979_v0  ;;  %v2953_v29 = vadd.f32 %v2952_v5, %v10840_v58  ;;  %v3041_v8 = vpop.f32.mrf.mxu1  ;;  %v775_v25 = vpop.f32.mrf.mxu2 }
 0x208   : > { %v11105_v56 = vpack.c.bf16 %v1241_v49, %v1237_v15  ;;  %v776_v62 = vadd.f32 %v775_v25, %v10835_v45  ;;  %3503 = vmatpush.bf16.msrb.mxu3 %v9380_v30 }
 0x209   : > { %v11108_v6 = vadd.f32 %v3041_v8, %v2953_v29 }
 0x20a   : > { %14753 = vst [vmem:[#allocation79_spill] sm:$0xff] %v11105_v56  ;;  %v864_v13 = vpop.f32.mrf.mxu3  ;;  %v1116_v49 = vmul.f32 0.2, %v776_v62  ;;  %vm988_vm14 = vcmp.ge.f32.partialorder %v776_v62, 0.0 }
 0x20b   : > { %v865_v60 = vadd.f32 %v864_v13, %v10838_v48 }
 0x20c   : > { %v1244_v13 = vsel %vm988_vm14, %v776_v62, %v1116_v49  ;;  %v8743_v49 = vld [vmem:[#allocation2 + $0x1c8] sm:$0xf] }
 0x20d   : > { %v1117_v8 = vmul.f32 0.2, %v865_v60  ;;  %vm989_vm15 = vcmp.ge.f32.partialorder %v865_v60, 0.0 }
 0x20e   : > { %v2955_v3 = vpop.f32.mrf.mxu0 }
 0x20f   : > { %v2956_v61 = vadd.f32 %v2955_v3, %v10840_v58  ;;  %v3044_v40 = vpop.f32.mrf.mxu1  ;;  %v777_v15 = vpop.f32.mrf.mxu2  ;;  %v1245_v22 = vsel %vm989_vm15, %v865_v60, %v1117_v8 }
 0x210   : > { %v778_v63 = vadd.f32 %v777_v15, %v10835_v45 }
 0x211   : > { %v11114_v53 = vadd.f32 %v3044_v40, %v2956_v61  ;;  %3270 = vmatmul.bf16.gmra.mxu0 %v10796_v26 }
 0x212   : > { %v866_v5 = vpop.f32.mrf.mxu3  ;;  %vm992_vm1 = vcmp.ge.f32.partialorder %v778_v63, 0.0  ;;  %v1120_v25 = vmul.f32 0.2, %v778_v63  ;;  %3359 = vmatmul.bf16.gmra.mxu1 %v10798_v43 }
 0x213   : > { %14754 = vst [vmem:[#allocation80_spill] sm:$0xff] %v11114_v53  ;;  %v867_v29 = vadd.f32 %v866_v5, %v10838_v48 }
 0x214   : > { %v1248_v59 = vsel %vm992_vm1, %v778_v63, %v1120_v25  ;;  %3097 = vmatmul.bf16.gmra.mxu2 %v10994_v47  ;;  %v9932_v63 = vld [vmem:[#allocation2 + $0x1e4] sm:$0xf0] }
 0x215   : > { %vm993_vm2 = vcmp.ge.f32.partialorder %v867_v29, 0.0  ;;  %v1121_v20 = vmul.f32 0.2, %v867_v29  ;;  %v11120_v30 = vpack.c.bf16 %v1248_v59, %v1244_v13  ;;  %v8744_v8 = vor.u32 %v9932_v63, %v8743_v49 }
 0x216   : > { %v2957_v40 = vpop.f32.mrf.mxu0 }
 0x217   : > { %14755 = vst [vmem:[#allocation81_spill] sm:$0xff] %v11120_v30  ;;  %v1249_v3 = vsel %vm993_vm2, %v867_v29, %v1121_v20  ;;  %3186 = vmatmul.bf16.gmra.mxu3 %v10997_v14  ;;  %v2958_v15 = vadd.f32 %v2957_v40, %v10840_v58  ;;  %v3046_v5 = vpop.f32.mrf.mxu1  ;;  %v780_v26 = vpop.f32.mrf.mxu2  ;;  %3588 = vmatpush.bf16.msrb.mxu0 %v8744_v8 }
 0x218   : > { %v11123_v61 = vpack.c.bf16 %v1249_v3, %v1245_v22  ;;  %v781_v62 = vadd.f32 %v780_v26, %v10835_v45 }
 0x219   : > { %v11126_v53 = vadd.f32 %v3046_v5, %v2958_v15 }
 0x21a   : > { %14756 = vst [vmem:[#allocation82_spill] sm:$0xff] %v11123_v61  ;;  %v869_v43 = vpop.f32.mrf.mxu3  ;;  %v1124_v59 = vmul.f32 0.2, %v781_v62  ;;  %vm996_vm0 = vcmp.ge.f32.partialorder %v781_v62, 0.0 }
 0x21b   : > { %v870_v60 = vadd.f32 %v869_v43, %v10838_v48 }
 0x21c   : > { %v1252_v49 = vsel %vm996_vm0, %v781_v62, %v1124_v59 }
 0x21d   : > { %v1125_v40 = vmul.f32 0.2, %v870_v60  ;;  %vm997_vm3 = vcmp.ge.f32.partialorder %v870_v60, 0.0 }
 0x21e   : > { %v2960_v29 = vpop.f32.mrf.mxu0 }
 0x21f   : > { %v2961_v25 = vadd.f32 %v2960_v29, %v10840_v58  ;;  %v3049_v20 = vpop.f32.mrf.mxu1  ;;  %v782_v13 = vpop.f32.mrf.mxu2 }
 0x220   : > { %v783_v22 = vadd.f32 %v782_v13, %v10835_v45  ;;  %v1253_v45 = vsel %vm997_vm3, %v870_v60, %v1125_v40  ;;  %v9345_v40 = vld [vmem:[#allocation2 + $0x6a0] sm:$0xf0] }
 0x221   : > { %v11132_v15 = vadd.f32 %v3049_v20, %v2961_v25  ;;  %3275 = vmatmul.bf16.gmra.mxu0 %v10818_v50  ;;  %v9089_v25 = vld [vmem:[#allocation2 + $0x4a0] sm:$0xf0] }
 0x222   : > { %v871_v3 = vpop.f32.mrf.mxu3  ;;  %vm1000_vm4 = vcmp.ge.f32.partialorder %v783_v22, 0.0  ;;  %v1128_v43 = vmul.f32 0.2, %v783_v22  ;;  %3364 = vmatmul.bf16.gmra.mxu1 %v10820_v4 }
 0x223   : > { %14757 = vst [vmem:[#allocation83_spill] sm:$0xff] %v11132_v15  ;;  %v872_v26 = vadd.f32 %v871_v3, %v10838_v48  ;;  %v10015_v48 = vld [vmem:[#allocation2 + $0x484] sm:$0xf] }
 0x224   : > { %v1256_v63 = vsel %vm1000_vm4, %v783_v22, %v1128_v43  ;;  %3102 = vmatmul.bf16.gmra.mxu2 %v11012_v27  ;;  %v9092_v3 = vor.u32 %v10015_v48, %v9089_v25  ;;  %v10079_v22 = vld [vmem:[#allocation2 + $0x684] sm:$0xf] }
 0x225   : > { %vm1001_vm5 = vcmp.ge.f32.partialorder %v872_v26, 0.0  ;;  %v1129_v5 = vmul.f32 0.2, %v872_v26  ;;  %v11138_v8 = vpack.c.bf16 %v1256_v63, %v1252_v49  ;;  %v9348_v43 = vor.u32 %v10079_v22, %v9345_v40 }
 0x226   : > { %v2962_v13 = vpop.f32.mrf.mxu0  ;;  %3415 = vmatpush.bf16.msrb.mxu2 %v9092_v3 }
 0x227   : > { %v1257_v29 = vsel %vm1001_vm5, %v872_v26, %v1129_v5  ;;  %3191 = vmatmul.bf16.gmra.mxu3 %v11015_v17  ;;  %v2963_v4 = vadd.f32 %v2962_v13, %v10840_v58  ;;  %v3051_v50 = vpop.f32.mrf.mxu1  ;;  %v3063_v15 = vpop.f32.mrf.mxu2  ;;  %v10249_v5 = vld [vmem:[#allocation4 + $0x4] sm:$0xff] }
 0x228   : > { %v11141_v20 = vpack.c.bf16 %v1257_v29, %v1253_v45  ;;  %v3064_v62 = vadd.f32 %v3063_v15, %v10846_v23  ;;  %v11147_v49 = vperm.slane %v10249_v5, 1  ;;  %3504 = vmatpush.bf16.msrb.mxu3 %v9348_v43 }
 0x229   : > { %v11145_v60 = vadd.f32 %v3051_v50, %v2963_v4 }
 0x22a   : > { %v3152_v59 = vpop.f32.mrf.mxu3 }
 0x22b   : > { %v3153_v26 = vadd.f32 %v3152_v59, %v3064_v62 }
 0x22d   : > { %v5980_v50 = vmul.f32 0.2, %v3153_v26  ;;  %vm5724_vm6 = vcmp.ge.f32.partialorder %v3153_v26, 0.0 }
 0x22e   : > { %v3241_v63 = vpop.f32.mrf.mxu0 }
 0x22f   : > { %v3242_v45 = vadd.f32 %v3241_v63, %v11147_v49  ;;  %v3330_v58 = vpop.f32.mrf.mxu1  ;;  %v3065_v29 = vpop.f32.mrf.mxu2  ;;  %v11157_v13 = vsel %vm5724_vm6, %v3153_v26, %v5980_v50 }
 0x230   : > { %v3066_v48 = vadd.f32 %v3065_v29, %v10860_v35  ;;  %14758 = vst [vmem:[#allocation84_spill] sm:$0xff] %v11157_v13  ;;  %v9924_v29 = vld [vmem:[#allocation2 + $0x1a4] sm:$0xf0]  ;;  %v14761_v13 = vld [vmem:[#allocation14_spill] sm:$0xff] }
 0x231   : > { %v11151_v15 = vadd.f32 %v3330_v58, %v3242_v45  ;;  %3280 = vmatmul.bf16.gmra.mxu0 %v10675_v28  ;;  %v8711_v58 = vld [vmem:[#allocation2 + $0x188] sm:$0xf] }
 0x232   : > { %v3154_v23 = vpop.f32.mrf.mxu3  ;;  %3369 = vmatmul.bf16.gmra.mxu1 %v10680_v31 }
 0x233   : > { %v3155_v4 = vadd.f32 %v3154_v23, %v3066_v48  ;;  %v8712_v48 = vor.u32 %v9924_v29, %v8711_v58 }
 0x234   : > { %3107 = vmatmul.bf16.gmra.mxu2 %v11030_v32 }
 0x235   : > { %vm5732_vm7 = vcmp.ge.f32.partialorder %v3155_v4, 0.0  ;;  %v5988_v25 = vmul.f32 0.2, %v3155_v4  ;;  %3589 = vmatpush.bf16.msrb.mxu0 %v8712_v48 }
 0x236   : > { %v3243_v35 = vpop.f32.mrf.mxu0 }
 0x237   : > { %3196 = vmatmul.bf16.gmra.mxu3 %v11033_v16  ;;  %v11159_v3 = vsel %vm5732_vm7, %v3155_v4, %v5988_v25  ;;  %v3244_v59 = vadd.f32 %v3243_v35, %v11147_v49  ;;  %v3332_v22 = vpop.f32.mrf.mxu1  ;;  %v3068_v40 = vpop.f32.mrf.mxu2 }
 0x238   : > { %14759 = vst [vmem:[#allocation85_spill] sm:$0xff] %v11159_v3  ;;  %v3069_v43 = vadd.f32 %v3068_v40, %v10866_v44 }
 0x239   : > { %v11165_v63 = vadd.f32 %v3332_v22, %v3244_v59  ;;  %v14762_v22 = vld [vmem:[#allocation15_spill] sm:$0xff] }
 0x23a   : > { %v3157_v5 = vpop.f32.mrf.mxu3 }
 0x23b   : > { %v3158_v45 = vadd.f32 %v3157_v5, %v3069_v43  ;;  %v10007_v43 = vld [vmem:[#allocation2 + $0x444] sm:$0xf] }
 0x23c   : > { %v9057_v5 = vld [vmem:[#allocation2 + $0x460] sm:$0xf0] }
 0x23d   : > { %v5996_v44 = vmul.f32 0.2, %v3158_v45  ;;  %vm5740_vm8 = vcmp.ge.f32.partialorder %v3158_v45, 0.0  ;;  %v9060_v58 = vor.u32 %v10007_v43, %v9057_v5 }
 0x23e   : > { %v3246_v26 = vpop.f32.mrf.mxu0 }
 0x23f   : > { %v3247_v23 = vadd.f32 %v3246_v26, %v11147_v49  ;;  %v3335_v50 = vpop.f32.mrf.mxu1  ;;  %v3070_v4 = vpop.f32.mrf.mxu2  ;;  %v11175_v29 = vsel %vm5740_vm8, %v3158_v45, %v5996_v44  ;;  %3416 = vmatpush.bf16.msrb.mxu2 %v9060_v58 }
 0x240   : > { %v3071_v25 = vadd.f32 %v3070_v4, %v10880_v24  ;;  %14763 = vst [vmem:[#allocation87_spill] sm:$0xff] %v11175_v29  ;;  %v14765_v4 = vld [vmem:[#allocation43_spill] sm:$0xff] }
 0x241   : > { %v11169_v35 = vadd.f32 %v3335_v50, %v3247_v23  ;;  %3285 = vmatmul.bf16.gmra.mxu0 %v14761_v13  ;;  %v8679_v29 = vld [vmem:[#allocation2 + $0x148] sm:$0xf] }
 0x242   : > { %v3159_v62 = vpop.f32.mrf.mxu3  ;;  %3374 = vmatmul.bf16.gmra.mxu1 %v14762_v22  ;;  %v9313_v22 = vld [vmem:[#allocation2 + $0x660] sm:$0xf0] }
 0x243   : > { %14760 = vst [vmem:[#allocation86_spill] sm:$0xff] %v11169_v35  ;;  %v3160_v59 = vadd.f32 %v3159_v62, %v3071_v25 }
 0x244   : > { %3112 = vmatmul.bf16.gmra.mxu2 %v11048_v1  ;;  %v10071_v1 = vld [vmem:[#allocation2 + $0x644] sm:$0xf] }
 0x245   : > { %vm5748_vm9 = vcmp.ge.f32.partialorder %v3160_v59, 0.0  ;;  %v6004_v40 = vmul.f32 0.2, %v3160_v59  ;;  %v9316_v45 = vor.u32 %v10071_v1, %v9313_v22 }
 0x246   : > { %v3248_v24 = vpop.f32.mrf.mxu0 }
 0x247   : > { %3201 = vmatmul.bf16.gmra.mxu3 %v11051_v38  ;;  %v11177_v26 = vsel %vm5748_vm9, %v3160_v59, %v6004_v40  ;;  %v3249_v48 = vadd.f32 %v3248_v24, %v11147_v49  ;;  %v3337_v62 = vpop.f32.mrf.mxu1  ;;  %v3073_v23 = vpop.f32.mrf.mxu2  ;;  %v14766_v24 = vld [vmem:[#allocation46_spill] sm:$0xff] }
 0x248   : > { %14764 = vst [vmem:[#allocation88_spill] sm:$0xff] %v11177_v26  ;;  %v3074_v25 = vadd.f32 %v3073_v23, %v14765_v4  ;;  %3505 = vmatpush.bf16.msrb.mxu3 %v9316_v45  ;;  %v14767_v23 = vld [vmem:[#allocation18_spill] sm:$0xff]  ;;  %v9916_v26 = vld [vmem:[#allocation2 + $0x164] sm:$0xf0] }
 0x249   : > { %v11183_v38 = vadd.f32 %v3337_v62, %v3249_v48  ;;  %v14768_v62 = vld [vmem:[#allocation19_spill] sm:$0xff] }
 0x24a   : > { %v3162_v3 = vpop.f32.mrf.mxu3 }
 0x24b   : > { %v3163_v43 = vadd.f32 %v3162_v3, %v3074_v25 }
 0x24d   : > { %v6012_v58 = vmul.f32 0.2, %v3163_v43  ;;  %vm5756_vm10 = vcmp.ge.f32.partialorder %v3163_v43, 0.0 }
 0x24e   : > { %v3251_v44 = vpop.f32.mrf.mxu0 }
 0x24f   : > { %v3252_v59 = vadd.f32 %v3251_v44, %v11147_v49  ;;  %v3340_v40 = vpop.f32.mrf.mxu1  ;;  %v3075_v5 = vpop.f32.mrf.mxu2  ;;  %v11193_v22 = vsel %vm5756_vm10, %v3163_v43, %v6012_v58  ;;  %v8680_v43 = vor.u32 %v9916_v26, %v8679_v29  ;;  %v9025_v29 = vld [vmem:[#allocation2 + $0x420] sm:$0xf0] }
 0x250   : > { %v3076_v13 = vadd.f32 %v3075_v5, %v14766_v24  ;;  %14769 = vst [vmem:[#allocation43_spill] sm:$0xff] %v11193_v22 }
 0x251   : > { %v11187_v50 = vadd.f32 %v3340_v40, %v3252_v59  ;;  %3290 = vmatmul.bf16.gmra.mxu0 %v14767_v23 }
 0x252   : > { %v3164_v35 = vpop.f32.mrf.mxu3  ;;  %3379 = vmatmul.bf16.gmra.mxu1 %v14768_v62  ;;  %3590 = vmatpush.bf16.msrb.mxu0 %v8680_v43 }
 0x253   : > { %v3165_v48 = vadd.f32 %v3164_v35, %v3076_v13  ;;  %v14771_v35 = vld [vmem:[#allocation47_spill] sm:$0xff]  ;;  %v14773_v13 = vld [vmem:[#allocation22_spill] sm:$0xff] }
 0x254   : > { %3117 = vmatmul.bf16.gmra.mxu2 %v11066_v9 }
 0x255   : > { %vm5764_vm11 = vcmp.ge.f32.partialorder %v3165_v48, 0.0  ;;  %v6020_v1 = vmul.f32 0.2, %v3165_v48 }
 0x256   : > { %v3253_v3 = vpop.f32.mrf.mxu0 }
 0x257   : > { %3206 = vmatmul.bf16.gmra.mxu3 %v11069_v34  ;;  %v11195_v4 = vsel %vm5764_vm11, %v3165_v48, %v6020_v1  ;;  %v3254_v25 = vadd.f32 %v3253_v3, %v11147_v49  ;;  %v3342_v45 = vpop.f32.mrf.mxu1  ;;  %v3078_v44 = vpop.f32.mrf.mxu2  ;;  %v14772_v3 = vld [vmem:[#allocation50_spill] sm:$0xff] }
 0x258   : > { %14770 = vst [vmem:[#allocation46_spill] sm:$0xff] %v11195_v4  ;;  %v3079_v59 = vadd.f32 %v3078_v44, %v14771_v35 }
 0x259   : > { %v11201_v5 = vadd.f32 %v3342_v45, %v3254_v25  ;;  %v14774_v45 = vld [vmem:[#allocation23_spill] sm:$0xff] }
 0x25a   : > { %v3167_v40 = vpop.f32.mrf.mxu3 }
 0x25b   : > { %v3168_v24 = vadd.f32 %v3167_v40, %v3079_v59 }
 0x25d   : > { %v6028_v44 = vmul.f32 0.2, %v3168_v24  ;;  %vm5772_vm12 = vcmp.ge.f32.partialorder %v3168_v24, 0.0 }
 0x25e   : > { %v3256_v34 = vpop.f32.mrf.mxu0 }
 0x25f   : > { %v3257_v58 = vadd.f32 %v3256_v34, %v11147_v49  ;;  %v3345_v48 = vpop.f32.mrf.mxu1  ;;  %v3080_v1 = vpop.f32.mrf.mxu2  ;;  %v9999_v34 = vld [vmem:[#allocation2 + $0x404] sm:$0xf]  ;;  %v11211_v40 = vsel %vm5772_vm12, %v3168_v24, %v6028_v44 }
 0x260   : > { %v3081_v9 = vadd.f32 %v3080_v1, %v14772_v3  ;;  %v9028_v59 = vor.u32 %v9999_v34, %v9025_v29  ;;  %14775 = vst [vmem:[#allocation47_spill] sm:$0xff] %v11211_v40  ;;  %v14777_v1 = vld [vmem:[#allocation51_spill] sm:$0xff] }
 0x261   : > { %v11205_v23 = vadd.f32 %v3345_v48, %v3257_v58  ;;  %3295 = vmatmul.bf16.gmra.mxu0 %v14773_v13  ;;  %v8999_v48 = vld [vmem:[#allocation2 + $0x3c8] sm:$0xf] }
 0x262   : > { %v3169_v62 = vpop.f32.mrf.mxu3  ;;  %3384 = vmatmul.bf16.gmra.mxu1 %v14774_v45  ;;  %3417 = vmatpush.bf16.msrb.mxu2 %v9028_v59  ;;  %v9996_v40 = vld [vmem:[#allocation2 + $0x3e4] sm:$0xf0]  ;;  %v14779_v59 = vld [vmem:[#allocation26_spill] sm:$0xff] }
 0x263   : > { %v3170_v25 = vadd.f32 %v3169_v62, %v3081_v9 }
 0x264   : > { %3122 = vmatmul.bf16.gmra.mxu2 %v11084_v42  ;;  %v9281_v42 = vld [vmem:[#allocation2 + $0x620] sm:$0xf0] }
 0x265   : > { %vm5780_vm13 = vcmp.ge.f32.partialorder %v3170_v25, 0.0  ;;  %v6036_v35 = vmul.f32 0.2, %v3170_v25 }
 0x266   : > { %v3258_v26 = vpop.f32.mrf.mxu0 }
 0x267   : > { %3211 = vmatmul.bf16.gmra.mxu3 %v11087_v18  ;;  %v11213_v43 = vsel %vm5780_vm13, %v3170_v25, %v6036_v35  ;;  %v3259_v58 = vadd.f32 %v3258_v26, %v11147_v49  ;;  %v3347_v9 = vpop.f32.mrf.mxu1  ;;  %v3083_v62 = vpop.f32.mrf.mxu2  ;;  %v10063_v18 = vld [vmem:[#allocation2 + $0x604] sm:$0xf] }
 0x268   : > { %14776 = vst [vmem:[#allocation50_spill] sm:$0xff] %v11213_v43  ;;  %v3084_v3 = vadd.f32 %v3083_v62, %v14777_v1  ;;  %v9284_v24 = vor.u32 %v10063_v18, %v9281_v42  ;;  %v14778_v26 = vld [vmem:[#allocation54_spill] sm:$0xff]  ;;  %v8967_v18 = vld [vmem:[#allocation2 + $0x388] sm:$0xf] }
 0x269   : > { %v11219_v4 = vadd.f32 %v3347_v9, %v3259_v58  ;;  %v9000_v58 = vor.u32 %v9996_v40, %v8999_v48  ;;  %v8935_v43 = vld [vmem:[#allocation2 + $0x348] sm:$0xf] }
 0x26a   : > { %v3172_v22 = vpop.f32.mrf.mxu3  ;;  %3506 = vmatpush.bf16.msrb.mxu3 %v9284_v24 }
 0x26b   : > { %v3173_v34 = vadd.f32 %v3172_v22, %v3084_v3  ;;  %v14780_v22 = vld [vmem:[#allocation27_spill] sm:$0xff]  ;;  %3677 = vmatpush.bf16.msrb.mxu1 %v9000_v58 }
 0x26c   : > { %v9988_v3 = vld [vmem:[#allocation2 + $0x3a4] sm:$0xf0] }
 0x26d   : > { %v6044_v9 = vmul.f32 0.2, %v3173_v34  ;;  %vm5788_vm14 = vcmp.ge.f32.partialorder %v3173_v34, 0.0 }
 0x26e   : > { %v3261_v44 = vpop.f32.mrf.mxu0 }
 0x26f   : > { %v3262_v25 = vadd.f32 %v3261_v44, %v11147_v49  ;;  %v3350_v35 = vpop.f32.mrf.mxu1  ;;  %v3085_v29 = vpop.f32.mrf.mxu2  ;;  %v8968_v44 = vor.u32 %v9988_v3, %v8967_v18  ;;  %v9972_v3 = vld [vmem:[#allocation2 + $0x324] sm:$0xf0] }
 0x270   : > { %v3086_v45 = vadd.f32 %v3085_v29, %v14778_v26  ;;  %v14783_v29 = vld [vmem:[#allocation55_spill] sm:$0xff] }
 0x271   : > { %v11223_v62 = vadd.f32 %v3350_v35, %v3262_v25  ;;  %3300 = vmatmul.bf16.gmra.mxu0 %v14779_v59  ;;  %v11229_v25 = vsel %vm5788_vm14, %v3173_v34, %v6044_v9  ;;  %3678 = vmatpush.bf16.msrb.mxu1 %v8968_v44  ;;  %v8647_v9 = vld [vmem:[#allocation2 + $0x108] sm:$0xf] }
 0x272   : > { %v3174_v13 = vpop.f32.mrf.mxu3  ;;  %3389 = vmatmul.bf16.gmra.mxu1 %v14780_v22  ;;  %14781 = vst [vmem:[#allocation51_spill] sm:$0xff] %v11229_v25 }
 0x273   : > { %v3175_v1 = vadd.f32 %v3174_v13, %v3086_v45 }
 0x274   : > { %3127 = vmatmul.bf16.gmra.mxu2 %v11102_v57 }
 0x275   : > { %vm5796_vm15 = vcmp.ge.f32.partialorder %v3175_v1, 0.0  ;;  %v6052_v42 = vmul.f32 0.2, %v3175_v1 }
 0x276   : > { %v3263_v24 = vpop.f32.mrf.mxu0 }
 0x277   : > { %3216 = vmatmul.bf16.gmra.mxu3 %v11105_v56  ;;  %v11231_v35 = vsel %vm5796_vm15, %v3175_v1, %v6052_v42  ;;  %v3264_v13 = vadd.f32 %v3263_v24, %v11147_v49  ;;  %v3352_v45 = vpop.f32.mrf.mxu1  ;;  %v3088_v40 = vpop.f32.mrf.mxu2  ;;  %v9980_v56 = vld [vmem:[#allocation2 + $0x364] sm:$0xf0] }
 0x278   : > { %14782 = vst [vmem:[#allocation54_spill] sm:$0xff] %v11231_v35  ;;  %v3089_v26 = vadd.f32 %v3088_v40, %v14783_v29  ;;  %v8936_v18 = vor.u32 %v9980_v56, %v8935_v43  ;;  %v9908_v1 = vld [vmem:[#allocation2 + $0x124] sm:$0xf0] }
 0x279   : > { %v11237_v57 = vadd.f32 %v3352_v45, %v3264_v13  ;;  %v8903_v42 = vld [vmem:[#allocation2 + $0x308] sm:$0xf]  ;;  %v8648_v22 = vor.u32 %v9908_v1, %v8647_v9 }
 0x27a   : > { %v3177_v58 = vpop.f32.mrf.mxu3  ;;  %3679 = vmatpush.bf16.msrb.mxu1 %v8936_v18  ;;  %v8904_v59 = vor.u32 %v9972_v3, %v8903_v42  ;;  %v8615_v13 = vld [vmem:[#allocation2 + $0xc8] sm:$0xf] }
 0x27b   : > { %v3178_v34 = vadd.f32 %v3177_v58, %v3089_v26  ;;  %3591 = vmatpush.bf16.msrb.mxu0 %v8648_v22  ;;  %v9900_v56 = vld [vmem:[#allocation2 + $0xe4] sm:$0xf0]  ;;  %v14784_v26 = vld [vmem:[#allocation30_spill] sm:$0xff] }
 0x27c   : > { %v8871_v43 = vld [vmem:[#allocation2 + $0x2c8] sm:$0xf]  ;;  %v8616_v58 = vor.u32 %v9900_v56, %v8615_v13 }
 0x27d   : > { %v9964_v18 = vld [vmem:[#allocation2 + $0x2e4] sm:$0xf0]  ;;  %v6060_v9 = vmul.f32 0.2, %v3178_v34  ;;  %vm5804_vm1 = vcmp.ge.f32.partialorder %v3178_v34, 0.0 }
 0x27e   : > { %v3266_v24 = vpop.f32.mrf.mxu0  ;;  %3680 = vmatpush.bf16.msrb.mxu1 %v8904_v59  ;;  %v14785_v42 = vld [vmem:[#allocation31_spill] sm:$0xff]  ;;  %v8872_v3 = vor.u32 %v9964_v18, %v8871_v43 }
 0x27f   : > { %v3267_v48 = vadd.f32 %v3266_v24, %v11147_v49  ;;  %v3355_v25 = vpop.f32.mrf.mxu1  ;;  %v3090_v40 = vpop.f32.mrf.mxu2  ;;  %3592 = vmatpush.bf16.msrb.mxu0 %v8616_v58  ;;  %v8583_v59 = vld [vmem:[#allocation2 + $0x88] sm:$0xf]  ;;  %v11248_v56 = vsel %vm5804_vm1, %v3178_v34, %v6060_v9 }
 0x280   : > { %v3091_v44 = vadd.f32 %v3090_v40, %v10962_v55  ;;  %v9255_v22 = vld [vmem:[#allocation2 + $0x5c8] sm:$0xf]  ;;  %14786 = vst [vmem:[#allocation55_spill] sm:$0xff] %v11248_v56 }
 0x281   : > { %v11241_v45 = vadd.f32 %v3355_v25, %v3267_v48  ;;  %3305 = vmatmul.bf16.gmra.mxu0 %v14784_v26  ;;  %v10060_v25 = vld [vmem:[#allocation2 + $0x5e4] sm:$0xf0] }
 0x282   : > { %v3179_v29 = vpop.f32.mrf.mxu3  ;;  %3394 = vmatmul.bf16.gmra.mxu1 %v14785_v42  ;;  %v9892_v48 = vld [vmem:[#allocation2 + $0xa4] sm:$0xf0]  ;;  %v9256_v40 = vor.u32 %v10060_v25, %v9255_v22 }
 0x283   : > { %v3180_v1 = vadd.f32 %v3179_v29, %v3091_v44  ;;  %3681 = vmatpush.bf16.msrb.mxu1 %v8872_v3  ;;  %v8584_v13 = vor.u32 %v9892_v48, %v8583_v59  ;;  %v8839_v44 = vld [vmem:[#allocation2 + $0x288] sm:$0xf] }
 0x284   : > { %3132 = vmatmul.bf16.gmra.mxu2 %v11120_v30  ;;  %v9956_v29 = vld [vmem:[#allocation2 + $0x2a4] sm:$0xf0] }
 0x285   : > { %vm5812_vm2 = vcmp.ge.f32.partialorder %v3180_v1, 0.0  ;;  %v6068_v55 = vmul.f32 0.2, %v3180_v1  ;;  %3766 = vmatpush.bf16.msra.mxu2 %v9256_v40  ;;  %3593 = vmatpush.bf16.msrb.mxu0 %v8584_v13  ;;  %v8551_v59 = vld [vmem:[#allocation2 + $0x48] sm:$0xf] }
 0x286   : > { %v3268_v24 = vpop.f32.mrf.mxu0  ;;  %v9884_v25 = vld [vmem:[#allocation2 + $0x64] sm:$0xf0] }
 0x287   : > { %3221 = vmatmul.bf16.gmra.mxu3 %v11123_v61  ;;  %v11251_v43 = vsel %vm5812_vm2, %v3180_v1, %v6068_v55  ;;  %v3269_v58 = vadd.f32 %v3268_v24, %v11147_v49  ;;  %v3357_v18 = vpop.f32.mrf.mxu1  ;;  %v3093_v35 = vpop.f32.mrf.mxu2  ;;  %v8840_v61 = vor.u32 %v9956_v29, %v8839_v44  ;;  %v8807_v34 = vld [vmem:[#allocation2 + $0x248] sm:$0xf]  ;;  %v8552_v48 = vor.u32 %v9884_v25, %v8551_v59 }
 0x288   : > { %14787 = vst [vmem:[#allocation89_spill] sm:$0xff] %v11251_v43  ;;  %v3094_v30 = vadd.f32 %v3093_v35, %v10968_v51  ;;  %v9511_v1 = vld [vmem:[#allocation2 + $0x7c8] sm:$0xf] }
 0x289   : > { %v11257_v9 = vadd.f32 %v3357_v18, %v3269_v58  ;;  %3682 = vmatpush.bf16.msrb.mxu1 %v8840_v61  ;;  %v10124_v55 = vld [vmem:[#allocation2 + $0x7e4] sm:$0xf0]  ;;  %3594 = vmatpush.bf16.msrb.mxu0 %v8552_v48 }
 0x28a   : > { %v3182_v22 = vpop.f32.mrf.mxu3  ;;  %v9948_v24 = vld [vmem:[#allocation2 + $0x264] sm:$0xf0]  ;;  %v9512_v44 = vor.u32 %v10124_v55, %v9511_v1  ;;  %v14788_v1 = vld [vmem:[#allocation34_spill] sm:$0xff] }
 0x28b   : > { %v3183_v42 = vadd.f32 %v3182_v22, %v3094_v30  ;;  %v8808_v29 = vor.u32 %v9948_v24, %v8807_v34  ;;  %v8519_v3 = vld [vmem:[#allocation2 + $0x8] sm:$0xf] }
 0x28c   : > { %3855 = vmatpush.bf16.msra.mxu3 %v9512_v44  ;;  %v9876_v51 = vld [vmem:[#allocation2 + $0x24] sm:$0xf0]  ;;  %v14793_v44 = vld [vmem:[#allocation38_spill] sm:$0xff] }
 0x28d   : > { %3683 = vmatpush.bf16.msrb.mxu1 %v8808_v29  ;;  %v8775_v35 = vld [vmem:[#allocation2 + $0x208] sm:$0xf]  ;;  %v8520_v56 = vor.u32 %v9876_v51, %v8519_v3  ;;  %v6076_v22 = vmul.f32 0.2, %v3183_v42  ;;  %vm5820_vm0 = vcmp.ge.f32.partialorder %v3183_v42, 0.0  ;;  %v14791_v29 = vld [vmem:[#allocation60_spill] sm:$0xff] }
 0x28e   : > { %v9940_v40 = vld [vmem:[#allocation2 + $0x224] sm:$0xf0]  ;;  %v3271_v13 = vpop.f32.mrf.mxu0 }
 0x28f   : > { %v8776_v43 = vor.u32 %v9940_v40, %v8775_v35  ;;  %v3272_v58 = vadd.f32 %v3271_v13, %v11147_v49  ;;  %v3360_v61 = vpop.f32.mrf.mxu1  ;;  %v3095_v18 = vpop.f32.mrf.mxu2  ;;  %3595 = vmatpush.bf16.msrb.mxu0 %v8520_v56 }
 0x290   : > { %v3096_v59 = vadd.f32 %v3095_v18, %v10982_v46  ;;  %v11267_v46 = vsel %vm5820_vm0, %v3183_v42, %v6076_v22 }
 0x291   : > { %v11261_v30 = vadd.f32 %v3360_v61, %v3272_v58  ;;  %3310 = vmatmul.bf16.gmra.mxu0 %v10807_v2  ;;  %3684 = vmatpush.bf16.msrb.mxu1 %v8776_v43  ;;  %14789 = vst [vmem:[#allocation34_spill] sm:$0xff] %v11267_v46 }
 0x292   : > { %v3184_v25 = vpop.f32.mrf.mxu3  ;;  %3399 = vmatmul.bf16.gmra.mxu1 %v14788_v1 }
 0x293   : > { %v3185_v34 = vadd.f32 %v3184_v25, %v3096_v59 }
 0x294   : > { %3137 = vmatmul.bf16.gmra.mxu2 %v11138_v8 }
 0x295   : > { %vm5828_vm3 = vcmp.ge.f32.partialorder %v3185_v34, 0.0  ;;  %v6084_v3 = vmul.f32 0.2, %v3185_v34 }
 0x296   : > { %v3273_v55 = vpop.f32.mrf.mxu0 }
 0x297   : > { %3226 = vmatmul.bf16.gmra.mxu3 %v11141_v20  ;;  %v11269_v56 = vsel %vm5828_vm3, %v3185_v34, %v6084_v3  ;;  %v3274_v48 = vadd.f32 %v3273_v55, %v11147_v49  ;;  %v3362_v24 = vpop.f32.mrf.mxu1  ;;  %v3098_v43 = vpop.f32.mrf.mxu2  ;;  %v14792_v34 = vld [vmem:[#allocation37_spill] sm:$0xff] }
 0x298   : > { %14790 = vst [vmem:[#allocation90_spill] sm:$0xff] %v11269_v56  ;;  %v3099_v51 = vadd.f32 %v3098_v43, %v14791_v29  ;;  %v10052_v43 = vld [vmem:[#allocation2 + $0x5a4] sm:$0xf0] }
 0x299   : > { %v11275_v40 = vadd.f32 %v3362_v24, %v3274_v48  ;;  %v9223_v24 = vld [vmem:[#allocation2 + $0x588] sm:$0xf] }
 0x29a   : > { %v3187_v35 = vpop.f32.mrf.mxu3 }
 0x29b   : > { %v3188_v13 = vadd.f32 %v3187_v35, %v3099_v51 }
 0x29d   : > { %v6092_v3 = vmul.f32 0.2, %v3188_v13  ;;  %vm5836_vm4 = vcmp.ge.f32.partialorder %v3188_v13, 0.0 }
 0x29e   : > { %v3276_v58 = vpop.f32.mrf.mxu0 }
 0x29f   : > { %v3277_v61 = vadd.f32 %v3276_v58, %v11147_v49  ;;  %v3365_v42 = vpop.f32.mrf.mxu1  ;;  %v3100_v18 = vpop.f32.mrf.mxu2  ;;  %v11285_v51 = vsel %vm5836_vm4, %v3188_v13, %v6092_v3 }
 0x2a0   : > { %v3101_v59 = vadd.f32 %v3100_v18, %v11000_v33  ;;  %v9224_v33 = vor.u32 %v10052_v43, %v9223_v24  ;;  %14794 = vst [vmem:[#allocation60_spill] sm:$0xff] %v11285_v51 }
 0x2a1   : > { %v11279_v22 = vadd.f32 %v3365_v42, %v3277_v61  ;;  %3315 = vmatmul.bf16.gmra.mxu0 %v14792_v34 }
 0x2a2   : > { %v3189_v25 = vpop.f32.mrf.mxu3  ;;  %3404 = vmatmul.bf16.gmra.mxu1 %v14793_v44  ;;  %3767 = vmatpush.bf16.msra.mxu2 %v9224_v33 }
 0x2a3   : > { %v3190_v55 = vadd.f32 %v3189_v25, %v3101_v59  ;;  %v14796_v59 = vld [vmem:[#allocation63_spill] sm:$0xff] }
 0x2a4   : > { %3418 = vmatmul.bf16.vlgmr.msrb.gmra.mxu2 %v10853_v41  ;;  %v10116_v41 = vld [vmem:[#allocation2 + $0x7a4] sm:$0xf0] }
 0x2a5   : > { %vm5844_vm5 = vcmp.ge.f32.partialorder %v3190_v55, 0.0  ;;  %v6100_v48 = vmul.f32 0.2, %v3190_v55 }
 0x2a6   : > { %v3278_v29 = vpop.f32.mrf.mxu0 }
 0x2a7   : > { %3507 = vmatmul.bf16.vlgmr.msrb.gmra.mxu3 %v10857_v37  ;;  %v11287_v35 = vsel %vm5844_vm5, %v3190_v55, %v6100_v48  ;;  %v3279_v58 = vadd.f32 %v3278_v29, %v11147_v49  ;;  %v3367_v61 = vpop.f32.mrf.mxu1  ;;  %v3103_v42 = vpop.f32.mrf.mxu2  ;;  %v9479_v37 = vld [vmem:[#allocation2 + $0x788] sm:$0xf] }
 0x2a8   : > { %14795 = vst [vmem:[#allocation37_spill] sm:$0xff] %v11287_v35  ;;  %v3104_v25 = vadd.f32 %v3103_v42, %v14796_v59  ;;  %v9480_v13 = vor.u32 %v10116_v41, %v9479_v37  ;;  %v14797_v42 = vld [vmem:[#allocation8_spill] sm:$0xff]  ;;  %v14799_v37 = vld [vmem:[#allocation41_spill] sm:$0xff] }
 0x2a9   : > { %v11293_v56 = vadd.f32 %v3367_v61, %v3279_v58  ;;  %v14798_v61 = vld [vmem:[#allocation9_spill] sm:$0xff] }
 0x2aa   : > { %v3192_v46 = vpop.f32.mrf.mxu3  ;;  %3856 = vmatpush.bf16.msra.mxu3 %v9480_v13 }
 0x2ab   : > { %v3193_v24 = vadd.f32 %v3192_v46, %v3104_v25  ;;  %v14800_v46 = vld [vmem:[#allocation42_spill] sm:$0xff] }
 0x2ad   : > { %v6108_v33 = vmul.f32 0.2, %v3193_v24  ;;  %vm5852_vm6 = vcmp.ge.f32.partialorder %v3193_v24, 0.0 }
 0x2ae   : > { %v3281_v3 = vpop.f32.mrf.mxu0 }
 0x2af   : > { %v3282_v55 = vadd.f32 %v3281_v3, %v11147_v49  ;;  %v3370_v48 = vpop.f32.mrf.mxu1  ;;  %v3105_v43 = vpop.f32.mrf.mxu2  ;;  %v11303_v25 = vsel %vm5852_vm6, %v3193_v24, %v6108_v33 }
 0x2b0   : > { %v3106_v29 = vadd.f32 %v3105_v43, %v11018_v54  ;;  %14801 = vst [vmem:[#allocation63_spill] sm:$0xff] %v11303_v25  ;;  %v14805_v25 = vld [vmem:[#allocation13_spill] sm:$0xff] }
 0x2b1   : > { %v11297_v18 = vadd.f32 %v3370_v48, %v3282_v55  ;;  %3596 = vmatmul.bf16.vlgmr.msrb.gmra.mxu0 %v14797_v42  ;;  %v14803_v48 = vld [vmem:[#allocation65_spill] sm:$0xff] }
 0x2b2   : > { %v3194_v44 = vpop.f32.mrf.mxu3  ;;  %3685 = vmatmul.bf16.vlgmr.msrb.gmra.mxu1 %v14798_v61  ;;  %v14804_v61 = vld [vmem:[#allocation12_spill] sm:$0xff] }
 0x2b3   : > { %v3195_v58 = vadd.f32 %v3194_v44, %v3106_v29 }
 0x2b4   : > { %3423 = vmatmul.bf16.gmra.mxu2 %v14799_v37 }
 0x2b5   : > { %vm5860_vm7 = vcmp.ge.f32.partialorder %v3195_v58, 0.0  ;;  %v6116_v41 = vmul.f32 0.2, %v3195_v58 }
 0x2b6   : > { %v3283_v59 = vpop.f32.mrf.mxu0 }
 0x2b7   : > { %3512 = vmatmul.bf16.gmra.mxu3 %v14800_v46  ;;  %v11305_v54 = vsel %vm5860_vm7, %v3195_v58, %v6116_v41  ;;  %v3284_v13 = vadd.f32 %v3283_v59, %v11147_v49  ;;  %v3372_v3 = vpop.f32.mrf.mxu1  ;;  %v3108_v55 = vpop.f32.mrf.mxu2 }
 0x2b8   : > { %14802 = vst [vmem:[#allocation91_spill] sm:$0xff] %v11305_v54  ;;  %v3109_v43 = vadd.f32 %v3108_v55, %v14803_v48 }
 0x2b9   : > { %v11311_v51 = vadd.f32 %v3372_v3, %v3284_v13  ;;  %v10044_v3 = vld [vmem:[#allocation2 + $0x564] sm:$0xf0] }
 0x2ba   : > { %v3197_v29 = vpop.f32.mrf.mxu3 }
 0x2bb   : > { %v3198_v35 = vadd.f32 %v3197_v29, %v3109_v43 }
 0x2bd   : > { %v6124_v42 = vmul.f32 0.2, %v3198_v35  ;;  %vm5868_vm8 = vcmp.ge.f32.partialorder %v3198_v35, 0.0 }
 0x2be   : > { %v3286_v37 = vpop.f32.mrf.mxu0 }
 0x2bf   : > { %v3287_v46 = vadd.f32 %v3286_v37, %v11147_v49  ;;  %v3375_v24 = vpop.f32.mrf.mxu1  ;;  %v3110_v33 = vpop.f32.mrf.mxu2  ;;  %v9191_v37 = vld [vmem:[#allocation2 + $0x548] sm:$0xf]  ;;  %v11321_v48 = vsel %vm5868_vm8, %v3198_v35, %v6124_v42 }
 0x2c0   : > { %v3111_v58 = vadd.f32 %v3110_v33, %v11036_v7  ;;  %v9192_v7 = vor.u32 %v10044_v3, %v9191_v37  ;;  %14806 = vst [vmem:[#allocation65_spill] sm:$0xff] %v11321_v48 }
 0x2c1   : > { %v11315_v59 = vadd.f32 %v3375_v24, %v3287_v46  ;;  %3601 = vmatmul.bf16.gmra.mxu0 %v14804_v61 }
 0x2c2   : > { %v3199_v41 = vpop.f32.mrf.mxu3  ;;  %3690 = vmatmul.bf16.gmra.mxu1 %v14805_v25  ;;  %3768 = vmatpush.bf16.msra.mxu2 %v9192_v7  ;;  %v10108_v25 = vld [vmem:[#allocation2 + $0x764] sm:$0xf0] }
 0x2c3   : > { %v3200_v44 = vadd.f32 %v3199_v41, %v3111_v58  ;;  %v14808_v58 = vld [vmem:[#allocation68_spill] sm:$0xff] }
 0x2c4   : > { %3428 = vmatmul.bf16.gmra.mxu2 %v10893_v10  ;;  %v9447_v10 = vld [vmem:[#allocation2 + $0x748] sm:$0xf] }
 0x2c5   : > { %vm5876_vm9 = vcmp.ge.f32.partialorder %v3200_v44, 0.0  ;;  %v6132_v13 = vmul.f32 0.2, %v3200_v44  ;;  %v9448_v35 = vor.u32 %v10108_v25, %v9447_v10  ;;  %v14811_v25 = vld [vmem:[#allocation48_spill] sm:$0xff] }
 0x2c6   : > { %v3288_v55 = vpop.f32.mrf.mxu0 }
 0x2c7   : > { %3517 = vmatmul.bf16.gmra.mxu3 %v10897_v11  ;;  %v11323_v46 = vsel %vm5876_vm9, %v3200_v44, %v6132_v13  ;;  %v3289_v43 = vadd.f32 %v3288_v55, %v11147_v49  ;;  %v3377_v29 = vpop.f32.mrf.mxu1  ;;  %v3113_v24 = vpop.f32.mrf.mxu2 }
 0x2c8   : > { %14807 = vst [vmem:[#allocation92_spill] sm:$0xff] %v11323_v46  ;;  %v3114_v41 = vadd.f32 %v3113_v24, %v14808_v58  ;;  %3857 = vmatpush.bf16.msra.mxu3 %v9448_v35  ;;  %v14809_v24 = vld [vmem:[#allocation16_spill] sm:$0xff] }
 0x2c9   : > { %v11329_v11 = vadd.f32 %v3377_v29, %v3289_v43  ;;  %v14810_v29 = vld [vmem:[#allocation17_spill] sm:$0xff] }
 0x2ca   : > { %v3202_v54 = vpop.f32.mrf.mxu3 }
 0x2cb   : > { %v3203_v37 = vadd.f32 %v3202_v54, %v3114_v41  ;;  %v14812_v54 = vld [vmem:[#allocation49_spill] sm:$0xff] }
 0x2cd   : > { %v6140_v7 = vmul.f32 0.2, %v3203_v37  ;;  %vm5884_vm10 = vcmp.ge.f32.partialorder %v3203_v37, 0.0 }
 0x2ce   : > { %v3291_v42 = vpop.f32.mrf.mxu0 }
 0x2cf   : > { %v3292_v44 = vadd.f32 %v3291_v42, %v11147_v49  ;;  %v3380_v13 = vpop.f32.mrf.mxu1  ;;  %v3115_v3 = vpop.f32.mrf.mxu2  ;;  %v11339_v41 = vsel %vm5884_vm10, %v3203_v37, %v6140_v7 }
 0x2d0   : > { %v3116_v55 = vadd.f32 %v3115_v3, %v11054_v36  ;;  %14813 = vst [vmem:[#allocation68_spill] sm:$0xff] %v11339_v41  ;;  %v14817_v41 = vld [vmem:[#allocation21_spill] sm:$0xff] }
 0x2d1   : > { %v11333_v33 = vadd.f32 %v3380_v13, %v3292_v44  ;;  %3606 = vmatmul.bf16.gmra.mxu0 %v14809_v24  ;;  %v14815_v13 = vld [vmem:[#allocation71_spill] sm:$0xff] }
 0x2d2   : > { %v3204_v61 = vpop.f32.mrf.mxu3  ;;  %3695 = vmatmul.bf16.gmra.mxu1 %v14810_v29  ;;  %v14816_v29 = vld [vmem:[#allocation20_spill] sm:$0xff] }
 0x2d3   : > { %v3205_v43 = vadd.f32 %v3204_v61, %v3116_v55 }
 0x2d4   : > { %3433 = vmatmul.bf16.gmra.mxu2 %v14811_v25 }
 0x2d5   : > { %vm5892_vm11 = vcmp.ge.f32.partialorder %v3205_v43, 0.0  ;;  %v6148_v10 = vmul.f32 0.2, %v3205_v43 }
 0x2d6   : > { %v3293_v58 = vpop.f32.mrf.mxu0 }
 0x2d7   : > { %3522 = vmatmul.bf16.gmra.mxu3 %v14812_v54  ;;  %v11341_v36 = vsel %vm5892_vm11, %v3205_v43, %v6148_v10  ;;  %v3294_v35 = vadd.f32 %v3293_v58, %v11147_v49  ;;  %v3382_v42 = vpop.f32.mrf.mxu1  ;;  %v3118_v44 = vpop.f32.mrf.mxu2 }
 0x2d8   : > { %14814 = vst [vmem:[#allocation93_spill] sm:$0xff] %v11341_v36  ;;  %v3119_v3 = vadd.f32 %v3118_v44, %v14815_v13 }
 0x2d9   : > { %v11347_v48 = vadd.f32 %v3382_v42, %v3294_v35  ;;  %v10036_v42 = vld [vmem:[#allocation2 + $0x524] sm:$0xf0] }
 0x2da   : > { %v3207_v55 = vpop.f32.mrf.mxu3 }
 0x2db   : > { %v3208_v46 = vadd.f32 %v3207_v55, %v3119_v3 }
 0x2dd   : > { %v6156_v24 = vmul.f32 0.2, %v3208_v46  ;;  %vm5900_vm12 = vcmp.ge.f32.partialorder %v3208_v46, 0.0 }
 0x2de   : > { %v3296_v25 = vpop.f32.mrf.mxu0 }
 0x2df   : > { %v3297_v54 = vadd.f32 %v3296_v25, %v11147_v49  ;;  %v3385_v37 = vpop.f32.mrf.mxu1  ;;  %v3120_v7 = vpop.f32.mrf.mxu2  ;;  %v9159_v25 = vld [vmem:[#allocation2 + $0x508] sm:$0xf]  ;;  %v11357_v13 = vsel %vm5900_vm12, %v3208_v46, %v6156_v24 }
 0x2e0   : > { %v3121_v43 = vadd.f32 %v3120_v7, %v11072_v21  ;;  %v9160_v21 = vor.u32 %v10036_v42, %v9159_v25  ;;  %14818 = vst [vmem:[#allocation71_spill] sm:$0xff] %v11357_v13 }
 0x2e1   : > { %v11351_v58 = vadd.f32 %v3385_v37, %v3297_v54  ;;  %3611 = vmatmul.bf16.gmra.mxu0 %v14816_v29 }
 0x2e2   : > { %v3209_v10 = vpop.f32.mrf.mxu3  ;;  %3700 = vmatmul.bf16.gmra.mxu1 %v14817_v41  ;;  %3769 = vmatpush.bf16.msra.mxu2 %v9160_v21  ;;  %v10100_v41 = vld [vmem:[#allocation2 + $0x724] sm:$0xf0] }
 0x2e3   : > { %v3210_v61 = vadd.f32 %v3209_v10, %v3121_v43  ;;  %v14820_v43 = vld [vmem:[#allocation74_spill] sm:$0xff] }
 0x2e4   : > { %3438 = vmatmul.bf16.gmra.mxu2 %v10934_v19  ;;  %v9415_v19 = vld [vmem:[#allocation2 + $0x708] sm:$0xf] }
 0x2e5   : > { %vm5908_vm13 = vcmp.ge.f32.partialorder %v3210_v61, 0.0  ;;  %v6164_v35 = vmul.f32 0.2, %v3210_v61  ;;  %v9416_v46 = vor.u32 %v10100_v41, %v9415_v19  ;;  %v14823_v41 = vld [vmem:[#allocation56_spill] sm:$0xff] }
 0x2e6   : > { %v3298_v44 = vpop.f32.mrf.mxu0 }
 0x2e7   : > { %3527 = vmatmul.bf16.gmra.mxu3 %v10938_v39  ;;  %v11359_v54 = vsel %vm5908_vm13, %v3210_v61, %v6164_v35  ;;  %v3299_v3 = vadd.f32 %v3298_v44, %v11147_v49  ;;  %v3387_v55 = vpop.f32.mrf.mxu1  ;;  %v3123_v37 = vpop.f32.mrf.mxu2 }
 0x2e8   : > { %14819 = vst [vmem:[#allocation94_spill] sm:$0xff] %v11359_v54  ;;  %v3124_v10 = vadd.f32 %v3123_v37, %v14820_v43  ;;  %3858 = vmatpush.bf16.msra.mxu3 %v9416_v46  ;;  %v14821_v37 = vld [vmem:[#allocation24_spill] sm:$0xff] }
 0x2e9   : > { %v11365_v39 = vadd.f32 %v3387_v55, %v3299_v3  ;;  %v14822_v55 = vld [vmem:[#allocation25_spill] sm:$0xff] }
 0x2ea   : > { %v3212_v36 = vpop.f32.mrf.mxu3 }
 0x2eb   : > { %v3213_v25 = vadd.f32 %v3212_v36, %v3124_v10  ;;  %v14824_v36 = vld [vmem:[#allocation57_spill] sm:$0xff] }
 0x2ed   : > { %v6172_v21 = vmul.f32 0.2, %v3213_v25  ;;  %vm5916_vm14 = vcmp.ge.f32.partialorder %v3213_v25, 0.0 }
 0x2ee   : > { %v3301_v24 = vpop.f32.mrf.mxu0 }
 0x2ef   : > { %v3302_v61 = vadd.f32 %v3301_v24, %v11147_v49  ;;  %v3390_v35 = vpop.f32.mrf.mxu1  ;;  %v3125_v42 = vpop.f32.mrf.mxu2  ;;  %v11375_v10 = vsel %vm5916_vm14, %v3213_v25, %v6172_v21 }
 0x2f0   : > { %v3126_v44 = vadd.f32 %v3125_v42, %v11090_v12  ;;  %14825 = vst [vmem:[#allocation74_spill] sm:$0xff] %v11375_v10  ;;  %v14829_v10 = vld [vmem:[#allocation29_spill] sm:$0xff] }
 0x2f1   : > { %v11369_v7 = vadd.f32 %v3390_v35, %v3302_v61  ;;  %3616 = vmatmul.bf16.gmra.mxu0 %v14821_v37  ;;  %v14827_v35 = vld [vmem:[#allocation77_spill] sm:$0xff] }
 0x2f2   : > { %v3214_v29 = vpop.f32.mrf.mxu3  ;;  %3705 = vmatmul.bf16.gmra.mxu1 %v14822_v55  ;;  %v14828_v55 = vld [vmem:[#allocation28_spill] sm:$0xff] }
 0x2f3   : > { %v3215_v3 = vadd.f32 %v3214_v29, %v3126_v44 }
 0x2f4   : > { %3443 = vmatmul.bf16.gmra.mxu2 %v14823_v41 }
 0x2f5   : > { %vm5924_vm15 = vcmp.ge.f32.partialorder %v3215_v3, 0.0  ;;  %v6180_v19 = vmul.f32 0.2, %v3215_v3 }
 0x2f6   : > { %v3303_v43 = vpop.f32.mrf.mxu0 }
 0x2f7   : > { %3532 = vmatmul.bf16.gmra.mxu3 %v14824_v36  ;;  %v11377_v12 = vsel %vm5924_vm15, %v3215_v3, %v6180_v19  ;;  %v3304_v46 = vadd.f32 %v3303_v43, %v11147_v49  ;;  %v3392_v24 = vpop.f32.mrf.mxu1  ;;  %v3128_v61 = vpop.f32.mrf.mxu2 }
 0x2f8   : > { %14826 = vst [vmem:[#allocation95_spill] sm:$0xff] %v11377_v12  ;;  %v3129_v42 = vadd.f32 %v3128_v61, %v14827_v35 }
 0x2f9   : > { %v11383_v13 = vadd.f32 %v3392_v24, %v3304_v46  ;;  %v10028_v24 = vld [vmem:[#allocation2 + $0x4e4] sm:$0xf0] }
 0x2fa   : > { %v3217_v44 = vpop.f32.mrf.mxu3 }
 0x2fb   : > { %v3218_v54 = vadd.f32 %v3217_v44, %v3129_v42 }
 0x2fd   : > { %v6188_v37 = vmul.f32 0.2, %v3218_v54  ;;  %vm5932_vm1 = vcmp.ge.f32.partialorder %v3218_v54, 0.0 }
 0x2fe   : > { %v3306_v41 = vpop.f32.mrf.mxu0 }
 0x2ff   : > { %v3307_v36 = vadd.f32 %v3306_v41, %v11147_v49  ;;  %v3395_v25 = vpop.f32.mrf.mxu1  ;;  %v3130_v21 = vpop.f32.mrf.mxu2  ;;  %v9127_v41 = vld [vmem:[#allocation2 + $0x4c8] sm:$0xf]  ;;  %v11393_v35 = vsel %vm5932_vm1, %v3218_v54, %v6188_v37 }
 0x300   : > { %v3131_v3 = vadd.f32 %v3130_v21, %v11108_v6  ;;  %v9128_v6 = vor.u32 %v10028_v24, %v9127_v41  ;;  %14830 = vst [vmem:[#allocation77_spill] sm:$0xff] %v11393_v35  ;;  %v9928_v35 = vld [vmem:[#allocation2 + $0x1cc] sm:$0xf] }
 0x301   : > { %v11387_v43 = vadd.f32 %v3395_v25, %v3307_v36  ;;  %3621 = vmatmul.bf16.gmra.mxu0 %v14828_v55 }
 0x302   : > { %v3219_v19 = vpop.f32.mrf.mxu3  ;;  %3710 = vmatmul.bf16.gmra.mxu1 %v14829_v10  ;;  %3770 = vmatpush.bf16.msra.mxu2 %v9128_v6  ;;  %v10092_v10 = vld [vmem:[#allocation2 + $0x6e4] sm:$0xf0] }
 0x303   : > { %v3220_v29 = vadd.f32 %v3219_v19, %v3131_v3  ;;  %v14832_v3 = vld [vmem:[#allocation80_spill] sm:$0xff] }
 0x304   : > { %3448 = vmatmul.bf16.gmra.mxu2 %v10975_v52  ;;  %v9383_v52 = vld [vmem:[#allocation2 + $0x6c8] sm:$0xf] }
 0x305   : > { %vm5940_vm2 = vcmp.ge.f32.partialorder %v3220_v29, 0.0  ;;  %v6196_v46 = vmul.f32 0.2, %v3220_v29  ;;  %v9384_v54 = vor.u32 %v10092_v10, %v9383_v52 }
 0x306   : > { %v3308_v61 = vpop.f32.mrf.mxu0 }
 0x307   : > { %3537 = vmatmul.bf16.gmra.mxu3 %v10979_v0  ;;  %v11395_v36 = vsel %vm5940_vm2, %v3220_v29, %v6196_v46  ;;  %v3309_v42 = vadd.f32 %v3308_v61, %v11147_v49  ;;  %v3397_v44 = vpop.f32.mrf.mxu1  ;;  %v3133_v25 = vpop.f32.mrf.mxu2 }
 0x308   : > { %14831 = vst [vmem:[#allocation96_spill] sm:$0xff] %v11395_v36  ;;  %v3134_v19 = vadd.f32 %v3133_v25, %v14832_v3  ;;  %3859 = vmatpush.bf16.msra.mxu3 %v9384_v54  ;;  %v14833_v25 = vld [vmem:[#allocation32_spill] sm:$0xff]  ;;  %v8745_v36 = vld [vmem:[#allocation2 + $0x1e8] sm:$0xf0] }
 0x309   : > { %v11401_v0 = vadd.f32 %v3397_v44, %v3309_v42  ;;  %v14834_v44 = vld [vmem:[#allocation33_spill] sm:$0xff] }
 0x30a   : > { %v3222_v12 = vpop.f32.mrf.mxu3 }
 0x30b   : > { %v3223_v41 = vadd.f32 %v3222_v12, %v3134_v19 }
 0x30d   : > { %v6204_v6 = vmul.f32 0.2, %v3223_v41  ;;  %vm5948_vm0 = vcmp.ge.f32.partialorder %v3223_v41, 0.0 }
 0x30e   : > { %v3311_v37 = vpop.f32.mrf.mxu0 }
 0x30f   : > { %v3312_v29 = vadd.f32 %v3311_v37, %v11147_v49  ;;  %v3400_v46 = vpop.f32.mrf.mxu1  ;;  %v3135_v24 = vpop.f32.mrf.mxu2  ;;  %v11411_v12 = vsel %vm5948_vm0, %v3223_v41, %v6204_v6  ;;  %v14837_v37 = vld [vmem:[#allocation83_spill] sm:$0xff]  ;;  %v8748_v41 = vor.u32 %v9928_v35, %v8745_v36 }
 0x310   : > { %v3136_v61 = vadd.f32 %v3135_v24, %v11126_v53  ;;  %14835 = vst [vmem:[#allocation80_spill] sm:$0xff] %v11411_v12  ;;  %v10020_v35 = vld [vmem:[#allocation2 + $0x4a4] sm:$0xf0] }
 0x311   : > { %v11405_v21 = vadd.f32 %v3400_v46, %v3312_v29  ;;  %3626 = vmatmul.bf16.gmra.mxu0 %v14833_v25 }
 0x312   : > { %v3224_v55 = vpop.f32.mrf.mxu3  ;;  %3715 = vmatmul.bf16.gmra.mxu1 %v14834_v44  ;;  %3944 = vmatpush.bf16.msra.mxu0 %v8748_v41 }
 0x313   : > { %v3225_v42 = vadd.f32 %v3224_v55, %v3136_v61  ;;  %v14838_v55 = vld [vmem:[#allocation35_spill] sm:$0xff] }
 0x314   : > { %3453 = vmatmul.bf16.gmra.mxu2 %v10994_v47 }
 0x315   : > { %vm5956_vm3 = vcmp.ge.f32.partialorder %v3225_v42, 0.0  ;;  %v6212_v52 = vmul.f32 0.2, %v3225_v42 }
 0x316   : > { %v3313_v10 = vpop.f32.mrf.mxu0 }
 0x317   : > { %3542 = vmatmul.bf16.gmra.mxu3 %v10997_v14  ;;  %v11413_v53 = vsel %vm5956_vm3, %v3225_v42, %v6212_v52  ;;  %v3314_v3 = vadd.f32 %v3313_v10, %v11147_v49  ;;  %v3402_v19 = vpop.f32.mrf.mxu1  ;;  %v3138_v54 = vpop.f32.mrf.mxu2 }
 0x318   : > { %14836 = vst [vmem:[#allocation32_spill] sm:$0xff] %v11413_v53  ;;  %v3139_v29 = vadd.f32 %v3138_v54, %v14837_v37  ;;  %v9351_v53 = vld [vmem:[#allocation2 + $0x688] sm:$0xf] }
 0x319   : > { %v11419_v24 = vadd.f32 %v3402_v19, %v3314_v3  ;;  %v14839_v19 = vld [vmem:[#allocation36_spill] sm:$0xff] }
 0x31a   : > { %v3227_v46 = vpop.f32.mrf.mxu3 }
 0x31b   : > { %v3228_v61 = vadd.f32 %v3227_v46, %v3139_v29 }
 0x31d   : > { %v6220_v54 = vmul.f32 0.2, %v3228_v61  ;;  %vm5964_vm4 = vcmp.ge.f32.partialorder %v3228_v61, 0.0 }
 0x31e   : > { %v3316_v14 = vpop.f32.mrf.mxu0 }
 0x31f   : > { %v3317_v6 = vadd.f32 %v3316_v14, %v11147_v49  ;;  %v3405_v42 = vpop.f32.mrf.mxu1  ;;  %v3140_v52 = vpop.f32.mrf.mxu2  ;;  %v9095_v14 = vld [vmem:[#allocation2 + $0x488] sm:$0xf]  ;;  %v11429_v29 = vsel %vm5964_vm4, %v3228_v61, %v6220_v54 }
 0x320   : > { %v3141_v10 = vadd.f32 %v3140_v52, %v11145_v60  ;;  %v9096_v36 = vor.u32 %v10020_v35, %v9095_v14  ;;  %14840 = vst [vmem:[#allocation83_spill] sm:$0xff] %v11429_v29  ;;  %v10250_v54 = vld [vmem:[#allocation4 + $0x4] sm:$0xff]  ;;  %v8713_v29 = vld [vmem:[#allocation2 + $0x1a8] sm:$0xf0] }
 0x321   : > { %v11423_v44 = vadd.f32 %v3405_v42, %v3317_v6  ;;  %3631 = vmatmul.bf16.gmra.mxu0 %v14838_v55 }
 0x322   : > { %v3229_v47 = vpop.f32.mrf.mxu3  ;;  %3720 = vmatmul.bf16.gmra.mxu1 %v14839_v19  ;;  %3771 = vmatpush.bf16.msra.mxu2 %v9096_v36 }
 0x323   : > { %v3230_v3 = vadd.f32 %v3229_v47, %v3141_v10 }
 0x324   : > { %3458 = vmatmul.bf16.gmra.mxu2 %v11012_v27 }
 0x325   : > { %vm5972_vm5 = vcmp.ge.f32.partialorder %v3230_v3, 0.0  ;;  %v6228_v37 = vmul.f32 0.2, %v3230_v3 }
 0x326   : > { %v3318_v60 = vpop.f32.mrf.mxu0 }
 0x327   : > { %3547 = vmatmul.bf16.gmra.mxu3 %v11015_v17  ;;  %v11431_v46 = vsel %vm5972_vm5, %v3230_v3, %v6228_v37  ;;  %v3319_v41 = vadd.f32 %v3318_v60, %v11147_v49  ;;  %v3407_v47 = vpop.f32.mrf.mxu1  ;;  %v3419_v6 = vpop.f32.mrf.mxu2  ;;  %v10084_v17 = vld [vmem:[#allocation2 + $0x6a4] sm:$0xf0]  ;;  %v11439_v3 = vperm.slane %v10250_v54, 2  ;;  %v14844_v54 = vld [vmem:[#allocation86_spill] sm:$0xff] }
 0x328   : > { %14841 = vst [vmem:[#allocation35_spill] sm:$0xff] %v11431_v46  ;;  %v3420_v52 = vadd.f32 %v3419_v6, %v11151_v15  ;;  %v9352_v61 = vor.u32 %v10084_v17, %v9351_v53 }
 0x329   : > { %v11437_v12 = vadd.f32 %v3407_v47, %v3319_v41 }
 0x32a   : > { %v3508_v10 = vpop.f32.mrf.mxu3  ;;  %3860 = vmatpush.bf16.msra.mxu3 %v9352_v61 }
 0x32b   : > { %v3509_v14 = vadd.f32 %v3508_v10, %v3420_v52 }
 0x32d   : > { %v5981_v36 = vmul.f32 0.2, %v3509_v14  ;;  %vm5725_vm6 = vcmp.ge.f32.partialorder %v3509_v14, 0.0 }
 0x32e   : > { %v3597_v49 = vpop.f32.mrf.mxu0 }
 0x32f   : > { %v3598_v37 = vadd.f32 %v3597_v49, %v11439_v3  ;;  %v3686_v35 = vpop.f32.mrf.mxu1  ;;  %v3421_v60 = vpop.f32.mrf.mxu2  ;;  %v11449_v53 = vsel %vm5725_vm6, %v3509_v14, %v5981_v36 }
 0x330   : > { %v3422_v42 = vadd.f32 %v3421_v60, %v11165_v63  ;;  %14842 = vst [vmem:[#allocation36_spill] sm:$0xff] %v11449_v53 }
 0x331   : > { %v11443_v6 = vadd.f32 %v3686_v35, %v3598_v37  ;;  %3636 = vmatmul.bf16.gmra.mxu0 %v10675_v28 }
 0x332   : > { %v3510_v15 = vpop.f32.mrf.mxu3  ;;  %3725 = vmatmul.bf16.gmra.mxu1 %v10680_v31 }
 0x333   : > { %v3511_v41 = vadd.f32 %v3510_v15, %v3422_v42  ;;  %v9920_v15 = vld [vmem:[#allocation2 + $0x18c] sm:$0xf] }
 0x334   : > { %3463 = vmatmul.bf16.gmra.mxu2 %v11030_v32  ;;  %v8716_v36 = vor.u32 %v9920_v15, %v8713_v29  ;;  %v14848_v29 = vld [vmem:[#allocation69_spill] sm:$0xff]  ;;  %v10012_v15 = vld [vmem:[#allocation2 + $0x464] sm:$0xf0] }
 0x335   : > { %vm5733_vm7 = vcmp.ge.f32.partialorder %v3511_v41, 0.0  ;;  %v5989_v17 = vmul.f32 0.2, %v3511_v41 }
 0x336   : > { %v3599_v63 = vpop.f32.mrf.mxu0  ;;  %3945 = vmatpush.bf16.msra.mxu0 %v8716_v36 }
 0x337   : > { %3552 = vmatmul.bf16.gmra.mxu3 %v11033_v16  ;;  %v11451_v47 = vsel %vm5733_vm7, %v3511_v41, %v5989_v17  ;;  %v3600_v10 = vadd.f32 %v3599_v63, %v11439_v3  ;;  %v3688_v42 = vpop.f32.mrf.mxu1  ;;  %v3424_v61 = vpop.f32.mrf.mxu2 }
 0x338   : > { %14843 = vst [vmem:[#allocation97_spill] sm:$0xff] %v11451_v47  ;;  %v3425_v49 = vadd.f32 %v3424_v61, %v14844_v54  ;;  %v14846_v47 = vld [vmem:[#allocation14_spill] sm:$0xff] }
 0x339   : > { %v11457_v35 = vadd.f32 %v3688_v42, %v3600_v10  ;;  %v14847_v42 = vld [vmem:[#allocation15_spill] sm:$0xff] }
 0x33a   : > { %v3513_v37 = vpop.f32.mrf.mxu3 }
 0x33b   : > { %v3514_v60 = vadd.f32 %v3513_v37, %v3425_v49  ;;  %v14849_v49 = vld [vmem:[#allocation70_spill] sm:$0xff]  ;;  %v9063_v37 = vld [vmem:[#allocation2 + $0x448] sm:$0xf] }
 0x33d   : > { %v5997_v61 = vmul.f32 0.2, %v3514_v60  ;;  %vm5741_vm8 = vcmp.ge.f32.partialorder %v3514_v60, 0.0 }
 0x33e   : > { %v3602_v14 = vpop.f32.mrf.mxu0 }
 0x33f   : > { %v3603_v41 = vadd.f32 %v3602_v14, %v11439_v3  ;;  %v3691_v17 = vpop.f32.mrf.mxu1  ;;  %v3426_v46 = vpop.f32.mrf.mxu2  ;;  %v11467_v14 = vsel %vm5741_vm8, %v3514_v60, %v5997_v61 }
 0x340   : > { %v3427_v52 = vadd.f32 %v3426_v46, %v11183_v38  ;;  %v9064_v46 = vor.u32 %v10012_v15, %v9063_v37  ;;  %14850 = vst [vmem:[#allocation98_spill] sm:$0xff] %v11467_v14 }
 0x341   : > { %v11461_v63 = vadd.f32 %v3691_v17, %v3603_v41  ;;  %3641 = vmatmul.bf16.gmra.mxu0 %v14846_v47  ;;  %v9319_v47 = vld [vmem:[#allocation2 + $0x648] sm:$0xf] }
 0x342   : > { %v3515_v53 = vpop.f32.mrf.mxu3  ;;  %3730 = vmatmul.bf16.gmra.mxu1 %v14847_v42  ;;  %3772 = vmatpush.bf16.msra.mxu2 %v9064_v46 }
 0x343   : > { %14845 = vst [vmem:[#allocation86_spill] sm:$0xff] %v11461_v63  ;;  %v3516_v10 = vadd.f32 %v3515_v53, %v3427_v52  ;;  %v10076_v63 = vld [vmem:[#allocation2 + $0x664] sm:$0xf0] }
 0x344   : > { %3468 = vmatmul.bf16.gmra.mxu2 %v14848_v29  ;;  %v9320_v60 = vor.u32 %v10076_v63, %v9319_v47  ;;  %v14854_v63 = vld [vmem:[#allocation72_spill] sm:$0xff] }
 0x345   : > { %vm5749_vm9 = vcmp.ge.f32.partialorder %v3516_v10, 0.0  ;;  %v6005_v54 = vmul.f32 0.2, %v3516_v10 }
 0x346   : > { %v3604_v38 = vpop.f32.mrf.mxu0  ;;  %3861 = vmatpush.bf16.msra.mxu3 %v9320_v60 }
 0x347   : > { %3557 = vmatmul.bf16.gmra.mxu3 %v14849_v49  ;;  %v11469_v36 = vsel %vm5749_vm9, %v3516_v10, %v6005_v54  ;;  %v3605_v41 = vadd.f32 %v3604_v38, %v11439_v3  ;;  %v3693_v53 = vpop.f32.mrf.mxu1  ;;  %v3429_v52 = vpop.f32.mrf.mxu2 }
 0x348   : > { %14851 = vst [vmem:[#allocation99_spill] sm:$0xff] %v11469_v36  ;;  %v3430_v42 = vadd.f32 %v3429_v52, %v11187_v50  ;;  %v14852_v50 = vld [vmem:[#allocation18_spill] sm:$0xff]  ;;  %v9912_v36 = vld [vmem:[#allocation2 + $0x14c] sm:$0xf] }
 0x349   : > { %v11475_v49 = vadd.f32 %v3693_v53, %v3605_v41  ;;  %v14853_v53 = vld [vmem:[#allocation19_spill] sm:$0xff] }
 0x34a   : > { %v3518_v29 = vpop.f32.mrf.mxu3 }
 0x34b   : > { %v3519_v37 = vadd.f32 %v3518_v29, %v3430_v42  ;;  %v14855_v42 = vld [vmem:[#allocation73_spill] sm:$0xff] }
 0x34d   : > { %v6013_v46 = vmul.f32 0.2, %v3519_v37  ;;  %vm5757_vm10 = vcmp.ge.f32.partialorder %v3519_v37, 0.0 }
 0x34e   : > { %v3607_v61 = vpop.f32.mrf.mxu0 }
 0x34f   : > { %v3608_v10 = vadd.f32 %v3607_v61, %v11439_v3  ;;  %v3696_v54 = vpop.f32.mrf.mxu1  ;;  %v3431_v15 = vpop.f32.mrf.mxu2  ;;  %v11485_v52 = vsel %vm5757_vm10, %v3519_v37, %v6013_v46 }
 0x350   : > { %v3432_v38 = vadd.f32 %v3431_v15, %v11201_v5  ;;  %14856 = vst [vmem:[#allocation100_spill] sm:$0xff] %v11485_v52 }
 0x351   : > { %v11479_v17 = vadd.f32 %v3696_v54, %v3608_v10  ;;  %3646 = vmatmul.bf16.gmra.mxu0 %v14852_v50 }
 0x352   : > { %v3520_v16 = vpop.f32.mrf.mxu3  ;;  %3735 = vmatmul.bf16.gmra.mxu1 %v14853_v53 }
 0x353   : > { %v3521_v41 = vadd.f32 %v3520_v16, %v3432_v38  ;;  %v14858_v16 = vld [vmem:[#allocation22_spill] sm:$0xff] }
 0x354   : > { %3473 = vmatmul.bf16.gmra.mxu2 %v14854_v63 }
 0x355   : > { %vm5765_vm11 = vcmp.ge.f32.partialorder %v3521_v41, 0.0  ;;  %v6021_v47 = vmul.f32 0.2, %v3521_v41 }
 0x356   : > { %v3609_v29 = vpop.f32.mrf.mxu0 }
 0x357   : > { %3562 = vmatmul.bf16.gmra.mxu3 %v14855_v42  ;;  %v11487_v5 = vsel %vm5765_vm11, %v3521_v41, %v6021_v47  ;;  %v3610_v60 = vadd.f32 %v3609_v29, %v11439_v3  ;;  %v3698_v61 = vpop.f32.mrf.mxu1  ;;  %v3434_v10 = vpop.f32.mrf.mxu2  ;;  %v8681_v42 = vld [vmem:[#allocation2 + $0x168] sm:$0xf0] }
 0x358   : > { %14857 = vst [vmem:[#allocation101_spill] sm:$0xff] %v11487_v5  ;;  %v3435_v54 = vadd.f32 %v3434_v10, %v11205_v23  ;;  %v8684_v37 = vor.u32 %v9912_v36, %v8681_v42  ;;  %v14860_v36 = vld [vmem:[#allocation75_spill] sm:$0xff] }
 0x359   : > { %v11493_v38 = vadd.f32 %v3698_v61, %v3610_v60  ;;  %v14859_v61 = vld [vmem:[#allocation23_spill] sm:$0xff] }
 0x35a   : > { %v3523_v15 = vpop.f32.mrf.mxu3  ;;  %3946 = vmatpush.bf16.msra.mxu0 %v8684_v37  ;;  %v9031_v42 = vld [vmem:[#allocation2 + $0x408] sm:$0xf] }
 0x35b   : > { %v3524_v14 = vadd.f32 %v3523_v15, %v3435_v54  ;;  %v10004_v54 = vld [vmem:[#allocation2 + $0x424] sm:$0xf0] }
 0x35c   : > { %v9032_v15 = vor.u32 %v10004_v54, %v9031_v42 }
 0x35d   : > { %v6029_v23 = vmul.f32 0.2, %v3524_v14  ;;  %vm5773_vm12 = vcmp.ge.f32.partialorder %v3524_v14, 0.0 }
 0x35e   : > { %v3612_v63 = vpop.f32.mrf.mxu0  ;;  %3773 = vmatpush.bf16.msra.mxu2 %v9032_v15  ;;  %v14865_v15 = vld [vmem:[#allocation26_spill] sm:$0xff] }
 0x35f   : > { %v3613_v46 = vadd.f32 %v3612_v63, %v11439_v3  ;;  %v3701_v41 = vpop.f32.mrf.mxu1  ;;  %v3436_v47 = vpop.f32.mrf.mxu2  ;;  %v14861_v63 = vld [vmem:[#allocation76_spill] sm:$0xff]  ;;  %v11503_v37 = vsel %vm5773_vm12, %v3524_v14, %v6029_v23 }
 0x360   : > { %v3437_v29 = vadd.f32 %v3436_v47, %v11219_v4  ;;  %14862 = vst [vmem:[#allocation102_spill] sm:$0xff] %v11503_v37  ;;  %v9001_v37 = vld [vmem:[#allocation2 + $0x3e8] sm:$0xf0] }
 0x361   : > { %v11497_v50 = vadd.f32 %v3701_v41, %v3613_v46  ;;  %3651 = vmatmul.bf16.gmra.mxu0 %v14858_v16 }
 0x362   : > { %v3525_v53 = vpop.f32.mrf.mxu3  ;;  %3740 = vmatmul.bf16.gmra.mxu1 %v14859_v61  ;;  %v10068_v61 = vld [vmem:[#allocation2 + $0x624] sm:$0xf0] }
 0x363   : > { %v3526_v60 = vadd.f32 %v3525_v53, %v3437_v29  ;;  %v9992_v29 = vld [vmem:[#allocation2 + $0x3cc] sm:$0xf] }
 0x364   : > { %3478 = vmatmul.bf16.gmra.mxu2 %v14860_v36  ;;  %v9287_v36 = vld [vmem:[#allocation2 + $0x608] sm:$0xf] }
 0x365   : > { %vm5781_vm13 = vcmp.ge.f32.partialorder %v3526_v60, 0.0  ;;  %v6037_v10 = vmul.f32 0.2, %v3526_v60  ;;  %v9288_v14 = vor.u32 %v10068_v61, %v9287_v36  ;;  %v14867_v61 = vld [vmem:[#allocation78_spill] sm:$0xff]  ;;  %v9984_v36 = vld [vmem:[#allocation2 + $0x38c] sm:$0xf] }
 0x366   : > { %v3614_v4 = vpop.f32.mrf.mxu0 }
 0x367   : > { %3567 = vmatmul.bf16.gmra.mxu3 %v14861_v63  ;;  %v11505_v46 = vsel %vm5781_vm13, %v3526_v60, %v6037_v10  ;;  %v3615_v41 = vadd.f32 %v3614_v4, %v11439_v3  ;;  %v3703_v53 = vpop.f32.mrf.mxu1  ;;  %v3439_v47 = vpop.f32.mrf.mxu2 }
 0x368   : > { %14863 = vst [vmem:[#allocation103_spill] sm:$0xff] %v11505_v46  ;;  %v3440_v52 = vadd.f32 %v3439_v47, %v11223_v62  ;;  %3862 = vmatpush.bf16.msra.mxu3 %v9288_v14  ;;  %v8969_v14 = vld [vmem:[#allocation2 + $0x3a8] sm:$0xf0] }
 0x369   : > { %v11511_v63 = vadd.f32 %v3703_v53, %v3615_v41  ;;  %v9004_v41 = vor.u32 %v9992_v29, %v9001_v37 }
 0x36a   : > { %v3528_v5 = vpop.f32.mrf.mxu3 }
 0x36b   : > { %v3529_v42 = vadd.f32 %v3528_v5, %v3440_v52  ;;  %v14866_v52 = vld [vmem:[#allocation27_spill] sm:$0xff]  ;;  %4033 = vmatpush.bf16.msra.mxu1 %v9004_v41 }
 0x36d   : > { %v6045_v53 = vmul.f32 0.2, %v3529_v42  ;;  %vm5789_vm14 = vcmp.ge.f32.partialorder %v3529_v42, 0.0 }
 0x36e   : > { %v3617_v23 = vpop.f32.mrf.mxu0 }
 0x36f   : > { %v3618_v60 = vadd.f32 %v3617_v23, %v11439_v3  ;;  %v3706_v10 = vpop.f32.mrf.mxu1  ;;  %v3441_v54 = vpop.f32.mrf.mxu2 }
 0x370   : > { %v3442_v4 = vadd.f32 %v3441_v54, %v11237_v57  ;;  %v14868_v57 = vld [vmem:[#allocation79_spill] sm:$0xff] }
 0x371   : > { %v11515_v62 = vadd.f32 %v3706_v10, %v3618_v60  ;;  %3656 = vmatmul.bf16.gmra.mxu0 %v14865_v15  ;;  %v8972_v60 = vor.u32 %v9984_v36, %v8969_v14  ;;  %v11521_v10 = vsel %vm5789_vm14, %v3529_v42, %v6045_v53  ;;  %v9904_v53 = vld [vmem:[#allocation2 + $0x10c] sm:$0xf] }
 0x372   : > { %v3530_v16 = vpop.f32.mrf.mxu3  ;;  %3745 = vmatmul.bf16.gmra.mxu1 %v14866_v52  ;;  %14869 = vst [vmem:[#allocation105_spill] sm:$0xff] %v11521_v10  ;;  %v8905_v14 = vld [vmem:[#allocation2 + $0x328] sm:$0xf0] }
 0x373   : > { %14864 = vst [vmem:[#allocation104_spill] sm:$0xff] %v11515_v62  ;;  %v3531_v47 = vadd.f32 %v3530_v16, %v3442_v4  ;;  %4034 = vmatpush.bf16.msra.mxu1 %v8972_v60 }
 0x374   : > { %3483 = vmatmul.bf16.gmra.mxu2 %v14867_v61  ;;  %v9976_v61 = vld [vmem:[#allocation2 + $0x34c] sm:$0xf] }
 0x375   : > { %vm5797_vm15 = vcmp.ge.f32.partialorder %v3531_v47, 0.0  ;;  %v6053_v5 = vmul.f32 0.2, %v3531_v47 }
 0x376   : > { %v3619_v23 = vpop.f32.mrf.mxu0 }
 0x377   : > { %3572 = vmatmul.bf16.gmra.mxu3 %v14868_v57  ;;  %v11523_v54 = vsel %vm5797_vm15, %v3531_v47, %v6053_v5  ;;  %v3620_v16 = vadd.f32 %v3619_v23, %v11439_v3  ;;  %v3708_v37 = vpop.f32.mrf.mxu1  ;;  %v3444_v29 = vpop.f32.mrf.mxu2  ;;  %v8937_v57 = vld [vmem:[#allocation2 + $0x368] sm:$0xf0] }
 0x378   : > { %14870 = vst [vmem:[#allocation106_spill] sm:$0xff] %v11523_v54  ;;  %v3445_v41 = vadd.f32 %v3444_v29, %v11241_v45  ;;  %v8940_v36 = vor.u32 %v9976_v61, %v8937_v57  ;;  %v8649_v47 = vld [vmem:[#allocation2 + $0x128] sm:$0xf0] }
 0x379   : > { %v11529_v52 = vadd.f32 %v3708_v37, %v3620_v16  ;;  %v9968_v5 = vld [vmem:[#allocation2 + $0x30c] sm:$0xf]  ;;  %v8652_v15 = vor.u32 %v9904_v53, %v8649_v47 }
 0x37a   : > { %v3533_v46 = vpop.f32.mrf.mxu3  ;;  %4035 = vmatpush.bf16.msra.mxu1 %v8940_v36  ;;  %v8908_v62 = vor.u32 %v9968_v5, %v8905_v14  ;;  %v9896_v16 = vld [vmem:[#allocation2 + $0xcc] sm:$0xf]  ;;  %v14872_v14 = vld [vmem:[#allocation81_spill] sm:$0xff] }
 0x37b   : > { %v3534_v42 = vadd.f32 %v3533_v46, %v3445_v41  ;;  %3947 = vmatpush.bf16.msra.mxu0 %v8652_v15  ;;  %v8617_v61 = vld [vmem:[#allocation2 + $0xe8] sm:$0xf0]  ;;  %v14873_v15 = vld [vmem:[#allocation82_spill] sm:$0xff] }
 0x37c   : > { %v9960_v46 = vld [vmem:[#allocation2 + $0x2cc] sm:$0xf]  ;;  %v8620_v37 = vor.u32 %v9896_v16, %v8617_v61 }
 0x37d   : > { %v8873_v41 = vld [vmem:[#allocation2 + $0x2e8] sm:$0xf0]  ;;  %v6061_v36 = vmul.f32 0.2, %v3534_v42  ;;  %vm5805_vm1 = vcmp.ge.f32.partialorder %v3534_v42, 0.0 }
 0x37e   : > { %v3622_v23 = vpop.f32.mrf.mxu0  ;;  %4036 = vmatpush.bf16.msra.mxu1 %v8908_v62  ;;  %v14871_v47 = vld [vmem:[#allocation31_spill] sm:$0xff]  ;;  %v8876_v5 = vor.u32 %v9960_v46, %v8873_v41 }
 0x37f   : > { %v3623_v4 = vadd.f32 %v3622_v23, %v11439_v3  ;;  %v3711_v10 = vpop.f32.mrf.mxu1  ;;  %v3446_v45 = vpop.f32.mrf.mxu2  ;;  %3948 = vmatpush.bf16.msra.mxu0 %v8620_v37  ;;  %v9888_v62 = vld [vmem:[#allocation2 + $0x8c] sm:$0xf]  ;;  %v11540_v46 = vsel %vm5805_vm1, %v3534_v42, %v6061_v36 }
 0x380   : > { %v3447_v60 = vadd.f32 %v3446_v45, %v11257_v9  ;;  %v8585_v23 = vld [vmem:[#allocation2 + $0xa8] sm:$0xf0]  ;;  %14874 = vst [vmem:[#allocation107_spill] sm:$0xff] %v11540_v46 }
 0x381   : > { %v11533_v57 = vadd.f32 %v3711_v10, %v3623_v4  ;;  %3661 = vmatmul.bf16.gmra.mxu0 %v14784_v26  ;;  %v10056_v10 = vld [vmem:[#allocation2 + $0x5cc] sm:$0xf]  ;;  %v8588_v61 = vor.u32 %v9888_v62, %v8585_v23 }
 0x382   : > { %v3535_v29 = vpop.f32.mrf.mxu3  ;;  %3750 = vmatmul.bf16.gmra.mxu1 %v14871_v47  ;;  %v9257_v4 = vld [vmem:[#allocation2 + $0x5e8] sm:$0xf0] }
 0x383   : > { %v3536_v53 = vadd.f32 %v3535_v29, %v3447_v60  ;;  %4037 = vmatpush.bf16.msra.mxu1 %v8876_v5  ;;  %v9260_v16 = vor.u32 %v10056_v10, %v9257_v4  ;;  %v9952_v60 = vld [vmem:[#allocation2 + $0x28c] sm:$0xf]  ;;  %3949 = vmatpush.bf16.msra.mxu0 %v8588_v61 }
 0x384   : > { %3488 = vmatmul.bf16.gmra.mxu2 %v14872_v14  ;;  %v8841_v29 = vld [vmem:[#allocation2 + $0x2a8] sm:$0xf0] }
 0x385   : > { %vm5813_vm2 = vcmp.ge.f32.partialorder %v3536_v53, 0.0  ;;  %v6069_v9 = vmul.f32 0.2, %v3536_v53  ;;  %4122 = vmatpush.bf16.msrb.mxu2 %v9260_v16  ;;  %v9880_v62 = vld [vmem:[#allocation2 + $0x4c] sm:$0xf] }
 0x386   : > { %v3624_v45 = vpop.f32.mrf.mxu0  ;;  %v8553_v4 = vld [vmem:[#allocation2 + $0x68] sm:$0xf0] }
 0x387   : > { %3577 = vmatmul.bf16.gmra.mxu3 %v14873_v15  ;;  %v11543_v41 = vsel %vm5813_vm2, %v3536_v53, %v6069_v9  ;;  %v3625_v37 = vadd.f32 %v3624_v45, %v11439_v3  ;;  %v3713_v54 = vpop.f32.mrf.mxu1  ;;  %v3449_v14 = vpop.f32.mrf.mxu2  ;;  %v8844_v15 = vor.u32 %v9952_v60, %v8841_v29  ;;  %v9944_v42 = vld [vmem:[#allocation2 + $0x24c] sm:$0xf]  ;;  %v8556_v23 = vor.u32 %v9880_v62, %v8553_v4 }
 0x388   : > { %14875 = vst [vmem:[#allocation108_spill] sm:$0xff] %v11543_v41  ;;  %v3450_v47 = vadd.f32 %v3449_v14, %v11261_v30  ;;  %v10120_v53 = vld [vmem:[#allocation2 + $0x7cc] sm:$0xf] }
 0x389   : > { %v11549_v36 = vadd.f32 %v3713_v54, %v3625_v37  ;;  %4038 = vmatpush.bf16.msra.mxu1 %v8844_v15  ;;  %v9513_v9 = vld [vmem:[#allocation2 + $0x7e8] sm:$0xf0]  ;;  %3950 = vmatpush.bf16.msra.mxu0 %v8556_v23 }
 0x38a   : > { %v3538_v10 = vpop.f32.mrf.mxu3  ;;  %v8809_v45 = vld [vmem:[#allocation2 + $0x268] sm:$0xf0]  ;;  %v9516_v60 = vor.u32 %v10120_v53, %v9513_v9 }
 0x38b   : > { %v3539_v26 = vadd.f32 %v3538_v10, %v3450_v47  ;;  %v8812_v29 = vor.u32 %v9944_v42, %v8809_v45  ;;  %v9872_v5 = vld [vmem:[#allocation2 + $0xc] sm:$0xf] }
 0x38c   : > { %4211 = vmatpush.bf16.msrb.mxu3 %v9516_v60  ;;  %v8521_v30 = vld [vmem:[#allocation2 + $0x28] sm:$0xf0] }
 0x38d   : > { %4039 = vmatpush.bf16.msra.mxu1 %v8812_v29  ;;  %v9936_v14 = vld [vmem:[#allocation2 + $0x20c] sm:$0xf]  ;;  %v8524_v46 = vor.u32 %v9872_v5, %v8521_v30  ;;  %v6077_v10 = vmul.f32 0.2, %v3539_v26  ;;  %vm5821_vm0 = vcmp.ge.f32.partialorder %v3539_v26, 0.0 }
 0x38e   : > { %v8777_v16 = vld [vmem:[#allocation2 + $0x228] sm:$0xf0]  ;;  %v3627_v61 = vpop.f32.mrf.mxu0 }
 0x38f   : > { %v8780_v41 = vor.u32 %v9936_v14, %v8777_v16  ;;  %v3628_v54 = vadd.f32 %v3627_v61, %v11439_v3  ;;  %v3716_v15 = vpop.f32.mrf.mxu1  ;;  %v3451_v37 = vpop.f32.mrf.mxu2  ;;  %3951 = vmatpush.bf16.msra.mxu0 %v8524_v46 }
 0x390   : > { %v3452_v62 = vadd.f32 %v3451_v37, %v11275_v40  ;;  %v11559_v40 = vsel %vm5821_vm0, %v3539_v26, %v6077_v10 }
 0x391   : > { %v11553_v47 = vadd.f32 %v3716_v15, %v3628_v54  ;;  %3666 = vmatmul.bf16.gmra.mxu0 %v10807_v2  ;;  %4040 = vmatpush.bf16.msra.mxu1 %v8780_v41  ;;  %14876 = vst [vmem:[#allocation109_spill] sm:$0xff] %v11559_v40  ;;  %v10112_v40 = vld [vmem:[#allocation2 + $0x78c] sm:$0xf] }
 0x392   : > { %v3540_v4 = vpop.f32.mrf.mxu3  ;;  %3755 = vmatmul.bf16.gmra.mxu1 %v14788_v1 }
 0x393   : > { %v3541_v42 = vadd.f32 %v3540_v4, %v3452_v62 }
 0x394   : > { %3493 = vmatmul.bf16.gmra.mxu2 %v11138_v8 }
 0x395   : > { %vm5829_vm3 = vcmp.ge.f32.partialorder %v3541_v42, 0.0  ;;  %v6085_v5 = vmul.f32 0.2, %v3541_v42 }
 0x396   : > { %v3629_v53 = vpop.f32.mrf.mxu0 }
 0x397   : > { %3582 = vmatmul.bf16.gmra.mxu3 %v11141_v20  ;;  %v11561_v46 = vsel %vm5829_vm3, %v3541_v42, %v6085_v5  ;;  %v3630_v9 = vadd.f32 %v3629_v53, %v11439_v3  ;;  %v3718_v23 = vpop.f32.mrf.mxu1  ;;  %v3454_v41 = vpop.f32.mrf.mxu2  ;;  %v14878_v42 = vld [vmem:[#allocation38_spill] sm:$0xff]  ;;  %v14879_v5 = vld [vmem:[#allocation39_spill] sm:$0xff]  ;;  %v14880_v53 = vld [vmem:[#allocation40_spill] sm:$0xff] }
 0x398   : > { %14877 = vst [vmem:[#allocation110_spill] sm:$0xff] %v11561_v46  ;;  %v3455_v60 = vadd.f32 %v3454_v41, %v11279_v22  ;;  %v9481_v46 = vld [vmem:[#allocation2 + $0x7a8] sm:$0xf0] }
 0x399   : > { %v11567_v30 = vadd.f32 %v3718_v23, %v3630_v9  ;;  %v10048_v9 = vld [vmem:[#allocation2 + $0x58c] sm:$0xf] }
 0x39a   : > { %v3543_v29 = vpop.f32.mrf.mxu3  ;;  %v9225_v23 = vld [vmem:[#allocation2 + $0x5a8] sm:$0xf0] }
 0x39b   : > { %v3544_v14 = vadd.f32 %v3543_v29, %v3455_v60 }
 0x39d   : > { %v6093_v4 = vmul.f32 0.2, %v3544_v14  ;;  %vm5837_vm4 = vcmp.ge.f32.partialorder %v3544_v14, 0.0 }
 0x39e   : > { %v3632_v16 = vpop.f32.mrf.mxu0 }
 0x39f   : > { %v3633_v61 = vadd.f32 %v3632_v16, %v11439_v3  ;;  %v3721_v26 = vpop.f32.mrf.mxu1  ;;  %v3456_v54 = vpop.f32.mrf.mxu2  ;;  %v11577_v60 = vsel %vm5837_vm4, %v3544_v14, %v6093_v4  ;;  %v9484_v14 = vor.u32 %v10112_v40, %v9481_v46  ;;  %v14885_v46 = vld [vmem:[#allocation41_spill] sm:$0xff] }
 0x3a0   : > { %v3457_v15 = vadd.f32 %v3456_v54, %v11293_v56  ;;  %v9228_v56 = vor.u32 %v10048_v9, %v9225_v23  ;;  %14881 = vst [vmem:[#allocation38_spill] sm:$0xff] %v11577_v60 }
 0x3a1   : > { %v11571_v62 = vadd.f32 %v3721_v26, %v3633_v61  ;;  %3671 = vmatmul.bf16.gmra.mxu0 %v14792_v34  ;;  %4212 = vmatpush.bf16.msrb.mxu3 %v9484_v14 }
 0x3a2   : > { %v3545_v37 = vpop.f32.mrf.mxu3  ;;  %3760 = vmatmul.bf16.gmra.mxu1 %v14878_v42  ;;  %4123 = vmatpush.bf16.msrb.mxu2 %v9228_v56 }
 0x3a3   : > { %v3546_v10 = vadd.f32 %v3545_v37, %v3457_v15 }
 0x3a4   : > { %3774 = vmatmul.bf16.vlgmr.msra.gmra.mxu2 %v14879_v5 }
 0x3a5   : > { %vm5845_vm5 = vcmp.ge.f32.partialorder %v3546_v10, 0.0  ;;  %v6101_v22 = vmul.f32 0.2, %v3546_v10 }
 0x3a6   : > { %v3634_v41 = vpop.f32.mrf.mxu0 }
 0x3a7   : > { %3863 = vmatmul.bf16.vlgmr.msra.gmra.mxu3 %v14880_v53  ;;  %v11579_v29 = vsel %vm5845_vm5, %v3546_v10, %v6101_v22  ;;  %v3635_v16 = vadd.f32 %v3634_v41, %v11439_v3  ;;  %v3723_v61 = vpop.f32.mrf.mxu1  ;;  %v3459_v26 = vpop.f32.mrf.mxu2 }
 0x3a8   : > { %14882 = vst [vmem:[#allocation39_spill] sm:$0xff] %v11579_v29  ;;  %v3460_v15 = vadd.f32 %v3459_v26, %v11297_v18  ;;  %v14883_v18 = vld [vmem:[#allocation8_spill] sm:$0xff]  ;;  %v14886_v26 = vld [vmem:[#allocation42_spill] sm:$0xff] }
 0x3a9   : > { %v11585_v45 = vadd.f32 %v3723_v61, %v3635_v16  ;;  %v14884_v61 = vld [vmem:[#allocation9_spill] sm:$0xff] }
 0x3aa   : > { %v3548_v37 = vpop.f32.mrf.mxu3 }
 0x3ab   : > { %v3549_v9 = vadd.f32 %v3548_v37, %v3460_v15 }
 0x3ad   : > { %v6109_v56 = vmul.f32 0.2, %v3549_v9  ;;  %vm5853_vm6 = vcmp.ge.f32.partialorder %v3549_v9, 0.0 }
 0x3ae   : > { %v3637_v4 = vpop.f32.mrf.mxu0 }
 0x3af   : > { %v3638_v10 = vadd.f32 %v3637_v4, %v11439_v3  ;;  %v3726_v22 = vpop.f32.mrf.mxu1  ;;  %v3461_v23 = vpop.f32.mrf.mxu2  ;;  %v11595_v37 = vsel %vm5853_vm6, %v3549_v9, %v6109_v56 }
 0x3b0   : > { %v3462_v41 = vadd.f32 %v3461_v23, %v11311_v51  ;;  %14887 = vst [vmem:[#allocation8_spill] sm:$0xff] %v11595_v37  ;;  %v14891_v37 = vld [vmem:[#allocation13_spill] sm:$0xff] }
 0x3b1   : > { %v11589_v54 = vadd.f32 %v3726_v22, %v3638_v10  ;;  %3952 = vmatmul.bf16.vlgmr.msra.gmra.mxu0 %v14883_v18 }
 0x3b2   : > { %v3550_v53 = vpop.f32.mrf.mxu3  ;;  %4041 = vmatmul.bf16.vlgmr.msra.gmra.mxu1 %v14884_v61 }
 0x3b3   : > { %v3551_v16 = vadd.f32 %v3550_v53, %v3462_v41 }
 0x3b4   : > { %3779 = vmatmul.bf16.gmra.mxu2 %v14885_v46  ;;  %v14890_v46 = vld [vmem:[#allocation12_spill] sm:$0xff] }
 0x3b5   : > { %vm5861_vm7 = vcmp.ge.f32.partialorder %v3551_v16, 0.0  ;;  %v6117_v40 = vmul.f32 0.2, %v3551_v16 }
 0x3b6   : > { %v3639_v15 = vpop.f32.mrf.mxu0 }
 0x3b7   : > { %3868 = vmatmul.bf16.gmra.mxu3 %v14886_v26  ;;  %v11597_v51 = vsel %vm5861_vm7, %v3551_v16, %v6117_v40  ;;  %v3640_v14 = vadd.f32 %v3639_v15, %v11439_v3  ;;  %v3728_v4 = vpop.f32.mrf.mxu1  ;;  %v3464_v10 = vpop.f32.mrf.mxu2 }
 0x3b8   : > { %14888 = vst [vmem:[#allocation111_spill] sm:$0xff] %v11597_v51  ;;  %v3465_v22 = vadd.f32 %v3464_v10, %v11315_v59  ;;  %v9193_v10 = vld [vmem:[#allocation2 + $0x568] sm:$0xf0] }
 0x3b9   : > { %v11603_v41 = vadd.f32 %v3728_v4, %v3640_v14  ;;  %v14892_v14 = vld [vmem:[#allocation44_spill] sm:$0xff]  ;;  %v14893_v4 = vld [vmem:[#allocation45_spill] sm:$0xff] }
 0x3ba   : > { %v3553_v23 = vpop.f32.mrf.mxu3 }
 0x3bb   : > { %v3554_v60 = vadd.f32 %v3553_v23, %v3465_v22 }
 0x3bd   : > { %v6125_v61 = vmul.f32 0.2, %v3554_v60  ;;  %vm5869_vm8 = vcmp.ge.f32.partialorder %v3554_v60, 0.0 }
 0x3be   : > { %v3642_v29 = vpop.f32.mrf.mxu0 }
 0x3bf   : > { %v3643_v26 = vadd.f32 %v3642_v29, %v11439_v3  ;;  %v3731_v9 = vpop.f32.mrf.mxu1  ;;  %v3466_v56 = vpop.f32.mrf.mxu2  ;;  %v10040_v29 = vld [vmem:[#allocation2 + $0x54c] sm:$0xf]  ;;  %v11613_v23 = vsel %vm5869_vm8, %v3554_v60, %v6125_v61 }
 0x3c0   : > { %v3467_v16 = vadd.f32 %v3466_v56, %v11329_v11  ;;  %v9196_v11 = vor.u32 %v10040_v29, %v9193_v10  ;;  %14894 = vst [vmem:[#allocation113_spill] sm:$0xff] %v11613_v23 }
 0x3c1   : > { %v11607_v15 = vadd.f32 %v3731_v9, %v3643_v26  ;;  %3957 = vmatmul.bf16.gmra.mxu0 %v14890_v46  ;;  %v9449_v46 = vld [vmem:[#allocation2 + $0x768] sm:$0xf0] }
 0x3c2   : > { %v3555_v40 = vpop.f32.mrf.mxu3  ;;  %4046 = vmatmul.bf16.gmra.mxu1 %v14891_v37  ;;  %4124 = vmatpush.bf16.msrb.mxu2 %v9196_v11  ;;  %v10104_v37 = vld [vmem:[#allocation2 + $0x74c] sm:$0xf] }
 0x3c3   : > { %14889 = vst [vmem:[#allocation112_spill] sm:$0xff] %v11607_v15  ;;  %v3556_v53 = vadd.f32 %v3555_v40, %v3467_v16  ;;  %v9452_v60 = vor.u32 %v10104_v37, %v9449_v46  ;;  %v14898_v37 = vld [vmem:[#allocation48_spill] sm:$0xff] }
 0x3c4   : > { %3784 = vmatmul.bf16.gmra.mxu2 %v14892_v14 }
 0x3c5   : > { %vm5877_vm9 = vcmp.ge.f32.partialorder %v3556_v53, 0.0  ;;  %v6133_v59 = vmul.f32 0.2, %v3556_v53  ;;  %4213 = vmatpush.bf16.msrb.mxu3 %v9452_v60 }
 0x3c6   : > { %v3644_v22 = vpop.f32.mrf.mxu0 }
 0x3c7   : > { %3873 = vmatmul.bf16.gmra.mxu3 %v14893_v4  ;;  %v11615_v26 = vsel %vm5877_vm9, %v3556_v53, %v6133_v59  ;;  %v3645_v9 = vadd.f32 %v3644_v22, %v11439_v3  ;;  %v3733_v56 = vpop.f32.mrf.mxu1  ;;  %v3469_v16 = vpop.f32.mrf.mxu2 }
 0x3c8   : > { %14895 = vst [vmem:[#allocation114_spill] sm:$0xff] %v11615_v26  ;;  %v3470_v51 = vadd.f32 %v3469_v16, %v11333_v33  ;;  %v14896_v33 = vld [vmem:[#allocation16_spill] sm:$0xff] }
 0x3c9   : > { %v11621_v4 = vadd.f32 %v3733_v56, %v3645_v9  ;;  %v14897_v56 = vld [vmem:[#allocation17_spill] sm:$0xff] }
 0x3ca   : > { %v3558_v14 = vpop.f32.mrf.mxu3 }
 0x3cb   : > { %v3559_v29 = vadd.f32 %v3558_v14, %v3470_v51  ;;  %v14899_v51 = vld [vmem:[#allocation49_spill] sm:$0xff] }
 0x3cd   : > { %v6141_v11 = vmul.f32 0.2, %v3559_v29  ;;  %vm5885_vm10 = vcmp.ge.f32.partialorder %v3559_v29, 0.0 }
 0x3ce   : > { %v3647_v61 = vpop.f32.mrf.mxu0 }
 0x3cf   : > { %v3648_v53 = vadd.f32 %v3647_v61, %v11439_v3  ;;  %v3736_v59 = vpop.f32.mrf.mxu1  ;;  %v3471_v10 = vpop.f32.mrf.mxu2  ;;  %v11631_v16 = vsel %vm5885_vm10, %v3559_v29, %v6141_v11 }
 0x3d0   : > { %v3472_v22 = vadd.f32 %v3471_v10, %v11347_v48  ;;  %14900 = vst [vmem:[#allocation16_spill] sm:$0xff] %v11631_v16  ;;  %v14904_v16 = vld [vmem:[#allocation21_spill] sm:$0xff] }
 0x3d1   : > { %v11625_v40 = vadd.f32 %v3736_v59, %v3648_v53  ;;  %3962 = vmatmul.bf16.gmra.mxu0 %v14896_v33 }
 0x3d2   : > { %v3560_v15 = vpop.f32.mrf.mxu3  ;;  %4051 = vmatmul.bf16.gmra.mxu1 %v14897_v56 }
 0x3d3   : > { %v3561_v9 = vadd.f32 %v3560_v15, %v3472_v22 }
 0x3d4   : > { %3789 = vmatmul.bf16.gmra.mxu2 %v14898_v37  ;;  %v14903_v37 = vld [vmem:[#allocation20_spill] sm:$0xff] }
 0x3d5   : > { %vm5893_vm11 = vcmp.ge.f32.partialorder %v3561_v9, 0.0  ;;  %v6149_v46 = vmul.f32 0.2, %v3561_v9 }
 0x3d6   : > { %v3649_v14 = vpop.f32.mrf.mxu0 }
 0x3d7   : > { %3878 = vmatmul.bf16.gmra.mxu3 %v14899_v51  ;;  %v11633_v48 = vsel %vm5893_vm11, %v3561_v9, %v6149_v46  ;;  %v3650_v60 = vadd.f32 %v3649_v14, %v11439_v3  ;;  %v3738_v61 = vpop.f32.mrf.mxu1  ;;  %v3474_v53 = vpop.f32.mrf.mxu2 }
 0x3d8   : > { %14901 = vst [vmem:[#allocation115_spill] sm:$0xff] %v11633_v48  ;;  %v3475_v59 = vadd.f32 %v3474_v53, %v11351_v58  ;;  %v9161_v53 = vld [vmem:[#allocation2 + $0x528] sm:$0xf0] }
 0x3d9   : > { %v11639_v22 = vadd.f32 %v3738_v61, %v3650_v60  ;;  %v14905_v60 = vld [vmem:[#allocation52_spill] sm:$0xff]  ;;  %v14906_v61 = vld [vmem:[#allocation53_spill] sm:$0xff] }
 0x3da   : > { %v3563_v10 = vpop.f32.mrf.mxu3 }
 0x3db   : > { %v3564_v23 = vadd.f32 %v3563_v10, %v3475_v59 }
 0x3dd   : > { %v6157_v56 = vmul.f32 0.2, %v3564_v23  ;;  %vm5901_vm12 = vcmp.ge.f32.partialorder %v3564_v23, 0.0 }
 0x3de   : > { %v3652_v26 = vpop.f32.mrf.mxu0 }
 0x3df   : > { %v3653_v51 = vadd.f32 %v3652_v26, %v11439_v3  ;;  %v3741_v29 = vpop.f32.mrf.mxu1  ;;  %v3476_v11 = vpop.f32.mrf.mxu2  ;;  %v10032_v26 = vld [vmem:[#allocation2 + $0x50c] sm:$0xf]  ;;  %v11649_v10 = vsel %vm5901_vm12, %v3564_v23, %v6157_v56 }
 0x3e0   : > { %v3477_v9 = vadd.f32 %v3476_v11, %v11365_v39  ;;  %v9164_v39 = vor.u32 %v10032_v26, %v9161_v53  ;;  %14907 = vst [vmem:[#allocation117_spill] sm:$0xff] %v11649_v10 }
 0x3e1   : > { %v11643_v14 = vadd.f32 %v3741_v29, %v3653_v51  ;;  %3967 = vmatmul.bf16.gmra.mxu0 %v14903_v37  ;;  %v9417_v37 = vld [vmem:[#allocation2 + $0x728] sm:$0xf0] }
 0x3e2   : > { %v3565_v46 = vpop.f32.mrf.mxu3  ;;  %4056 = vmatmul.bf16.gmra.mxu1 %v14904_v16  ;;  %4125 = vmatpush.bf16.msrb.mxu2 %v9164_v39  ;;  %v10096_v16 = vld [vmem:[#allocation2 + $0x70c] sm:$0xf] }
 0x3e3   : > { %14902 = vst [vmem:[#allocation116_spill] sm:$0xff] %v11643_v14  ;;  %v3566_v15 = vadd.f32 %v3565_v46, %v3477_v9  ;;  %v9420_v23 = vor.u32 %v10096_v16, %v9417_v37  ;;  %v14911_v16 = vld [vmem:[#allocation56_spill] sm:$0xff] }
 0x3e4   : > { %3794 = vmatmul.bf16.gmra.mxu2 %v14905_v60 }
 0x3e5   : > { %vm5909_vm13 = vcmp.ge.f32.partialorder %v3566_v15, 0.0  ;;  %v6165_v58 = vmul.f32 0.2, %v3566_v15  ;;  %4214 = vmatpush.bf16.msrb.mxu3 %v9420_v23 }
 0x3e6   : > { %v3654_v59 = vpop.f32.mrf.mxu0 }
 0x3e7   : > { %3883 = vmatmul.bf16.gmra.mxu3 %v14906_v61  ;;  %v11651_v51 = vsel %vm5909_vm13, %v3566_v15, %v6165_v58  ;;  %v3655_v29 = vadd.f32 %v3654_v59, %v11439_v3  ;;  %v3743_v11 = vpop.f32.mrf.mxu1  ;;  %v3479_v9 = vpop.f32.mrf.mxu2 }
 0x3e8   : > { %14908 = vst [vmem:[#allocation118_spill] sm:$0xff] %v11651_v51  ;;  %v3480_v48 = vadd.f32 %v3479_v9, %v11369_v7  ;;  %v14909_v7 = vld [vmem:[#allocation24_spill] sm:$0xff] }
 0x3e9   : > { %v11657_v61 = vadd.f32 %v3743_v11, %v3655_v29  ;;  %v14910_v11 = vld [vmem:[#allocation25_spill] sm:$0xff] }
 0x3ea   : > { %v3568_v60 = vpop.f32.mrf.mxu3 }
 0x3eb   : > { %v3569_v26 = vadd.f32 %v3568_v60, %v3480_v48  ;;  %v14912_v48 = vld [vmem:[#allocation57_spill] sm:$0xff] }
 0x3ed   : > { %v6173_v39 = vmul.f32 0.2, %v3569_v26  ;;  %vm5917_vm14 = vcmp.ge.f32.partialorder %v3569_v26, 0.0 }
 0x3ee   : > { %v3657_v56 = vpop.f32.mrf.mxu0 }
 0x3ef   : > { %v3658_v15 = vadd.f32 %v3657_v56, %v11439_v3  ;;  %v3746_v58 = vpop.f32.mrf.mxu1  ;;  %v3481_v53 = vpop.f32.mrf.mxu2  ;;  %v11667_v9 = vsel %vm5917_vm14, %v3569_v26, %v6173_v39 }
 0x3f0   : > { %v3482_v59 = vadd.f32 %v3481_v53, %v11383_v13  ;;  %14913 = vst [vmem:[#allocation24_spill] sm:$0xff] %v11667_v9  ;;  %v14917_v9 = vld [vmem:[#allocation29_spill] sm:$0xff] }
 0x3f1   : > { %v11661_v46 = vadd.f32 %v3746_v58, %v3658_v15  ;;  %3972 = vmatmul.bf16.gmra.mxu0 %v14909_v7 }
 0x3f2   : > { %v3570_v14 = vpop.f32.mrf.mxu3  ;;  %4061 = vmatmul.bf16.gmra.mxu1 %v14910_v11 }
 0x3f3   : > { %v3571_v29 = vadd.f32 %v3570_v14, %v3482_v59 }
 0x3f4   : > { %3799 = vmatmul.bf16.gmra.mxu2 %v14911_v16  ;;  %v14916_v16 = vld [vmem:[#allocation28_spill] sm:$0xff] }
 0x3f5   : > { %vm5925_vm15 = vcmp.ge.f32.partialorder %v3571_v29, 0.0  ;;  %v6181_v37 = vmul.f32 0.2, %v3571_v29 }
 0x3f6   : > { %v3659_v60 = vpop.f32.mrf.mxu0 }
 0x3f7   : > { %3888 = vmatmul.bf16.gmra.mxu3 %v14912_v48  ;;  %v11669_v13 = vsel %vm5925_vm15, %v3571_v29, %v6181_v37  ;;  %v3660_v23 = vadd.f32 %v3659_v60, %v11439_v3  ;;  %v3748_v56 = vpop.f32.mrf.mxu1  ;;  %v3484_v15 = vpop.f32.mrf.mxu2 }
 0x3f8   : > { %14914 = vst [vmem:[#allocation119_spill] sm:$0xff] %v11669_v13  ;;  %v3485_v58 = vadd.f32 %v3484_v15, %v11387_v43  ;;  %v9129_v15 = vld [vmem:[#allocation2 + $0x4e8] sm:$0xf0] }
 0x3f9   : > { %v11675_v59 = vadd.f32 %v3748_v56, %v3660_v23  ;;  %v14918_v23 = vld [vmem:[#allocation58_spill] sm:$0xff]  ;;  %v14919_v56 = vld [vmem:[#allocation59_spill] sm:$0xff] }
 0x3fa   : > { %v3573_v53 = vpop.f32.mrf.mxu3 }
 0x3fb   : > { %v3574_v10 = vadd.f32 %v3573_v53, %v3485_v58 }
 0x3fd   : > { %v6189_v11 = vmul.f32 0.2, %v3574_v10  ;;  %vm5933_vm1 = vcmp.ge.f32.partialorder %v3574_v10, 0.0 }
 0x3fe   : > { %v3662_v51 = vpop.f32.mrf.mxu0 }
 0x3ff   : > { %v3663_v48 = vadd.f32 %v3662_v51, %v11439_v3  ;;  %v3751_v26 = vpop.f32.mrf.mxu1  ;;  %v3486_v39 = vpop.f32.mrf.mxu2  ;;  %v10024_v51 = vld [vmem:[#allocation2 + $0x4cc] sm:$0xf]  ;;  %v11685_v53 = vsel %vm5933_vm1, %v3574_v10, %v6189_v11 }
 0x400   : > { %v3487_v29 = vadd.f32 %v3486_v39, %v11401_v0  ;;  %v9132_v0 = vor.u32 %v10024_v51, %v9129_v15  ;;  %14920 = vst [vmem:[#allocation121_spill] sm:$0xff] %v11685_v53  ;;  %v8751_v53 = vld [vmem:[#allocation2 + $0x1d0] sm:$0xf] }
 0x401   : > { %v11679_v60 = vadd.f32 %v3751_v26, %v3663_v48  ;;  %3977 = vmatmul.bf16.gmra.mxu0 %v14916_v16  ;;  %v9385_v16 = vld [vmem:[#allocation2 + $0x6e8] sm:$0xf0] }
 0x402   : > { %v3575_v37 = vpop.f32.mrf.mxu3  ;;  %4066 = vmatmul.bf16.gmra.mxu1 %v14917_v9  ;;  %4126 = vmatpush.bf16.msrb.mxu2 %v9132_v0  ;;  %v10088_v9 = vld [vmem:[#allocation2 + $0x6cc] sm:$0xf] }
 0x403   : > { %14915 = vst [vmem:[#allocation120_spill] sm:$0xff] %v11679_v60  ;;  %v3576_v14 = vadd.f32 %v3575_v37, %v3487_v29  ;;  %v9388_v10 = vor.u32 %v10088_v9, %v9385_v16  ;;  %v14923_v9 = vld [vmem:[#allocation61_spill] sm:$0xff] }
 0x404   : > { %3804 = vmatmul.bf16.gmra.mxu2 %v14918_v23 }
 0x405   : > { %vm5941_vm2 = vcmp.ge.f32.partialorder %v3576_v14, 0.0  ;;  %v6197_v43 = vmul.f32 0.2, %v3576_v14  ;;  %4215 = vmatpush.bf16.msrb.mxu3 %v9388_v10 }
 0x406   : > { %v3664_v58 = vpop.f32.mrf.mxu0 }
 0x407   : > { %3893 = vmatmul.bf16.gmra.mxu3 %v14919_v56  ;;  %v11687_v48 = vsel %vm5941_vm2, %v3576_v14, %v6197_v43  ;;  %v3665_v26 = vadd.f32 %v3664_v58, %v11439_v3  ;;  %v3753_v39 = vpop.f32.mrf.mxu1  ;;  %v3489_v29 = vpop.f32.mrf.mxu2 }
 0x408   : > { %14921 = vst [vmem:[#allocation122_spill] sm:$0xff] %v11687_v48  ;;  %v3490_v13 = vadd.f32 %v3489_v29, %v11405_v21  ;;  %v9933_v48 = vld [vmem:[#allocation2 + $0x1ec] sm:$0xf0] }
 0x409   : > { %v11693_v56 = vadd.f32 %v3753_v39, %v3665_v26  ;;  %v14922_v26 = vld [vmem:[#allocation33_spill] sm:$0xff] }
 0x40a   : > { %v3578_v23 = vpop.f32.mrf.mxu3 }
 0x40b   : > { %v3579_v51 = vadd.f32 %v3578_v23, %v3490_v13  ;;  %v14924_v13 = vld [vmem:[#allocation62_spill] sm:$0xff] }
 0x40d   : > { %v6205_v21 = vmul.f32 0.2, %v3579_v51  ;;  %vm5949_vm0 = vcmp.ge.f32.partialorder %v3579_v51, 0.0 }
 0x40e   : > { %v3667_v11 = vpop.f32.mrf.mxu0 }
 0x40f   : > { %v3668_v14 = vadd.f32 %v3667_v11, %v11439_v3  ;;  %v3756_v43 = vpop.f32.mrf.mxu1  ;;  %v3491_v15 = vpop.f32.mrf.mxu2  ;;  %v11703_v39 = vsel %vm5949_vm0, %v3579_v51, %v6205_v21  ;;  %v8752_v51 = vor.u32 %v9933_v48, %v8751_v53  ;;  %v14927_v53 = vld [vmem:[#allocation64_spill] sm:$0xff]  ;;  %v10016_v48 = vld [vmem:[#allocation2 + $0x48c] sm:$0xf] }
 0x410   : > { %v3492_v58 = vadd.f32 %v3491_v15, %v11419_v24  ;;  %14925 = vst [vmem:[#allocation123_spill] sm:$0xff] %v11703_v39  ;;  %v10080_v39 = vld [vmem:[#allocation2 + $0x68c] sm:$0xf] }
 0x411   : > { %v11697_v37 = vadd.f32 %v3756_v43, %v3668_v14  ;;  %3982 = vmatmul.bf16.gmra.mxu0 %v14833_v25 }
 0x412   : > { %v3580_v60 = vpop.f32.mrf.mxu3  ;;  %4071 = vmatmul.bf16.gmra.mxu1 %v14922_v26  ;;  %4300 = vmatpush.bf16.msrb.mxu0 %v8752_v51 }
 0x413   : > { %v3581_v0 = vadd.f32 %v3580_v60, %v3492_v58 }
 0x414   : > { %3809 = vmatmul.bf16.gmra.mxu2 %v14923_v9 }
 0x415   : > { %vm5957_vm3 = vcmp.ge.f32.partialorder %v3581_v0, 0.0  ;;  %v6213_v16 = vmul.f32 0.2, %v3581_v0 }
 0x416   : > { %v3669_v23 = vpop.f32.mrf.mxu0 }
 0x417   : > { %3898 = vmatmul.bf16.gmra.mxu3 %v14924_v13  ;;  %v11705_v24 = vsel %vm5957_vm3, %v3581_v0, %v6213_v16  ;;  %v3670_v29 = vadd.f32 %v3669_v23, %v11439_v3  ;;  %v3758_v10 = vpop.f32.mrf.mxu1  ;;  %v3494_v11 = vpop.f32.mrf.mxu2 }
 0x418   : > { %14926 = vst [vmem:[#allocation124_spill] sm:$0xff] %v11705_v24  ;;  %v3495_v14 = vadd.f32 %v3494_v11, %v11423_v44  ;;  %v9353_v24 = vld [vmem:[#allocation2 + $0x6a8] sm:$0xf0] }
 0x419   : > { %v11711_v15 = vadd.f32 %v3758_v10, %v3670_v29 }
 0x41a   : > { %v3583_v43 = vpop.f32.mrf.mxu3 }
 0x41b   : > { %v3584_v58 = vadd.f32 %v3583_v43, %v3495_v14 }
 0x41d   : > { %v6221_v44 = vmul.f32 0.2, %v3584_v58  ;;  %vm5965_vm4 = vcmp.ge.f32.partialorder %v3584_v58, 0.0 }
 0x41e   : > { %v3672_v13 = vpop.f32.mrf.mxu0 }
 0x41f   : > { %v3673_v21 = vadd.f32 %v3672_v13, %v11439_v3  ;;  %v3761_v0 = vpop.f32.mrf.mxu1  ;;  %v3496_v16 = vpop.f32.mrf.mxu2  ;;  %v9097_v13 = vld [vmem:[#allocation2 + $0x4a8] sm:$0xf0]  ;;  %v11721_v14 = vsel %vm5965_vm4, %v3584_v58, %v6221_v44  ;;  %v9356_v58 = vor.u32 %v10080_v39, %v9353_v24  ;;  %v10251_v44 = vld [vmem:[#allocation4 + $0x4] sm:$0xff] }
 0x420   : > { %v3497_v23 = vadd.f32 %v3496_v16, %v11437_v12  ;;  %v9100_v11 = vor.u32 %v10016_v48, %v9097_v13  ;;  %14928 = vst [vmem:[#allocation64_spill] sm:$0xff] %v11721_v14  ;;  %v14930_v24 = vld [vmem:[#allocation67_spill] sm:$0xff]  ;;  %v8719_v14 = vld [vmem:[#allocation2 + $0x190] sm:$0xf] }
 0x421   : > { %v11715_v26 = vadd.f32 %v3761_v0, %v3673_v21  ;;  %3987 = vmatmul.bf16.gmra.mxu0 %v14838_v55  ;;  %4216 = vmatpush.bf16.msrb.mxu3 %v9356_v58 }
 0x422   : > { %v3585_v9 = vpop.f32.mrf.mxu3  ;;  %4076 = vmatmul.bf16.gmra.mxu1 %v14839_v19  ;;  %4127 = vmatpush.bf16.msrb.mxu2 %v9100_v11 }
 0x423   : > { %v3586_v29 = vadd.f32 %v3585_v9, %v3497_v23 }
 0x424   : > { %3814 = vmatmul.bf16.gmra.mxu2 %v11012_v27 }
 0x425   : > { %vm5973_vm5 = vcmp.ge.f32.partialorder %v3586_v29, 0.0  ;;  %v6229_v10 = vmul.f32 0.2, %v3586_v29 }
 0x426   : > { %v3674_v12 = vpop.f32.mrf.mxu0 }
 0x427   : > { %3903 = vmatmul.bf16.gmra.mxu3 %v14927_v53  ;;  %v11723_v43 = vsel %vm5973_vm5, %v3586_v29, %v6229_v10  ;;  %v3675_v51 = vadd.f32 %v3674_v12, %v11439_v3  ;;  %v3763_v9 = vpop.f32.mrf.mxu1  ;;  %v3775_v21 = vpop.f32.mrf.mxu2  ;;  %v11731_v29 = vperm.slane %v10251_v44, 3 }
 0x428   : > { %14929 = vst [vmem:[#allocation125_spill] sm:$0xff] %v11723_v43  ;;  %v3776_v16 = vadd.f32 %v3775_v21, %v11443_v6  ;;  %v9925_v43 = vld [vmem:[#allocation2 + $0x1ac] sm:$0xf0] }
 0x429   : > { %v11729_v60 = vadd.f32 %v3763_v9, %v3675_v51 }
 0x42a   : > { %v3864_v23 = vpop.f32.mrf.mxu3 }
 0x42b   : > { %v3865_v48 = vadd.f32 %v3864_v23, %v3776_v16 }
 0x42d   : > { %v5982_v11 = vmul.f32 0.2, %v3865_v48  ;;  %vm5726_vm6 = vcmp.ge.f32.partialorder %v3865_v48, 0.0 }
 0x42e   : > { %v3953_v3 = vpop.f32.mrf.mxu0 }
 0x42f   : > { %v3954_v10 = vadd.f32 %v3953_v3, %v11731_v29  ;;  %v4042_v13 = vpop.f32.mrf.mxu1  ;;  %v3777_v12 = vpop.f32.mrf.mxu2  ;;  %v11741_v9 = vsel %vm5726_vm6, %v3865_v48, %v5982_v11  ;;  %v14933_v3 = vld [vmem:[#allocation86_spill] sm:$0xff]  ;;  %v8720_v11 = vor.u32 %v9925_v43, %v8719_v14  ;;  %v14937_v14 = vld [vmem:[#allocation69_spill] sm:$0xff] }
 0x430   : > { %v3778_v0 = vadd.f32 %v3777_v12, %v11457_v35  ;;  %14931 = vst [vmem:[#allocation126_spill] sm:$0xff] %v11741_v9  ;;  %v14938_v43 = vld [vmem:[#allocation70_spill] sm:$0xff] }
 0x431   : > { %v11735_v21 = vadd.f32 %v4042_v13, %v3954_v10  ;;  %3992 = vmatmul.bf16.gmra.mxu0 %v10675_v28 }
 0x432   : > { %v3866_v6 = vpop.f32.mrf.mxu3  ;;  %4081 = vmatmul.bf16.gmra.mxu1 %v10680_v31  ;;  %4301 = vmatpush.bf16.msrb.mxu0 %v8720_v11 }
 0x433   : > { %v3867_v51 = vadd.f32 %v3866_v6, %v3778_v0 }
 0x434   : > { %3819 = vmatmul.bf16.gmra.mxu2 %v11030_v32 }
 0x435   : > { %vm5734_vm7 = vcmp.ge.f32.partialorder %v3867_v51, 0.0  ;;  %v5990_v39 = vmul.f32 0.2, %v3867_v51 }
 0x436   : > { %v3955_v35 = vpop.f32.mrf.mxu0 }
 0x437   : > { %3908 = vmatmul.bf16.gmra.mxu3 %v14930_v24  ;;  %v11743_v16 = vsel %vm5734_vm7, %v3867_v51, %v5990_v39  ;;  %v3956_v58 = vadd.f32 %v3955_v35, %v11731_v29  ;;  %v4044_v0 = vpop.f32.mrf.mxu1  ;;  %v3780_v44 = vpop.f32.mrf.mxu2 }
 0x438   : > { %14932 = vst [vmem:[#allocation127_spill] sm:$0xff] %v11743_v16  ;;  %v3781_v10 = vadd.f32 %v3780_v44, %v14933_v3  ;;  %v14935_v16 = vld [vmem:[#allocation14_spill] sm:$0xff] }
 0x439   : > { %v11749_v12 = vadd.f32 %v4044_v0, %v3956_v58  ;;  %v14936_v0 = vld [vmem:[#allocation15_spill] sm:$0xff] }
 0x43a   : > { %v3869_v13 = vpop.f32.mrf.mxu3 }
 0x43b   : > { %v3870_v6 = vadd.f32 %v3869_v13, %v3781_v10  ;;  %v10008_v10 = vld [vmem:[#allocation2 + $0x44c] sm:$0xf] }
 0x43c   : > { %v9065_v13 = vld [vmem:[#allocation2 + $0x468] sm:$0xf0] }
 0x43d   : > { %v5998_v44 = vmul.f32 0.2, %v3870_v6  ;;  %vm5742_vm8 = vcmp.ge.f32.partialorder %v3870_v6, 0.0 }
 0x43e   : > { %v3958_v48 = vpop.f32.mrf.mxu0 }
 0x43f   : > { %v3959_v51 = vadd.f32 %v3958_v48, %v11731_v29  ;;  %v4047_v39 = vpop.f32.mrf.mxu1  ;;  %v3782_v24 = vpop.f32.mrf.mxu2  ;;  %v11759_v48 = vsel %vm5742_vm8, %v3870_v6, %v5998_v44 }
 0x440   : > { %v3783_v23 = vadd.f32 %v3782_v24, %v11475_v49  ;;  %v9068_v24 = vor.u32 %v10008_v10, %v9065_v13  ;;  %14939 = vst [vmem:[#allocation128_spill] sm:$0xff] %v11759_v48 }
 0x441   : > { %v11753_v35 = vadd.f32 %v4047_v39, %v3959_v51  ;;  %3997 = vmatmul.bf16.gmra.mxu0 %v14935_v16  ;;  %v10072_v16 = vld [vmem:[#allocation2 + $0x64c] sm:$0xf] }
 0x442   : > { %v3871_v9 = vpop.f32.mrf.mxu3  ;;  %4086 = vmatmul.bf16.gmra.mxu1 %v14936_v0  ;;  %4128 = vmatpush.bf16.msrb.mxu2 %v9068_v24 }
 0x443   : > { %14934 = vst [vmem:[#allocation86_spill] sm:$0xff] %v11753_v35  ;;  %v3872_v58 = vadd.f32 %v3871_v9, %v3783_v23  ;;  %v9321_v35 = vld [vmem:[#allocation2 + $0x668] sm:$0xf0] }
 0x444   : > { %3824 = vmatmul.bf16.gmra.mxu2 %v14937_v14  ;;  %v9324_v6 = vor.u32 %v10072_v16, %v9321_v35  ;;  %v14943_v35 = vld [vmem:[#allocation72_spill] sm:$0xff] }
 0x445   : > { %vm5750_vm9 = vcmp.ge.f32.partialorder %v3872_v58, 0.0  ;;  %v6006_v3 = vmul.f32 0.2, %v3872_v58 }
 0x446   : > { %v3960_v49 = vpop.f32.mrf.mxu0  ;;  %4217 = vmatpush.bf16.msrb.mxu3 %v9324_v6 }
 0x447   : > { %3913 = vmatmul.bf16.gmra.mxu3 %v14938_v43  ;;  %v11761_v11 = vsel %vm5750_vm9, %v3872_v58, %v6006_v3  ;;  %v3961_v51 = vadd.f32 %v3960_v49, %v11731_v29  ;;  %v4049_v9 = vpop.f32.mrf.mxu1  ;;  %v3785_v23 = vpop.f32.mrf.mxu2 }
 0x448   : > { %14940 = vst [vmem:[#allocation129_spill] sm:$0xff] %v11761_v11  ;;  %v3786_v0 = vadd.f32 %v3785_v23, %v11479_v17  ;;  %v14941_v17 = vld [vmem:[#allocation18_spill] sm:$0xff]  ;;  %v8687_v11 = vld [vmem:[#allocation2 + $0x150] sm:$0xf] }
 0x449   : > { %v11767_v43 = vadd.f32 %v4049_v9, %v3961_v51  ;;  %v14942_v9 = vld [vmem:[#allocation19_spill] sm:$0xff] }
 0x44a   : > { %v3874_v14 = vpop.f32.mrf.mxu3 }
 0x44b   : > { %v3875_v10 = vadd.f32 %v3874_v14, %v3786_v0  ;;  %v14944_v0 = vld [vmem:[#allocation73_spill] sm:$0xff] }
 0x44d   : > { %v6014_v24 = vmul.f32 0.2, %v3875_v10  ;;  %vm5758_vm10 = vcmp.ge.f32.partialorder %v3875_v10, 0.0 }
 0x44e   : > { %v3963_v44 = vpop.f32.mrf.mxu0 }
 0x44f   : > { %v3964_v58 = vadd.f32 %v3963_v44, %v11731_v29  ;;  %v4052_v3 = vpop.f32.mrf.mxu1  ;;  %v3787_v13 = vpop.f32.mrf.mxu2  ;;  %v11777_v23 = vsel %vm5758_vm10, %v3875_v10, %v6014_v24 }
 0x450   : > { %v3788_v49 = vadd.f32 %v3787_v13, %v11493_v38  ;;  %14945 = vst [vmem:[#allocation130_spill] sm:$0xff] %v11777_v23  ;;  %v14954_v23 = vld [vmem:[#allocation104_spill] sm:$0xff] }
 0x451   : > { %v11771_v39 = vadd.f32 %v4052_v3, %v3964_v58  ;;  %4002 = vmatmul.bf16.gmra.mxu0 %v14941_v17 }
 0x452   : > { %v3876_v32 = vpop.f32.mrf.mxu3  ;;  %4091 = vmatmul.bf16.gmra.mxu1 %v14942_v9 }
 0x453   : > { %v3877_v51 = vadd.f32 %v3876_v32, %v3788_v49  ;;  %v14948_v32 = vld [vmem:[#allocation22_spill] sm:$0xff] }
 0x454   : > { %3829 = vmatmul.bf16.gmra.mxu2 %v14943_v35 }
 0x455   : > { %vm5766_vm11 = vcmp.ge.f32.partialorder %v3877_v51, 0.0  ;;  %v6022_v16 = vmul.f32 0.2, %v3877_v51 }
 0x456   : > { %v3965_v14 = vpop.f32.mrf.mxu0 }
 0x457   : > { %3918 = vmatmul.bf16.gmra.mxu3 %v14944_v0  ;;  %v11779_v38 = vsel %vm5766_vm11, %v3877_v51, %v6022_v16  ;;  %v3966_v6 = vadd.f32 %v3965_v14, %v11731_v29  ;;  %v4054_v44 = vpop.f32.mrf.mxu1  ;;  %v3790_v58 = vpop.f32.mrf.mxu2  ;;  %v9917_v0 = vld [vmem:[#allocation2 + $0x16c] sm:$0xf0] }
 0x458   : > { %14946 = vst [vmem:[#allocation131_spill] sm:$0xff] %v11779_v38  ;;  %v3791_v3 = vadd.f32 %v3790_v58, %v11497_v50  ;;  %v8688_v10 = vor.u32 %v9917_v0, %v8687_v11  ;;  %v14950_v11 = vld [vmem:[#allocation75_spill] sm:$0xff] }
 0x459   : > { %v11785_v49 = vadd.f32 %v4054_v44, %v3966_v6  ;;  %v14949_v44 = vld [vmem:[#allocation23_spill] sm:$0xff] }
 0x45a   : > { %v3879_v13 = vpop.f32.mrf.mxu3  ;;  %4302 = vmatpush.bf16.msrb.mxu0 %v8688_v10  ;;  %v10000_v0 = vld [vmem:[#allocation2 + $0x40c] sm:$0xf] }
 0x45b   : > { %v3880_v48 = vadd.f32 %v3879_v13, %v3791_v3  ;;  %v9033_v3 = vld [vmem:[#allocation2 + $0x428] sm:$0xf0] }
 0x45c   : > { %v9036_v13 = vor.u32 %v10000_v0, %v9033_v3 }
 0x45d   : > { %v6030_v50 = vmul.f32 0.2, %v3880_v48  ;;  %vm5774_vm12 = vcmp.ge.f32.partialorder %v3880_v48, 0.0 }
 0x45e   : > { %v3968_v35 = vpop.f32.mrf.mxu0  ;;  %4129 = vmatpush.bf16.msrb.mxu2 %v9036_v13  ;;  %v14956_v13 = vld [vmem:[#allocation26_spill] sm:$0xff] }
 0x45f   : > { %v3969_v24 = vadd.f32 %v3968_v35, %v11731_v29  ;;  %v4057_v51 = vpop.f32.mrf.mxu1  ;;  %v3792_v16 = vpop.f32.mrf.mxu2  ;;  %v14951_v35 = vld [vmem:[#allocation76_spill] sm:$0xff]  ;;  %v11795_v10 = vsel %vm5774_vm12, %v3880_v48, %v6030_v50 }
 0x460   : > { %v3793_v14 = vadd.f32 %v3792_v16, %v11511_v63  ;;  %14952 = vst [vmem:[#allocation133_spill] sm:$0xff] %v11795_v10  ;;  %v9997_v10 = vld [vmem:[#allocation2 + $0x3ec] sm:$0xf0] }
 0x461   : > { %v11789_v17 = vadd.f32 %v4057_v51, %v3969_v24  ;;  %4007 = vmatmul.bf16.gmra.mxu0 %v14948_v32  ;;  %v9289_v32 = vld [vmem:[#allocation2 + $0x628] sm:$0xf0] }
 0x462   : > { %v3881_v9 = vpop.f32.mrf.mxu3  ;;  %4096 = vmatmul.bf16.gmra.mxu1 %v14949_v44  ;;  %v10064_v44 = vld [vmem:[#allocation2 + $0x60c] sm:$0xf] }
 0x463   : > { %14947 = vst [vmem:[#allocation132_spill] sm:$0xff] %v11789_v17  ;;  %v3882_v6 = vadd.f32 %v3881_v9, %v3793_v14  ;;  %v9292_v48 = vor.u32 %v10064_v44, %v9289_v32  ;;  %v9007_v14 = vld [vmem:[#allocation2 + $0x3d0] sm:$0xf]  ;;  %v14958_v44 = vld [vmem:[#allocation78_spill] sm:$0xff] }
 0x464   : > { %3834 = vmatmul.bf16.gmra.mxu2 %v14950_v11 }
 0x465   : > { %vm5782_vm13 = vcmp.ge.f32.partialorder %v3882_v6, 0.0  ;;  %v6038_v58 = vmul.f32 0.2, %v3882_v6  ;;  %4218 = vmatpush.bf16.msrb.mxu3 %v9292_v48  ;;  %v9989_v48 = vld [vmem:[#allocation2 + $0x3ac] sm:$0xf0] }
 0x466   : > { %v3970_v63 = vpop.f32.mrf.mxu0 }
 0x467   : > { %3923 = vmatmul.bf16.gmra.mxu3 %v14951_v35  ;;  %v11797_v24 = vsel %vm5782_vm13, %v3882_v6, %v6038_v58  ;;  %v3971_v51 = vadd.f32 %v3970_v63, %v11731_v29  ;;  %v4059_v9 = vpop.f32.mrf.mxu1  ;;  %v3795_v16 = vpop.f32.mrf.mxu2 }
 0x468   : > { %14953 = vst [vmem:[#allocation134_spill] sm:$0xff] %v11797_v24  ;;  %v3796_v38 = vadd.f32 %v3795_v16, %v14954_v23 }
 0x469   : > { %v11803_v35 = vadd.f32 %v4059_v9, %v3971_v51  ;;  %v9008_v51 = vor.u32 %v9997_v10, %v9007_v14 }
 0x46a   : > { %v3884_v11 = vpop.f32.mrf.mxu3 }
 0x46b   : > { %v3885_v0 = vadd.f32 %v3884_v11, %v3796_v38  ;;  %v14957_v38 = vld [vmem:[#allocation27_spill] sm:$0xff]  ;;  %4389 = vmatpush.bf16.msrb.mxu1 %v9008_v51  ;;  %v8975_v11 = vld [vmem:[#allocation2 + $0x390] sm:$0xf] }
 0x46d   : > { %v6046_v9 = vmul.f32 0.2, %v3885_v0  ;;  %vm5790_vm14 = vcmp.ge.f32.partialorder %v3885_v0, 0.0 }
 0x46e   : > { %v3973_v50 = vpop.f32.mrf.mxu0 }
 0x46f   : > { %v3974_v6 = vadd.f32 %v3973_v50, %v11731_v29  ;;  %v4062_v58 = vpop.f32.mrf.mxu1  ;;  %v3797_v3 = vpop.f32.mrf.mxu2 }
 0x470   : > { %v3798_v63 = vadd.f32 %v3797_v3, %v11529_v52  ;;  %v14959_v52 = vld [vmem:[#allocation79_spill] sm:$0xff] }
 0x471   : > { %v11807_v23 = vadd.f32 %v4062_v58, %v3974_v6  ;;  %4012 = vmatmul.bf16.gmra.mxu0 %v14956_v13  ;;  %v8976_v6 = vor.u32 %v9989_v48, %v8975_v11  ;;  %v11813_v58 = vsel %vm5790_vm14, %v3885_v0, %v6046_v9  ;;  %v8655_v9 = vld [vmem:[#allocation2 + $0x110] sm:$0xf] }
 0x472   : > { %v3886_v17 = vpop.f32.mrf.mxu3  ;;  %4101 = vmatmul.bf16.gmra.mxu1 %v14957_v38  ;;  %14960 = vst [vmem:[#allocation135_spill] sm:$0xff] %v11813_v58  ;;  %v9973_v48 = vld [vmem:[#allocation2 + $0x32c] sm:$0xf0] }
 0x473   : > { %14955 = vst [vmem:[#allocation104_spill] sm:$0xff] %v11807_v23  ;;  %v3887_v16 = vadd.f32 %v3886_v17, %v3798_v63  ;;  %4390 = vmatpush.bf16.msrb.mxu1 %v8976_v6 }
 0x474   : > { %3839 = vmatmul.bf16.gmra.mxu2 %v14958_v44  ;;  %v8943_v44 = vld [vmem:[#allocation2 + $0x350] sm:$0xf] }
 0x475   : > { %vm5798_vm15 = vcmp.ge.f32.partialorder %v3887_v16, 0.0  ;;  %v6054_v32 = vmul.f32 0.2, %v3887_v16 }
 0x476   : > { %v3975_v50 = vpop.f32.mrf.mxu0 }
 0x477   : > { %3928 = vmatmul.bf16.gmra.mxu3 %v14959_v52  ;;  %v11815_v3 = vsel %vm5798_vm15, %v3887_v16, %v6054_v32  ;;  %v3976_v17 = vadd.f32 %v3975_v50, %v11731_v29  ;;  %v4064_v10 = vpop.f32.mrf.mxu1  ;;  %v3800_v14 = vpop.f32.mrf.mxu2  ;;  %v9981_v52 = vld [vmem:[#allocation2 + $0x36c] sm:$0xf0] }
 0x478   : > { %14961 = vst [vmem:[#allocation136_spill] sm:$0xff] %v11815_v3  ;;  %v3801_v51 = vadd.f32 %v3800_v14, %v11533_v57  ;;  %v8944_v11 = vor.u32 %v9981_v52, %v8943_v44  ;;  %v9909_v16 = vld [vmem:[#allocation2 + $0x12c] sm:$0xf0] }
 0x479   : > { %v11821_v38 = vadd.f32 %v4064_v10, %v3976_v17  ;;  %v8911_v32 = vld [vmem:[#allocation2 + $0x310] sm:$0xf]  ;;  %v8656_v13 = vor.u32 %v9909_v16, %v8655_v9  ;;  %v14963_v10 = vld [vmem:[#allocation30_spill] sm:$0xff] }
 0x47a   : > { %v3889_v24 = vpop.f32.mrf.mxu3  ;;  %4391 = vmatpush.bf16.msrb.mxu1 %v8944_v11  ;;  %v8912_v23 = vor.u32 %v9973_v48, %v8911_v32  ;;  %v8623_v17 = vld [vmem:[#allocation2 + $0xd0] sm:$0xf]  ;;  %v14964_v32 = vld [vmem:[#allocation31_spill] sm:$0xff] }
 0x47b   : > { %v3890_v0 = vadd.f32 %v3889_v24, %v3801_v51  ;;  %4303 = vmatpush.bf16.msrb.mxu0 %v8656_v13  ;;  %v9901_v44 = vld [vmem:[#allocation2 + $0xec] sm:$0xf0]  ;;  %v14966_v13 = vld [vmem:[#allocation82_spill] sm:$0xff] }
 0x47c   : > { %v8879_v24 = vld [vmem:[#allocation2 + $0x2d0] sm:$0xf]  ;;  %v8624_v51 = vor.u32 %v9901_v44, %v8623_v17 }
 0x47d   : > { %v9965_v11 = vld [vmem:[#allocation2 + $0x2ec] sm:$0xf0]  ;;  %v6062_v9 = vmul.f32 0.2, %v3890_v0  ;;  %vm5806_vm1 = vcmp.ge.f32.partialorder %v3890_v0, 0.0 }
 0x47e   : > { %v3978_v50 = vpop.f32.mrf.mxu0  ;;  %4392 = vmatpush.bf16.msrb.mxu1 %v8912_v23  ;;  %v8880_v48 = vor.u32 %v9965_v11, %v8879_v24  ;;  %v8591_v23 = vld [vmem:[#allocation2 + $0x90] sm:$0xf] }
 0x47f   : > { %v3979_v63 = vadd.f32 %v3978_v50, %v11731_v29  ;;  %v4067_v58 = vpop.f32.mrf.mxu1  ;;  %v3802_v57 = vpop.f32.mrf.mxu2  ;;  %v14965_v50 = vld [vmem:[#allocation81_spill] sm:$0xff]  ;;  %4304 = vmatpush.bf16.msrb.mxu0 %v8624_v51  ;;  %v11832_v24 = vsel %vm5806_vm1, %v3890_v0, %v6062_v9  ;;  %v8815_v0 = vld [vmem:[#allocation2 + $0x250] sm:$0xf] }
 0x480   : > { %v3803_v6 = vadd.f32 %v3802_v57, %v11549_v36  ;;  %v9893_v57 = vld [vmem:[#allocation2 + $0xac] sm:$0xf0]  ;;  %14967 = vst [vmem:[#allocation138_spill] sm:$0xff] %v11832_v24 }
 0x481   : > { %v11825_v52 = vadd.f32 %v4067_v58, %v3979_v63  ;;  %4017 = vmatmul.bf16.gmra.mxu0 %v14963_v10  ;;  %v9263_v58 = vld [vmem:[#allocation2 + $0x5d0] sm:$0xf]  ;;  %v8592_v3 = vor.u32 %v9893_v57, %v8591_v23 }
 0x482   : > { %v3891_v14 = vpop.f32.mrf.mxu3  ;;  %4106 = vmatmul.bf16.gmra.mxu1 %v14964_v32  ;;  %v10061_v63 = vld [vmem:[#allocation2 + $0x5ec] sm:$0xf0] }
 0x483   : > { %14962 = vst [vmem:[#allocation137_spill] sm:$0xff] %v11825_v52  ;;  %v3892_v16 = vadd.f32 %v3891_v14, %v3803_v6  ;;  %4393 = vmatpush.bf16.msrb.mxu1 %v8880_v48  ;;  %v9264_v44 = vor.u32 %v10061_v63, %v9263_v58  ;;  %v8847_v6 = vld [vmem:[#allocation2 + $0x290] sm:$0xf]  ;;  %4305 = vmatpush.bf16.msrb.mxu0 %v8592_v3 }
 0x484   : > { %3844 = vmatmul.bf16.gmra.mxu2 %v14965_v50  ;;  %v9957_v14 = vld [vmem:[#allocation2 + $0x2ac] sm:$0xf0] }
 0x485   : > { %vm5814_vm2 = vcmp.ge.f32.partialorder %v3892_v16, 0.0  ;;  %v6070_v36 = vmul.f32 0.2, %v3892_v16  ;;  %4478 = vmatpush.bf16.msra.mxu2 %v9264_v44  ;;  %v8559_v23 = vld [vmem:[#allocation2 + $0x50] sm:$0xf] }
 0x486   : > { %v3980_v17 = vpop.f32.mrf.mxu0  ;;  %v9885_v63 = vld [vmem:[#allocation2 + $0x6c] sm:$0xf0] }
 0x487   : > { %3933 = vmatmul.bf16.gmra.mxu3 %v14966_v13  ;;  %v11835_v11 = vsel %vm5814_vm2, %v3892_v16, %v6070_v36  ;;  %v3981_v51 = vadd.f32 %v3980_v17, %v11731_v29  ;;  %v4069_v50 = vpop.f32.mrf.mxu1  ;;  %v3805_v32 = vpop.f32.mrf.mxu2  ;;  %v8848_v13 = vor.u32 %v9957_v14, %v8847_v6  ;;  %v9519_v16 = vld [vmem:[#allocation2 + $0x7d0] sm:$0xf]  ;;  %v8560_v57 = vor.u32 %v9885_v63, %v8559_v23 }
 0x488   : > { %14968 = vst [vmem:[#allocation139_spill] sm:$0xff] %v11835_v11  ;;  %v3806_v10 = vadd.f32 %v3805_v32, %v11553_v47  ;;  %v10125_v36 = vld [vmem:[#allocation2 + $0x7ec] sm:$0xf0] }
 0x489   : > { %v11841_v9 = vadd.f32 %v4069_v50, %v3981_v51  ;;  %4394 = vmatpush.bf16.msrb.mxu1 %v8848_v13  ;;  %v9949_v17 = vld [vmem:[#allocation2 + $0x26c] sm:$0xf0]  ;;  %v9520_v6 = vor.u32 %v10125_v36, %v9519_v16  ;;  %4306 = vmatpush.bf16.msrb.mxu0 %v8560_v57 }
 0x48a   : > { %v3894_v58 = vpop.f32.mrf.mxu3  ;;  %v8816_v14 = vor.u32 %v9949_v17, %v8815_v0  ;;  %v8527_v48 = vld [vmem:[#allocation2 + $0x10] sm:$0xf] }
 0x48b   : > { %v3895_v52 = vadd.f32 %v3894_v58, %v3806_v10  ;;  %4567 = vmatpush.bf16.msra.mxu3 %v9520_v6  ;;  %v9877_v47 = vld [vmem:[#allocation2 + $0x2c] sm:$0xf0] }
 0x48c   : > { %v8783_v32 = vld [vmem:[#allocation2 + $0x210] sm:$0xf]  ;;  %v8528_v24 = vor.u32 %v9877_v47, %v8527_v48 }
 0x48d   : > { %4395 = vmatpush.bf16.msrb.mxu1 %v8816_v14  ;;  %v9941_v3 = vld [vmem:[#allocation2 + $0x22c] sm:$0xf0]  ;;  %v6078_v58 = vmul.f32 0.2, %v3895_v52  ;;  %vm5822_vm0 = vcmp.ge.f32.partialorder %v3895_v52, 0.0 }
 0x48e   : > { %v3983_v44 = vpop.f32.mrf.mxu0  ;;  %v8784_v11 = vor.u32 %v9941_v3, %v8783_v32  ;;  %4307 = vmatpush.bf16.msrb.mxu0 %v8528_v24  ;;  %v10117_v17 = vld [vmem:[#allocation2 + $0x7ac] sm:$0xf0] }
 0x48f   : > { %v3984_v50 = vadd.f32 %v3983_v44, %v11731_v29  ;;  %v4072_v13 = vpop.f32.mrf.mxu1  ;;  %v3807_v51 = vpop.f32.mrf.mxu2 }
 0x490   : > { %v3808_v23 = vadd.f32 %v3807_v51, %v11567_v30  ;;  %v11851_v30 = vsel %vm5822_vm0, %v3895_v52, %v6078_v58 }
 0x491   : > { %v11845_v10 = vadd.f32 %v4072_v13, %v3984_v50  ;;  %4022 = vmatmul.bf16.gmra.mxu0 %v10807_v2  ;;  %4396 = vmatpush.bf16.msrb.mxu1 %v8784_v11  ;;  %14969 = vst [vmem:[#allocation140_spill] sm:$0xff] %v11851_v30 }
 0x492   : > { %v3896_v63 = vpop.f32.mrf.mxu3  ;;  %4111 = vmatmul.bf16.gmra.mxu1 %v14788_v1 }
 0x493   : > { %v3897_v0 = vadd.f32 %v3896_v63, %v3808_v23 }
 0x494   : > { %3849 = vmatmul.bf16.gmra.mxu2 %v11138_v8 }
 0x495   : > { %vm5830_vm3 = vcmp.ge.f32.partialorder %v3897_v0, 0.0  ;;  %v6086_v48 = vmul.f32 0.2, %v3897_v0 }
 0x496   : > { %v3985_v16 = vpop.f32.mrf.mxu0 }
 0x497   : > { %3938 = vmatmul.bf16.gmra.mxu3 %v11141_v20  ;;  %v11853_v24 = vsel %vm5830_vm3, %v3897_v0, %v6086_v48  ;;  %v3986_v36 = vadd.f32 %v3985_v16, %v11731_v29  ;;  %v4074_v57 = vpop.f32.mrf.mxu1  ;;  %v3810_v11 = vpop.f32.mrf.mxu2  ;;  %v14971_v0 = vld [vmem:[#allocation40_spill] sm:$0xff] }
 0x498   : > { %14970 = vst [vmem:[#allocation141_spill] sm:$0xff] %v11853_v24  ;;  %v3811_v6 = vadd.f32 %v3810_v11, %v11571_v62  ;;  %v9231_v48 = vld [vmem:[#allocation2 + $0x590] sm:$0xf] }
 0x499   : > { %v11859_v47 = vadd.f32 %v4074_v57, %v3986_v36  ;;  %v10053_v16 = vld [vmem:[#allocation2 + $0x5ac] sm:$0xf0] }
 0x49a   : > { %v3899_v14 = vpop.f32.mrf.mxu3 }
 0x49b   : > { %v3900_v32 = vadd.f32 %v3899_v14, %v3811_v6 }
 0x49d   : > { %v6094_v63 = vmul.f32 0.2, %v3900_v32  ;;  %vm5838_vm4 = vcmp.ge.f32.partialorder %v3900_v32, 0.0 }
 0x49e   : > { %v3988_v3 = vpop.f32.mrf.mxu0 }
 0x49f   : > { %v3989_v44 = vadd.f32 %v3988_v3, %v11731_v29  ;;  %v4077_v52 = vpop.f32.mrf.mxu1  ;;  %v3812_v50 = vpop.f32.mrf.mxu2  ;;  %v11869_v57 = vsel %vm5838_vm4, %v3900_v32, %v6094_v63 }
 0x4a0   : > { %v3813_v13 = vadd.f32 %v3812_v50, %v11585_v45  ;;  %v9232_v45 = vor.u32 %v10053_v16, %v9231_v48  ;;  %14972 = vst [vmem:[#allocation40_spill] sm:$0xff] %v11869_v57 }
 0x4a1   : > { %v11863_v23 = vadd.f32 %v4077_v52, %v3989_v44  ;;  %4027 = vmatmul.bf16.gmra.mxu0 %v14792_v34 }
 0x4a2   : > { %v3901_v51 = vpop.f32.mrf.mxu3  ;;  %4116 = vmatmul.bf16.gmra.mxu1 %v14878_v42  ;;  %4479 = vmatpush.bf16.msra.mxu2 %v9232_v45 }
 0x4a3   : > { %v3902_v58 = vadd.f32 %v3901_v51, %v3813_v13  ;;  %v9487_v51 = vld [vmem:[#allocation2 + $0x790] sm:$0xf] }
 0x4a4   : > { %4130 = vmatmul.bf16.vlgmr.msrb.gmra.mxu2 %v14879_v5  ;;  %v9488_v32 = vor.u32 %v10117_v17, %v9487_v51 }
 0x4a5   : > { %vm5846_vm5 = vcmp.ge.f32.partialorder %v3902_v58, 0.0  ;;  %v6102_v62 = vmul.f32 0.2, %v3902_v58 }
 0x4a6   : > { %v3990_v36 = vpop.f32.mrf.mxu0  ;;  %4568 = vmatpush.bf16.msra.mxu3 %v9488_v32 }
 0x4a7   : > { %4219 = vmatmul.bf16.vlgmr.msrb.gmra.mxu3 %v14971_v0  ;;  %v11871_v11 = vsel %vm5846_vm5, %v3902_v58, %v6102_v62  ;;  %v3991_v6 = vadd.f32 %v3990_v36, %v11731_v29  ;;  %v4079_v14 = vpop.f32.mrf.mxu1  ;;  %v3815_v3 = vpop.f32.mrf.mxu2 }
 0x4a8   : > { %14973 = vst [vmem:[#allocation142_spill] sm:$0xff] %v11871_v11  ;;  %v3816_v52 = vadd.f32 %v3815_v3, %v11589_v54  ;;  %v14976_v3 = vld [vmem:[#allocation42_spill] sm:$0xff] }
 0x4a9   : > { %v11877_v13 = vadd.f32 %v4079_v14, %v3991_v6  ;;  %v14974_v6 = vld [vmem:[#allocation9_spill] sm:$0xff] }
 0x4aa   : > { %v3904_v50 = vpop.f32.mrf.mxu3  ;;  %v14975_v14 = vld [vmem:[#allocation41_spill] sm:$0xff] }
 0x4ab   : > { %v3905_v48 = vadd.f32 %v3904_v50, %v3816_v52 }
 0x4ad   : > { %v6110_v54 = vmul.f32 0.2, %v3905_v48  ;;  %vm5854_vm6 = vcmp.ge.f32.partialorder %v3905_v48, 0.0 }
 0x4ae   : > { %v3993_v63 = vpop.f32.mrf.mxu0 }
 0x4af   : > { %v3994_v58 = vadd.f32 %v3993_v63, %v11731_v29  ;;  %v4082_v62 = vpop.f32.mrf.mxu1  ;;  %v3817_v16 = vpop.f32.mrf.mxu2  ;;  %v11887_v50 = vsel %vm5854_vm6, %v3905_v48, %v6110_v54 }
 0x4b0   : > { %v3818_v36 = vadd.f32 %v3817_v16, %v11603_v41  ;;  %14977 = vst [vmem:[#allocation9_spill] sm:$0xff] %v11887_v50  ;;  %v14982_v50 = vld [vmem:[#allocation13_spill] sm:$0xff] }
 0x4b1   : > { %v11881_v44 = vadd.f32 %v4082_v62, %v3994_v58  ;;  %4308 = vmatmul.bf16.vlgmr.msrb.gmra.mxu0 %v14883_v18  ;;  %v14979_v58 = vld [vmem:[#allocation112_spill] sm:$0xff] }
 0x4b2   : > { %v3906_v30 = vpop.f32.mrf.mxu3  ;;  %4397 = vmatmul.bf16.vlgmr.msrb.gmra.mxu1 %v14974_v6 }
 0x4b3   : > { %v3907_v45 = vadd.f32 %v3906_v30, %v3818_v36 }
 0x4b4   : > { %4135 = vmatmul.bf16.gmra.mxu2 %v14975_v14 }
 0x4b5   : > { %vm5862_vm7 = vcmp.ge.f32.partialorder %v3907_v45, 0.0  ;;  %v6118_v17 = vmul.f32 0.2, %v3907_v45 }
 0x4b6   : > { %v3995_v52 = vpop.f32.mrf.mxu0 }
 0x4b7   : > { %4224 = vmatmul.bf16.gmra.mxu3 %v14976_v3  ;;  %v11889_v41 = vsel %vm5862_vm7, %v3907_v45, %v6118_v17  ;;  %v3996_v51 = vadd.f32 %v3995_v52, %v11731_v29  ;;  %v4084_v32 = vpop.f32.mrf.mxu1  ;;  %v3820_v63 = vpop.f32.mrf.mxu2  ;;  %v14981_v3 = vld [vmem:[#allocation12_spill] sm:$0xff] }
 0x4b8   : > { %14978 = vst [vmem:[#allocation143_spill] sm:$0xff] %v11889_v41  ;;  %v3821_v62 = vadd.f32 %v3820_v63, %v14979_v58  ;;  %v14984_v63 = vld [vmem:[#allocation45_spill] sm:$0xff]  ;;  %v10045_v58 = vld [vmem:[#allocation2 + $0x56c] sm:$0xf0] }
 0x4b9   : > { %v11895_v36 = vadd.f32 %v4084_v32, %v3996_v51  ;;  %v14983_v32 = vld [vmem:[#allocation44_spill] sm:$0xff] }
 0x4ba   : > { %v3909_v16 = vpop.f32.mrf.mxu3 }
 0x4bb   : > { %v3910_v57 = vadd.f32 %v3909_v16, %v3821_v62 }
 0x4bd   : > { %v6126_v14 = vmul.f32 0.2, %v3910_v57  ;;  %vm5870_vm8 = vcmp.ge.f32.partialorder %v3910_v57, 0.0 }
 0x4be   : > { %v3998_v11 = vpop.f32.mrf.mxu0 }
 0x4bf   : > { %v3999_v24 = vadd.f32 %v3998_v11, %v11731_v29  ;;  %v4087_v48 = vpop.f32.mrf.mxu1  ;;  %v3822_v54 = vpop.f32.mrf.mxu2  ;;  %v9199_v11 = vld [vmem:[#allocation2 + $0x550] sm:$0xf]  ;;  %v11905_v16 = vsel %vm5870_vm8, %v3910_v57, %v6126_v14 }
 0x4c0   : > { %v3823_v45 = vadd.f32 %v3822_v54, %v11621_v4  ;;  %v9200_v4 = vor.u32 %v10045_v58, %v9199_v11  ;;  %14985 = vst [vmem:[#allocation144_spill] sm:$0xff] %v11905_v16 }
 0x4c1   : > { %v11899_v52 = vadd.f32 %v4087_v48, %v3999_v24  ;;  %4313 = vmatmul.bf16.gmra.mxu0 %v14981_v3  ;;  %v10109_v3 = vld [vmem:[#allocation2 + $0x76c] sm:$0xf0] }
 0x4c2   : > { %v3911_v17 = vpop.f32.mrf.mxu3  ;;  %4402 = vmatmul.bf16.gmra.mxu1 %v14982_v50  ;;  %4480 = vmatpush.bf16.msra.mxu2 %v9200_v4  ;;  %v9455_v50 = vld [vmem:[#allocation2 + $0x750] sm:$0xf] }
 0x4c3   : > { %14980 = vst [vmem:[#allocation112_spill] sm:$0xff] %v11899_v52  ;;  %v3912_v30 = vadd.f32 %v3911_v17, %v3823_v45  ;;  %v9456_v57 = vor.u32 %v10109_v3, %v9455_v50  ;;  %v14988_v50 = vld [vmem:[#allocation48_spill] sm:$0xff] }
 0x4c4   : > { %4140 = vmatmul.bf16.gmra.mxu2 %v14983_v32 }
 0x4c5   : > { %vm5878_vm9 = vcmp.ge.f32.partialorder %v3912_v30, 0.0  ;;  %v6134_v51 = vmul.f32 0.2, %v3912_v30  ;;  %4569 = vmatpush.bf16.msra.mxu3 %v9456_v57 }
 0x4c6   : > { %v4000_v62 = vpop.f32.mrf.mxu0 }
 0x4c7   : > { %4229 = vmatmul.bf16.gmra.mxu3 %v14984_v63  ;;  %v11907_v24 = vsel %vm5878_vm9, %v3912_v30, %v6134_v51  ;;  %v4001_v48 = vadd.f32 %v4000_v62, %v11731_v29  ;;  %v4089_v54 = vpop.f32.mrf.mxu1  ;;  %v3825_v45 = vpop.f32.mrf.mxu2 }
 0x4c8   : > { %14986 = vst [vmem:[#allocation145_spill] sm:$0xff] %v11907_v24  ;;  %v3826_v41 = vadd.f32 %v3825_v45, %v11625_v40 }
 0x4c9   : > { %v11913_v63 = vadd.f32 %v4089_v54, %v4001_v48  ;;  %v14987_v48 = vld [vmem:[#allocation17_spill] sm:$0xff] }
 0x4ca   : > { %v3914_v32 = vpop.f32.mrf.mxu3 }
 0x4cb   : > { %v3915_v11 = vadd.f32 %v3914_v32, %v3826_v41  ;;  %v14989_v41 = vld [vmem:[#allocation49_spill] sm:$0xff] }
 0x4cd   : > { %v6142_v40 = vmul.f32 0.2, %v3915_v11  ;;  %vm5886_vm10 = vcmp.ge.f32.partialorder %v3915_v11, 0.0 }
 0x4ce   : > { %v4003_v14 = vpop.f32.mrf.mxu0 }
 0x4cf   : > { %v4004_v30 = vadd.f32 %v4003_v14, %v11731_v29  ;;  %v4092_v51 = vpop.f32.mrf.mxu1  ;;  %v3827_v58 = vpop.f32.mrf.mxu2  ;;  %v11923_v54 = vsel %vm5886_vm10, %v3915_v11, %v6142_v40 }
 0x4d0   : > { %v3828_v62 = vadd.f32 %v3827_v58, %v11639_v22  ;;  %14990 = vst [vmem:[#allocation146_spill] sm:$0xff] %v11923_v54  ;;  %v14995_v54 = vld [vmem:[#allocation21_spill] sm:$0xff] }
 0x4d1   : > { %v11917_v17 = vadd.f32 %v4092_v51, %v4004_v30  ;;  %4318 = vmatmul.bf16.gmra.mxu0 %v14896_v33  ;;  %v14992_v30 = vld [vmem:[#allocation116_spill] sm:$0xff] }
 0x4d2   : > { %v3916_v52 = vpop.f32.mrf.mxu3  ;;  %4407 = vmatmul.bf16.gmra.mxu1 %v14987_v48 }
 0x4d3   : > { %v3917_v4 = vadd.f32 %v3916_v52, %v3828_v62 }
 0x4d4   : > { %4145 = vmatmul.bf16.gmra.mxu2 %v14988_v50  ;;  %v14994_v50 = vld [vmem:[#allocation20_spill] sm:$0xff] }
 0x4d5   : > { %vm5894_vm11 = vcmp.ge.f32.partialorder %v3917_v4, 0.0  ;;  %v6150_v3 = vmul.f32 0.2, %v3917_v4 }
 0x4d6   : > { %v4005_v32 = vpop.f32.mrf.mxu0 }
 0x4d7   : > { %4234 = vmatmul.bf16.gmra.mxu3 %v14989_v41  ;;  %v11925_v22 = vsel %vm5894_vm11, %v3917_v4, %v6150_v3  ;;  %v4006_v45 = vadd.f32 %v4005_v32, %v11731_v29  ;;  %v4094_v57 = vpop.f32.mrf.mxu1  ;;  %v3830_v14 = vpop.f32.mrf.mxu2 }
 0x4d8   : > { %14991 = vst [vmem:[#allocation147_spill] sm:$0xff] %v11925_v22  ;;  %v3831_v51 = vadd.f32 %v3830_v14, %v14992_v30  ;;  %v14997_v14 = vld [vmem:[#allocation53_spill] sm:$0xff]  ;;  %v10037_v30 = vld [vmem:[#allocation2 + $0x52c] sm:$0xf0] }
 0x4d9   : > { %v11931_v62 = vadd.f32 %v4094_v57, %v4006_v45  ;;  %v14996_v57 = vld [vmem:[#allocation52_spill] sm:$0xff] }
 0x4da   : > { %v3919_v58 = vpop.f32.mrf.mxu3 }
 0x4db   : > { %v3920_v16 = vadd.f32 %v3919_v58, %v3831_v51 }
 0x4dd   : > { %v6158_v48 = vmul.f32 0.2, %v3920_v16  ;;  %vm5902_vm12 = vcmp.ge.f32.partialorder %v3920_v16, 0.0 }
 0x4de   : > { %v4008_v24 = vpop.f32.mrf.mxu0 }
 0x4df   : > { %v4009_v41 = vadd.f32 %v4008_v24, %v11731_v29  ;;  %v4097_v11 = vpop.f32.mrf.mxu1  ;;  %v3832_v40 = vpop.f32.mrf.mxu2  ;;  %v9167_v24 = vld [vmem:[#allocation2 + $0x510] sm:$0xf]  ;;  %v11941_v58 = vsel %vm5902_vm12, %v3920_v16, %v6158_v48 }
 0x4e0   : > { %v3833_v4 = vadd.f32 %v3832_v40, %v11657_v61  ;;  %v9168_v61 = vor.u32 %v10037_v30, %v9167_v24  ;;  %14998 = vst [vmem:[#allocation148_spill] sm:$0xff] %v11941_v58 }
 0x4e1   : > { %v11935_v32 = vadd.f32 %v4097_v11, %v4009_v41  ;;  %4323 = vmatmul.bf16.gmra.mxu0 %v14994_v50  ;;  %v10101_v50 = vld [vmem:[#allocation2 + $0x72c] sm:$0xf0] }
 0x4e2   : > { %v3921_v3 = vpop.f32.mrf.mxu3  ;;  %4412 = vmatmul.bf16.gmra.mxu1 %v14995_v54  ;;  %4481 = vmatpush.bf16.msra.mxu2 %v9168_v61  ;;  %v9423_v54 = vld [vmem:[#allocation2 + $0x710] sm:$0xf] }
 0x4e3   : > { %14993 = vst [vmem:[#allocation116_spill] sm:$0xff] %v11935_v32  ;;  %v3922_v52 = vadd.f32 %v3921_v3, %v3833_v4  ;;  %v9424_v16 = vor.u32 %v10101_v50, %v9423_v54  ;;  %v15001_v54 = vld [vmem:[#allocation56_spill] sm:$0xff] }
 0x4e4   : > { %4150 = vmatmul.bf16.gmra.mxu2 %v14996_v57 }
 0x4e5   : > { %vm5910_vm13 = vcmp.ge.f32.partialorder %v3922_v52, 0.0  ;;  %v6166_v45 = vmul.f32 0.2, %v3922_v52  ;;  %4570 = vmatpush.bf16.msra.mxu3 %v9424_v16 }
 0x4e6   : > { %v4010_v51 = vpop.f32.mrf.mxu0 }
 0x4e7   : > { %4239 = vmatmul.bf16.gmra.mxu3 %v14997_v14  ;;  %v11943_v41 = vsel %vm5910_vm13, %v3922_v52, %v6166_v45  ;;  %v4011_v11 = vadd.f32 %v4010_v51, %v11731_v29  ;;  %v4099_v40 = vpop.f32.mrf.mxu1  ;;  %v3835_v4 = vpop.f32.mrf.mxu2 }
 0x4e8   : > { %14999 = vst [vmem:[#allocation149_spill] sm:$0xff] %v11943_v41  ;;  %v3836_v22 = vadd.f32 %v3835_v4, %v11661_v46 }
 0x4e9   : > { %v11949_v14 = vadd.f32 %v4099_v40, %v4011_v11  ;;  %v15000_v11 = vld [vmem:[#allocation25_spill] sm:$0xff] }
 0x4ea   : > { %v3924_v57 = vpop.f32.mrf.mxu3 }
 0x4eb   : > { %v3925_v24 = vadd.f32 %v3924_v57, %v3836_v22  ;;  %v15002_v22 = vld [vmem:[#allocation57_spill] sm:$0xff] }
 0x4ed   : > { %v6174_v46 = vmul.f32 0.2, %v3925_v24  ;;  %vm5918_vm14 = vcmp.ge.f32.partialorder %v3925_v24, 0.0 }
 0x4ee   : > { %v4013_v48 = vpop.f32.mrf.mxu0 }
 0x4ef   : > { %v4014_v52 = vadd.f32 %v4013_v48, %v11731_v29  ;;  %v4102_v45 = vpop.f32.mrf.mxu1  ;;  %v3837_v30 = vpop.f32.mrf.mxu2  ;;  %v11959_v40 = vsel %vm5918_vm14, %v3925_v24, %v6174_v46 }
 0x4f0   : > { %v3838_v51 = vadd.f32 %v3837_v30, %v11675_v59  ;;  %15003 = vst [vmem:[#allocation150_spill] sm:$0xff] %v11959_v40  ;;  %v15008_v40 = vld [vmem:[#allocation29_spill] sm:$0xff] }
 0x4f1   : > { %v11953_v3 = vadd.f32 %v4102_v45, %v4014_v52  ;;  %4328 = vmatmul.bf16.gmra.mxu0 %v14909_v7  ;;  %v15005_v52 = vld [vmem:[#allocation120_spill] sm:$0xff] }
 0x4f2   : > { %v3926_v32 = vpop.f32.mrf.mxu3  ;;  %4417 = vmatmul.bf16.gmra.mxu1 %v15000_v11 }
 0x4f3   : > { %v3927_v61 = vadd.f32 %v3926_v32, %v3838_v51 }
 0x4f4   : > { %4155 = vmatmul.bf16.gmra.mxu2 %v15001_v54  ;;  %v15007_v54 = vld [vmem:[#allocation28_spill] sm:$0xff] }
 0x4f5   : > { %vm5926_vm15 = vcmp.ge.f32.partialorder %v3927_v61, 0.0  ;;  %v6182_v50 = vmul.f32 0.2, %v3927_v61 }
 0x4f6   : > { %v4015_v57 = vpop.f32.mrf.mxu0 }
 0x4f7   : > { %4244 = vmatmul.bf16.gmra.mxu3 %v15002_v22  ;;  %v11961_v59 = vsel %vm5926_vm15, %v3927_v61, %v6182_v50  ;;  %v4016_v4 = vadd.f32 %v4015_v57, %v11731_v29  ;;  %v4104_v16 = vpop.f32.mrf.mxu1  ;;  %v3840_v48 = vpop.f32.mrf.mxu2 }
 0x4f8   : > { %15004 = vst [vmem:[#allocation151_spill] sm:$0xff] %v11961_v59  ;;  %v3841_v45 = vadd.f32 %v3840_v48, %v15005_v52  ;;  %v15010_v48 = vld [vmem:[#allocation59_spill] sm:$0xff]  ;;  %v10029_v52 = vld [vmem:[#allocation2 + $0x4ec] sm:$0xf0] }
 0x4f9   : > { %v11967_v51 = vadd.f32 %v4104_v16, %v4016_v4  ;;  %v15009_v16 = vld [vmem:[#allocation58_spill] sm:$0xff] }
 0x4fa   : > { %v3929_v30 = vpop.f32.mrf.mxu3 }
 0x4fb   : > { %v3930_v58 = vadd.f32 %v3929_v30, %v3841_v45 }
 0x4fd   : > { %v6190_v11 = vmul.f32 0.2, %v3930_v58  ;;  %vm5934_vm1 = vcmp.ge.f32.partialorder %v3930_v58, 0.0 }
 0x4fe   : > { %v4018_v41 = vpop.f32.mrf.mxu0 }
 0x4ff   : > { %v4019_v22 = vadd.f32 %v4018_v41, %v11731_v29  ;;  %v4107_v24 = vpop.f32.mrf.mxu1  ;;  %v3842_v46 = vpop.f32.mrf.mxu2  ;;  %v9135_v41 = vld [vmem:[#allocation2 + $0x4d0] sm:$0xf]  ;;  %v11977_v30 = vsel %vm5934_vm1, %v3930_v58, %v6190_v11 }
 0x500   : > { %v3843_v61 = vadd.f32 %v3842_v46, %v11693_v56  ;;  %v9136_v56 = vor.u32 %v10029_v52, %v9135_v41  ;;  %15011 = vst [vmem:[#allocation152_spill] sm:$0xff] %v11977_v30  ;;  %v9929_v30 = vld [vmem:[#allocation2 + $0x1d4] sm:$0xf] }
 0x501   : > { %v11971_v57 = vadd.f32 %v4107_v24, %v4019_v22  ;;  %4333 = vmatmul.bf16.gmra.mxu0 %v15007_v54  ;;  %v10093_v54 = vld [vmem:[#allocation2 + $0x6ec] sm:$0xf0] }
 0x502   : > { %v3931_v50 = vpop.f32.mrf.mxu3  ;;  %4422 = vmatmul.bf16.gmra.mxu1 %v15008_v40  ;;  %4482 = vmatpush.bf16.msra.mxu2 %v9136_v56  ;;  %v9391_v40 = vld [vmem:[#allocation2 + $0x6d0] sm:$0xf] }
 0x503   : > { %15006 = vst [vmem:[#allocation120_spill] sm:$0xff] %v11971_v57  ;;  %v3932_v32 = vadd.f32 %v3931_v50, %v3843_v61  ;;  %v9392_v58 = vor.u32 %v10093_v54, %v9391_v40  ;;  %v15014_v40 = vld [vmem:[#allocation61_spill] sm:$0xff] }
 0x504   : > { %4160 = vmatmul.bf16.gmra.mxu2 %v15009_v16 }
 0x505   : > { %vm5942_vm2 = vcmp.ge.f32.partialorder %v3932_v32, 0.0  ;;  %v6198_v4 = vmul.f32 0.2, %v3932_v32  ;;  %4571 = vmatpush.bf16.msra.mxu3 %v9392_v58 }
 0x506   : > { %v4020_v45 = vpop.f32.mrf.mxu0 }
 0x507   : > { %4249 = vmatmul.bf16.gmra.mxu3 %v15010_v48  ;;  %v11979_v22 = vsel %vm5942_vm2, %v3932_v32, %v6198_v4  ;;  %v4021_v24 = vadd.f32 %v4020_v45, %v11731_v29  ;;  %v4109_v46 = vpop.f32.mrf.mxu1  ;;  %v3845_v61 = vpop.f32.mrf.mxu2 }
 0x508   : > { %15012 = vst [vmem:[#allocation153_spill] sm:$0xff] %v11979_v22  ;;  %v3846_v59 = vadd.f32 %v3845_v61, %v11697_v37  ;;  %v8753_v22 = vld [vmem:[#allocation2 + $0x1f0] sm:$0xf0] }
 0x509   : > { %v11985_v48 = vadd.f32 %v4109_v46, %v4021_v24  ;;  %v15013_v24 = vld [vmem:[#allocation33_spill] sm:$0xff] }
 0x50a   : > { %v3934_v16 = vpop.f32.mrf.mxu3 }
 0x50b   : > { %v3935_v41 = vadd.f32 %v3934_v16, %v3846_v59  ;;  %v15015_v59 = vld [vmem:[#allocation62_spill] sm:$0xff] }
 0x50d   : > { %v6206_v37 = vmul.f32 0.2, %v3935_v41  ;;  %vm5950_vm0 = vcmp.ge.f32.partialorder %v3935_v41, 0.0 }
 0x50e   : > { %v4023_v11 = vpop.f32.mrf.mxu0 }
 0x50f   : > { %v4024_v32 = vadd.f32 %v4023_v11, %v11731_v29  ;;  %v4112_v4 = vpop.f32.mrf.mxu1  ;;  %v3847_v52 = vpop.f32.mrf.mxu2  ;;  %v11995_v46 = vsel %vm5950_vm0, %v3935_v41, %v6206_v37  ;;  %v8756_v41 = vor.u32 %v9929_v30, %v8753_v22  ;;  %v9103_v30 = vld [vmem:[#allocation2 + $0x490] sm:$0xf] }
 0x510   : > { %v3848_v45 = vadd.f32 %v3847_v52, %v11711_v15  ;;  %15016 = vst [vmem:[#allocation154_spill] sm:$0xff] %v11995_v46  ;;  %v10021_v22 = vld [vmem:[#allocation2 + $0x4ac] sm:$0xf0] }
 0x511   : > { %v11989_v50 = vadd.f32 %v4112_v4, %v4024_v32  ;;  %4338 = vmatmul.bf16.gmra.mxu0 %v14833_v25  ;;  %v10085_v46 = vld [vmem:[#allocation2 + $0x6ac] sm:$0xf0] }
 0x512   : > { %v3936_v57 = vpop.f32.mrf.mxu3  ;;  %4427 = vmatmul.bf16.gmra.mxu1 %v15013_v24  ;;  %4656 = vmatpush.bf16.msra.mxu0 %v8756_v41 }
 0x513   : > { %v3937_v56 = vadd.f32 %v3936_v57, %v3848_v45  ;;  %v9359_v57 = vld [vmem:[#allocation2 + $0x690] sm:$0xf] }
 0x514   : > { %4165 = vmatmul.bf16.gmra.mxu2 %v15014_v40 }
 0x515   : > { %vm5958_vm3 = vcmp.ge.f32.partialorder %v3937_v56, 0.0  ;;  %v6214_v54 = vmul.f32 0.2, %v3937_v56 }
 0x516   : > { %v4025_v16 = vpop.f32.mrf.mxu0 }
 0x517   : > { %4254 = vmatmul.bf16.gmra.mxu3 %v15015_v59  ;;  %v11997_v15 = vsel %vm5958_vm3, %v3937_v56, %v6214_v54  ;;  %v4026_v61 = vadd.f32 %v4025_v16, %v11731_v29  ;;  %v4114_v58 = vpop.f32.mrf.mxu1  ;;  %v3850_v11 = vpop.f32.mrf.mxu2 }
 0x518   : > { %15017 = vst [vmem:[#allocation155_spill] sm:$0xff] %v11997_v15  ;;  %v3851_v32 = vadd.f32 %v3850_v11, %v11715_v26  ;;  %v8721_v15 = vld [vmem:[#allocation2 + $0x1b0] sm:$0xf0] }
 0x519   : > { %v12003_v52 = vadd.f32 %v4114_v58, %v4026_v61 }
 0x51a   : > { %v3939_v4 = vpop.f32.mrf.mxu3 }
 0x51b   : > { %v3940_v45 = vadd.f32 %v3939_v4, %v3851_v32 }
 0x51d   : > { %v6222_v26 = vmul.f32 0.2, %v3940_v45  ;;  %vm5966_vm4 = vcmp.ge.f32.partialorder %v3940_v45, 0.0 }
 0x51e   : > { %v4028_v59 = vpop.f32.mrf.mxu0 }
 0x51f   : > { %v4029_v37 = vadd.f32 %v4028_v59, %v11731_v29  ;;  %v4117_v56 = vpop.f32.mrf.mxu1  ;;  %v3852_v54 = vpop.f32.mrf.mxu2  ;;  %v9104_v59 = vor.u32 %v10021_v22, %v9103_v30  ;;  %v12013_v11 = vsel %vm5966_vm4, %v3940_v45, %v6222_v26  ;;  %v9360_v45 = vor.u32 %v10085_v46, %v9359_v57  ;;  %v10252_v26 = vld [vmem:[#allocation4 + $0x4] sm:$0xff] }
 0x520   : > { %v3853_v16 = vadd.f32 %v3852_v54, %v11729_v60  ;;  %15018 = vst [vmem:[#allocation156_spill] sm:$0xff] %v12013_v11  ;;  %v15020_v57 = vld [vmem:[#allocation66_spill] sm:$0xff] }
 0x521   : > { %v12007_v24 = vadd.f32 %v4117_v56, %v4029_v37  ;;  %4343 = vmatmul.bf16.gmra.mxu0 %v14838_v55  ;;  %4483 = vmatpush.bf16.msra.mxu2 %v9104_v59 }
 0x522   : > { %v3941_v40 = vpop.f32.mrf.mxu3  ;;  %4432 = vmatmul.bf16.gmra.mxu1 %v14839_v19  ;;  %4572 = vmatpush.bf16.msra.mxu3 %v9360_v45 }
 0x523   : > { %v3942_v61 = vadd.f32 %v3941_v40, %v3853_v16 }
 0x524   : > { %4170 = vmatmul.bf16.gmra.mxu2 %v11012_v27 }
 0x525   : > { %vm5974_vm5 = vcmp.ge.f32.partialorder %v3942_v61, 0.0  ;;  %v6230_v58 = vmul.f32 0.2, %v3942_v61 }
 0x526   : > { %v4030_v60 = vpop.f32.mrf.mxu0 }
 0x527   : > { %4259 = vmatmul.bf16.gmra.mxu3 %v14927_v53  ;;  %v12015_v32 = vsel %vm5974_vm5, %v3942_v61, %v6230_v58  ;;  %v4031_v4 = vadd.f32 %v4030_v60, %v11731_v29  ;;  %v4119_v40 = vpop.f32.mrf.mxu1  ;;  %v4131_v41 = vpop.f32.mrf.mxu2  ;;  %v12023_v61 = vperm.slane %v10252_v26, 4 }
 0x528   : > { %15019 = vst [vmem:[#allocation157_spill] sm:$0xff] %v12015_v32  ;;  %v4132_v56 = vadd.f32 %v4131_v41, %v11735_v21  ;;  %v9921_v32 = vld [vmem:[#allocation2 + $0x194] sm:$0xf] }
 0x529   : > { %v12021_v16 = vadd.f32 %v4119_v40, %v4031_v4  ;;  %v15021_v40 = vld [vmem:[#allocation67_spill] sm:$0xff] }
 0x52a   : > { %v4220_v54 = vpop.f32.mrf.mxu3 }
 0x52b   : > { %v4221_v30 = vadd.f32 %v4220_v54, %v4132_v56 }
 0x52d   : > { %v5983_v59 = vmul.f32 0.2, %v4221_v30  ;;  %vm5727_vm6 = vcmp.ge.f32.partialorder %v4221_v30, 0.0 }
 0x52e   : > { %v4309_v29 = vpop.f32.mrf.mxu0 }
 0x52f   : > { %v4310_v58 = vadd.f32 %v4309_v29, %v12023_v61  ;;  %v4398_v22 = vpop.f32.mrf.mxu1  ;;  %v4133_v60 = vpop.f32.mrf.mxu2  ;;  %v12033_v56 = vsel %vm5727_vm6, %v4221_v30, %v5983_v59  ;;  %v8724_v59 = vor.u32 %v9921_v32, %v8721_v15  ;;  %v15028_v15 = vld [vmem:[#allocation69_spill] sm:$0xff]  ;;  %v15029_v32 = vld [vmem:[#allocation70_spill] sm:$0xff] }
 0x530   : > { %v4134_v37 = vadd.f32 %v4133_v60, %v11749_v12  ;;  %15022 = vst [vmem:[#allocation158_spill] sm:$0xff] %v12033_v56 }
 0x531   : > { %v12027_v41 = vadd.f32 %v4398_v22, %v4310_v58  ;;  %4348 = vmatmul.bf16.gmra.mxu0 %v10675_v28  ;;  %v15024_v58 = vld [vmem:[#allocation86_spill] sm:$0xff] }
 0x532   : > { %v4222_v21 = vpop.f32.mrf.mxu3  ;;  %4437 = vmatmul.bf16.gmra.mxu1 %v10680_v31  ;;  %4657 = vmatpush.bf16.msra.mxu0 %v8724_v59 }
 0x533   : > { %v4223_v4 = vadd.f32 %v4222_v21, %v4134_v37 }
 0x534   : > { %4175 = vmatmul.bf16.gmra.mxu2 %v15020_v57 }
 0x535   : > { %vm5735_vm7 = vcmp.ge.f32.partialorder %v4223_v4, 0.0  ;;  %v5991_v46 = vmul.f32 0.2, %v4223_v4 }
 0x536   : > { %v4311_v12 = vpop.f32.mrf.mxu0 }
 0x537   : > { %4264 = vmatmul.bf16.gmra.mxu3 %v15021_v40  ;;  %v12035_v54 = vsel %vm5735_vm7, %v4223_v4, %v5991_v46  ;;  %v4312_v26 = vadd.f32 %v4311_v12, %v12023_v61  ;;  %v4400_v37 = vpop.f32.mrf.mxu1  ;;  %v4136_v29 = vpop.f32.mrf.mxu2 }
 0x538   : > { %15023 = vst [vmem:[#allocation159_spill] sm:$0xff] %v12035_v54  ;;  %v4137_v22 = vadd.f32 %v4136_v29, %v15024_v58  ;;  %v15026_v54 = vld [vmem:[#allocation14_spill] sm:$0xff] }
 0x539   : > { %v12041_v21 = vadd.f32 %v4400_v37, %v4312_v26  ;;  %v15027_v37 = vld [vmem:[#allocation15_spill] sm:$0xff] }
 0x53a   : > { %v4225_v60 = vpop.f32.mrf.mxu3 }
 0x53b   : > { %v4226_v11 = vadd.f32 %v4225_v60, %v4137_v22  ;;  %v9071_v22 = vld [vmem:[#allocation2 + $0x450] sm:$0xf] }
 0x53c   : > { %v10013_v60 = vld [vmem:[#allocation2 + $0x46c] sm:$0xf0] }
 0x53d   : > { %v5999_v29 = vmul.f32 0.2, %v4226_v11  ;;  %vm5743_vm8 = vcmp.ge.f32.partialorder %v4226_v11, 0.0 }
 0x53e   : > { %v4314_v30 = vpop.f32.mrf.mxu0 }
 0x53f   : > { %v4315_v4 = vadd.f32 %v4314_v30, %v12023_v61  ;;  %v4403_v46 = vpop.f32.mrf.mxu1  ;;  %v4138_v40 = vpop.f32.mrf.mxu2  ;;  %v12051_v30 = vsel %vm5743_vm8, %v4226_v11, %v5999_v29 }
 0x540   : > { %v4139_v45 = vadd.f32 %v4138_v40, %v11767_v43  ;;  %v9072_v40 = vor.u32 %v10013_v60, %v9071_v22  ;;  %15030 = vst [vmem:[#allocation160_spill] sm:$0xff] %v12051_v30 }
 0x541   : > { %v12045_v12 = vadd.f32 %v4403_v46, %v4315_v4  ;;  %4353 = vmatmul.bf16.gmra.mxu0 %v15026_v54  ;;  %v9327_v54 = vld [vmem:[#allocation2 + $0x650] sm:$0xf] }
 0x542   : > { %v4227_v56 = vpop.f32.mrf.mxu3  ;;  %4442 = vmatmul.bf16.gmra.mxu1 %v15027_v37  ;;  %4484 = vmatpush.bf16.msra.mxu2 %v9072_v40 }
 0x543   : > { %15025 = vst [vmem:[#allocation86_spill] sm:$0xff] %v12045_v12  ;;  %v4228_v26 = vadd.f32 %v4227_v56, %v4139_v45  ;;  %v10077_v12 = vld [vmem:[#allocation2 + $0x66c] sm:$0xf0] }
 0x544   : > { %4180 = vmatmul.bf16.gmra.mxu2 %v15028_v15  ;;  %v9328_v11 = vor.u32 %v10077_v12, %v9327_v54  ;;  %v15035_v12 = vld [vmem:[#allocation72_spill] sm:$0xff] }
 0x545   : > { %vm5751_vm9 = vcmp.ge.f32.partialorder %v4228_v26, 0.0  ;;  %v6007_v58 = vmul.f32 0.2, %v4228_v26 }
 0x546   : > { %v4316_v43 = vpop.f32.mrf.mxu0  ;;  %4573 = vmatpush.bf16.msra.mxu3 %v9328_v11 }
 0x547   : > { %4269 = vmatmul.bf16.gmra.mxu3 %v15029_v32  ;;  %v12053_v59 = vsel %vm5751_vm9, %v4228_v26, %v6007_v58  ;;  %v4317_v4 = vadd.f32 %v4316_v43, %v12023_v61  ;;  %v4405_v56 = vpop.f32.mrf.mxu1  ;;  %v4141_v45 = vpop.f32.mrf.mxu2 }
 0x548   : > { %15031 = vst [vmem:[#allocation161_spill] sm:$0xff] %v12053_v59  ;;  %v4142_v37 = vadd.f32 %v4141_v45, %v11771_v39  ;;  %v15033_v39 = vld [vmem:[#allocation18_spill] sm:$0xff] }
 0x549   : > { %v12059_v32 = vadd.f32 %v4405_v56, %v4317_v4  ;;  %v15034_v56 = vld [vmem:[#allocation19_spill] sm:$0xff] }
 0x54a   : > { %v4230_v15 = vpop.f32.mrf.mxu3 }
 0x54b   : > { %v4231_v22 = vadd.f32 %v4230_v15, %v4142_v37  ;;  %v15036_v37 = vld [vmem:[#allocation73_spill] sm:$0xff] }
 0x54d   : > { %v6015_v40 = vmul.f32 0.2, %v4231_v22  ;;  %vm5759_vm10 = vcmp.ge.f32.partialorder %v4231_v22, 0.0 }
 0x54e   : > { %v4319_v29 = vpop.f32.mrf.mxu0 }
 0x54f   : > { %v4320_v26 = vadd.f32 %v4319_v29, %v12023_v61  ;;  %v4408_v58 = vpop.f32.mrf.mxu1  ;;  %v4143_v60 = vpop.f32.mrf.mxu2  ;;  %v12069_v45 = vsel %vm5759_vm10, %v4231_v22, %v6015_v40 }
 0x550   : > { %v4144_v43 = vadd.f32 %v4143_v60, %v11785_v49  ;;  %15037 = vst [vmem:[#allocation163_spill] sm:$0xff] %v12069_v45  ;;  %v15047_v45 = vld [vmem:[#allocation104_spill] sm:$0xff] }
 0x551   : > { %v12063_v46 = vadd.f32 %v4408_v58, %v4320_v26  ;;  %4358 = vmatmul.bf16.gmra.mxu0 %v15033_v39  ;;  %v15039_v58 = vld [vmem:[#allocation132_spill] sm:$0xff] }
 0x552   : > { %v4232_v57 = vpop.f32.mrf.mxu3  ;;  %4447 = vmatmul.bf16.gmra.mxu1 %v15034_v56 }
 0x553   : > { %15032 = vst [vmem:[#allocation162_spill] sm:$0xff] %v12063_v46  ;;  %v4233_v4 = vadd.f32 %v4232_v57, %v4144_v43  ;;  %v15041_v57 = vld [vmem:[#allocation22_spill] sm:$0xff] }
 0x554   : > { %4185 = vmatmul.bf16.gmra.mxu2 %v15035_v12  ;;  %v9913_v12 = vld [vmem:[#allocation2 + $0x154] sm:$0xf] }
 0x555   : > { %vm5767_vm11 = vcmp.ge.f32.partialorder %v4233_v4, 0.0  ;;  %v6023_v54 = vmul.f32 0.2, %v4233_v4 }
 0x556   : > { %v4321_v15 = vpop.f32.mrf.mxu0 }
 0x557   : > { %4274 = vmatmul.bf16.gmra.mxu3 %v15036_v37  ;;  %v12071_v49 = vsel %vm5767_vm11, %v4233_v4, %v6023_v54  ;;  %v4322_v11 = vadd.f32 %v4321_v15, %v12023_v61  ;;  %v4410_v29 = vpop.f32.mrf.mxu1  ;;  %v4146_v26 = vpop.f32.mrf.mxu2  ;;  %v8689_v37 = vld [vmem:[#allocation2 + $0x170] sm:$0xf0] }
 0x558   : > { %15038 = vst [vmem:[#allocation164_spill] sm:$0xff] %v12071_v49  ;;  %v4147_v60 = vadd.f32 %v4146_v26, %v15039_v58  ;;  %v8692_v22 = vor.u32 %v9913_v12, %v8689_v37  ;;  %v15043_v12 = vld [vmem:[#allocation75_spill] sm:$0xff]  ;;  %v9039_v37 = vld [vmem:[#allocation2 + $0x410] sm:$0xf] }
 0x559   : > { %v12077_v30 = vadd.f32 %v4410_v29, %v4322_v11  ;;  %v15042_v29 = vld [vmem:[#allocation23_spill] sm:$0xff] }
 0x55a   : > { %v4235_v43 = vpop.f32.mrf.mxu3  ;;  %4658 = vmatpush.bf16.msra.mxu0 %v8692_v22 }
 0x55b   : > { %v4236_v59 = vadd.f32 %v4235_v43, %v4147_v60  ;;  %v10005_v60 = vld [vmem:[#allocation2 + $0x42c] sm:$0xf0] }
 0x55c   : > { %v9040_v43 = vor.u32 %v10005_v60, %v9039_v37 }
 0x55d   : > { %v6031_v26 = vmul.f32 0.2, %v4236_v59  ;;  %vm5775_vm12 = vcmp.ge.f32.partialorder %v4236_v59, 0.0 }
 0x55e   : > { %v4324_v56 = vpop.f32.mrf.mxu0  ;;  %4485 = vmatpush.bf16.msra.mxu2 %v9040_v43  ;;  %v15050_v43 = vld [vmem:[#allocation26_spill] sm:$0xff] }
 0x55f   : > { %v4325_v40 = vadd.f32 %v4324_v56, %v12023_v61  ;;  %v4413_v4 = vpop.f32.mrf.mxu1  ;;  %v4148_v54 = vpop.f32.mrf.mxu2  ;;  %v15044_v56 = vld [vmem:[#allocation76_spill] sm:$0xff]  ;;  %v12087_v22 = vsel %vm5775_vm12, %v4236_v59, %v6031_v26 }
 0x560   : > { %v4149_v15 = vadd.f32 %v4148_v54, %v11803_v35  ;;  %15045 = vst [vmem:[#allocation165_spill] sm:$0xff] %v12087_v22  ;;  %v9009_v22 = vld [vmem:[#allocation2 + $0x3f0] sm:$0xf0] }
 0x561   : > { %v12081_v46 = vadd.f32 %v4413_v4, %v4325_v40  ;;  %4363 = vmatmul.bf16.gmra.mxu0 %v15041_v57  ;;  %v10069_v57 = vld [vmem:[#allocation2 + $0x62c] sm:$0xf0] }
 0x562   : > { %v4237_v39 = vpop.f32.mrf.mxu3  ;;  %4452 = vmatmul.bf16.gmra.mxu1 %v15042_v29  ;;  %v9295_v29 = vld [vmem:[#allocation2 + $0x610] sm:$0xf] }
 0x563   : > { %15040 = vst [vmem:[#allocation132_spill] sm:$0xff] %v12081_v46  ;;  %v4238_v11 = vadd.f32 %v4237_v39, %v4149_v15  ;;  %v9296_v59 = vor.u32 %v10069_v57, %v9295_v29  ;;  %v9993_v15 = vld [vmem:[#allocation2 + $0x3d4] sm:$0xf]  ;;  %v15052_v29 = vld [vmem:[#allocation78_spill] sm:$0xff] }
 0x564   : > { %4190 = vmatmul.bf16.gmra.mxu2 %v15043_v12 }
 0x565   : > { %vm5783_vm13 = vcmp.ge.f32.partialorder %v4238_v11, 0.0  ;;  %v6039_v58 = vmul.f32 0.2, %v4238_v11  ;;  %4574 = vmatpush.bf16.msra.mxu3 %v9296_v59  ;;  %v8977_v59 = vld [vmem:[#allocation2 + $0x3b0] sm:$0xf0] }
 0x566   : > { %v4326_v35 = vpop.f32.mrf.mxu0 }
 0x567   : > { %4279 = vmatmul.bf16.gmra.mxu3 %v15044_v56  ;;  %v12089_v40 = vsel %vm5783_vm13, %v4238_v11, %v6039_v58  ;;  %v4327_v4 = vadd.f32 %v4326_v35, %v12023_v61  ;;  %v4415_v39 = vpop.f32.mrf.mxu1  ;;  %v4151_v54 = vpop.f32.mrf.mxu2 }
 0x568   : > { %15046 = vst [vmem:[#allocation166_spill] sm:$0xff] %v12089_v40  ;;  %v4152_v49 = vadd.f32 %v4151_v54, %v15047_v45 }
 0x569   : > { %v12095_v56 = vadd.f32 %v4415_v39, %v4327_v4  ;;  %v9012_v4 = vor.u32 %v9993_v15, %v9009_v22 }
 0x56a   : > { %v4240_v12 = vpop.f32.mrf.mxu3 }
 0x56b   : > { %15048 = vst [vmem:[#allocation104_spill] sm:$0xff] %v12095_v56  ;;  %v4241_v37 = vadd.f32 %v4240_v12, %v4152_v49  ;;  %v15051_v49 = vld [vmem:[#allocation27_spill] sm:$0xff]  ;;  %4745 = vmatpush.bf16.msra.mxu1 %v9012_v4  ;;  %v9985_v12 = vld [vmem:[#allocation2 + $0x394] sm:$0xf]  ;;  %v15056_v4 = vld [vmem:[#allocation137_spill] sm:$0xff] }
 0x56d   : > { %v6047_v39 = vmul.f32 0.2, %v4241_v37  ;;  %vm5791_vm14 = vcmp.ge.f32.partialorder %v4241_v37, 0.0 }
 0x56e   : > { %v4329_v26 = vpop.f32.mrf.mxu0 }
 0x56f   : > { %v4330_v11 = vadd.f32 %v4329_v26, %v12023_v61  ;;  %v4418_v58 = vpop.f32.mrf.mxu1  ;;  %v4153_v60 = vpop.f32.mrf.mxu2 }
 0x570   : > { %v4154_v35 = vadd.f32 %v4153_v60, %v11821_v38  ;;  %v15053_v38 = vld [vmem:[#allocation79_spill] sm:$0xff] }
 0x571   : > { %v12099_v45 = vadd.f32 %v4418_v58, %v4330_v11  ;;  %4368 = vmatmul.bf16.gmra.mxu0 %v15050_v43  ;;  %v8980_v11 = vor.u32 %v9985_v12, %v8977_v59  ;;  %v12105_v58 = vsel %vm5791_vm14, %v4241_v37, %v6047_v39  ;;  %v9905_v39 = vld [vmem:[#allocation2 + $0x114] sm:$0xf] }
 0x572   : > { %v4242_v46 = vpop.f32.mrf.mxu3  ;;  %4457 = vmatmul.bf16.gmra.mxu1 %v15051_v49  ;;  %15054 = vst [vmem:[#allocation168_spill] sm:$0xff] %v12105_v58  ;;  %v9977_v49 = vld [vmem:[#allocation2 + $0x354] sm:$0xf] }
 0x573   : > { %15049 = vst [vmem:[#allocation167_spill] sm:$0xff] %v12099_v45  ;;  %v4243_v54 = vadd.f32 %v4242_v46, %v4154_v35  ;;  %4746 = vmatpush.bf16.msra.mxu1 %v8980_v11  ;;  %v8913_v59 = vld [vmem:[#allocation2 + $0x330] sm:$0xf0] }
 0x574   : > { %4195 = vmatmul.bf16.gmra.mxu2 %v15052_v29 }
 0x575   : > { %vm5799_vm15 = vcmp.ge.f32.partialorder %v4243_v54, 0.0  ;;  %v6055_v57 = vmul.f32 0.2, %v4243_v54 }
 0x576   : > { %v4331_v26 = vpop.f32.mrf.mxu0 }
 0x577   : > { %4284 = vmatmul.bf16.gmra.mxu3 %v15053_v38  ;;  %v12107_v60 = vsel %vm5799_vm15, %v4243_v54, %v6055_v57  ;;  %v4332_v46 = vadd.f32 %v4331_v26, %v12023_v61  ;;  %v4420_v22 = vpop.f32.mrf.mxu1  ;;  %v4156_v15 = vpop.f32.mrf.mxu2  ;;  %v8945_v38 = vld [vmem:[#allocation2 + $0x370] sm:$0xf0] }
 0x578   : > { %15055 = vst [vmem:[#allocation169_spill] sm:$0xff] %v12107_v60  ;;  %v4157_v40 = vadd.f32 %v4156_v15, %v15056_v4  ;;  %v8948_v12 = vor.u32 %v9977_v49, %v8945_v38  ;;  %v8657_v54 = vld [vmem:[#allocation2 + $0x130] sm:$0xf0]  ;;  %v15058_v38 = vld [vmem:[#allocation30_spill] sm:$0xff] }
 0x579   : > { %v12113_v43 = vadd.f32 %v4420_v22, %v4332_v46  ;;  %v9969_v57 = vld [vmem:[#allocation2 + $0x314] sm:$0xf]  ;;  %v8660_v45 = vor.u32 %v9905_v39, %v8657_v54 }
 0x57a   : > { %v4245_v29 = vpop.f32.mrf.mxu3  ;;  %4747 = vmatpush.bf16.msra.mxu1 %v8948_v12  ;;  %v8916_v56 = vor.u32 %v9969_v57, %v8913_v59  ;;  %v9897_v46 = vld [vmem:[#allocation2 + $0xd4] sm:$0xf]  ;;  %v15059_v57 = vld [vmem:[#allocation31_spill] sm:$0xff] }
 0x57b   : > { %v4246_v37 = vadd.f32 %v4245_v29, %v4157_v40  ;;  %4659 = vmatpush.bf16.msra.mxu0 %v8660_v45  ;;  %v8625_v49 = vld [vmem:[#allocation2 + $0xf0] sm:$0xf0]  ;;  %v15061_v45 = vld [vmem:[#allocation82_spill] sm:$0xff] }
 0x57c   : > { %v9961_v40 = vld [vmem:[#allocation2 + $0x2d4] sm:$0xf]  ;;  %v8628_v22 = vor.u32 %v9897_v46, %v8625_v49 }
 0x57d   : > { %v8881_v12 = vld [vmem:[#allocation2 + $0x2f0] sm:$0xf0]  ;;  %v6063_v39 = vmul.f32 0.2, %v4246_v37  ;;  %vm5807_vm1 = vcmp.ge.f32.partialorder %v4246_v37, 0.0 }
 0x57e   : > { %v4334_v26 = vpop.f32.mrf.mxu0  ;;  %4748 = vmatpush.bf16.msra.mxu1 %v8916_v56  ;;  %v8884_v59 = vor.u32 %v9961_v40, %v8881_v12  ;;  %v9889_v56 = vld [vmem:[#allocation2 + $0x94] sm:$0xf] }
 0x57f   : > { %v4335_v35 = vadd.f32 %v4334_v26, %v12023_v61  ;;  %v4423_v58 = vpop.f32.mrf.mxu1  ;;  %v4158_v15 = vpop.f32.mrf.mxu2  ;;  %v15060_v26 = vld [vmem:[#allocation81_spill] sm:$0xff]  ;;  %4660 = vmatpush.bf16.msra.mxu0 %v8628_v22  ;;  %v12124_v40 = vsel %vm5807_vm1, %v4246_v37, %v6063_v39  ;;  %v9945_v37 = vld [vmem:[#allocation2 + $0x254] sm:$0xf] }
 0x580   : > { %v4159_v11 = vadd.f32 %v4158_v15, %v11841_v9  ;;  %v8593_v15 = vld [vmem:[#allocation2 + $0xb0] sm:$0xf0]  ;;  %15062 = vst [vmem:[#allocation170_spill] sm:$0xff] %v12124_v40 }
 0x581   : > { %v12117_v29 = vadd.f32 %v4423_v58, %v4335_v35  ;;  %4373 = vmatmul.bf16.gmra.mxu0 %v15058_v38  ;;  %v10057_v58 = vld [vmem:[#allocation2 + $0x5d4] sm:$0xf]  ;;  %v8596_v60 = vor.u32 %v9889_v56, %v8593_v15 }
 0x582   : > { %v4247_v4 = vpop.f32.mrf.mxu3  ;;  %4462 = vmatmul.bf16.gmra.mxu1 %v15059_v57  ;;  %v9265_v35 = vld [vmem:[#allocation2 + $0x5f0] sm:$0xf0] }
 0x583   : > { %15057 = vst [vmem:[#allocation137_spill] sm:$0xff] %v12117_v29  ;;  %v4248_v54 = vadd.f32 %v4247_v4, %v4159_v11  ;;  %4749 = vmatpush.bf16.msra.mxu1 %v8884_v59  ;;  %v9268_v49 = vor.u32 %v10057_v58, %v9265_v35  ;;  %v9953_v11 = vld [vmem:[#allocation2 + $0x294] sm:$0xf]  ;;  %4661 = vmatpush.bf16.msra.mxu0 %v8596_v60 }
 0x584   : > { %4200 = vmatmul.bf16.gmra.mxu2 %v15060_v26  ;;  %v8849_v4 = vld [vmem:[#allocation2 + $0x2b0] sm:$0xf0] }
 0x585   : > { %vm5815_vm2 = vcmp.ge.f32.partialorder %v4248_v54, 0.0  ;;  %v6071_v9 = vmul.f32 0.2, %v4248_v54  ;;  %4834 = vmatpush.bf16.msrb.mxu2 %v9268_v49  ;;  %v9881_v56 = vld [vmem:[#allocation2 + $0x54] sm:$0xf] }
 0x586   : > { %v4336_v46 = vpop.f32.mrf.mxu0  ;;  %v8561_v35 = vld [vmem:[#allocation2 + $0x70] sm:$0xf0] }
 0x587   : > { %4289 = vmatmul.bf16.gmra.mxu3 %v15061_v45  ;;  %v12127_v12 = vsel %vm5815_vm2, %v4248_v54, %v6071_v9  ;;  %v4337_v22 = vadd.f32 %v4336_v46, %v12023_v61  ;;  %v4425_v26 = vpop.f32.mrf.mxu1  ;;  %v4161_v57 = vpop.f32.mrf.mxu2  ;;  %v8852_v45 = vor.u32 %v9953_v11, %v8849_v4  ;;  %v10121_v54 = vld [vmem:[#allocation2 + $0x7d4] sm:$0xf]  ;;  %v8564_v15 = vor.u32 %v9881_v56, %v8561_v35 }
 0x588   : > { %15063 = vst [vmem:[#allocation171_spill] sm:$0xff] %v12127_v12  ;;  %v4162_v38 = vadd.f32 %v4161_v57, %v11845_v10  ;;  %v9521_v9 = vld [vmem:[#allocation2 + $0x7f0] sm:$0xf0] }
 0x589   : > { %v12133_v39 = vadd.f32 %v4425_v26, %v4337_v22  ;;  %4750 = vmatpush.bf16.msra.mxu1 %v8852_v45  ;;  %v8817_v46 = vld [vmem:[#allocation2 + $0x270] sm:$0xf0]  ;;  %v9524_v11 = vor.u32 %v10121_v54, %v9521_v9  ;;  %4662 = vmatpush.bf16.msra.mxu0 %v8564_v15 }
 0x58a   : > { %v4250_v58 = vpop.f32.mrf.mxu3  ;;  %v8820_v4 = vor.u32 %v9945_v37, %v8817_v46  ;;  %v9873_v59 = vld [vmem:[#allocation2 + $0x14] sm:$0xf] }
 0x58b   : > { %v4251_v29 = vadd.f32 %v4250_v58, %v4162_v38  ;;  %4923 = vmatpush.bf16.msrb.mxu3 %v9524_v11  ;;  %v8529_v10 = vld [vmem:[#allocation2 + $0x30] sm:$0xf0] }
 0x58c   : > { %v9937_v57 = vld [vmem:[#allocation2 + $0x214] sm:$0xf]  ;;  %v8532_v40 = vor.u32 %v9873_v59, %v8529_v10 }
 0x58d   : > { %4751 = vmatpush.bf16.msra.mxu1 %v8820_v4  ;;  %v8785_v60 = vld [vmem:[#allocation2 + $0x230] sm:$0xf0]  ;;  %v6079_v58 = vmul.f32 0.2, %v4251_v29  ;;  %vm5823_vm0 = vcmp.ge.f32.partialorder %v4251_v29, 0.0 }
 0x58e   : > { %v4339_v49 = vpop.f32.mrf.mxu0  ;;  %v8788_v12 = vor.u32 %v9937_v57, %v8785_v60  ;;  %4663 = vmatpush.bf16.msra.mxu0 %v8532_v40 }
 0x58f   : > { %v4340_v26 = vadd.f32 %v4339_v49, %v12023_v61  ;;  %v4428_v45 = vpop.f32.mrf.mxu1  ;;  %v4163_v22 = vpop.f32.mrf.mxu2 }
 0x590   : > { %v4164_v56 = vadd.f32 %v4163_v22, %v11859_v47  ;;  %v12143_v47 = vsel %vm5823_vm0, %v4251_v29, %v6079_v58 }
 0x591   : > { %v12137_v38 = vadd.f32 %v4428_v45, %v4340_v26  ;;  %4378 = vmatmul.bf16.gmra.mxu0 %v10807_v2  ;;  %4752 = vmatpush.bf16.msra.mxu1 %v8788_v12  ;;  %15064 = vst [vmem:[#allocation172_spill] sm:$0xff] %v12143_v47  ;;  %v15074_v47 = vld [vmem:[#allocation12_spill] sm:$0xff] }
 0x592   : > { %v4252_v35 = vpop.f32.mrf.mxu3  ;;  %4467 = vmatmul.bf16.gmra.mxu1 %v14788_v1 }
 0x593   : > { %v4253_v37 = vadd.f32 %v4252_v35, %v4164_v56 }
 0x594   : > { %4205 = vmatmul.bf16.gmra.mxu2 %v11138_v8 }
 0x595   : > { %vm5831_vm3 = vcmp.ge.f32.partialorder %v4253_v37, 0.0  ;;  %v6087_v59 = vmul.f32 0.2, %v4253_v37 }
 0x596   : > { %v4341_v54 = vpop.f32.mrf.mxu0 }
 0x597   : > { %4294 = vmatmul.bf16.gmra.mxu3 %v11141_v20  ;;  %v12145_v40 = vsel %vm5831_vm3, %v4253_v37, %v6087_v59  ;;  %v4342_v9 = vadd.f32 %v4341_v54, %v12023_v61  ;;  %v4430_v15 = vpop.f32.mrf.mxu1  ;;  %v4166_v12 = vpop.f32.mrf.mxu2  ;;  %v10049_v37 = vld [vmem:[#allocation2 + $0x594] sm:$0xf] }
 0x598   : > { %15065 = vst [vmem:[#allocation173_spill] sm:$0xff] %v12145_v40  ;;  %v4167_v11 = vadd.f32 %v4166_v12, %v11863_v23  ;;  %v9233_v59 = vld [vmem:[#allocation2 + $0x5b0] sm:$0xf0] }
 0x599   : > { %v12151_v10 = vadd.f32 %v4430_v15, %v4342_v9 }
 0x59a   : > { %v4255_v4 = vpop.f32.mrf.mxu3 }
 0x59b   : > { %v4256_v57 = vadd.f32 %v4255_v4, %v4167_v11 }
 0x59d   : > { %v6095_v35 = vmul.f32 0.2, %v4256_v57  ;;  %vm5839_vm4 = vcmp.ge.f32.partialorder %v4256_v57, 0.0 }
 0x59e   : > { %v4344_v60 = vpop.f32.mrf.mxu0 }
 0x59f   : > { %v4345_v49 = vadd.f32 %v4344_v60, %v12023_v61  ;;  %v4433_v29 = vpop.f32.mrf.mxu1  ;;  %v4168_v26 = vpop.f32.mrf.mxu2  ;;  %v12161_v9 = vsel %vm5839_vm4, %v4256_v57, %v6095_v35 }
 0x5a0   : > { %v4169_v45 = vadd.f32 %v4168_v26, %v11877_v13  ;;  %v9236_v13 = vor.u32 %v10049_v37, %v9233_v59  ;;  %15066 = vst [vmem:[#allocation174_spill] sm:$0xff] %v12161_v9 }
 0x5a1   : > { %v12155_v56 = vadd.f32 %v4433_v29, %v4345_v49  ;;  %4383 = vmatmul.bf16.gmra.mxu0 %v14792_v34 }
 0x5a2   : > { %v4257_v22 = vpop.f32.mrf.mxu3  ;;  %4472 = vmatmul.bf16.gmra.mxu1 %v14878_v42  ;;  %4835 = vmatpush.bf16.msrb.mxu2 %v9236_v13 }
 0x5a3   : > { %v4258_v58 = vadd.f32 %v4257_v22, %v4169_v45  ;;  %v10113_v45 = vld [vmem:[#allocation2 + $0x794] sm:$0xf] }
 0x5a4   : > { %4486 = vmatmul.bf16.vlgmr.msra.gmra.mxu2 %v14879_v5  ;;  %v9489_v22 = vld [vmem:[#allocation2 + $0x7b0] sm:$0xf0] }
 0x5a5   : > { %vm5847_vm5 = vcmp.ge.f32.partialorder %v4258_v58, 0.0  ;;  %v6103_v23 = vmul.f32 0.2, %v4258_v58  ;;  %v9492_v57 = vor.u32 %v10113_v45, %v9489_v22 }
 0x5a6   : > { %v4346_v54 = vpop.f32.mrf.mxu0 }
 0x5a7   : > { %4575 = vmatmul.bf16.vlgmr.msra.gmra.mxu3 %v14971_v0  ;;  %v12163_v15 = vsel %vm5847_vm5, %v4258_v58, %v6103_v23  ;;  %v4347_v12 = vadd.f32 %v4346_v54, %v12023_v61  ;;  %v4435_v11 = vpop.f32.mrf.mxu1  ;;  %v4171_v4 = vpop.f32.mrf.mxu2 }
 0x5a8   : > { %15067 = vst [vmem:[#allocation175_spill] sm:$0xff] %v12163_v15  ;;  %v4172_v49 = vadd.f32 %v4171_v4, %v11881_v44  ;;  %4924 = vmatpush.bf16.msrb.mxu3 %v9492_v57  ;;  %v15069_v4 = vld [vmem:[#allocation42_spill] sm:$0xff] }
 0x5a9   : > { %v12169_v26 = vadd.f32 %v4435_v11, %v4347_v12  ;;  %v15068_v11 = vld [vmem:[#allocation41_spill] sm:$0xff] }
 0x5aa   : > { %v4260_v29 = vpop.f32.mrf.mxu3 }
 0x5ab   : > { %v4261_v37 = vadd.f32 %v4260_v29, %v4172_v49 }
 0x5ad   : > { %v6111_v44 = vmul.f32 0.2, %v4261_v37  ;;  %vm5855_vm6 = vcmp.ge.f32.partialorder %v4261_v37, 0.0 }
 0x5ae   : > { %v4349_v35 = vpop.f32.mrf.mxu0 }
 0x5af   : > { %v4350_v58 = vadd.f32 %v4349_v35, %v12023_v61  ;;  %v4438_v23 = vpop.f32.mrf.mxu1  ;;  %v4173_v59 = vpop.f32.mrf.mxu2  ;;  %v12179_v29 = vsel %vm5855_vm6, %v4261_v37, %v6111_v44  ;;  %v15072_v35 = vld [vmem:[#allocation112_spill] sm:$0xff] }
 0x5b0   : > { %v4174_v54 = vadd.f32 %v4173_v59, %v11895_v36  ;;  %15070 = vst [vmem:[#allocation41_spill] sm:$0xff] %v12179_v29  ;;  %v15075_v29 = vld [vmem:[#allocation13_spill] sm:$0xff] }
 0x5b1   : > { %v12173_v60 = vadd.f32 %v4438_v23, %v4350_v58  ;;  %4664 = vmatmul.bf16.vlgmr.msra.gmra.mxu0 %v14883_v18 }
 0x5b2   : > { %v4262_v46 = vpop.f32.mrf.mxu3  ;;  %4753 = vmatmul.bf16.vlgmr.msra.gmra.mxu1 %v14974_v6 }
 0x5b3   : > { %v4263_v13 = vadd.f32 %v4262_v46, %v4174_v54 }
 0x5b4   : > { %4491 = vmatmul.bf16.gmra.mxu2 %v15068_v11 }
 0x5b5   : > { %vm5863_vm7 = vcmp.ge.f32.partialorder %v4263_v13, 0.0  ;;  %v6119_v12 = vmul.f32 0.2, %v4263_v13 }
 0x5b6   : > { %v4351_v49 = vpop.f32.mrf.mxu0 }
 0x5b7   : > { %4580 = vmatmul.bf16.gmra.mxu3 %v15069_v4  ;;  %v12181_v36 = vsel %vm5863_vm7, %v4263_v13, %v6119_v12  ;;  %v4352_v45 = vadd.f32 %v4351_v49, %v12023_v61  ;;  %v4440_v22 = vpop.f32.mrf.mxu1  ;;  %v4176_v57 = vpop.f32.mrf.mxu2 }
 0x5b8   : > { %15071 = vst [vmem:[#allocation42_spill] sm:$0xff] %v12181_v36  ;;  %v4177_v58 = vadd.f32 %v4176_v57, %v15072_v35  ;;  %v15077_v57 = vld [vmem:[#allocation45_spill] sm:$0xff]  ;;  %v9201_v35 = vld [vmem:[#allocation2 + $0x570] sm:$0xf0] }
 0x5b9   : > { %v12187_v59 = vadd.f32 %v4440_v22, %v4352_v45  ;;  %v15076_v22 = vld [vmem:[#allocation44_spill] sm:$0xff] }
 0x5ba   : > { %v4265_v23 = vpop.f32.mrf.mxu3 }
 0x5bb   : > { %v4266_v54 = vadd.f32 %v4265_v23, %v4177_v58 }
 0x5bd   : > { %v6127_v40 = vmul.f32 0.2, %v4266_v54  ;;  %vm5871_vm8 = vcmp.ge.f32.partialorder %v4266_v54, 0.0 }
 0x5be   : > { %v4354_v9 = vpop.f32.mrf.mxu0 }
 0x5bf   : > { %v4355_v15 = vadd.f32 %v4354_v9, %v12023_v61  ;;  %v4443_v37 = vpop.f32.mrf.mxu1  ;;  %v4178_v44 = vpop.f32.mrf.mxu2  ;;  %v10041_v9 = vld [vmem:[#allocation2 + $0x554] sm:$0xf]  ;;  %v12197_v23 = vsel %vm5871_vm8, %v4266_v54, %v6127_v40 }
 0x5c0   : > { %v4179_v13 = vadd.f32 %v4178_v44, %v11913_v63  ;;  %v9204_v63 = vor.u32 %v10041_v9, %v9201_v35  ;;  %15078 = vst [vmem:[#allocation176_spill] sm:$0xff] %v12197_v23 }
 0x5c1   : > { %v12191_v49 = vadd.f32 %v4443_v37, %v4355_v15  ;;  %4669 = vmatmul.bf16.gmra.mxu0 %v15074_v47  ;;  %v9457_v47 = vld [vmem:[#allocation2 + $0x770] sm:$0xf0] }
 0x5c2   : > { %v4267_v12 = vpop.f32.mrf.mxu3  ;;  %4758 = vmatmul.bf16.gmra.mxu1 %v15075_v29  ;;  %4836 = vmatpush.bf16.msrb.mxu2 %v9204_v63  ;;  %v10105_v29 = vld [vmem:[#allocation2 + $0x754] sm:$0xf] }
 0x5c3   : > { %15073 = vst [vmem:[#allocation112_spill] sm:$0xff] %v12191_v49  ;;  %v4268_v46 = vadd.f32 %v4267_v12, %v4179_v13  ;;  %v9460_v40 = vor.u32 %v10105_v29, %v9457_v47  ;;  %v15081_v29 = vld [vmem:[#allocation48_spill] sm:$0xff] }
 0x5c4   : > { %4496 = vmatmul.bf16.gmra.mxu2 %v15076_v22 }
 0x5c5   : > { %vm5879_vm9 = vcmp.ge.f32.partialorder %v4268_v46, 0.0  ;;  %v6135_v45 = vmul.f32 0.2, %v4268_v46  ;;  %4925 = vmatpush.bf16.msrb.mxu3 %v9460_v40 }
 0x5c6   : > { %v4356_v58 = vpop.f32.mrf.mxu0 }
 0x5c7   : > { %4585 = vmatmul.bf16.gmra.mxu3 %v15077_v57  ;;  %v12199_v15 = vsel %vm5879_vm9, %v4268_v46, %v6135_v45  ;;  %v4357_v37 = vadd.f32 %v4356_v58, %v12023_v61  ;;  %v4445_v44 = vpop.f32.mrf.mxu1  ;;  %v4181_v13 = vpop.f32.mrf.mxu2 }
 0x5c8   : > { %15079 = vst [vmem:[#allocation177_spill] sm:$0xff] %v12199_v15  ;;  %v4182_v36 = vadd.f32 %v4181_v13, %v11917_v17 }
 0x5c9   : > { %v12205_v57 = vadd.f32 %v4445_v44, %v4357_v37  ;;  %v15080_v37 = vld [vmem:[#allocation17_spill] sm:$0xff] }
 0x5ca   : > { %v4270_v22 = vpop.f32.mrf.mxu3 }
 0x5cb   : > { %v4271_v9 = vadd.f32 %v4270_v22, %v4182_v36  ;;  %v15082_v36 = vld [vmem:[#allocation49_spill] sm:$0xff] }
 0x5cd   : > { %v6143_v17 = vmul.f32 0.2, %v4271_v9  ;;  %vm5887_vm10 = vcmp.ge.f32.partialorder %v4271_v9, 0.0 }
 0x5ce   : > { %v4359_v46 = vpop.f32.mrf.mxu0 }
 0x5cf   : > { %v4360_v54 = vadd.f32 %v4359_v46, %v12023_v61  ;;  %v4448_v45 = vpop.f32.mrf.mxu1  ;;  %v4183_v35 = vpop.f32.mrf.mxu2  ;;  %v12215_v44 = vsel %vm5887_vm10, %v4271_v9, %v6143_v17 }
 0x5d0   : > { %v4184_v58 = vadd.f32 %v4183_v35, %v11931_v62  ;;  %15083 = vst [vmem:[#allocation178_spill] sm:$0xff] %v12215_v44  ;;  %v15088_v44 = vld [vmem:[#allocation21_spill] sm:$0xff] }
 0x5d1   : > { %v12209_v12 = vadd.f32 %v4448_v45, %v4360_v54  ;;  %4674 = vmatmul.bf16.gmra.mxu0 %v14896_v33  ;;  %v15085_v54 = vld [vmem:[#allocation116_spill] sm:$0xff] }
 0x5d2   : > { %v4272_v49 = vpop.f32.mrf.mxu3  ;;  %4763 = vmatmul.bf16.gmra.mxu1 %v15080_v37 }
 0x5d3   : > { %v4273_v63 = vadd.f32 %v4272_v49, %v4184_v58 }
 0x5d4   : > { %4501 = vmatmul.bf16.gmra.mxu2 %v15081_v29  ;;  %v15087_v29 = vld [vmem:[#allocation20_spill] sm:$0xff] }
 0x5d5   : > { %vm5895_vm11 = vcmp.ge.f32.partialorder %v4273_v63, 0.0  ;;  %v6151_v47 = vmul.f32 0.2, %v4273_v63 }
 0x5d6   : > { %v4361_v22 = vpop.f32.mrf.mxu0 }
 0x5d7   : > { %4590 = vmatmul.bf16.gmra.mxu3 %v15082_v36  ;;  %v12217_v62 = vsel %vm5895_vm11, %v4273_v63, %v6151_v47  ;;  %v4362_v13 = vadd.f32 %v4361_v22, %v12023_v61  ;;  %v4450_v40 = vpop.f32.mrf.mxu1  ;;  %v4186_v46 = vpop.f32.mrf.mxu2 }
 0x5d8   : > { %15084 = vst [vmem:[#allocation179_spill] sm:$0xff] %v12217_v62  ;;  %v4187_v45 = vadd.f32 %v4186_v46, %v15085_v54  ;;  %v15090_v46 = vld [vmem:[#allocation53_spill] sm:$0xff]  ;;  %v9169_v54 = vld [vmem:[#allocation2 + $0x530] sm:$0xf0] }
 0x5d9   : > { %v12223_v58 = vadd.f32 %v4450_v40, %v4362_v13  ;;  %v15089_v40 = vld [vmem:[#allocation52_spill] sm:$0xff] }
 0x5da   : > { %v4275_v35 = vpop.f32.mrf.mxu3 }
 0x5db   : > { %v4276_v23 = vadd.f32 %v4275_v35, %v4187_v45 }
 0x5dd   : > { %v6159_v37 = vmul.f32 0.2, %v4276_v23  ;;  %vm5903_vm12 = vcmp.ge.f32.partialorder %v4276_v23, 0.0 }
 0x5de   : > { %v4364_v15 = vpop.f32.mrf.mxu0 }
 0x5df   : > { %v4365_v36 = vadd.f32 %v4364_v15, %v12023_v61  ;;  %v4453_v9 = vpop.f32.mrf.mxu1  ;;  %v4188_v17 = vpop.f32.mrf.mxu2  ;;  %v10033_v15 = vld [vmem:[#allocation2 + $0x514] sm:$0xf]  ;;  %v12233_v35 = vsel %vm5903_vm12, %v4276_v23, %v6159_v37 }
 0x5e0   : > { %v4189_v63 = vadd.f32 %v4188_v17, %v11949_v14  ;;  %v9172_v14 = vor.u32 %v10033_v15, %v9169_v54  ;;  %15091 = vst [vmem:[#allocation180_spill] sm:$0xff] %v12233_v35 }
 0x5e1   : > { %v12227_v22 = vadd.f32 %v4453_v9, %v4365_v36  ;;  %4679 = vmatmul.bf16.gmra.mxu0 %v15087_v29  ;;  %v9425_v29 = vld [vmem:[#allocation2 + $0x730] sm:$0xf0] }
 0x5e2   : > { %v4277_v47 = vpop.f32.mrf.mxu3  ;;  %4768 = vmatmul.bf16.gmra.mxu1 %v15088_v44  ;;  %4837 = vmatpush.bf16.msrb.mxu2 %v9172_v14  ;;  %v10097_v44 = vld [vmem:[#allocation2 + $0x714] sm:$0xf] }
 0x5e3   : > { %15086 = vst [vmem:[#allocation116_spill] sm:$0xff] %v12227_v22  ;;  %v4278_v49 = vadd.f32 %v4277_v47, %v4189_v63  ;;  %v9428_v23 = vor.u32 %v10097_v44, %v9425_v29  ;;  %v15094_v44 = vld [vmem:[#allocation56_spill] sm:$0xff] }
 0x5e4   : > { %4506 = vmatmul.bf16.gmra.mxu2 %v15089_v40 }
 0x5e5   : > { %vm5911_vm13 = vcmp.ge.f32.partialorder %v4278_v49, 0.0  ;;  %v6167_v13 = vmul.f32 0.2, %v4278_v49  ;;  %4926 = vmatpush.bf16.msrb.mxu3 %v9428_v23 }
 0x5e6   : > { %v4366_v45 = vpop.f32.mrf.mxu0 }
 0x5e7   : > { %4595 = vmatmul.bf16.gmra.mxu3 %v15090_v46  ;;  %v12235_v36 = vsel %vm5911_vm13, %v4278_v49, %v6167_v13  ;;  %v4367_v9 = vadd.f32 %v4366_v45, %v12023_v61  ;;  %v4455_v17 = vpop.f32.mrf.mxu1  ;;  %v4191_v63 = vpop.f32.mrf.mxu2 }
 0x5e8   : > { %15092 = vst [vmem:[#allocation181_spill] sm:$0xff] %v12235_v36  ;;  %v4192_v62 = vadd.f32 %v4191_v63, %v11953_v3 }
 0x5e9   : > { %v12241_v46 = vadd.f32 %v4455_v17, %v4367_v9  ;;  %v15093_v9 = vld [vmem:[#allocation25_spill] sm:$0xff] }
 0x5ea   : > { %v4280_v40 = vpop.f32.mrf.mxu3 }
 0x5eb   : > { %v4281_v15 = vadd.f32 %v4280_v40, %v4192_v62  ;;  %v15095_v62 = vld [vmem:[#allocation57_spill] sm:$0xff] }
 0x5ed   : > { %v6175_v3 = vmul.f32 0.2, %v4281_v15  ;;  %vm5919_vm14 = vcmp.ge.f32.partialorder %v4281_v15, 0.0 }
 0x5ee   : > { %v4369_v37 = vpop.f32.mrf.mxu0 }
 0x5ef   : > { %v4370_v49 = vadd.f32 %v4369_v37, %v12023_v61  ;;  %v4458_v13 = vpop.f32.mrf.mxu1  ;;  %v4193_v54 = vpop.f32.mrf.mxu2  ;;  %v12251_v17 = vsel %vm5919_vm14, %v4281_v15, %v6175_v3 }
 0x5f0   : > { %v4194_v45 = vadd.f32 %v4193_v54, %v11967_v51  ;;  %15096 = vst [vmem:[#allocation182_spill] sm:$0xff] %v12251_v17  ;;  %v15101_v17 = vld [vmem:[#allocation29_spill] sm:$0xff] }
 0x5f1   : > { %v12245_v47 = vadd.f32 %v4458_v13, %v4370_v49  ;;  %4684 = vmatmul.bf16.gmra.mxu0 %v14909_v7  ;;  %v15098_v49 = vld [vmem:[#allocation120_spill] sm:$0xff] }
 0x5f2   : > { %v4282_v22 = vpop.f32.mrf.mxu3  ;;  %4773 = vmatmul.bf16.gmra.mxu1 %v15093_v9 }
 0x5f3   : > { %v4283_v14 = vadd.f32 %v4282_v22, %v4194_v45 }
 0x5f4   : > { %4511 = vmatmul.bf16.gmra.mxu2 %v15094_v44  ;;  %v15100_v44 = vld [vmem:[#allocation28_spill] sm:$0xff] }
 0x5f5   : > { %vm5927_vm15 = vcmp.ge.f32.partialorder %v4283_v14, 0.0  ;;  %v6183_v29 = vmul.f32 0.2, %v4283_v14 }
 0x5f6   : > { %v4371_v40 = vpop.f32.mrf.mxu0 }
 0x5f7   : > { %4600 = vmatmul.bf16.gmra.mxu3 %v15095_v62  ;;  %v12253_v51 = vsel %vm5927_vm15, %v4283_v14, %v6183_v29  ;;  %v4372_v63 = vadd.f32 %v4371_v40, %v12023_v61  ;;  %v4460_v23 = vpop.f32.mrf.mxu1  ;;  %v4196_v37 = vpop.f32.mrf.mxu2 }
 0x5f8   : > { %15097 = vst [vmem:[#allocation183_spill] sm:$0xff] %v12253_v51  ;;  %v4197_v13 = vadd.f32 %v4196_v37, %v15098_v49  ;;  %v15103_v37 = vld [vmem:[#allocation59_spill] sm:$0xff]  ;;  %v9137_v49 = vld [vmem:[#allocation2 + $0x4f0] sm:$0xf0] }
 0x5f9   : > { %v12259_v45 = vadd.f32 %v4460_v23, %v4372_v63  ;;  %v15102_v23 = vld [vmem:[#allocation58_spill] sm:$0xff] }
 0x5fa   : > { %v4285_v54 = vpop.f32.mrf.mxu3 }
 0x5fb   : > { %v4286_v35 = vadd.f32 %v4285_v54, %v4197_v13 }
 0x5fd   : > { %v6191_v9 = vmul.f32 0.2, %v4286_v35  ;;  %vm5935_vm1 = vcmp.ge.f32.partialorder %v4286_v35, 0.0 }
 0x5fe   : > { %v4374_v36 = vpop.f32.mrf.mxu0 }
 0x5ff   : > { %v4375_v62 = vadd.f32 %v4374_v36, %v12023_v61  ;;  %v4463_v15 = vpop.f32.mrf.mxu1  ;;  %v4198_v3 = vpop.f32.mrf.mxu2  ;;  %v10025_v36 = vld [vmem:[#allocation2 + $0x4d4] sm:$0xf]  ;;  %v12269_v54 = vsel %vm5935_vm1, %v4286_v35, %v6191_v9 }
 0x600   : > { %v4199_v14 = vadd.f32 %v4198_v3, %v11985_v48  ;;  %v9140_v48 = vor.u32 %v10025_v36, %v9137_v49  ;;  %15104 = vst [vmem:[#allocation184_spill] sm:$0xff] %v12269_v54  ;;  %v8759_v54 = vld [vmem:[#allocation2 + $0x1d8] sm:$0xf] }
 0x601   : > { %v12263_v40 = vadd.f32 %v4463_v15, %v4375_v62  ;;  %4689 = vmatmul.bf16.gmra.mxu0 %v15100_v44  ;;  %v9393_v44 = vld [vmem:[#allocation2 + $0x6f0] sm:$0xf0] }
 0x602   : > { %v4287_v29 = vpop.f32.mrf.mxu3  ;;  %4778 = vmatmul.bf16.gmra.mxu1 %v15101_v17  ;;  %4838 = vmatpush.bf16.msrb.mxu2 %v9140_v48  ;;  %v10089_v17 = vld [vmem:[#allocation2 + $0x6d4] sm:$0xf] }
 0x603   : > { %15099 = vst [vmem:[#allocation120_spill] sm:$0xff] %v12263_v40  ;;  %v4288_v22 = vadd.f32 %v4287_v29, %v4199_v14  ;;  %v9396_v35 = vor.u32 %v10089_v17, %v9393_v44  ;;  %v15107_v17 = vld [vmem:[#allocation61_spill] sm:$0xff] }
 0x604   : > { %4516 = vmatmul.bf16.gmra.mxu2 %v15102_v23 }
 0x605   : > { %vm5943_vm2 = vcmp.ge.f32.partialorder %v4288_v22, 0.0  ;;  %v6199_v63 = vmul.f32 0.2, %v4288_v22  ;;  %4927 = vmatpush.bf16.msrb.mxu3 %v9396_v35 }
 0x606   : > { %v4376_v13 = vpop.f32.mrf.mxu0 }
 0x607   : > { %4605 = vmatmul.bf16.gmra.mxu3 %v15103_v37  ;;  %v12271_v62 = vsel %vm5943_vm2, %v4288_v22, %v6199_v63  ;;  %v4377_v15 = vadd.f32 %v4376_v13, %v12023_v61  ;;  %v4465_v3 = vpop.f32.mrf.mxu1  ;;  %v4201_v14 = vpop.f32.mrf.mxu2 }
 0x608   : > { %15105 = vst [vmem:[#allocation185_spill] sm:$0xff] %v12271_v62  ;;  %v4202_v51 = vadd.f32 %v4201_v14, %v11989_v50  ;;  %v9934_v62 = vld [vmem:[#allocation2 + $0x1f4] sm:$0xf0] }
 0x609   : > { %v12277_v37 = vadd.f32 %v4465_v3, %v4377_v15  ;;  %v15106_v15 = vld [vmem:[#allocation33_spill] sm:$0xff] }
 0x60a   : > { %v4290_v23 = vpop.f32.mrf.mxu3 }
 0x60b   : > { %v4291_v36 = vadd.f32 %v4290_v23, %v4202_v51  ;;  %v15108_v51 = vld [vmem:[#allocation62_spill] sm:$0xff] }
 0x60d   : > { %v6207_v50 = vmul.f32 0.2, %v4291_v36  ;;  %vm5951_vm0 = vcmp.ge.f32.partialorder %v4291_v36, 0.0 }
 0x60e   : > { %v4379_v9 = vpop.f32.mrf.mxu0 }
 0x60f   : > { %v4380_v22 = vadd.f32 %v4379_v9, %v12023_v61  ;;  %v4468_v63 = vpop.f32.mrf.mxu1  ;;  %v4203_v49 = vpop.f32.mrf.mxu2  ;;  %v12287_v3 = vsel %vm5951_vm0, %v4291_v36, %v6207_v50  ;;  %v8760_v36 = vor.u32 %v9934_v62, %v8759_v54  ;;  %v10017_v54 = vld [vmem:[#allocation2 + $0x494] sm:$0xf] }
 0x610   : > { %v4204_v13 = vadd.f32 %v4203_v49, %v12003_v52  ;;  %15109 = vst [vmem:[#allocation186_spill] sm:$0xff] %v12287_v3  ;;  %v9105_v62 = vld [vmem:[#allocation2 + $0x4b0] sm:$0xf0] }
 0x611   : > { %v12281_v29 = vadd.f32 %v4468_v63, %v4380_v22  ;;  %4694 = vmatmul.bf16.gmra.mxu0 %v14833_v25  ;;  %v9361_v3 = vld [vmem:[#allocation2 + $0x6b0] sm:$0xf0] }
 0x612   : > { %v4292_v40 = vpop.f32.mrf.mxu3  ;;  %4783 = vmatmul.bf16.gmra.mxu1 %v15106_v15  ;;  %5012 = vmatpush.bf16.msrb.mxu0 %v8760_v36 }
 0x613   : > { %v4293_v48 = vadd.f32 %v4292_v40, %v4204_v13  ;;  %v10081_v40 = vld [vmem:[#allocation2 + $0x694] sm:$0xf] }
 0x614   : > { %4521 = vmatmul.bf16.gmra.mxu2 %v15107_v17 }
 0x615   : > { %vm5959_vm3 = vcmp.ge.f32.partialorder %v4293_v48, 0.0  ;;  %v6215_v44 = vmul.f32 0.2, %v4293_v48 }
 0x616   : > { %v4381_v23 = vpop.f32.mrf.mxu0 }
 0x617   : > { %4610 = vmatmul.bf16.gmra.mxu3 %v15108_v51  ;;  %v12289_v52 = vsel %vm5959_vm3, %v4293_v48, %v6215_v44  ;;  %v4382_v14 = vadd.f32 %v4381_v23, %v12023_v61  ;;  %v4470_v35 = vpop.f32.mrf.mxu1  ;;  %v4206_v9 = vpop.f32.mrf.mxu2 }
 0x618   : > { %15110 = vst [vmem:[#allocation187_spill] sm:$0xff] %v12289_v52  ;;  %v4207_v22 = vadd.f32 %v4206_v9, %v12007_v24  ;;  %v9926_v52 = vld [vmem:[#allocation2 + $0x1b4] sm:$0xf0] }
 0x619   : > { %v12295_v49 = vadd.f32 %v4470_v35, %v4382_v14 }
 0x61a   : > { %v4295_v63 = vpop.f32.mrf.mxu3 }
 0x61b   : > { %v4296_v13 = vadd.f32 %v4295_v63, %v4207_v22 }
 0x61d   : > { %v6223_v24 = vmul.f32 0.2, %v4296_v13  ;;  %vm5967_vm4 = vcmp.ge.f32.partialorder %v4296_v13, 0.0 }
 0x61e   : > { %v4384_v51 = vpop.f32.mrf.mxu0 }
 0x61f   : > { %v4385_v50 = vadd.f32 %v4384_v51, %v12023_v61  ;;  %v4473_v48 = vpop.f32.mrf.mxu1  ;;  %v4208_v44 = vpop.f32.mrf.mxu2  ;;  %v9108_v51 = vor.u32 %v10017_v54, %v9105_v62  ;;  %v12305_v9 = vsel %vm5967_vm4, %v4296_v13, %v6223_v24  ;;  %v9364_v13 = vor.u32 %v10081_v40, %v9361_v3  ;;  %v10253_v24 = vld [vmem:[#allocation4 + $0x4] sm:$0xff] }
 0x620   : > { %v4209_v23 = vadd.f32 %v4208_v44, %v12021_v16  ;;  %15111 = vst [vmem:[#allocation188_spill] sm:$0xff] %v12305_v9  ;;  %v15113_v40 = vld [vmem:[#allocation66_spill] sm:$0xff] }
 0x621   : > { %v12299_v15 = vadd.f32 %v4473_v48, %v4385_v50  ;;  %4699 = vmatmul.bf16.gmra.mxu0 %v14838_v55  ;;  %4839 = vmatpush.bf16.msrb.mxu2 %v9108_v51 }
 0x622   : > { %v4297_v17 = vpop.f32.mrf.mxu3  ;;  %4788 = vmatmul.bf16.gmra.mxu1 %v14839_v19  ;;  %4928 = vmatpush.bf16.msrb.mxu3 %v9364_v13 }
 0x623   : > { %v4298_v14 = vadd.f32 %v4297_v17, %v4209_v23 }
 0x624   : > { %4526 = vmatmul.bf16.gmra.mxu2 %v11012_v27 }
 0x625   : > { %vm5975_vm5 = vcmp.ge.f32.partialorder %v4298_v14, 0.0  ;;  %v6231_v35 = vmul.f32 0.2, %v4298_v14 }
 0x626   : > { %v4386_v16 = vpop.f32.mrf.mxu0 }
 0x627   : > { %4615 = vmatmul.bf16.gmra.mxu3 %v14927_v53  ;;  %v12307_v22 = vsel %vm5975_vm5, %v4298_v14, %v6231_v35  ;;  %v4387_v63 = vadd.f32 %v4386_v16, %v12023_v61  ;;  %v4475_v17 = vpop.f32.mrf.mxu1  ;;  %v4487_v36 = vpop.f32.mrf.mxu2  ;;  %v12315_v14 = vperm.slane %v10253_v24, 5 }
 0x628   : > { %15112 = vst [vmem:[#allocation189_spill] sm:$0xff] %v12307_v22  ;;  %v4488_v48 = vadd.f32 %v4487_v36, %v12027_v41  ;;  %v8727_v22 = vld [vmem:[#allocation2 + $0x198] sm:$0xf] }
 0x629   : > { %v12313_v23 = vadd.f32 %v4475_v17, %v4387_v63  ;;  %v15114_v17 = vld [vmem:[#allocation67_spill] sm:$0xff] }
 0x62a   : > { %v4576_v44 = vpop.f32.mrf.mxu3 }
 0x62b   : > { %v4577_v54 = vadd.f32 %v4576_v44, %v4488_v48 }
 0x62d   : > { %v5984_v51 = vmul.f32 0.2, %v4577_v54  ;;  %vm5728_vm6 = vcmp.ge.f32.partialorder %v4577_v54, 0.0 }
 0x62e   : > { %v4665_v61 = vpop.f32.mrf.mxu0 }
 0x62f   : > { %v4666_v35 = vadd.f32 %v4665_v61, %v12315_v14  ;;  %v4754_v62 = vpop.f32.mrf.mxu1  ;;  %v4489_v16 = vpop.f32.mrf.mxu2  ;;  %v12325_v48 = vsel %vm5728_vm6, %v4577_v54, %v5984_v51  ;;  %v8728_v51 = vor.u32 %v9926_v52, %v8727_v22  ;;  %v15121_v52 = vld [vmem:[#allocation69_spill] sm:$0xff]  ;;  %v15122_v22 = vld [vmem:[#allocation70_spill] sm:$0xff] }
 0x630   : > { %v4490_v50 = vadd.f32 %v4489_v16, %v12041_v21  ;;  %15115 = vst [vmem:[#allocation190_spill] sm:$0xff] %v12325_v48 }
 0x631   : > { %v12319_v36 = vadd.f32 %v4754_v62, %v4666_v35  ;;  %4704 = vmatmul.bf16.gmra.mxu0 %v10675_v28  ;;  %v15117_v35 = vld [vmem:[#allocation86_spill] sm:$0xff] }
 0x632   : > { %v4578_v41 = vpop.f32.mrf.mxu3  ;;  %4793 = vmatmul.bf16.gmra.mxu1 %v10680_v31  ;;  %5013 = vmatpush.bf16.msrb.mxu0 %v8728_v51 }
 0x633   : > { %v4579_v63 = vadd.f32 %v4578_v41, %v4490_v50 }
 0x634   : > { %4531 = vmatmul.bf16.gmra.mxu2 %v15113_v40  ;;  %v9329_v40 = vld [vmem:[#allocation2 + $0x670] sm:$0xf0] }
 0x635   : > { %vm5736_vm7 = vcmp.ge.f32.partialorder %v4579_v63, 0.0  ;;  %v5992_v3 = vmul.f32 0.2, %v4579_v63 }
 0x636   : > { %v4667_v21 = vpop.f32.mrf.mxu0 }
 0x637   : > { %4620 = vmatmul.bf16.gmra.mxu3 %v15114_v17  ;;  %v12327_v44 = vsel %vm5736_vm7, %v4579_v63, %v5992_v3  ;;  %v4668_v24 = vadd.f32 %v4667_v21, %v12315_v14  ;;  %v4756_v50 = vpop.f32.mrf.mxu1  ;;  %v4492_v61 = vpop.f32.mrf.mxu2 }
 0x638   : > { %15116 = vst [vmem:[#allocation191_spill] sm:$0xff] %v12327_v44  ;;  %v4493_v62 = vadd.f32 %v4492_v61, %v15117_v35  ;;  %v15119_v44 = vld [vmem:[#allocation14_spill] sm:$0xff] }
 0x639   : > { %v12333_v41 = vadd.f32 %v4756_v50, %v4668_v24  ;;  %v15120_v50 = vld [vmem:[#allocation15_spill] sm:$0xff] }
 0x63a   : > { %v4581_v16 = vpop.f32.mrf.mxu3 }
 0x63b   : > { %v4582_v9 = vadd.f32 %v4581_v16, %v4493_v62  ;;  %v10009_v62 = vld [vmem:[#allocation2 + $0x454] sm:$0xf] }
 0x63c   : > { %v9073_v16 = vld [vmem:[#allocation2 + $0x470] sm:$0xf0] }
 0x63d   : > { %v6000_v61 = vmul.f32 0.2, %v4582_v9  ;;  %vm5744_vm8 = vcmp.ge.f32.partialorder %v4582_v9, 0.0 }
 0x63e   : > { %v4670_v54 = vpop.f32.mrf.mxu0 }
 0x63f   : > { %v4671_v63 = vadd.f32 %v4670_v54, %v12315_v14  ;;  %v4759_v3 = vpop.f32.mrf.mxu1  ;;  %v4494_v17 = vpop.f32.mrf.mxu2  ;;  %v12343_v54 = vsel %vm5744_vm8, %v4582_v9, %v6000_v61 }
 0x640   : > { %v4495_v13 = vadd.f32 %v4494_v17, %v12059_v32  ;;  %v9076_v17 = vor.u32 %v10009_v62, %v9073_v16  ;;  %15123 = vst [vmem:[#allocation192_spill] sm:$0xff] %v12343_v54 }
 0x641   : > { %v12337_v21 = vadd.f32 %v4759_v3, %v4671_v63  ;;  %4709 = vmatmul.bf16.gmra.mxu0 %v15119_v44 }
 0x642   : > { %v4583_v48 = vpop.f32.mrf.mxu3  ;;  %4798 = vmatmul.bf16.gmra.mxu1 %v15120_v50  ;;  %v15125_v50 = vld [vmem:[#allocation162_spill] sm:$0xff]  ;;  %4840 = vmatpush.bf16.msrb.mxu2 %v9076_v17 }
 0x643   : > { %15118 = vst [vmem:[#allocation86_spill] sm:$0xff] %v12337_v21  ;;  %v4584_v24 = vadd.f32 %v4583_v48, %v4495_v13  ;;  %v10073_v21 = vld [vmem:[#allocation2 + $0x654] sm:$0xf] }
 0x644   : > { %4536 = vmatmul.bf16.gmra.mxu2 %v15121_v52  ;;  %v9332_v9 = vor.u32 %v10073_v21, %v9329_v40  ;;  %v15131_v21 = vld [vmem:[#allocation73_spill] sm:$0xff] }
 0x645   : > { %vm5752_vm9 = vcmp.ge.f32.partialorder %v4584_v24, 0.0  ;;  %v6008_v35 = vmul.f32 0.2, %v4584_v24 }
 0x646   : > { %v4672_v32 = vpop.f32.mrf.mxu0  ;;  %4929 = vmatpush.bf16.msrb.mxu3 %v9332_v9 }
 0x647   : > { %4625 = vmatmul.bf16.gmra.mxu3 %v15122_v22  ;;  %v12345_v51 = vsel %vm5752_vm9, %v4584_v24, %v6008_v35  ;;  %v4673_v63 = vadd.f32 %v4672_v32, %v12315_v14  ;;  %v4761_v48 = vpop.f32.mrf.mxu1  ;;  %v4497_v13 = vpop.f32.mrf.mxu2 }
 0x648   : > { %15124 = vst [vmem:[#allocation193_spill] sm:$0xff] %v12345_v51  ;;  %v4498_v44 = vadd.f32 %v4497_v13, %v15125_v50  ;;  %v15128_v50 = vld [vmem:[#allocation18_spill] sm:$0xff] }
 0x649   : > { %v12351_v22 = vadd.f32 %v4761_v48, %v4673_v63  ;;  %v15129_v48 = vld [vmem:[#allocation19_spill] sm:$0xff] }
 0x64a   : > { %v4586_v52 = vpop.f32.mrf.mxu3 }
 0x64b   : > { %15126 = vst [vmem:[#allocation162_spill] sm:$0xff] %v12351_v22  ;;  %v4587_v62 = vadd.f32 %v4586_v52, %v4498_v44  ;;  %v15130_v44 = vld [vmem:[#allocation72_spill] sm:$0xff] }
 0x64d   : > { %v6016_v17 = vmul.f32 0.2, %v4587_v62  ;;  %vm5760_vm10 = vcmp.ge.f32.partialorder %v4587_v62, 0.0 }
 0x64e   : > { %v4675_v61 = vpop.f32.mrf.mxu0 }
 0x64f   : > { %v4676_v24 = vadd.f32 %v4675_v61, %v12315_v14  ;;  %v4764_v35 = vpop.f32.mrf.mxu1  ;;  %v4499_v16 = vpop.f32.mrf.mxu2  ;;  %v12361_v13 = vsel %vm5760_vm10, %v4587_v62, %v6016_v17 }
 0x650   : > { %v4500_v32 = vadd.f32 %v4499_v16, %v12077_v30  ;;  %15132 = vst [vmem:[#allocation195_spill] sm:$0xff] %v12361_v13  ;;  %v15143_v13 = vld [vmem:[#allocation167_spill] sm:$0xff] }
 0x651   : > { %v12355_v3 = vadd.f32 %v4764_v35, %v4676_v24  ;;  %4714 = vmatmul.bf16.gmra.mxu0 %v15128_v50  ;;  %v15134_v35 = vld [vmem:[#allocation132_spill] sm:$0xff] }
 0x652   : > { %v4588_v31 = vpop.f32.mrf.mxu3  ;;  %4803 = vmatmul.bf16.gmra.mxu1 %v15129_v48 }
 0x653   : > { %15127 = vst [vmem:[#allocation194_spill] sm:$0xff] %v12355_v3  ;;  %v4589_v63 = vadd.f32 %v4588_v31, %v4500_v32  ;;  %v15137_v31 = vld [vmem:[#allocation22_spill] sm:$0xff] }
 0x654   : > { %4541 = vmatmul.bf16.gmra.mxu2 %v15130_v44  ;;  %v8695_v44 = vld [vmem:[#allocation2 + $0x158] sm:$0xf] }
 0x655   : > { %vm5768_vm11 = vcmp.ge.f32.partialorder %v4589_v63, 0.0  ;;  %v6024_v40 = vmul.f32 0.2, %v4589_v63 }
 0x656   : > { %v4677_v52 = vpop.f32.mrf.mxu0 }
 0x657   : > { %4630 = vmatmul.bf16.gmra.mxu3 %v15131_v21  ;;  %v12363_v30 = vsel %vm5768_vm11, %v4589_v63, %v6024_v40  ;;  %v4678_v9 = vadd.f32 %v4677_v52, %v12315_v14  ;;  %v4766_v61 = vpop.f32.mrf.mxu1  ;;  %v4502_v24 = vpop.f32.mrf.mxu2  ;;  %v9918_v21 = vld [vmem:[#allocation2 + $0x174] sm:$0xf0]  ;;  %v15135_v52 = vld [vmem:[#allocation104_spill] sm:$0xff] }
 0x658   : > { %15133 = vst [vmem:[#allocation196_spill] sm:$0xff] %v12363_v30  ;;  %v4503_v16 = vadd.f32 %v4502_v24, %v15134_v35  ;;  %v8696_v62 = vor.u32 %v9918_v21, %v8695_v44  ;;  %v15139_v44 = vld [vmem:[#allocation75_spill] sm:$0xff]  ;;  %v10001_v21 = vld [vmem:[#allocation2 + $0x414] sm:$0xf] }
 0x659   : > { %v12369_v54 = vadd.f32 %v4766_v61, %v4678_v9  ;;  %v15138_v61 = vld [vmem:[#allocation23_spill] sm:$0xff] }
 0x65a   : > { %v4591_v32 = vpop.f32.mrf.mxu3  ;;  %5014 = vmatpush.bf16.msrb.mxu0 %v8696_v62 }
 0x65b   : > { %v4592_v51 = vadd.f32 %v4591_v32, %v4503_v16  ;;  %v9041_v16 = vld [vmem:[#allocation2 + $0x430] sm:$0xf0] }
 0x65d   : > { %v6032_v24 = vmul.f32 0.2, %v4592_v51  ;;  %vm5776_vm12 = vcmp.ge.f32.partialorder %v4592_v51, 0.0 }
 0x65e   : > { %v4680_v48 = vpop.f32.mrf.mxu0 }
 0x65f   : > { %v4681_v17 = vadd.f32 %v4680_v48, %v12315_v14  ;;  %v4769_v63 = vpop.f32.mrf.mxu1  ;;  %v4504_v40 = vpop.f32.mrf.mxu2  ;;  %v15140_v48 = vld [vmem:[#allocation76_spill] sm:$0xff]  ;;  %v12379_v62 = vsel %vm5776_vm12, %v4592_v51, %v6032_v24 }
 0x660   : > { %v4505_v50 = vadd.f32 %v4504_v40, %v15135_v52  ;;  %v9044_v40 = vor.u32 %v10001_v21, %v9041_v16  ;;  %15141 = vst [vmem:[#allocation104_spill] sm:$0xff] %v12379_v62  ;;  %v9015_v52 = vld [vmem:[#allocation2 + $0x3d8] sm:$0xf] }
 0x661   : > { %v12373_v22 = vadd.f32 %v4769_v63, %v4681_v17  ;;  %4719 = vmatmul.bf16.gmra.mxu0 %v15137_v31  ;;  %v9297_v31 = vld [vmem:[#allocation2 + $0x630] sm:$0xf0]  ;;  %v9998_v62 = vld [vmem:[#allocation2 + $0x3f4] sm:$0xf0] }
 0x662   : > { %v4593_v3 = vpop.f32.mrf.mxu3  ;;  %4808 = vmatmul.bf16.gmra.mxu1 %v15138_v61  ;;  %4841 = vmatpush.bf16.msrb.mxu2 %v9044_v40  ;;  %v10065_v61 = vld [vmem:[#allocation2 + $0x614] sm:$0xf]  ;;  %v15146_v40 = vld [vmem:[#allocation26_spill] sm:$0xff] }
 0x663   : > { %15136 = vst [vmem:[#allocation132_spill] sm:$0xff] %v12373_v22  ;;  %v4594_v9 = vadd.f32 %v4593_v3, %v4505_v50  ;;  %v9300_v51 = vor.u32 %v10065_v61, %v9297_v31  ;;  %v15148_v61 = vld [vmem:[#allocation78_spill] sm:$0xff] }
 0x664   : > { %4546 = vmatmul.bf16.gmra.mxu2 %v15139_v44 }
 0x665   : > { %vm5784_vm13 = vcmp.ge.f32.partialorder %v4594_v9, 0.0  ;;  %v6040_v35 = vmul.f32 0.2, %v4594_v9  ;;  %4930 = vmatpush.bf16.msrb.mxu3 %v9300_v51  ;;  %v9990_v51 = vld [vmem:[#allocation2 + $0x3b4] sm:$0xf0] }
 0x666   : > { %v4682_v32 = vpop.f32.mrf.mxu0 }
 0x667   : > { %4635 = vmatmul.bf16.gmra.mxu3 %v15140_v48  ;;  %v12381_v17 = vsel %vm5784_vm13, %v4594_v9, %v6040_v35  ;;  %v4683_v63 = vadd.f32 %v4682_v32, %v12315_v14  ;;  %v4771_v3 = vpop.f32.mrf.mxu1  ;;  %v4507_v50 = vpop.f32.mrf.mxu2 }
 0x668   : > { %15142 = vst [vmem:[#allocation197_spill] sm:$0xff] %v12381_v17  ;;  %v4508_v30 = vadd.f32 %v4507_v50, %v15143_v13 }
 0x669   : > { %v12387_v48 = vadd.f32 %v4771_v3, %v4683_v63  ;;  %v9016_v63 = vor.u32 %v9998_v62, %v9015_v52 }
 0x66a   : > { %v4596_v44 = vpop.f32.mrf.mxu3 }
 0x66b   : > { %15144 = vst [vmem:[#allocation167_spill] sm:$0xff] %v12387_v48  ;;  %v4597_v21 = vadd.f32 %v4596_v44, %v4508_v30  ;;  %v15147_v30 = vld [vmem:[#allocation27_spill] sm:$0xff]  ;;  %5101 = vmatpush.bf16.msrb.mxu1 %v9016_v63  ;;  %v8983_v44 = vld [vmem:[#allocation2 + $0x398] sm:$0xf] }
 0x66c   : > { %v15152_v63 = vld [vmem:[#allocation137_spill] sm:$0xff] }
 0x66d   : > { %v6048_v3 = vmul.f32 0.2, %v4597_v21  ;;  %vm5792_vm14 = vcmp.ge.f32.partialorder %v4597_v21, 0.0 }
 0x66e   : > { %v4685_v24 = vpop.f32.mrf.mxu0 }
 0x66f   : > { %v4686_v9 = vadd.f32 %v4685_v24, %v12315_v14  ;;  %v4774_v35 = vpop.f32.mrf.mxu1  ;;  %v4509_v16 = vpop.f32.mrf.mxu2 }
 0x670   : > { %v4510_v32 = vadd.f32 %v4509_v16, %v12113_v43  ;;  %v15149_v43 = vld [vmem:[#allocation79_spill] sm:$0xff] }
 0x671   : > { %v12391_v13 = vadd.f32 %v4774_v35, %v4686_v9  ;;  %4724 = vmatmul.bf16.gmra.mxu0 %v15146_v40  ;;  %v8984_v9 = vor.u32 %v9990_v51, %v8983_v44  ;;  %v12397_v35 = vsel %vm5792_vm14, %v4597_v21, %v6048_v3  ;;  %v8663_v3 = vld [vmem:[#allocation2 + $0x118] sm:$0xf] }
 0x672   : > { %v4598_v22 = vpop.f32.mrf.mxu3  ;;  %4813 = vmatmul.bf16.gmra.mxu1 %v15147_v30  ;;  %15150 = vst [vmem:[#allocation199_spill] sm:$0xff] %v12397_v35  ;;  %v8951_v30 = vld [vmem:[#allocation2 + $0x358] sm:$0xf] }
 0x673   : > { %15145 = vst [vmem:[#allocation198_spill] sm:$0xff] %v12391_v13  ;;  %v4599_v50 = vadd.f32 %v4598_v22, %v4510_v32  ;;  %5102 = vmatpush.bf16.msrb.mxu1 %v8984_v9  ;;  %v9974_v51 = vld [vmem:[#allocation2 + $0x334] sm:$0xf0] }
 0x674   : > { %4551 = vmatmul.bf16.gmra.mxu2 %v15148_v61 }
 0x675   : > { %vm5800_vm15 = vcmp.ge.f32.partialorder %v4599_v50, 0.0  ;;  %v6056_v31 = vmul.f32 0.2, %v4599_v50 }
 0x676   : > { %v4687_v24 = vpop.f32.mrf.mxu0 }
 0x677   : > { %4640 = vmatmul.bf16.gmra.mxu3 %v15149_v43  ;;  %v12399_v16 = vsel %vm5800_vm15, %v4599_v50, %v6056_v31  ;;  %v4688_v22 = vadd.f32 %v4687_v24, %v12315_v14  ;;  %v4776_v62 = vpop.f32.mrf.mxu1  ;;  %v4512_v52 = vpop.f32.mrf.mxu2  ;;  %v9982_v43 = vld [vmem:[#allocation2 + $0x374] sm:$0xf0] }
 0x678   : > { %15151 = vst [vmem:[#allocation200_spill] sm:$0xff] %v12399_v16  ;;  %v4513_v17 = vadd.f32 %v4512_v52, %v15152_v63  ;;  %v8952_v44 = vor.u32 %v9982_v43, %v8951_v30  ;;  %v9910_v50 = vld [vmem:[#allocation2 + $0x134] sm:$0xf0]  ;;  %v15154_v43 = vld [vmem:[#allocation30_spill] sm:$0xff] }
 0x679   : > { %v12405_v40 = vadd.f32 %v4776_v62, %v4688_v22  ;;  %v8919_v31 = vld [vmem:[#allocation2 + $0x318] sm:$0xf]  ;;  %v8664_v13 = vor.u32 %v9910_v50, %v8663_v3 }
 0x67a   : > { %v4601_v61 = vpop.f32.mrf.mxu3  ;;  %5103 = vmatpush.bf16.msrb.mxu1 %v8952_v44  ;;  %v8920_v48 = vor.u32 %v9974_v51, %v8919_v31  ;;  %v8631_v22 = vld [vmem:[#allocation2 + $0xd8] sm:$0xf]  ;;  %v15155_v31 = vld [vmem:[#allocation31_spill] sm:$0xff] }
 0x67b   : > { %v4602_v21 = vadd.f32 %v4601_v61, %v4513_v17  ;;  %5015 = vmatpush.bf16.msrb.mxu0 %v8664_v13  ;;  %v9902_v30 = vld [vmem:[#allocation2 + $0xf4] sm:$0xf0]  ;;  %v15157_v13 = vld [vmem:[#allocation82_spill] sm:$0xff] }
 0x67c   : > { %v8887_v17 = vld [vmem:[#allocation2 + $0x2d8] sm:$0xf]  ;;  %v8632_v62 = vor.u32 %v9902_v30, %v8631_v22 }
 0x67d   : > { %v9966_v44 = vld [vmem:[#allocation2 + $0x2f4] sm:$0xf0]  ;;  %v6064_v3 = vmul.f32 0.2, %v4602_v21  ;;  %vm5808_vm1 = vcmp.ge.f32.partialorder %v4602_v21, 0.0 }
 0x67e   : > { %v4690_v24 = vpop.f32.mrf.mxu0  ;;  %5104 = vmatpush.bf16.msrb.mxu1 %v8920_v48  ;;  %v8888_v51 = vor.u32 %v9966_v44, %v8887_v17  ;;  %v8599_v48 = vld [vmem:[#allocation2 + $0x98] sm:$0xf] }
 0x67f   : > { %v4691_v32 = vadd.f32 %v4690_v24, %v12315_v14  ;;  %v4779_v35 = vpop.f32.mrf.mxu1  ;;  %v4514_v52 = vpop.f32.mrf.mxu2  ;;  %v15156_v24 = vld [vmem:[#allocation81_spill] sm:$0xff]  ;;  %5016 = vmatpush.bf16.msrb.mxu0 %v8632_v62  ;;  %v12416_v17 = vsel %vm5808_vm1, %v4602_v21, %v6064_v3 }
 0x680   : > { %v4515_v9 = vadd.f32 %v4514_v52, %v12133_v39  ;;  %v9894_v52 = vld [vmem:[#allocation2 + $0xb4] sm:$0xf0]  ;;  %15158 = vst [vmem:[#allocation201_spill] sm:$0xff] %v12416_v17 }
 0x681   : > { %v12409_v61 = vadd.f32 %v4779_v35, %v4691_v32  ;;  %4729 = vmatmul.bf16.gmra.mxu0 %v15154_v43  ;;  %v9271_v35 = vld [vmem:[#allocation2 + $0x5d8] sm:$0xf]  ;;  %v8600_v16 = vor.u32 %v9894_v52, %v8599_v48 }
 0x682   : > { %v4603_v63 = vpop.f32.mrf.mxu3  ;;  %4818 = vmatmul.bf16.gmra.mxu1 %v15155_v31  ;;  %v10062_v32 = vld [vmem:[#allocation2 + $0x5f4] sm:$0xf0] }
 0x683   : > { %15153 = vst [vmem:[#allocation137_spill] sm:$0xff] %v12409_v61  ;;  %v4604_v50 = vadd.f32 %v4603_v63, %v4515_v9  ;;  %5105 = vmatpush.bf16.msrb.mxu1 %v8888_v51  ;;  %v9272_v30 = vor.u32 %v10062_v32, %v9271_v35  ;;  %v8855_v9 = vld [vmem:[#allocation2 + $0x298] sm:$0xf]  ;;  %5017 = vmatpush.bf16.msrb.mxu0 %v8600_v16 }
 0x684   : > { %4556 = vmatmul.bf16.gmra.mxu2 %v15156_v24  ;;  %v9958_v63 = vld [vmem:[#allocation2 + $0x2b4] sm:$0xf0] }
 0x685   : > { %vm5816_vm2 = vcmp.ge.f32.partialorder %v4604_v50, 0.0  ;;  %v6072_v39 = vmul.f32 0.2, %v4604_v50  ;;  %5190 = vmatpush.bf16.msra.mxu2 %v9272_v30  ;;  %v8567_v48 = vld [vmem:[#allocation2 + $0x58] sm:$0xf] }
 0x686   : > { %v4692_v22 = vpop.f32.mrf.mxu0  ;;  %v9886_v32 = vld [vmem:[#allocation2 + $0x74] sm:$0xf0] }
 0x687   : > { %4645 = vmatmul.bf16.gmra.mxu3 %v15157_v13  ;;  %v12419_v44 = vsel %vm5816_vm2, %v4604_v50, %v6072_v39  ;;  %v4693_v62 = vadd.f32 %v4692_v22, %v12315_v14  ;;  %v4781_v24 = vpop.f32.mrf.mxu1  ;;  %v4517_v31 = vpop.f32.mrf.mxu2  ;;  %v8856_v13 = vor.u32 %v9958_v63, %v8855_v9  ;;  %v8823_v21 = vld [vmem:[#allocation2 + $0x258] sm:$0xf]  ;;  %v8568_v52 = vor.u32 %v9886_v32, %v8567_v48 }
 0x688   : > { %15159 = vst [vmem:[#allocation202_spill] sm:$0xff] %v12419_v44  ;;  %v4518_v43 = vadd.f32 %v4517_v31, %v12137_v38  ;;  %v9527_v50 = vld [vmem:[#allocation2 + $0x7d8] sm:$0xf] }
 0x689   : > { %v12425_v3 = vadd.f32 %v4781_v24, %v4693_v62  ;;  %5106 = vmatpush.bf16.msrb.mxu1 %v8856_v13  ;;  %v10126_v39 = vld [vmem:[#allocation2 + $0x7f4] sm:$0xf0]  ;;  %5018 = vmatpush.bf16.msrb.mxu0 %v8568_v52 }
 0x68a   : > { %v4606_v35 = vpop.f32.mrf.mxu3  ;;  %v9950_v22 = vld [vmem:[#allocation2 + $0x274] sm:$0xf0]  ;;  %v9528_v9 = vor.u32 %v10126_v39, %v9527_v50 }
 0x68b   : > { %v4607_v61 = vadd.f32 %v4606_v35, %v4518_v43  ;;  %v8824_v63 = vor.u32 %v9950_v22, %v8823_v21  ;;  %v8535_v51 = vld [vmem:[#allocation2 + $0x18] sm:$0xf] }
 0x68c   : > { %5279 = vmatpush.bf16.msra.mxu3 %v9528_v9  ;;  %v9878_v38 = vld [vmem:[#allocation2 + $0x34] sm:$0xf0] }
 0x68d   : > { %5107 = vmatpush.bf16.msrb.mxu1 %v8824_v63  ;;  %v8791_v31 = vld [vmem:[#allocation2 + $0x218] sm:$0xf]  ;;  %v8536_v17 = vor.u32 %v9878_v38, %v8535_v51  ;;  %v6080_v35 = vmul.f32 0.2, %v4607_v61  ;;  %vm5824_vm0 = vcmp.ge.f32.partialorder %v4607_v61, 0.0 }
 0x68e   : > { %v9942_v16 = vld [vmem:[#allocation2 + $0x234] sm:$0xf0]  ;;  %v4695_v30 = vpop.f32.mrf.mxu0 }
 0x68f   : > { %v8792_v44 = vor.u32 %v9942_v16, %v8791_v31  ;;  %v4696_v24 = vadd.f32 %v4695_v30, %v12315_v14  ;;  %v4784_v13 = vpop.f32.mrf.mxu1  ;;  %v4519_v62 = vpop.f32.mrf.mxu2  ;;  %5019 = vmatpush.bf16.msrb.mxu0 %v8536_v17 }
 0x690   : > { %v4520_v48 = vadd.f32 %v4519_v62, %v12151_v10  ;;  %v12435_v10 = vsel %vm5824_vm0, %v4607_v61, %v6080_v35 }
 0x691   : > { %v12429_v43 = vadd.f32 %v4784_v13, %v4696_v24  ;;  %4734 = vmatmul.bf16.gmra.mxu0 %v10807_v2  ;;  %5108 = vmatpush.bf16.msrb.mxu1 %v8792_v44  ;;  %15160 = vst [vmem:[#allocation203_spill] sm:$0xff] %v12435_v10 }
 0x692   : > { %v4608_v32 = vpop.f32.mrf.mxu3  ;;  %4823 = vmatmul.bf16.gmra.mxu1 %v14788_v1 }
 0x693   : > { %v4609_v21 = vadd.f32 %v4608_v32, %v4520_v48 }
 0x694   : > { %4561 = vmatmul.bf16.gmra.mxu2 %v11138_v8 }
 0x695   : > { %vm5832_vm3 = vcmp.ge.f32.partialorder %v4609_v21, 0.0  ;;  %v6088_v51 = vmul.f32 0.2, %v4609_v21 }
 0x696   : > { %v4697_v50 = vpop.f32.mrf.mxu0 }
 0x697   : > { %4650 = vmatmul.bf16.gmra.mxu3 %v11141_v20  ;;  %v12437_v17 = vsel %vm5832_vm3, %v4609_v21, %v6088_v51  ;;  %v4698_v39 = vadd.f32 %v4697_v50, %v12315_v14  ;;  %v4786_v52 = vpop.f32.mrf.mxu1  ;;  %v4522_v44 = vpop.f32.mrf.mxu2  ;;  %v9239_v21 = vld [vmem:[#allocation2 + $0x598] sm:$0xf] }
 0x698   : > { %15161 = vst [vmem:[#allocation204_spill] sm:$0xff] %v12437_v17  ;;  %v4523_v9 = vadd.f32 %v4522_v44, %v12155_v56  ;;  %v10054_v51 = vld [vmem:[#allocation2 + $0x5b4] sm:$0xf0] }
 0x699   : > { %v12443_v38 = vadd.f32 %v4786_v52, %v4698_v39 }
 0x69a   : > { %v4611_v63 = vpop.f32.mrf.mxu3 }
 0x69b   : > { %v4612_v31 = vadd.f32 %v4611_v63, %v4523_v9 }
 0x69d   : > { %v6096_v32 = vmul.f32 0.2, %v4612_v31  ;;  %vm5840_vm4 = vcmp.ge.f32.partialorder %v4612_v31, 0.0 }
 0x69e   : > { %v4700_v16 = vpop.f32.mrf.mxu0 }
 0x69f   : > { %v4701_v30 = vadd.f32 %v4700_v16, %v12315_v14  ;;  %v4789_v61 = vpop.f32.mrf.mxu1  ;;  %v4524_v24 = vpop.f32.mrf.mxu2  ;;  %v12453_v39 = vsel %vm5840_vm4, %v4612_v31, %v6096_v32 }
 0x6a0   : > { %v4525_v13 = vadd.f32 %v4524_v24, %v12169_v26  ;;  %v9240_v26 = vor.u32 %v10054_v51, %v9239_v21  ;;  %15162 = vst [vmem:[#allocation205_spill] sm:$0xff] %v12453_v39  ;;  %v15167_v39 = vld [vmem:[#allocation12_spill] sm:$0xff] }
 0x6a1   : > { %v12447_v48 = vadd.f32 %v4789_v61, %v4701_v30  ;;  %4739 = vmatmul.bf16.gmra.mxu0 %v14792_v34 }
 0x6a2   : > { %v4613_v62 = vpop.f32.mrf.mxu3  ;;  %4828 = vmatmul.bf16.gmra.mxu1 %v14878_v42  ;;  %5191 = vmatpush.bf16.msra.mxu2 %v9240_v26 }
 0x6a3   : > { %v4614_v35 = vadd.f32 %v4613_v62, %v4525_v13  ;;  %v9495_v13 = vld [vmem:[#allocation2 + $0x798] sm:$0xf] }
 0x6a4   : > { %4842 = vmatmul.bf16.vlgmr.msrb.gmra.mxu2 %v14879_v5  ;;  %v10118_v62 = vld [vmem:[#allocation2 + $0x7b4] sm:$0xf0] }
 0x6a5   : > { %vm5848_vm5 = vcmp.ge.f32.partialorder %v4614_v35, 0.0  ;;  %v6104_v56 = vmul.f32 0.2, %v4614_v35  ;;  %v9496_v31 = vor.u32 %v10118_v62, %v9495_v13  ;;  %v15166_v62 = vld [vmem:[#allocation112_spill] sm:$0xff] }
 0x6a6   : > { %v4702_v50 = vpop.f32.mrf.mxu0 }
 0x6a7   : > { %4931 = vmatmul.bf16.vlgmr.msrb.gmra.mxu3 %v14971_v0  ;;  %v12455_v52 = vsel %vm5848_vm5, %v4614_v35, %v6104_v56  ;;  %v4703_v44 = vadd.f32 %v4702_v50, %v12315_v14  ;;  %v4791_v9 = vpop.f32.mrf.mxu1  ;;  %v4527_v63 = vpop.f32.mrf.mxu2 }
 0x6a8   : > { %15163 = vst [vmem:[#allocation206_spill] sm:$0xff] %v12455_v52  ;;  %v4528_v30 = vadd.f32 %v4527_v63, %v12173_v60  ;;  %5280 = vmatpush.bf16.msra.mxu3 %v9496_v31 }
 0x6a9   : > { %v12461_v24 = vadd.f32 %v4791_v9, %v4703_v44 }
 0x6aa   : > { %v4616_v61 = vpop.f32.mrf.mxu3 }
 0x6ab   : > { %v4617_v21 = vadd.f32 %v4616_v61, %v4528_v30 }
 0x6ad   : > { %v6112_v60 = vmul.f32 0.2, %v4617_v21  ;;  %vm5856_vm6 = vcmp.ge.f32.partialorder %v4617_v21, 0.0 }
 0x6ae   : > { %v4705_v32 = vpop.f32.mrf.mxu0 }
 0x6af   : > { %v4706_v35 = vadd.f32 %v4705_v32, %v12315_v14  ;;  %v4794_v56 = vpop.f32.mrf.mxu1  ;;  %v4529_v51 = vpop.f32.mrf.mxu2  ;;  %v12471_v63 = vsel %vm5856_vm6, %v4617_v21, %v6112_v60 }
 0x6b0   : > { %v4530_v50 = vadd.f32 %v4529_v51, %v12187_v59  ;;  %15164 = vst [vmem:[#allocation207_spill] sm:$0xff] %v12471_v63  ;;  %v15168_v63 = vld [vmem:[#allocation13_spill] sm:$0xff] }
 0x6b1   : > { %v12465_v16 = vadd.f32 %v4794_v56, %v4706_v35  ;;  %5020 = vmatmul.bf16.vlgmr.msrb.gmra.mxu0 %v14883_v18 }
 0x6b2   : > { %v4618_v22 = vpop.f32.mrf.mxu3  ;;  %5109 = vmatmul.bf16.vlgmr.msrb.gmra.mxu1 %v14974_v6 }
 0x6b3   : > { %v4619_v26 = vadd.f32 %v4618_v22, %v4530_v50 }
 0x6b4   : > { %4847 = vmatmul.bf16.gmra.mxu2 %v15068_v11 }
 0x6b5   : > { %vm5864_vm7 = vcmp.ge.f32.partialorder %v4619_v26, 0.0  ;;  %v6120_v44 = vmul.f32 0.2, %v4619_v26 }
 0x6b6   : > { %v4707_v9 = vpop.f32.mrf.mxu0 }
 0x6b7   : > { %4936 = vmatmul.bf16.gmra.mxu3 %v15069_v4  ;;  %v12473_v59 = vsel %vm5864_vm7, %v4619_v26, %v6120_v44  ;;  %v4708_v30 = vadd.f32 %v4707_v9, %v12315_v14  ;;  %v4796_v61 = vpop.f32.mrf.mxu1  ;;  %v4532_v13 = vpop.f32.mrf.mxu2 }
 0x6b8   : > { %15165 = vst [vmem:[#allocation208_spill] sm:$0xff] %v12473_v59  ;;  %v4533_v31 = vadd.f32 %v4532_v13, %v15166_v62  ;;  %v15170_v13 = vld [vmem:[#allocation45_spill] sm:$0xff] }
 0x6b9   : > { %v12479_v35 = vadd.f32 %v4796_v61, %v4708_v30  ;;  %v15169_v61 = vld [vmem:[#allocation44_spill] sm:$0xff]  ;;  %v9207_v62 = vld [vmem:[#allocation2 + $0x558] sm:$0xf] }
 0x6ba   : > { %v4621_v32 = vpop.f32.mrf.mxu3 }
 0x6bb   : > { %v4622_v56 = vadd.f32 %v4621_v32, %v4533_v31  ;;  %v10046_v31 = vld [vmem:[#allocation2 + $0x574] sm:$0xf0] }
 0x6bd   : > { %v6128_v52 = vmul.f32 0.2, %v4622_v56  ;;  %vm5872_vm8 = vcmp.ge.f32.partialorder %v4622_v56, 0.0 }
 0x6be   : > { %v4710_v51 = vpop.f32.mrf.mxu0 }
 0x6bf   : > { %v4711_v50 = vadd.f32 %v4710_v51, %v12315_v14  ;;  %v4799_v21 = vpop.f32.mrf.mxu1  ;;  %v4534_v60 = vpop.f32.mrf.mxu2  ;;  %v12489_v51 = vsel %vm5872_vm8, %v4622_v56, %v6128_v52 }
 0x6c0   : > { %v4535_v26 = vadd.f32 %v4534_v60, %v12205_v57  ;;  %v9208_v57 = vor.u32 %v10046_v31, %v9207_v62  ;;  %15171 = vst [vmem:[#allocation112_spill] sm:$0xff] %v12489_v51 }
 0x6c1   : > { %v12483_v9 = vadd.f32 %v4799_v21, %v4711_v50  ;;  %5025 = vmatmul.bf16.gmra.mxu0 %v15167_v39 }
 0x6c2   : > { %v4623_v44 = vpop.f32.mrf.mxu3  ;;  %5114 = vmatmul.bf16.gmra.mxu1 %v15168_v63  ;;  %5192 = vmatpush.bf16.msra.mxu2 %v9208_v57 }
 0x6c3   : > { %v4624_v22 = vadd.f32 %v4623_v44, %v4535_v26 }
 0x6c4   : > { %4852 = vmatmul.bf16.gmra.mxu2 %v15169_v61  ;;  %v10110_v61 = vld [vmem:[#allocation2 + $0x774] sm:$0xf0] }
 0x6c5   : > { %vm5880_vm9 = vcmp.ge.f32.partialorder %v4624_v22, 0.0  ;;  %v6136_v30 = vmul.f32 0.2, %v4624_v22 }
 0x6c6   : > { %v4712_v32 = vpop.f32.mrf.mxu0 }
 0x6c7   : > { %4941 = vmatmul.bf16.gmra.mxu3 %v15170_v13  ;;  %v12491_v50 = vsel %vm5880_vm9, %v4624_v22, %v6136_v30  ;;  %v4713_v21 = vadd.f32 %v4712_v32, %v12315_v14  ;;  %v4801_v60 = vpop.f32.mrf.mxu1  ;;  %v4537_v26 = vpop.f32.mrf.mxu2  ;;  %v9463_v13 = vld [vmem:[#allocation2 + $0x758] sm:$0xf] }
 0x6c8   : > { %15172 = vst [vmem:[#allocation12_spill] sm:$0xff] %v12491_v50  ;;  %v4538_v59 = vadd.f32 %v4537_v26, %v12209_v12  ;;  %v9464_v52 = vor.u32 %v10110_v61, %v9463_v13  ;;  %v15175_v61 = vld [vmem:[#allocation49_spill] sm:$0xff] }
 0x6c9   : > { %v12497_v17 = vadd.f32 %v4801_v60, %v4713_v21  ;;  %v15173_v21 = vld [vmem:[#allocation17_spill] sm:$0xff] }
 0x6ca   : > { %v4626_v10 = vpop.f32.mrf.mxu3  ;;  %5281 = vmatpush.bf16.msra.mxu3 %v9464_v52 }
 0x6cb   : > { %v4627_v62 = vadd.f32 %v4626_v10, %v4538_v59  ;;  %v15174_v59 = vld [vmem:[#allocation48_spill] sm:$0xff] }
 0x6cd   : > { %v6144_v12 = vmul.f32 0.2, %v4627_v62  ;;  %vm5888_vm10 = vcmp.ge.f32.partialorder %v4627_v62, 0.0 }
 0x6ce   : > { %v4715_v22 = vpop.f32.mrf.mxu0 }
 0x6cf   : > { %v4716_v56 = vadd.f32 %v4715_v22, %v12315_v14  ;;  %v4804_v30 = vpop.f32.mrf.mxu1  ;;  %v4539_v31 = vpop.f32.mrf.mxu2  ;;  %v12507_v60 = vsel %vm5888_vm10, %v4627_v62, %v6144_v12 }
 0x6d0   : > { %v4540_v32 = vadd.f32 %v4539_v31, %v12223_v58  ;;  %15176 = vst [vmem:[#allocation209_spill] sm:$0xff] %v12507_v60  ;;  %v15181_v60 = vld [vmem:[#allocation21_spill] sm:$0xff] }
 0x6d1   : > { %v12501_v44 = vadd.f32 %v4804_v30, %v4716_v56  ;;  %5030 = vmatmul.bf16.gmra.mxu0 %v14896_v33  ;;  %v15178_v56 = vld [vmem:[#allocation116_spill] sm:$0xff] }
 0x6d2   : > { %v4628_v63 = vpop.f32.mrf.mxu3  ;;  %5119 = vmatmul.bf16.gmra.mxu1 %v15173_v21 }
 0x6d3   : > { %v4629_v57 = vadd.f32 %v4628_v63, %v4540_v32 }
 0x6d4   : > { %4857 = vmatmul.bf16.gmra.mxu2 %v15174_v59  ;;  %v15180_v59 = vld [vmem:[#allocation20_spill] sm:$0xff] }
 0x6d5   : > { %vm5896_vm11 = vcmp.ge.f32.partialorder %v4629_v57, 0.0  ;;  %v6152_v10 = vmul.f32 0.2, %v4629_v57 }
 0x6d6   : > { %v4717_v13 = vpop.f32.mrf.mxu0 }
 0x6d7   : > { %4946 = vmatmul.bf16.gmra.mxu3 %v15175_v61  ;;  %v12509_v58 = vsel %vm5896_vm11, %v4629_v57, %v6152_v10  ;;  %v4718_v26 = vadd.f32 %v4717_v13, %v12315_v14  ;;  %v4806_v52 = vpop.f32.mrf.mxu1  ;;  %v4542_v22 = vpop.f32.mrf.mxu2 }
 0x6d8   : > { %15177 = vst [vmem:[#allocation210_spill] sm:$0xff] %v12509_v58  ;;  %v4543_v30 = vadd.f32 %v4542_v22, %v15178_v56  ;;  %v15183_v22 = vld [vmem:[#allocation53_spill] sm:$0xff] }
 0x6d9   : > { %v12515_v32 = vadd.f32 %v4806_v52, %v4718_v26  ;;  %v15182_v52 = vld [vmem:[#allocation52_spill] sm:$0xff]  ;;  %v10038_v56 = vld [vmem:[#allocation2 + $0x534] sm:$0xf0] }
 0x6da   : > { %v4631_v31 = vpop.f32.mrf.mxu3 }
 0x6db   : > { %v4632_v51 = vadd.f32 %v4631_v31, %v4543_v30 }
 0x6dd   : > { %v6160_v21 = vmul.f32 0.2, %v4632_v51  ;;  %vm5904_vm12 = vcmp.ge.f32.partialorder %v4632_v51, 0.0 }
 0x6de   : > { %v4720_v50 = vpop.f32.mrf.mxu0 }
 0x6df   : > { %v4721_v61 = vadd.f32 %v4720_v50, %v12315_v14  ;;  %v4809_v62 = vpop.f32.mrf.mxu1  ;;  %v4544_v12 = vpop.f32.mrf.mxu2  ;;  %v9175_v50 = vld [vmem:[#allocation2 + $0x518] sm:$0xf]  ;;  %v12525_v31 = vsel %vm5904_vm12, %v4632_v51, %v6160_v21 }
 0x6e0   : > { %v4545_v57 = vadd.f32 %v4544_v12, %v12241_v46  ;;  %v9176_v46 = vor.u32 %v10038_v56, %v9175_v50  ;;  %15184 = vst [vmem:[#allocation211_spill] sm:$0xff] %v12525_v31 }
 0x6e1   : > { %v12519_v13 = vadd.f32 %v4809_v62, %v4721_v61  ;;  %5035 = vmatmul.bf16.gmra.mxu0 %v15180_v59  ;;  %v10102_v59 = vld [vmem:[#allocation2 + $0x734] sm:$0xf0] }
 0x6e2   : > { %v4633_v10 = vpop.f32.mrf.mxu3  ;;  %5124 = vmatmul.bf16.gmra.mxu1 %v15181_v60  ;;  %5193 = vmatpush.bf16.msra.mxu2 %v9176_v46  ;;  %v9431_v60 = vld [vmem:[#allocation2 + $0x718] sm:$0xf] }
 0x6e3   : > { %15179 = vst [vmem:[#allocation116_spill] sm:$0xff] %v12519_v13  ;;  %v4634_v63 = vadd.f32 %v4633_v10, %v4545_v57  ;;  %v9432_v51 = vor.u32 %v10102_v59, %v9431_v60  ;;  %v15187_v60 = vld [vmem:[#allocation56_spill] sm:$0xff] }
 0x6e4   : > { %4862 = vmatmul.bf16.gmra.mxu2 %v15182_v52 }
 0x6e5   : > { %vm5912_vm13 = vcmp.ge.f32.partialorder %v4634_v63, 0.0  ;;  %v6168_v26 = vmul.f32 0.2, %v4634_v63  ;;  %5282 = vmatpush.bf16.msra.mxu3 %v9432_v51 }
 0x6e6   : > { %v4722_v30 = vpop.f32.mrf.mxu0 }
 0x6e7   : > { %4951 = vmatmul.bf16.gmra.mxu3 %v15183_v22  ;;  %v12527_v61 = vsel %vm5912_vm13, %v4634_v63, %v6168_v26  ;;  %v4723_v62 = vadd.f32 %v4722_v30, %v12315_v14  ;;  %v4811_v12 = vpop.f32.mrf.mxu1  ;;  %v4547_v57 = vpop.f32.mrf.mxu2 }
 0x6e8   : > { %15185 = vst [vmem:[#allocation212_spill] sm:$0xff] %v12527_v61  ;;  %v4548_v58 = vadd.f32 %v4547_v57, %v12245_v47 }
 0x6e9   : > { %v12533_v22 = vadd.f32 %v4811_v12, %v4723_v62  ;;  %v15186_v62 = vld [vmem:[#allocation25_spill] sm:$0xff] }
 0x6ea   : > { %v4636_v52 = vpop.f32.mrf.mxu3 }
 0x6eb   : > { %v4637_v50 = vadd.f32 %v4636_v52, %v4548_v58  ;;  %v15188_v58 = vld [vmem:[#allocation57_spill] sm:$0xff] }
 0x6ed   : > { %v6176_v47 = vmul.f32 0.2, %v4637_v50  ;;  %vm5920_vm14 = vcmp.ge.f32.partialorder %v4637_v50, 0.0 }
 0x6ee   : > { %v4725_v21 = vpop.f32.mrf.mxu0 }
 0x6ef   : > { %v4726_v63 = vadd.f32 %v4725_v21, %v12315_v14  ;;  %v4814_v26 = vpop.f32.mrf.mxu1  ;;  %v4549_v56 = vpop.f32.mrf.mxu2  ;;  %v12543_v12 = vsel %vm5920_vm14, %v4637_v50, %v6176_v47 }
 0x6f0   : > { %v4550_v30 = vadd.f32 %v4549_v56, %v12259_v45  ;;  %15189 = vst [vmem:[#allocation213_spill] sm:$0xff] %v12543_v12  ;;  %v15194_v12 = vld [vmem:[#allocation29_spill] sm:$0xff] }
 0x6f1   : > { %v12537_v10 = vadd.f32 %v4814_v26, %v4726_v63  ;;  %5040 = vmatmul.bf16.gmra.mxu0 %v14909_v7  ;;  %v15191_v63 = vld [vmem:[#allocation120_spill] sm:$0xff] }
 0x6f2   : > { %v4638_v13 = vpop.f32.mrf.mxu3  ;;  %5129 = vmatmul.bf16.gmra.mxu1 %v15186_v62 }
 0x6f3   : > { %v4639_v46 = vadd.f32 %v4638_v13, %v4550_v30 }
 0x6f4   : > { %4867 = vmatmul.bf16.gmra.mxu2 %v15187_v60  ;;  %v15193_v60 = vld [vmem:[#allocation28_spill] sm:$0xff] }
 0x6f5   : > { %vm5928_vm15 = vcmp.ge.f32.partialorder %v4639_v46, 0.0  ;;  %v6184_v59 = vmul.f32 0.2, %v4639_v46 }
 0x6f6   : > { %v4727_v52 = vpop.f32.mrf.mxu0 }
 0x6f7   : > { %4956 = vmatmul.bf16.gmra.mxu3 %v15188_v58  ;;  %v12545_v45 = vsel %vm5928_vm15, %v4639_v46, %v6184_v59  ;;  %v4728_v57 = vadd.f32 %v4727_v52, %v12315_v14  ;;  %v4816_v51 = vpop.f32.mrf.mxu1  ;;  %v4552_v21 = vpop.f32.mrf.mxu2 }
 0x6f8   : > { %15190 = vst [vmem:[#allocation214_spill] sm:$0xff] %v12545_v45  ;;  %v4553_v26 = vadd.f32 %v4552_v21, %v15191_v63  ;;  %v15196_v21 = vld [vmem:[#allocation59_spill] sm:$0xff]  ;;  %v10030_v63 = vld [vmem:[#allocation2 + $0x4f4] sm:$0xf0] }
 0x6f9   : > { %v12551_v30 = vadd.f32 %v4816_v51, %v4728_v57  ;;  %v15195_v51 = vld [vmem:[#allocation58_spill] sm:$0xff] }
 0x6fa   : > { %v4641_v56 = vpop.f32.mrf.mxu3 }
 0x6fb   : > { %v4642_v31 = vadd.f32 %v4641_v56, %v4553_v26 }
 0x6fd   : > { %v6192_v62 = vmul.f32 0.2, %v4642_v31  ;;  %vm5936_vm1 = vcmp.ge.f32.partialorder %v4642_v31, 0.0 }
 0x6fe   : > { %v4730_v61 = vpop.f32.mrf.mxu0 }
 0x6ff   : > { %v4731_v58 = vadd.f32 %v4730_v61, %v12315_v14  ;;  %v4819_v50 = vpop.f32.mrf.mxu1  ;;  %v4554_v47 = vpop.f32.mrf.mxu2  ;;  %v9143_v61 = vld [vmem:[#allocation2 + $0x4d8] sm:$0xf]  ;;  %v12561_v56 = vsel %vm5936_vm1, %v4642_v31, %v6192_v62 }
 0x700   : > { %v4555_v46 = vadd.f32 %v4554_v47, %v12277_v37  ;;  %v9144_v37 = vor.u32 %v10030_v63, %v9143_v61  ;;  %15197 = vst [vmem:[#allocation215_spill] sm:$0xff] %v12561_v56  ;;  %v9930_v56 = vld [vmem:[#allocation2 + $0x1dc] sm:$0xf] }
 0x701   : > { %v12555_v52 = vadd.f32 %v4819_v50, %v4731_v58  ;;  %5045 = vmatmul.bf16.gmra.mxu0 %v15193_v60  ;;  %v10094_v60 = vld [vmem:[#allocation2 + $0x6f4] sm:$0xf0] }
 0x702   : > { %v4643_v59 = vpop.f32.mrf.mxu3  ;;  %5134 = vmatmul.bf16.gmra.mxu1 %v15194_v12  ;;  %5194 = vmatpush.bf16.msra.mxu2 %v9144_v37  ;;  %v9399_v12 = vld [vmem:[#allocation2 + $0x6d8] sm:$0xf] }
 0x703   : > { %15192 = vst [vmem:[#allocation120_spill] sm:$0xff] %v12555_v52  ;;  %v4644_v13 = vadd.f32 %v4643_v59, %v4555_v46  ;;  %v9400_v31 = vor.u32 %v10094_v60, %v9399_v12  ;;  %v15200_v12 = vld [vmem:[#allocation61_spill] sm:$0xff] }
 0x704   : > { %4872 = vmatmul.bf16.gmra.mxu2 %v15195_v51 }
 0x705   : > { %vm5944_vm2 = vcmp.ge.f32.partialorder %v4644_v13, 0.0  ;;  %v6200_v57 = vmul.f32 0.2, %v4644_v13  ;;  %5283 = vmatpush.bf16.msra.mxu3 %v9400_v31 }
 0x706   : > { %v4732_v26 = vpop.f32.mrf.mxu0 }
 0x707   : > { %4961 = vmatmul.bf16.gmra.mxu3 %v15196_v21  ;;  %v12563_v58 = vsel %vm5944_vm2, %v4644_v13, %v6200_v57  ;;  %v4733_v50 = vadd.f32 %v4732_v26, %v12315_v14  ;;  %v4821_v47 = vpop.f32.mrf.mxu1  ;;  %v4557_v46 = vpop.f32.mrf.mxu2 }
 0x708   : > { %15198 = vst [vmem:[#allocation216_spill] sm:$0xff] %v12563_v58  ;;  %v4558_v45 = vadd.f32 %v4557_v46, %v12281_v29  ;;  %v8761_v58 = vld [vmem:[#allocation2 + $0x1f8] sm:$0xf0] }
 0x709   : > { %v12569_v21 = vadd.f32 %v4821_v47, %v4733_v50  ;;  %v15199_v50 = vld [vmem:[#allocation33_spill] sm:$0xff] }
 0x70a   : > { %v4646_v51 = vpop.f32.mrf.mxu3 }
 0x70b   : > { %v4647_v61 = vadd.f32 %v4646_v51, %v4558_v45  ;;  %v15201_v45 = vld [vmem:[#allocation62_spill] sm:$0xff] }
 0x70d   : > { %v6208_v29 = vmul.f32 0.2, %v4647_v61  ;;  %vm5952_vm0 = vcmp.ge.f32.partialorder %v4647_v61, 0.0 }
 0x70e   : > { %v4735_v62 = vpop.f32.mrf.mxu0 }
 0x70f   : > { %v4736_v13 = vadd.f32 %v4735_v62, %v12315_v14  ;;  %v4824_v57 = vpop.f32.mrf.mxu1  ;;  %v4559_v63 = vpop.f32.mrf.mxu2  ;;  %v12579_v47 = vsel %vm5952_vm0, %v4647_v61, %v6208_v29  ;;  %v8764_v61 = vor.u32 %v9930_v56, %v8761_v58  ;;  %v9111_v56 = vld [vmem:[#allocation2 + $0x498] sm:$0xf] }
 0x710   : > { %v4560_v26 = vadd.f32 %v4559_v63, %v12295_v49  ;;  %15202 = vst [vmem:[#allocation217_spill] sm:$0xff] %v12579_v47  ;;  %v10022_v58 = vld [vmem:[#allocation2 + $0x4b4] sm:$0xf0] }
 0x711   : > { %v12573_v59 = vadd.f32 %v4824_v57, %v4736_v13  ;;  %5050 = vmatmul.bf16.gmra.mxu0 %v14833_v25  ;;  %v10086_v47 = vld [vmem:[#allocation2 + $0x6b4] sm:$0xf0] }
 0x712   : > { %v4648_v52 = vpop.f32.mrf.mxu3  ;;  %5139 = vmatmul.bf16.gmra.mxu1 %v15199_v50  ;;  %5368 = vmatpush.bf16.msra.mxu0 %v8764_v61 }
 0x713   : > { %v4649_v37 = vadd.f32 %v4648_v52, %v4560_v26  ;;  %v9367_v52 = vld [vmem:[#allocation2 + $0x698] sm:$0xf] }
 0x714   : > { %4877 = vmatmul.bf16.gmra.mxu2 %v15200_v12 }
 0x715   : > { %vm5960_vm3 = vcmp.ge.f32.partialorder %v4649_v37, 0.0  ;;  %v6216_v60 = vmul.f32 0.2, %v4649_v37 }
 0x716   : > { %v4737_v51 = vpop.f32.mrf.mxu0 }
 0x717   : > { %4966 = vmatmul.bf16.gmra.mxu3 %v15201_v45  ;;  %v12581_v49 = vsel %vm5960_vm3, %v4649_v37, %v6216_v60  ;;  %v4738_v46 = vadd.f32 %v4737_v51, %v12315_v14  ;;  %v4826_v31 = vpop.f32.mrf.mxu1  ;;  %v4562_v62 = vpop.f32.mrf.mxu2 }
 0x718   : > { %15203 = vst [vmem:[#allocation218_spill] sm:$0xff] %v12581_v49  ;;  %v4563_v13 = vadd.f32 %v4562_v62, %v12299_v15  ;;  %v9922_v49 = vld [vmem:[#allocation2 + $0x19c] sm:$0xf] }
 0x719   : > { %v12587_v63 = vadd.f32 %v4826_v31, %v4738_v46 }
 0x71a   : > { %v4651_v57 = vpop.f32.mrf.mxu3 }
 0x71b   : > { %v4652_v26 = vadd.f32 %v4651_v57, %v4563_v13 }
 0x71d   : > { %v6224_v15 = vmul.f32 0.2, %v4652_v26  ;;  %vm5968_vm4 = vcmp.ge.f32.partialorder %v4652_v26, 0.0 }
 0x71e   : > { %v4740_v45 = vpop.f32.mrf.mxu0 }
 0x71f   : > { %v4741_v29 = vadd.f32 %v4740_v45, %v12315_v14  ;;  %v4829_v37 = vpop.f32.mrf.mxu1  ;;  %v4564_v60 = vpop.f32.mrf.mxu2  ;;  %v9112_v45 = vor.u32 %v10022_v58, %v9111_v56  ;;  %v12597_v62 = vsel %vm5968_vm4, %v4652_v26, %v6224_v15  ;;  %v9368_v26 = vor.u32 %v10086_v47, %v9367_v52  ;;  %v10254_v15 = vld [vmem:[#allocation4 + $0x4] sm:$0xff] }
 0x720   : > { %v4565_v51 = vadd.f32 %v4564_v60, %v12313_v23  ;;  %15204 = vst [vmem:[#allocation219_spill] sm:$0xff] %v12597_v62  ;;  %v15207_v52 = vld [vmem:[#allocation66_spill] sm:$0xff] }
 0x721   : > { %v12591_v50 = vadd.f32 %v4829_v37, %v4741_v29  ;;  %5055 = vmatmul.bf16.gmra.mxu0 %v14838_v55  ;;  %5195 = vmatpush.bf16.msra.mxu2 %v9112_v45 }
 0x722   : > { %v4653_v12 = vpop.f32.mrf.mxu3  ;;  %5144 = vmatmul.bf16.gmra.mxu1 %v14839_v19  ;;  %5284 = vmatpush.bf16.msra.mxu3 %v9368_v26 }
 0x723   : > { %v4654_v46 = vadd.f32 %v4653_v12, %v4565_v51 }
 0x724   : > { %4882 = vmatmul.bf16.gmra.mxu2 %v11012_v27 }
 0x725   : > { %vm5976_vm5 = vcmp.ge.f32.partialorder %v4654_v46, 0.0  ;;  %v6232_v31 = vmul.f32 0.2, %v4654_v46 }
 0x726   : > { %v4742_v23 = vpop.f32.mrf.mxu0 }
 0x727   : > { %4971 = vmatmul.bf16.gmra.mxu3 %v14927_v53  ;;  %v12599_v13 = vsel %vm5976_vm5, %v4654_v46, %v6232_v31  ;;  %v4743_v57 = vadd.f32 %v4742_v23, %v12315_v14  ;;  %v4831_v12 = vpop.f32.mrf.mxu1  ;;  %v4843_v61 = vpop.f32.mrf.mxu2  ;;  %v12607_v46 = vperm.slane %v10254_v15, 6 }
 0x728   : > { %15205 = vst [vmem:[#allocation220_spill] sm:$0xff] %v12599_v13  ;;  %v4844_v37 = vadd.f32 %v4843_v61, %v12319_v36 }
 0x729   : > { %v12605_v51 = vadd.f32 %v4831_v12, %v4743_v57  ;;  %v15206_v12 = vld [vmem:[#allocation11_spill] sm:$0xff] }
 0x72a   : > { %v4932_v60 = vpop.f32.mrf.mxu3 }
 0x72b   : > { %v4933_v56 = vadd.f32 %v4932_v60, %v4844_v37  ;;  %v15208_v37 = vld [vmem:[#allocation67_spill] sm:$0xff] }
 0x72d   : > { %v5985_v45 = vmul.f32 0.2, %v4933_v56  ;;  %vm5729_vm6 = vcmp.ge.f32.partialorder %v4933_v56, 0.0 }
 0x72e   : > { %v5021_v14 = vpop.f32.mrf.mxu0 }
 0x72f   : > { %v5022_v31 = vadd.f32 %v5021_v14, %v12607_v46  ;;  %v5110_v58 = vpop.f32.mrf.mxu1  ;;  %v4845_v23 = vpop.f32.mrf.mxu2  ;;  %v12617_v60 = vsel %vm5729_vm6, %v4933_v56, %v5985_v45 }
 0x730   : > { %v4846_v29 = vadd.f32 %v4845_v23, %v12333_v41  ;;  %15209 = vst [vmem:[#allocation221_spill] sm:$0xff] %v12617_v60 }
 0x731   : > { %v12611_v61 = vadd.f32 %v5110_v58, %v5022_v31  ;;  %5060 = vmatmul.bf16.gmra.mxu0 %v10675_v28  ;;  %v15211_v58 = vld [vmem:[#allocation86_spill] sm:$0xff]  ;;  %v10078_v28 = vld [vmem:[#allocation2 + $0x674] sm:$0xf0] }
 0x732   : > { %v4934_v36 = vpop.f32.mrf.mxu3  ;;  %5149 = vmatmul.bf16.gmra.mxu1 %v15206_v12  ;;  %v15213_v12 = vld [vmem:[#allocation162_spill] sm:$0xff] }
 0x733   : > { %v4935_v57 = vadd.f32 %v4934_v36, %v4846_v29 }
 0x734   : > { %4887 = vmatmul.bf16.gmra.mxu2 %v15207_v52 }
 0x735   : > { %vm5737_vm7 = vcmp.ge.f32.partialorder %v4935_v57, 0.0  ;;  %v5993_v47 = vmul.f32 0.2, %v4935_v57 }
 0x736   : > { %v5023_v41 = vpop.f32.mrf.mxu0 }
 0x737   : > { %4976 = vmatmul.bf16.gmra.mxu3 %v15208_v37  ;;  %v12619_v26 = vsel %vm5737_vm7, %v4935_v57, %v5993_v47  ;;  %v5024_v14 = vadd.f32 %v5023_v41, %v12607_v46  ;;  %v5112_v29 = vpop.f32.mrf.mxu1  ;;  %v4848_v31 = vpop.f32.mrf.mxu2  ;;  %v8729_v37 = vld [vmem:[#allocation2 + $0x1b8] sm:$0xf0] }
 0x738   : > { %15210 = vst [vmem:[#allocation222_spill] sm:$0xff] %v12619_v26  ;;  %v4849_v23 = vadd.f32 %v4848_v31, %v15211_v58  ;;  %v8732_v45 = vor.u32 %v9922_v49, %v8729_v37  ;;  %v15215_v26 = vld [vmem:[#allocation14_spill] sm:$0xff]  ;;  %v15217_v49 = vld [vmem:[#allocation69_spill] sm:$0xff] }
 0x739   : > { %v12625_v62 = vadd.f32 %v5112_v29, %v5024_v14  ;;  %v15216_v29 = vld [vmem:[#allocation15_spill] sm:$0xff]  ;;  %v15218_v37 = vld [vmem:[#allocation70_spill] sm:$0xff] }
 0x73a   : > { %v4937_v36 = vpop.f32.mrf.mxu3  ;;  %5369 = vmatpush.bf16.msra.mxu0 %v8732_v45 }
 0x73b   : > { %15212 = vst [vmem:[#allocation86_spill] sm:$0xff] %v12625_v62  ;;  %v4938_v13 = vadd.f32 %v4937_v36, %v4849_v23  ;;  %v9079_v23 = vld [vmem:[#allocation2 + $0x458] sm:$0xf] }
 0x73c   : > { %v10014_v36 = vld [vmem:[#allocation2 + $0x474] sm:$0xf0] }
 0x73d   : > { %v6001_v31 = vmul.f32 0.2, %v4938_v13  ;;  %vm5745_vm8 = vcmp.ge.f32.partialorder %v4938_v13, 0.0 }
 0x73e   : > { %v5026_v56 = vpop.f32.mrf.mxu0 }
 0x73f   : > { %v5027_v57 = vadd.f32 %v5026_v56, %v12607_v46  ;;  %v5115_v47 = vpop.f32.mrf.mxu1  ;;  %v4850_v52 = vpop.f32.mrf.mxu2  ;;  %v12635_v56 = vsel %vm5745_vm8, %v4938_v13, %v6001_v31 }
 0x740   : > { %v4851_v15 = vadd.f32 %v4850_v52, %v15213_v12  ;;  %v9080_v52 = vor.u32 %v10014_v36, %v9079_v23  ;;  %15219 = vst [vmem:[#allocation223_spill] sm:$0xff] %v12635_v56 }
 0x741   : > { %v12629_v41 = vadd.f32 %v5115_v47, %v5027_v57  ;;  %5065 = vmatmul.bf16.gmra.mxu0 %v15215_v26 }
 0x742   : > { %v4939_v60 = vpop.f32.mrf.mxu3  ;;  %5154 = vmatmul.bf16.gmra.mxu1 %v15216_v29  ;;  %v15221_v29 = vld [vmem:[#allocation194_spill] sm:$0xff]  ;;  %5196 = vmatpush.bf16.msra.mxu2 %v9080_v52 }
 0x743   : > { %15214 = vst [vmem:[#allocation162_spill] sm:$0xff] %v12629_v41  ;;  %v4940_v14 = vadd.f32 %v4939_v60, %v4851_v15  ;;  %v9335_v41 = vld [vmem:[#allocation2 + $0x658] sm:$0xf] }
 0x744   : > { %4892 = vmatmul.bf16.gmra.mxu2 %v15217_v49  ;;  %v9336_v13 = vor.u32 %v10078_v28, %v9335_v41  ;;  %v15227_v41 = vld [vmem:[#allocation73_spill] sm:$0xff] }
 0x745   : > { %vm5753_vm9 = vcmp.ge.f32.partialorder %v4940_v14, 0.0  ;;  %v6009_v58 = vmul.f32 0.2, %v4940_v14 }
 0x746   : > { %v5028_v12 = vpop.f32.mrf.mxu0  ;;  %5285 = vmatpush.bf16.msra.mxu3 %v9336_v13 }
 0x747   : > { %4981 = vmatmul.bf16.gmra.mxu3 %v15218_v37  ;;  %v12637_v45 = vsel %vm5753_vm9, %v4940_v14, %v6009_v58  ;;  %v5029_v57 = vadd.f32 %v5028_v12, %v12607_v46  ;;  %v5117_v60 = vpop.f32.mrf.mxu1  ;;  %v4853_v15 = vpop.f32.mrf.mxu2 }
 0x748   : > { %15220 = vst [vmem:[#allocation224_spill] sm:$0xff] %v12637_v45  ;;  %v4854_v26 = vadd.f32 %v4853_v15, %v15221_v29  ;;  %v15224_v29 = vld [vmem:[#allocation18_spill] sm:$0xff] }
 0x749   : > { %v12643_v37 = vadd.f32 %v5117_v60, %v5029_v57  ;;  %v15225_v60 = vld [vmem:[#allocation19_spill] sm:$0xff] }
 0x74a   : > { %v4942_v49 = vpop.f32.mrf.mxu3 }
 0x74b   : > { %15222 = vst [vmem:[#allocation194_spill] sm:$0xff] %v12643_v37  ;;  %v4943_v23 = vadd.f32 %v4942_v49, %v4854_v26  ;;  %v15226_v26 = vld [vmem:[#allocation72_spill] sm:$0xff] }
 0x74d   : > { %v6017_v52 = vmul.f32 0.2, %v4943_v23  ;;  %vm5761_vm10 = vcmp.ge.f32.partialorder %v4943_v23, 0.0 }
 0x74e   : > { %v5031_v31 = vpop.f32.mrf.mxu0 }
 0x74f   : > { %v5032_v14 = vadd.f32 %v5031_v31, %v12607_v46  ;;  %v5120_v58 = vpop.f32.mrf.mxu1  ;;  %v4855_v36 = vpop.f32.mrf.mxu2  ;;  %v12653_v15 = vsel %vm5761_vm10, %v4943_v23, %v6017_v52 }
 0x750   : > { %v4856_v12 = vadd.f32 %v4855_v36, %v12369_v54  ;;  %15228 = vst [vmem:[#allocation226_spill] sm:$0xff] %v12653_v15  ;;  %v15239_v15 = vld [vmem:[#allocation198_spill] sm:$0xff] }
 0x751   : > { %v12647_v47 = vadd.f32 %v5120_v58, %v5032_v14  ;;  %5070 = vmatmul.bf16.gmra.mxu0 %v15224_v29  ;;  %v15230_v58 = vld [vmem:[#allocation132_spill] sm:$0xff] }
 0x752   : > { %v4944_v62 = vpop.f32.mrf.mxu3  ;;  %5159 = vmatmul.bf16.gmra.mxu1 %v15225_v60 }
 0x753   : > { %15223 = vst [vmem:[#allocation225_spill] sm:$0xff] %v12647_v47  ;;  %v4945_v57 = vadd.f32 %v4944_v62, %v4856_v12  ;;  %v15233_v62 = vld [vmem:[#allocation22_spill] sm:$0xff] }
 0x754   : > { %4897 = vmatmul.bf16.gmra.mxu2 %v15226_v26  ;;  %v9914_v26 = vld [vmem:[#allocation2 + $0x15c] sm:$0xf] }
 0x755   : > { %vm5769_vm11 = vcmp.ge.f32.partialorder %v4945_v57, 0.0  ;;  %v6025_v28 = vmul.f32 0.2, %v4945_v57 }
 0x756   : > { %v5033_v49 = vpop.f32.mrf.mxu0 }
 0x757   : > { %4986 = vmatmul.bf16.gmra.mxu3 %v15227_v41  ;;  %v12655_v54 = vsel %vm5769_vm11, %v4945_v57, %v6025_v28  ;;  %v5034_v13 = vadd.f32 %v5033_v49, %v12607_v46  ;;  %v5122_v31 = vpop.f32.mrf.mxu1  ;;  %v4858_v14 = vpop.f32.mrf.mxu2  ;;  %v8697_v41 = vld [vmem:[#allocation2 + $0x178] sm:$0xf0]  ;;  %v15231_v49 = vld [vmem:[#allocation167_spill] sm:$0xff] }
 0x758   : > { %15229 = vst [vmem:[#allocation227_spill] sm:$0xff] %v12655_v54  ;;  %v4859_v36 = vadd.f32 %v4858_v14, %v15230_v58  ;;  %v8700_v23 = vor.u32 %v9914_v26, %v8697_v41  ;;  %v15235_v26 = vld [vmem:[#allocation75_spill] sm:$0xff]  ;;  %v9047_v41 = vld [vmem:[#allocation2 + $0x418] sm:$0xf] }
 0x759   : > { %v12661_v56 = vadd.f32 %v5122_v31, %v5034_v13  ;;  %v15234_v31 = vld [vmem:[#allocation23_spill] sm:$0xff] }
 0x75a   : > { %v4947_v12 = vpop.f32.mrf.mxu3  ;;  %5370 = vmatpush.bf16.msra.mxu0 %v8700_v23 }
 0x75b   : > { %v4948_v45 = vadd.f32 %v4947_v12, %v4859_v36  ;;  %v10006_v36 = vld [vmem:[#allocation2 + $0x434] sm:$0xf0] }
 0x75d   : > { %v6033_v14 = vmul.f32 0.2, %v4948_v45  ;;  %vm5777_vm12 = vcmp.ge.f32.partialorder %v4948_v45, 0.0 }
 0x75e   : > { %v5036_v60 = vpop.f32.mrf.mxu0 }
 0x75f   : > { %v5037_v52 = vadd.f32 %v5036_v60, %v12607_v46  ;;  %v5125_v57 = vpop.f32.mrf.mxu1  ;;  %v4860_v28 = vpop.f32.mrf.mxu2  ;;  %v15236_v60 = vld [vmem:[#allocation76_spill] sm:$0xff]  ;;  %v12671_v23 = vsel %vm5777_vm12, %v4948_v45, %v6033_v14 }
 0x760   : > { %v4861_v29 = vadd.f32 %v4860_v28, %v15231_v49  ;;  %v9048_v28 = vor.u32 %v10006_v36, %v9047_v41  ;;  %15237 = vst [vmem:[#allocation167_spill] sm:$0xff] %v12671_v23  ;;  %v9994_v49 = vld [vmem:[#allocation2 + $0x3dc] sm:$0xf] }
 0x761   : > { %v12665_v37 = vadd.f32 %v5125_v57, %v5037_v52  ;;  %5075 = vmatmul.bf16.gmra.mxu0 %v15233_v62  ;;  %v10070_v62 = vld [vmem:[#allocation2 + $0x634] sm:$0xf0]  ;;  %v9017_v23 = vld [vmem:[#allocation2 + $0x3f8] sm:$0xf0] }
 0x762   : > { %v4949_v47 = vpop.f32.mrf.mxu3  ;;  %5164 = vmatmul.bf16.gmra.mxu1 %v15234_v31  ;;  %5197 = vmatpush.bf16.msra.mxu2 %v9048_v28  ;;  %v9303_v31 = vld [vmem:[#allocation2 + $0x618] sm:$0xf]  ;;  %v15242_v28 = vld [vmem:[#allocation26_spill] sm:$0xff] }
 0x763   : > { %15232 = vst [vmem:[#allocation132_spill] sm:$0xff] %v12665_v37  ;;  %v4950_v13 = vadd.f32 %v4949_v47, %v4861_v29  ;;  %v9304_v45 = vor.u32 %v10070_v62, %v9303_v31  ;;  %v15244_v31 = vld [vmem:[#allocation78_spill] sm:$0xff] }
 0x764   : > { %4902 = vmatmul.bf16.gmra.mxu2 %v15235_v26 }
 0x765   : > { %vm5785_vm13 = vcmp.ge.f32.partialorder %v4950_v13, 0.0  ;;  %v6041_v58 = vmul.f32 0.2, %v4950_v13  ;;  %5286 = vmatpush.bf16.msra.mxu3 %v9304_v45  ;;  %v8985_v45 = vld [vmem:[#allocation2 + $0x3b8] sm:$0xf0] }
 0x766   : > { %v5038_v12 = vpop.f32.mrf.mxu0 }
 0x767   : > { %4991 = vmatmul.bf16.gmra.mxu3 %v15236_v60  ;;  %v12673_v52 = vsel %vm5785_vm13, %v4950_v13, %v6041_v58  ;;  %v5039_v57 = vadd.f32 %v5038_v12, %v12607_v46  ;;  %v5127_v47 = vpop.f32.mrf.mxu1  ;;  %v4863_v29 = vpop.f32.mrf.mxu2 }
 0x768   : > { %15238 = vst [vmem:[#allocation228_spill] sm:$0xff] %v12673_v52  ;;  %v4864_v54 = vadd.f32 %v4863_v29, %v15239_v15 }
 0x769   : > { %v12679_v60 = vadd.f32 %v5127_v47, %v5039_v57  ;;  %v9020_v57 = vor.u32 %v9994_v49, %v9017_v23 }
 0x76a   : > { %v4952_v26 = vpop.f32.mrf.mxu3 }
 0x76b   : > { %15240 = vst [vmem:[#allocation198_spill] sm:$0xff] %v12679_v60  ;;  %v4953_v41 = vadd.f32 %v4952_v26, %v4864_v54  ;;  %v15243_v54 = vld [vmem:[#allocation27_spill] sm:$0xff]  ;;  %5457 = vmatpush.bf16.msra.mxu1 %v9020_v57  ;;  %v9986_v26 = vld [vmem:[#allocation2 + $0x39c] sm:$0xf] }
 0x76c   : > { %v15248_v57 = vld [vmem:[#allocation137_spill] sm:$0xff] }
 0x76d   : > { %v6049_v47 = vmul.f32 0.2, %v4953_v41  ;;  %vm5793_vm14 = vcmp.ge.f32.partialorder %v4953_v41, 0.0 }
 0x76e   : > { %v5041_v14 = vpop.f32.mrf.mxu0 }
 0x76f   : > { %v5042_v13 = vadd.f32 %v5041_v14, %v12607_v46  ;;  %v5130_v58 = vpop.f32.mrf.mxu1  ;;  %v4865_v36 = vpop.f32.mrf.mxu2 }
 0x770   : > { %v4866_v12 = vadd.f32 %v4865_v36, %v12405_v40  ;;  %v15245_v40 = vld [vmem:[#allocation79_spill] sm:$0xff] }
 0x771   : > { %v12683_v15 = vadd.f32 %v5130_v58, %v5042_v13  ;;  %5080 = vmatmul.bf16.gmra.mxu0 %v15242_v28  ;;  %v8988_v13 = vor.u32 %v9986_v26, %v8985_v45  ;;  %v12689_v58 = vsel %vm5793_vm14, %v4953_v41, %v6049_v47  ;;  %v9906_v47 = vld [vmem:[#allocation2 + $0x11c] sm:$0xf] }
 0x772   : > { %v4954_v37 = vpop.f32.mrf.mxu3  ;;  %5169 = vmatmul.bf16.gmra.mxu1 %v15243_v54  ;;  %15246 = vst [vmem:[#allocation230_spill] sm:$0xff] %v12689_v58  ;;  %v9978_v54 = vld [vmem:[#allocation2 + $0x35c] sm:$0xf] }
 0x773   : > { %15241 = vst [vmem:[#allocation229_spill] sm:$0xff] %v12683_v15  ;;  %v4955_v29 = vadd.f32 %v4954_v37, %v4866_v12  ;;  %5458 = vmatpush.bf16.msra.mxu1 %v8988_v13  ;;  %v8921_v45 = vld [vmem:[#allocation2 + $0x338] sm:$0xf0] }
 0x774   : > { %4907 = vmatmul.bf16.gmra.mxu2 %v15244_v31 }
 0x775   : > { %vm5801_vm15 = vcmp.ge.f32.partialorder %v4955_v29, 0.0  ;;  %v6057_v62 = vmul.f32 0.2, %v4955_v29 }
 0x776   : > { %v5043_v14 = vpop.f32.mrf.mxu0 }
 0x777   : > { %4996 = vmatmul.bf16.gmra.mxu3 %v15245_v40  ;;  %v12691_v36 = vsel %vm5801_vm15, %v4955_v29, %v6057_v62  ;;  %v5044_v37 = vadd.f32 %v5043_v14, %v12607_v46  ;;  %v5132_v23 = vpop.f32.mrf.mxu1  ;;  %v4868_v49 = vpop.f32.mrf.mxu2  ;;  %v8953_v40 = vld [vmem:[#allocation2 + $0x378] sm:$0xf0] }
 0x778   : > { %15247 = vst [vmem:[#allocation231_spill] sm:$0xff] %v12691_v36  ;;  %v4869_v52 = vadd.f32 %v4868_v49, %v15248_v57  ;;  %v8956_v26 = vor.u32 %v9978_v54, %v8953_v40  ;;  %v8665_v29 = vld [vmem:[#allocation2 + $0x138] sm:$0xf0]  ;;  %v15250_v40 = vld [vmem:[#allocation30_spill] sm:$0xff] }
 0x779   : > { %v12697_v28 = vadd.f32 %v5132_v23, %v5044_v37  ;;  %v9970_v62 = vld [vmem:[#allocation2 + $0x31c] sm:$0xf]  ;;  %v8668_v15 = vor.u32 %v9906_v47, %v8665_v29 }
 0x77a   : > { %v4957_v31 = vpop.f32.mrf.mxu3  ;;  %5459 = vmatpush.bf16.msra.mxu1 %v8956_v26  ;;  %v8924_v60 = vor.u32 %v9970_v62, %v8921_v45  ;;  %v9898_v37 = vld [vmem:[#allocation2 + $0xdc] sm:$0xf]  ;;  %v15251_v62 = vld [vmem:[#allocation31_spill] sm:$0xff] }
 0x77b   : > { %v4958_v41 = vadd.f32 %v4957_v31, %v4869_v52  ;;  %5371 = vmatpush.bf16.msra.mxu0 %v8668_v15  ;;  %v8633_v54 = vld [vmem:[#allocation2 + $0xf8] sm:$0xf0]  ;;  %v15253_v15 = vld [vmem:[#allocation82_spill] sm:$0xff] }
 0x77c   : > { %v9962_v52 = vld [vmem:[#allocation2 + $0x2dc] sm:$0xf]  ;;  %v8636_v23 = vor.u32 %v9898_v37, %v8633_v54 }
 0x77d   : > { %v8889_v26 = vld [vmem:[#allocation2 + $0x2f8] sm:$0xf0]  ;;  %v6065_v47 = vmul.f32 0.2, %v4958_v41  ;;  %vm5809_vm1 = vcmp.ge.f32.partialorder %v4958_v41, 0.0 }
 0x77e   : > { %v5046_v14 = vpop.f32.mrf.mxu0  ;;  %5460 = vmatpush.bf16.msra.mxu1 %v8924_v60  ;;  %v8892_v45 = vor.u32 %v9962_v52, %v8889_v26  ;;  %v9890_v60 = vld [vmem:[#allocation2 + $0x9c] sm:$0xf] }
 0x77f   : > { %v5047_v12 = vadd.f32 %v5046_v14, %v12607_v46  ;;  %v5135_v58 = vpop.f32.mrf.mxu1  ;;  %v4870_v49 = vpop.f32.mrf.mxu2  ;;  %v15252_v14 = vld [vmem:[#allocation81_spill] sm:$0xff]  ;;  %5372 = vmatpush.bf16.msra.mxu0 %v8636_v23  ;;  %v12708_v52 = vsel %vm5809_vm1, %v4958_v41, %v6065_v47 }
 0x780   : > { %v4871_v13 = vadd.f32 %v4870_v49, %v12425_v3  ;;  %v8601_v49 = vld [vmem:[#allocation2 + $0xb8] sm:$0xf0]  ;;  %15254 = vst [vmem:[#allocation232_spill] sm:$0xff] %v12708_v52 }
 0x781   : > { %v12701_v31 = vadd.f32 %v5135_v58, %v5047_v12  ;;  %5085 = vmatmul.bf16.gmra.mxu0 %v15250_v40  ;;  %v10058_v58 = vld [vmem:[#allocation2 + $0x5dc] sm:$0xf]  ;;  %v8604_v36 = vor.u32 %v9890_v60, %v8601_v49 }
 0x782   : > { %v4959_v57 = vpop.f32.mrf.mxu3  ;;  %5174 = vmatmul.bf16.gmra.mxu1 %v15251_v62  ;;  %v9273_v12 = vld [vmem:[#allocation2 + $0x5f8] sm:$0xf0] }
 0x783   : > { %15249 = vst [vmem:[#allocation137_spill] sm:$0xff] %v12701_v31  ;;  %v4960_v29 = vadd.f32 %v4959_v57, %v4871_v13  ;;  %5461 = vmatpush.bf16.msra.mxu1 %v8892_v45  ;;  %v9276_v54 = vor.u32 %v10058_v58, %v9273_v12  ;;  %v9954_v13 = vld [vmem:[#allocation2 + $0x29c] sm:$0xf]  ;;  %5373 = vmatpush.bf16.msra.mxu0 %v8604_v36 }
 0x784   : > { %4912 = vmatmul.bf16.gmra.mxu2 %v15252_v14  ;;  %v8857_v57 = vld [vmem:[#allocation2 + $0x2b8] sm:$0xf0] }
 0x785   : > { %vm5817_vm2 = vcmp.ge.f32.partialorder %v4960_v29, 0.0  ;;  %v6073_v3 = vmul.f32 0.2, %v4960_v29  ;;  %5546 = vmatpush.bf16.msrb.mxu2 %v9276_v54  ;;  %v9882_v60 = vld [vmem:[#allocation2 + $0x5c] sm:$0xf] }
 0x786   : > { %v5048_v37 = vpop.f32.mrf.mxu0  ;;  %v8569_v12 = vld [vmem:[#allocation2 + $0x78] sm:$0xf0] }
 0x787   : > { %5001 = vmatmul.bf16.gmra.mxu3 %v15253_v15  ;;  %v12711_v26 = vsel %vm5817_vm2, %v4960_v29, %v6073_v3  ;;  %v5049_v23 = vadd.f32 %v5048_v37, %v12607_v46  ;;  %v5137_v14 = vpop.f32.mrf.mxu1  ;;  %v4873_v62 = vpop.f32.mrf.mxu2  ;;  %v8860_v15 = vor.u32 %v9954_v13, %v8857_v57  ;;  %v9946_v41 = vld [vmem:[#allocation2 + $0x25c] sm:$0xf]  ;;  %v8572_v49 = vor.u32 %v9882_v60, %v8569_v12 }
 0x788   : > { %15255 = vst [vmem:[#allocation233_spill] sm:$0xff] %v12711_v26  ;;  %v4874_v40 = vadd.f32 %v4873_v62, %v12429_v43  ;;  %v10122_v29 = vld [vmem:[#allocation2 + $0x7dc] sm:$0xf] }
 0x789   : > { %v12717_v47 = vadd.f32 %v5137_v14, %v5049_v23  ;;  %5462 = vmatpush.bf16.msra.mxu1 %v8860_v15  ;;  %v9529_v3 = vld [vmem:[#allocation2 + $0x7f8] sm:$0xf0]  ;;  %5374 = vmatpush.bf16.msra.mxu0 %v8572_v49 }
 0x78a   : > { %v4962_v58 = vpop.f32.mrf.mxu3  ;;  %v8825_v37 = vld [vmem:[#allocation2 + $0x278] sm:$0xf0]  ;;  %v9532_v13 = vor.u32 %v10122_v29, %v9529_v3 }
 0x78b   : > { %v4963_v31 = vadd.f32 %v4962_v58, %v4874_v40  ;;  %v8828_v57 = vor.u32 %v9946_v41, %v8825_v37  ;;  %v9874_v45 = vld [vmem:[#allocation2 + $0x1c] sm:$0xf] }
 0x78c   : > { %5635 = vmatpush.bf16.msrb.mxu3 %v9532_v13  ;;  %v8537_v43 = vld [vmem:[#allocation2 + $0x38] sm:$0xf0] }
 0x78d   : > { %5463 = vmatpush.bf16.msra.mxu1 %v8828_v57  ;;  %v9938_v62 = vld [vmem:[#allocation2 + $0x21c] sm:$0xf]  ;;  %v8540_v52 = vor.u32 %v9874_v45, %v8537_v43  ;;  %v6081_v58 = vmul.f32 0.2, %v4963_v31  ;;  %vm5825_vm0 = vcmp.ge.f32.partialorder %v4963_v31, 0.0 }
 0x78e   : > { %v8793_v36 = vld [vmem:[#allocation2 + $0x238] sm:$0xf0]  ;;  %v5051_v54 = vpop.f32.mrf.mxu0 }
 0x78f   : > { %v8796_v26 = vor.u32 %v9938_v62, %v8793_v36  ;;  %v5052_v14 = vadd.f32 %v5051_v54, %v12607_v46  ;;  %v5140_v15 = vpop.f32.mrf.mxu1  ;;  %v4875_v23 = vpop.f32.mrf.mxu2  ;;  %5375 = vmatpush.bf16.msra.mxu0 %v8540_v52 }
 0x790   : > { %v4876_v60 = vadd.f32 %v4875_v23, %v12443_v38  ;;  %v12727_v38 = vsel %vm5825_vm0, %v4963_v31, %v6081_v58 }
 0x791   : > { %v12721_v40 = vadd.f32 %v5140_v15, %v5052_v14  ;;  %5090 = vmatmul.bf16.gmra.mxu0 %v10807_v2  ;;  %5464 = vmatpush.bf16.msra.mxu1 %v8796_v26  ;;  %15256 = vst [vmem:[#allocation234_spill] sm:$0xff] %v12727_v38  ;;  %v10098_v38 = vld [vmem:[#allocation2 + $0x71c] sm:$0xf] }
 0x792   : > { %v4964_v12 = vpop.f32.mrf.mxu3  ;;  %5179 = vmatmul.bf16.gmra.mxu1 %v14788_v1 }
 0x793   : > { %v4965_v41 = vadd.f32 %v4964_v12, %v4876_v60 }
 0x794   : > { %4917 = vmatmul.bf16.gmra.mxu2 %v11138_v8 }
 0x795   : > { %vm5833_vm3 = vcmp.ge.f32.partialorder %v4965_v41, 0.0  ;;  %v6089_v45 = vmul.f32 0.2, %v4965_v41 }
 0x796   : > { %v5053_v29 = vpop.f32.mrf.mxu0 }
 0x797   : > { %5006 = vmatmul.bf16.gmra.mxu3 %v11141_v20  ;;  %v12729_v52 = vsel %vm5833_vm3, %v4965_v41, %v6089_v45  ;;  %v5054_v3 = vadd.f32 %v5053_v29, %v12607_v46  ;;  %v5142_v49 = vpop.f32.mrf.mxu1  ;;  %v4878_v26 = vpop.f32.mrf.mxu2  ;;  %v10050_v41 = vld [vmem:[#allocation2 + $0x59c] sm:$0xf] }
 0x798   : > { %15257 = vst [vmem:[#allocation235_spill] sm:$0xff] %v12729_v52  ;;  %v4879_v13 = vadd.f32 %v4878_v26, %v12447_v48  ;;  %v9241_v45 = vld [vmem:[#allocation2 + $0x5b8] sm:$0xf0] }
 0x799   : > { %v12735_v43 = vadd.f32 %v5142_v49, %v5054_v3  ;;  %v9433_v52 = vld [vmem:[#allocation2 + $0x738] sm:$0xf0] }
 0x79a   : > { %v4967_v57 = vpop.f32.mrf.mxu3 }
 0x79b   : > { %v4968_v62 = vadd.f32 %v4967_v57, %v4879_v13 }
 0x79d   : > { %v6097_v12 = vmul.f32 0.2, %v4968_v62  ;;  %vm5841_vm4 = vcmp.ge.f32.partialorder %v4968_v62, 0.0 }
 0x79e   : > { %v5056_v36 = vpop.f32.mrf.mxu0 }
 0x79f   : > { %v5057_v54 = vadd.f32 %v5056_v36, %v12607_v46  ;;  %v5145_v31 = vpop.f32.mrf.mxu1  ;;  %v4880_v14 = vpop.f32.mrf.mxu2  ;;  %v12745_v3 = vsel %vm5841_vm4, %v4968_v62, %v6097_v12 }
 0x7a0   : > { %v4881_v15 = vadd.f32 %v4880_v14, %v12461_v24  ;;  %v9244_v24 = vor.u32 %v10050_v41, %v9241_v45  ;;  %15258 = vst [vmem:[#allocation236_spill] sm:$0xff] %v12745_v3 }
 0x7a1   : > { %v12739_v60 = vadd.f32 %v5145_v31, %v5057_v54  ;;  %5095 = vmatmul.bf16.gmra.mxu0 %v14792_v34 }
 0x7a2   : > { %v4969_v23 = vpop.f32.mrf.mxu3  ;;  %5184 = vmatmul.bf16.gmra.mxu1 %v14878_v42  ;;  %5547 = vmatpush.bf16.msrb.mxu2 %v9244_v24 }
 0x7a3   : > { %v4970_v58 = vadd.f32 %v4969_v23, %v4881_v15  ;;  %v10114_v15 = vld [vmem:[#allocation2 + $0x79c] sm:$0xf] }
 0x7a4   : > { %5198 = vmatmul.bf16.vlgmr.msra.gmra.mxu2 %v14879_v5  ;;  %v9497_v23 = vld [vmem:[#allocation2 + $0x7b8] sm:$0xf0] }
 0x7a5   : > { %vm5849_vm5 = vcmp.ge.f32.partialorder %v4970_v58, 0.0  ;;  %v6105_v48 = vmul.f32 0.2, %v4970_v58  ;;  %v9500_v62 = vor.u32 %v10114_v15, %v9497_v23 }
 0x7a6   : > { %v5058_v29 = vpop.f32.mrf.mxu0 }
 0x7a7   : > { %5287 = vmatmul.bf16.vlgmr.msra.gmra.mxu3 %v14971_v0  ;;  %v12747_v49 = vsel %vm5849_vm5, %v4970_v58, %v6105_v48  ;;  %v5059_v26 = vadd.f32 %v5058_v29, %v12607_v46  ;;  %v5147_v13 = vpop.f32.mrf.mxu1  ;;  %v4883_v57 = vpop.f32.mrf.mxu2 }
 0x7a8   : > { %15259 = vst [vmem:[#allocation237_spill] sm:$0xff] %v12747_v49  ;;  %v4884_v54 = vadd.f32 %v4883_v57, %v12465_v16  ;;  %5636 = vmatpush.bf16.msrb.mxu3 %v9500_v62 }
 0x7a9   : > { %v12753_v14 = vadd.f32 %v5147_v13, %v5059_v26 }
 0x7aa   : > { %v4972_v31 = vpop.f32.mrf.mxu3 }
 0x7ab   : > { %v4973_v41 = vadd.f32 %v4972_v31, %v4884_v54 }
 0x7ad   : > { %v6113_v16 = vmul.f32 0.2, %v4973_v41  ;;  %vm5857_vm6 = vcmp.ge.f32.partialorder %v4973_v41, 0.0 }
 0x7ae   : > { %v5061_v12 = vpop.f32.mrf.mxu0 }
 0x7af   : > { %v5062_v58 = vadd.f32 %v5061_v12, %v12607_v46  ;;  %v5150_v48 = vpop.f32.mrf.mxu1  ;;  %v4885_v45 = vpop.f32.mrf.mxu2  ;;  %v12763_v57 = vsel %vm5857_vm6, %v4973_v41, %v6113_v16 }
 0x7b0   : > { %v4886_v29 = vadd.f32 %v4885_v45, %v12479_v35  ;;  %15260 = vst [vmem:[#allocation238_spill] sm:$0xff] %v12763_v57  ;;  %v10106_v57 = vld [vmem:[#allocation2 + $0x75c] sm:$0xf] }
 0x7b1   : > { %v12757_v36 = vadd.f32 %v5150_v48, %v5062_v58  ;;  %5376 = vmatmul.bf16.vlgmr.msra.gmra.mxu0 %v14883_v18 }
 0x7b2   : > { %v4974_v37 = vpop.f32.mrf.mxu3  ;;  %5465 = vmatmul.bf16.vlgmr.msra.gmra.mxu1 %v14974_v6 }
 0x7b3   : > { %v4975_v24 = vadd.f32 %v4974_v37, %v4886_v29 }
 0x7b4   : > { %5203 = vmatmul.bf16.gmra.mxu2 %v15068_v11 }
 0x7b5   : > { %vm5865_vm7 = vcmp.ge.f32.partialorder %v4975_v24, 0.0  ;;  %v6121_v26 = vmul.f32 0.2, %v4975_v24 }
 0x7b6   : > { %v5063_v13 = vpop.f32.mrf.mxu0 }
 0x7b7   : > { %5292 = vmatmul.bf16.gmra.mxu3 %v15069_v4  ;;  %v12765_v35 = vsel %vm5865_vm7, %v4975_v24, %v6121_v26  ;;  %v5064_v54 = vadd.f32 %v5063_v13, %v12607_v46  ;;  %v5152_v31 = vpop.f32.mrf.mxu1  ;;  %v4888_v18 = vpop.f32.mrf.mxu2  ;;  %v15262_v13 = vld [vmem:[#allocation13_spill] sm:$0xff] }
 0x7b8   : > { %15261 = vst [vmem:[#allocation239_spill] sm:$0xff] %v12765_v35  ;;  %v4889_v6 = vadd.f32 %v4888_v18, %v12483_v9  ;;  %v10042_v18 = vld [vmem:[#allocation2 + $0x55c] sm:$0xf] }
 0x7b9   : > { %v12771_v23 = vadd.f32 %v5152_v31, %v5064_v54  ;;  %v15263_v54 = vld [vmem:[#allocation44_spill] sm:$0xff]  ;;  %v15264_v31 = vld [vmem:[#allocation45_spill] sm:$0xff] }
 0x7ba   : > { %v4977_v15 = vpop.f32.mrf.mxu3  ;;  %v9465_v35 = vld [vmem:[#allocation2 + $0x778] sm:$0xf0] }
 0x7bb   : > { %v4978_v62 = vadd.f32 %v4977_v15, %v4889_v6  ;;  %v9209_v6 = vld [vmem:[#allocation2 + $0x578] sm:$0xf0] }
 0x7bd   : > { %v6129_v24 = vmul.f32 0.2, %v4978_v62  ;;  %vm5873_vm8 = vcmp.ge.f32.partialorder %v4978_v62, 0.0 }
 0x7be   : > { %v5066_v12 = vpop.f32.mrf.mxu0 }
 0x7bf   : > { %v5067_v58 = vadd.f32 %v5066_v12, %v12607_v46  ;;  %v5155_v41 = vpop.f32.mrf.mxu1  ;;  %v4890_v48 = vpop.f32.mrf.mxu2  ;;  %v12781_v12 = vsel %vm5873_vm8, %v4978_v62, %v6129_v24  ;;  %v9468_v62 = vor.u32 %v10106_v57, %v9465_v35  ;;  %v15268_v35 = vld [vmem:[#allocation48_spill] sm:$0xff] }
 0x7c0   : > { %v4891_v45 = vadd.f32 %v4890_v48, %v12497_v17  ;;  %v9212_v17 = vor.u32 %v10042_v18, %v9209_v6  ;;  %15265 = vst [vmem:[#allocation13_spill] sm:$0xff] %v12781_v12 }
 0x7c1   : > { %v12775_v16 = vadd.f32 %v5155_v41, %v5067_v58  ;;  %5381 = vmatmul.bf16.gmra.mxu0 %v15167_v39  ;;  %5637 = vmatpush.bf16.msrb.mxu3 %v9468_v62 }
 0x7c2   : > { %v4979_v29 = vpop.f32.mrf.mxu3  ;;  %5470 = vmatmul.bf16.gmra.mxu1 %v15262_v13  ;;  %5548 = vmatpush.bf16.msrb.mxu2 %v9212_v17 }
 0x7c3   : > { %v4980_v26 = vadd.f32 %v4979_v29, %v4891_v45 }
 0x7c4   : > { %5208 = vmatmul.bf16.gmra.mxu2 %v15263_v54 }
 0x7c5   : > { %vm5881_vm9 = vcmp.ge.f32.partialorder %v4980_v26, 0.0  ;;  %v6137_v9 = vmul.f32 0.2, %v4980_v26 }
 0x7c6   : > { %v5068_v15 = vpop.f32.mrf.mxu0 }
 0x7c7   : > { %5297 = vmatmul.bf16.gmra.mxu3 %v15264_v31  ;;  %v12783_v58 = vsel %vm5881_vm9, %v4980_v26, %v6137_v9  ;;  %v5069_v39 = vadd.f32 %v5068_v15, %v12607_v46  ;;  %v5157_v41 = vpop.f32.mrf.mxu1  ;;  %v4893_v48 = vpop.f32.mrf.mxu2 }
 0x7c8   : > { %15266 = vst [vmem:[#allocation44_spill] sm:$0xff] %v12783_v58  ;;  %v4894_v29 = vadd.f32 %v4893_v48, %v12501_v44  ;;  %v15273_v58 = vld [vmem:[#allocation20_spill] sm:$0xff] }
 0x7c9   : > { %v12789_v37 = vadd.f32 %v5157_v41, %v5069_v39  ;;  %v15267_v39 = vld [vmem:[#allocation17_spill] sm:$0xff] }
 0x7ca   : > { %v4982_v13 = vpop.f32.mrf.mxu3  ;;  %v15269_v41 = vld [vmem:[#allocation49_spill] sm:$0xff] }
 0x7cb   : > { %v4983_v18 = vadd.f32 %v4982_v13, %v4894_v29 }
 0x7cd   : > { %v6145_v44 = vmul.f32 0.2, %v4983_v18  ;;  %vm5889_vm10 = vcmp.ge.f32.partialorder %v4983_v18, 0.0 }
 0x7ce   : > { %v5071_v24 = vpop.f32.mrf.mxu0 }
 0x7cf   : > { %v5072_v26 = vadd.f32 %v5071_v24, %v12607_v46  ;;  %v5160_v9 = vpop.f32.mrf.mxu1  ;;  %v4895_v6 = vpop.f32.mrf.mxu2  ;;  %v12799_v29 = vsel %vm5889_vm10, %v4983_v18, %v6145_v44  ;;  %v15272_v24 = vld [vmem:[#allocation116_spill] sm:$0xff] }
 0x7d0   : > { %v4896_v15 = vadd.f32 %v4895_v6, %v12515_v32  ;;  %15270 = vst [vmem:[#allocation45_spill] sm:$0xff] %v12799_v29  ;;  %v15274_v29 = vld [vmem:[#allocation21_spill] sm:$0xff] }
 0x7d1   : > { %v12793_v45 = vadd.f32 %v5160_v9, %v5072_v26  ;;  %5386 = vmatmul.bf16.gmra.mxu0 %v14896_v33 }
 0x7d2   : > { %v4984_v3 = vpop.f32.mrf.mxu3  ;;  %5475 = vmatmul.bf16.gmra.mxu1 %v15267_v39 }
 0x7d3   : > { %v4985_v17 = vadd.f32 %v4984_v3, %v4896_v15 }
 0x7d4   : > { %5213 = vmatmul.bf16.gmra.mxu2 %v15268_v35 }
 0x7d5   : > { %vm5897_vm11 = vcmp.ge.f32.partialorder %v4985_v17, 0.0  ;;  %v6153_v57 = vmul.f32 0.2, %v4985_v17 }
 0x7d6   : > { %v5073_v48 = vpop.f32.mrf.mxu0 }
 0x7d7   : > { %5302 = vmatmul.bf16.gmra.mxu3 %v15269_v41  ;;  %v12801_v32 = vsel %vm5897_vm11, %v4985_v17, %v6153_v57  ;;  %v5074_v13 = vadd.f32 %v5073_v48, %v12607_v46  ;;  %v5162_v62 = vpop.f32.mrf.mxu1  ;;  %v4898_v33 = vpop.f32.mrf.mxu2 }
 0x7d8   : > { %15271 = vst [vmem:[#allocation17_spill] sm:$0xff] %v12801_v32  ;;  %v4899_v26 = vadd.f32 %v4898_v33, %v15272_v24  ;;  %v15276_v33 = vld [vmem:[#allocation53_spill] sm:$0xff] }
 0x7d9   : > { %v12807_v6 = vadd.f32 %v5162_v62, %v5074_v13  ;;  %v15275_v62 = vld [vmem:[#allocation52_spill] sm:$0xff]  ;;  %v10034_v24 = vld [vmem:[#allocation2 + $0x51c] sm:$0xf] }
 0x7da   : > { %v4987_v9 = vpop.f32.mrf.mxu3 }
 0x7db   : > { %v4988_v15 = vadd.f32 %v4987_v9, %v4899_v26  ;;  %v9177_v26 = vld [vmem:[#allocation2 + $0x538] sm:$0xf0] }
 0x7dd   : > { %v6161_v49 = vmul.f32 0.2, %v4988_v15  ;;  %vm5905_vm12 = vcmp.ge.f32.partialorder %v4988_v15, 0.0 }
 0x7de   : > { %v5076_v39 = vpop.f32.mrf.mxu0 }
 0x7df   : > { %v5077_v12 = vadd.f32 %v5076_v39, %v12607_v46  ;;  %v5165_v18 = vpop.f32.mrf.mxu1  ;;  %v4900_v44 = vpop.f32.mrf.mxu2  ;;  %v12817_v39 = vsel %vm5905_vm12, %v4988_v15, %v6161_v49  ;;  %v9436_v49 = vor.u32 %v10098_v38, %v9433_v52  ;;  %v15280_v52 = vld [vmem:[#allocation56_spill] sm:$0xff] }
 0x7e0   : > { %v4901_v17 = vadd.f32 %v4900_v44, %v12533_v22  ;;  %v9180_v22 = vor.u32 %v10034_v24, %v9177_v26  ;;  %15277 = vst [vmem:[#allocation48_spill] sm:$0xff] %v12817_v39 }
 0x7e1   : > { %v12811_v48 = vadd.f32 %v5165_v18, %v5077_v12  ;;  %5391 = vmatmul.bf16.gmra.mxu0 %v15273_v58  ;;  %5638 = vmatpush.bf16.msrb.mxu3 %v9436_v49 }
 0x7e2   : > { %v4989_v57 = vpop.f32.mrf.mxu3  ;;  %5480 = vmatmul.bf16.gmra.mxu1 %v15274_v29  ;;  %5549 = vmatpush.bf16.msrb.mxu2 %v9180_v22 }
 0x7e3   : > { %v4990_v3 = vadd.f32 %v4989_v57, %v4901_v17 }
 0x7e4   : > { %5218 = vmatmul.bf16.gmra.mxu2 %v15275_v62 }
 0x7e5   : > { %vm5913_vm13 = vcmp.ge.f32.partialorder %v4990_v3, 0.0  ;;  %v6169_v13 = vmul.f32 0.2, %v4990_v3 }
 0x7e6   : > { %v5078_v9 = vpop.f32.mrf.mxu0 }
 0x7e7   : > { %5307 = vmatmul.bf16.gmra.mxu3 %v15276_v33  ;;  %v12819_v12 = vsel %vm5913_vm13, %v4990_v3, %v6169_v13  ;;  %v5079_v58 = vadd.f32 %v5078_v9, %v12607_v46  ;;  %v5167_v18 = vpop.f32.mrf.mxu1  ;;  %v4903_v44 = vpop.f32.mrf.mxu2 }
 0x7e8   : > { %15278 = vst [vmem:[#allocation49_spill] sm:$0xff] %v12819_v12  ;;  %v4904_v17 = vadd.f32 %v4903_v44, %v12537_v10  ;;  %v15286_v12 = vld [vmem:[#allocation28_spill] sm:$0xff] }
 0x7e9   : > { %v12825_v32 = vadd.f32 %v5167_v18, %v5079_v58  ;;  %v15279_v58 = vld [vmem:[#allocation25_spill] sm:$0xff] }
 0x7ea   : > { %v4992_v57 = vpop.f32.mrf.mxu3  ;;  %v15281_v18 = vld [vmem:[#allocation57_spill] sm:$0xff] }
 0x7eb   : > { %v4993_v24 = vadd.f32 %v4992_v57, %v4904_v17 }
 0x7ed   : > { %v6177_v10 = vmul.f32 0.2, %v4993_v24  ;;  %vm5921_vm14 = vcmp.ge.f32.partialorder %v4993_v24, 0.0 }
 0x7ee   : > { %v5081_v3 = vpop.f32.mrf.mxu0 }
 0x7ef   : > { %v5082_v15 = vadd.f32 %v5081_v3, %v12607_v46  ;;  %v5170_v13 = vpop.f32.mrf.mxu1  ;;  %v4905_v26 = vpop.f32.mrf.mxu2  ;;  %v12835_v17 = vsel %vm5921_vm14, %v4993_v24, %v6177_v10  ;;  %v15284_v3 = vld [vmem:[#allocation120_spill] sm:$0xff] }
 0x7f0   : > { %v4906_v9 = vadd.f32 %v4905_v26, %v12551_v30  ;;  %15282 = vst [vmem:[#allocation116_spill] sm:$0xff] %v12835_v17  ;;  %v15287_v17 = vld [vmem:[#allocation29_spill] sm:$0xff] }
 0x7f1   : > { %v12829_v29 = vadd.f32 %v5170_v13, %v5082_v15  ;;  %5396 = vmatmul.bf16.gmra.mxu0 %v14909_v7 }
 0x7f2   : > { %v4994_v33 = vpop.f32.mrf.mxu3  ;;  %5485 = vmatmul.bf16.gmra.mxu1 %v15279_v58 }
 0x7f3   : > { %v4995_v22 = vadd.f32 %v4994_v33, %v4906_v9 }
 0x7f4   : > { %5223 = vmatmul.bf16.gmra.mxu2 %v15280_v52 }
 0x7f5   : > { %vm5929_vm15 = vcmp.ge.f32.partialorder %v4995_v22, 0.0  ;;  %v6185_v38 = vmul.f32 0.2, %v4995_v22 }
 0x7f6   : > { %v5083_v44 = vpop.f32.mrf.mxu0 }
 0x7f7   : > { %5312 = vmatmul.bf16.gmra.mxu3 %v15281_v18  ;;  %v12837_v30 = vsel %vm5929_vm15, %v4995_v22, %v6185_v38  ;;  %v5084_v57 = vadd.f32 %v5083_v44, %v12607_v46  ;;  %v5172_v49 = vpop.f32.mrf.mxu1  ;;  %v4908_v7 = vpop.f32.mrf.mxu2 }
 0x7f8   : > { %15283 = vst [vmem:[#allocation20_spill] sm:$0xff] %v12837_v30  ;;  %v4909_v15 = vadd.f32 %v4908_v7, %v15284_v3  ;;  %v15289_v7 = vld [vmem:[#allocation59_spill] sm:$0xff]  ;;  %v10026_v3 = vld [vmem:[#allocation2 + $0x4dc] sm:$0xf] }
 0x7f9   : > { %v12843_v26 = vadd.f32 %v5172_v49, %v5084_v57  ;;  %v15288_v49 = vld [vmem:[#allocation58_spill] sm:$0xff] }
 0x7fa   : > { %v4997_v13 = vpop.f32.mrf.mxu3 }
 0x7fb   : > { %v4998_v9 = vadd.f32 %v4997_v13, %v4909_v15  ;;  %v9145_v15 = vld [vmem:[#allocation2 + $0x4f8] sm:$0xf0] }
 0x7fd   : > { %v6193_v18 = vmul.f32 0.2, %v4998_v9  ;;  %vm5937_vm1 = vcmp.ge.f32.partialorder %v4998_v9, 0.0 }
 0x7fe   : > { %v5086_v58 = vpop.f32.mrf.mxu0 }
 0x7ff   : > { %v5087_v39 = vadd.f32 %v5086_v58, %v12607_v46  ;;  %v5175_v24 = vpop.f32.mrf.mxu1  ;;  %v4910_v10 = vpop.f32.mrf.mxu2  ;;  %v12853_v58 = vsel %vm5937_vm1, %v4998_v9, %v6193_v18 }
 0x800   : > { %v4911_v22 = vadd.f32 %v4910_v10, %v12569_v21  ;;  %v9148_v21 = vor.u32 %v10026_v3, %v9145_v15  ;;  %15290 = vst [vmem:[#allocation52_spill] sm:$0xff] %v12853_v58 }
 0x801   : > { %v12847_v44 = vadd.f32 %v5175_v24, %v5087_v39  ;;  %5401 = vmatmul.bf16.gmra.mxu0 %v15286_v12 }
 0x802   : > { %v4999_v38 = vpop.f32.mrf.mxu3  ;;  %5490 = vmatmul.bf16.gmra.mxu1 %v15287_v17  ;;  %5550 = vmatpush.bf16.msrb.mxu2 %v9148_v21 }
 0x803   : > { %15285 = vst [vmem:[#allocation21_spill] sm:$0xff] %v12847_v44  ;;  %v5000_v33 = vadd.f32 %v4999_v38, %v4911_v22 }
 0x804   : > { %5228 = vmatmul.bf16.gmra.mxu2 %v15288_v49  ;;  %v9401_v49 = vld [vmem:[#allocation2 + $0x6f8] sm:$0xf0] }
 0x805   : > { %vm5945_vm2 = vcmp.ge.f32.partialorder %v5000_v33, 0.0  ;;  %v6201_v57 = vmul.f32 0.2, %v5000_v33 }
 0x806   : > { %v5088_v13 = vpop.f32.mrf.mxu0 }
 0x807   : > { %5317 = vmatmul.bf16.gmra.mxu3 %v15289_v7  ;;  %v12855_v39 = vsel %vm5945_vm2, %v5000_v33, %v6201_v57  ;;  %v5089_v12 = vadd.f32 %v5088_v13, %v12607_v46  ;;  %v5177_v24 = vpop.f32.mrf.mxu1  ;;  %v4913_v10 = vpop.f32.mrf.mxu2  ;;  %v10090_v7 = vld [vmem:[#allocation2 + $0x6dc] sm:$0xf] }
 0x808   : > { %15291 = vst [vmem:[#allocation25_spill] sm:$0xff] %v12855_v39  ;;  %v4914_v22 = vadd.f32 %v4913_v10, %v12573_v59  ;;  %v9404_v18 = vor.u32 %v10090_v7, %v9401_v49  ;;  %v15293_v7 = vld [vmem:[#allocation61_spill] sm:$0xff] }
 0x809   : > { %v12861_v30 = vadd.f32 %v5177_v24, %v5089_v12  ;;  %v15292_v12 = vld [vmem:[#allocation33_spill] sm:$0xff]  ;;  %v15294_v24 = vld [vmem:[#allocation62_spill] sm:$0xff] }
 0x80a   : > { %v5002_v38 = vpop.f32.mrf.mxu3  ;;  %5639 = vmatpush.bf16.msrb.mxu3 %v9404_v18  ;;  %v9081_v39 = vld [vmem:[#allocation2 + $0x478] sm:$0xf0] }
 0x80b   : > { %v5003_v3 = vadd.f32 %v5002_v38, %v4914_v22 }
 0x80d   : > { %v6209_v59 = vmul.f32 0.2, %v5003_v3  ;;  %vm5953_vm0 = vcmp.ge.f32.partialorder %v5003_v3, 0.0 }
 0x80e   : > { %v5091_v33 = vpop.f32.mrf.mxu0 }
 0x80f   : > { %v5092_v9 = vadd.f32 %v5091_v33, %v12607_v46  ;;  %v5180_v57 = vpop.f32.mrf.mxu1  ;;  %v4915_v15 = vpop.f32.mrf.mxu2  ;;  %v12871_v22 = vsel %vm5953_vm0, %v5003_v3, %v6209_v59  ;;  %v10134_v3 = vld [vmem:[%s14313_s3 + $0x38] sm:$0xff] }
 0x810   : > { %v4916_v13 = vadd.f32 %v4915_v15, %v12587_v63  ;;  %15295 = vst [vmem:[#allocation56_spill] sm:$0xff] %v12871_v22  ;;  %7136 = vmatpush.bf16.msrb.mxu0 %v10134_v3  ;;  %v10082_v22 = vld [vmem:[#allocation2 + $0x69c] sm:$0xf] }
 0x811   : > { %v12865_v17 = vadd.f32 %v5180_v57, %v5092_v9  ;;  %5406 = vmatmul.bf16.gmra.mxu0 %v14833_v25 }
 0x812   : > { %v5004_v44 = vpop.f32.mrf.mxu3  ;;  %5495 = vmatmul.bf16.gmra.mxu1 %v15292_v12 }
 0x813   : > { %v5005_v21 = vadd.f32 %v5004_v44, %v4916_v13 }
 0x814   : > { %5233 = vmatmul.bf16.gmra.mxu2 %v15293_v7 }
 0x815   : > { %vm5961_vm3 = vcmp.ge.f32.partialorder %v5005_v21, 0.0  ;;  %v6217_v49 = vmul.f32 0.2, %v5005_v21 }
 0x816   : > { %v5093_v10 = vpop.f32.mrf.mxu0 }
 0x817   : > { %5322 = vmatmul.bf16.gmra.mxu3 %v15294_v24  ;;  %v12873_v63 = vsel %vm5961_vm3, %v5005_v21, %v6217_v49  ;;  %v5094_v38 = vadd.f32 %v5093_v10, %v12607_v46  ;;  %v5182_v18 = vpop.f32.mrf.mxu1  ;;  %v4918_v25 = vpop.f32.mrf.mxu2 }
 0x818   : > { %15296 = vst [vmem:[#allocation120_spill] sm:$0xff] %v12873_v63  ;;  %v4919_v33 = vadd.f32 %v4918_v25, %v12591_v50  ;;  %v10018_v25 = vld [vmem:[#allocation2 + $0x49c] sm:$0xf] }
 0x819   : > { %v12879_v57 = vadd.f32 %v5182_v18, %v5094_v38  ;;  %v9369_v63 = vld [vmem:[#allocation2 + $0x6b8] sm:$0xf0] }
 0x81a   : > { %v5007_v9 = vpop.f32.mrf.mxu3 }
 0x81b   : > { %v5008_v15 = vadd.f32 %v5007_v9, %v4919_v33  ;;  %v9113_v33 = vld [vmem:[#allocation2 + $0x4b8] sm:$0xf0] }
 0x81d   : > { %v6225_v50 = vmul.f32 0.2, %v5008_v15  ;;  %vm5969_vm4 = vcmp.ge.f32.partialorder %v5008_v15, 0.0 }
 0x81e   : > { %v5096_v13 = vpop.f32.mrf.mxu0 }
 0x81f   : > { %v5097_v59 = vadd.f32 %v5096_v13, %v12607_v46  ;;  %v5185_v21 = vpop.f32.mrf.mxu1  ;;  %v4920_v12 = vpop.f32.mrf.mxu2  ;;  %v12892_v3 = vsel %vm5969_vm4, %v5008_v15, %v6225_v50  ;;  %v9372_v15 = vor.u32 %v10082_v22, %v9369_v63  ;;  %v10255_v50 = vld [vmem:[#allocation4 + $0x4] sm:$0xff] }
 0x820   : > { %v4921_v49 = vadd.f32 %v4920_v12, %v12605_v51  ;;  %v9116_v51 = vor.u32 %v10018_v25, %v9113_v33  ;;  %15297 = vst [vmem:[#allocation28_spill] sm:$0xff] %v12892_v3  ;;  %v15303_v63 = vld [vmem:[#allocation66_spill] sm:$0xff] }
 0x821   : > { %v12886_v44 = vadd.f32 %v5185_v21, %v5097_v59  ;;  %5411 = vmatmul.bf16.gmra.mxu0 %v14838_v55  ;;  %5640 = vmatpush.bf16.msrb.mxu3 %v9372_v15 }
 0x822   : > { %v5009_v10 = vpop.f32.mrf.mxu3  ;;  %5500 = vmatmul.bf16.gmra.mxu1 %v14839_v19  ;;  %5551 = vmatpush.bf16.msrb.mxu2 %v9116_v51  ;;  %v15299_v19 = vld [vmem:[#allocation86_spill] sm:$0xff] }
 0x823   : > { %v5010_v38 = vadd.f32 %v5009_v10, %v4921_v49  ;;  %v15301_v51 = vld [vmem:[#allocation10_spill] sm:$0xff] }
 0x824   : > { %5238 = vmatmul.bf16.gmra.mxu2 %v11012_v27 }
 0x825   : > { %vm5977_vm5 = vcmp.ge.f32.partialorder %v5010_v38, 0.0  ;;  %v6233_v18 = vmul.f32 0.2, %v5010_v38 }
 0x826   : > { %v5098_v9 = vpop.f32.mrf.mxu0 }
 0x827   : > { %5327 = vmatmul.bf16.gmra.mxu3 %v14927_v53  ;;  %v12894_v13 = vsel %vm5977_vm5, %v5010_v38, %v6233_v18  ;;  %v5099_v55 = vadd.f32 %v5098_v9, %v12607_v46  ;;  %v5187_v59 = vpop.f32.mrf.mxu1  ;;  %v5199_v21 = vpop.f32.mrf.mxu2  ;;  %v12902_v38 = vperm.slane %v10255_v50, 7 }
 0x828   : > { %15298 = vst [vmem:[#allocation29_spill] sm:$0xff] %v12894_v13  ;;  %v5200_v12 = vadd.f32 %v5199_v21, %v12611_v61 }
 0x829   : > { %v12900_v10 = vadd.f32 %v5187_v59, %v5099_v55 }
 0x82a   : > { %v5288_v49 = vpop.f32.mrf.mxu3 }
 0x82b   : > { %v5289_v25 = vadd.f32 %v5288_v49, %v5200_v12  ;;  %v15302_v12 = vld [vmem:[#allocation11_spill] sm:$0xff] }
 0x82c   : > { %v15304_v49 = vld [vmem:[#allocation67_spill] sm:$0xff] }
 0x82d   : > { %v5986_v55 = vmul.f32 0.2, %v5289_v25  ;;  %vm5730_vm6 = vcmp.ge.f32.partialorder %v5289_v25, 0.0 }
 0x82e   : > { %v5377_v46 = vpop.f32.mrf.mxu0 }
 0x82f   : > { %v5378_v18 = vadd.f32 %v5377_v46, %v12902_v38  ;;  %v5466_v33 = vpop.f32.mrf.mxu1  ;;  %v5201_v9 = vpop.f32.mrf.mxu2  ;;  %v12912_v15 = vsel %vm5730_vm6, %v5289_v25, %v5986_v55  ;;  %v10133_v25 = vld [vmem:[%s14313_s3 + $0x30] sm:$0xff] }
 0x830   : > { %v5202_v3 = vadd.f32 %v5201_v9, %v15299_v19  ;;  %15305 = vst [vmem:[#allocation61_spill] sm:$0xff] %v12912_v15  ;;  %v15307_v9 = vld [vmem:[#allocation162_spill] sm:$0xff]  ;;  %7137 = vmatpush.bf16.msrb.mxu0 %v10133_v25 }
 0x831   : > { %v12906_v21 = vadd.f32 %v5466_v33, %v5378_v18  ;;  %5416 = vmatmul.bf16.gmra.mxu0 %v15301_v51  ;;  %v15309_v15 = vld [vmem:[#allocation194_spill] sm:$0xff] }
 0x832   : > { %v5290_v61 = vpop.f32.mrf.mxu3  ;;  %5505 = vmatmul.bf16.gmra.mxu1 %v15302_v12  ;;  %v15314_v25 = vld [vmem:[#allocation70_spill] sm:$0xff] }
 0x833   : > { %15300 = vst [vmem:[#allocation33_spill] sm:$0xff] %v12906_v21  ;;  %v5291_v59 = vadd.f32 %v5290_v61, %v5202_v3 }
 0x834   : > { %5243 = vmatmul.bf16.gmra.mxu2 %v15303_v63  ;;  %v10074_v63 = vld [vmem:[#allocation2 + $0x65c] sm:$0xf] }
 0x835   : > { %vm5738_vm7 = vcmp.ge.f32.partialorder %v5291_v59, 0.0  ;;  %v5994_v22 = vmul.f32 0.2, %v5291_v59 }
 0x836   : > { %v5379_v19 = vpop.f32.mrf.mxu0 }
 0x837   : > { %5332 = vmatmul.bf16.gmra.mxu3 %v15304_v49  ;;  %v12914_v50 = vsel %vm5738_vm7, %v5291_v59, %v5994_v22  ;;  %v5380_v18 = vadd.f32 %v5379_v19, %v12902_v38  ;;  %v5468_v3 = vpop.f32.mrf.mxu1  ;;  %v5204_v33 = vpop.f32.mrf.mxu2 }
 0x838   : > { %15306 = vst [vmem:[#allocation62_spill] sm:$0xff] %v12914_v50  ;;  %v5205_v61 = vadd.f32 %v5204_v33, %v15307_v9  ;;  %v15311_v33 = vld [vmem:[#allocation14_spill] sm:$0xff]  ;;  %v15312_v9 = vld [vmem:[#allocation15_spill] sm:$0xff] }
 0x839   : > { %v12920_v12 = vadd.f32 %v5468_v3, %v5380_v18 }
 0x83a   : > { %v5293_v51 = vpop.f32.mrf.mxu3 }
 0x83b   : > { %15308 = vst [vmem:[#allocation86_spill] sm:$0xff] %v12920_v12  ;;  %v5294_v13 = vadd.f32 %v5293_v51, %v5205_v61  ;;  %v15313_v51 = vld [vmem:[#allocation69_spill] sm:$0xff] }
 0x83c   : > { %v9337_v12 = vld [vmem:[#allocation2 + $0x678] sm:$0xf0] }
 0x83d   : > { %v6002_v18 = vmul.f32 0.2, %v5294_v13  ;;  %vm5746_vm8 = vcmp.ge.f32.partialorder %v5294_v13, 0.0 }
 0x83e   : > { %v5382_v55 = vpop.f32.mrf.mxu0 }
 0x83f   : > { %v5383_v59 = vadd.f32 %v5382_v55, %v12902_v38  ;;  %v5471_v22 = vpop.f32.mrf.mxu1  ;;  %v5206_v46 = vpop.f32.mrf.mxu2  ;;  %v10010_v55 = vld [vmem:[#allocation2 + $0x45c] sm:$0xf] }
 0x840   : > { %v5207_v19 = vadd.f32 %v5206_v46, %v15309_v15  ;;  %v9084_v15 = vor.u32 %v10010_v55, %v9081_v39  ;;  %v12933_v46 = vsel %vm5746_vm8, %v5294_v13, %v6002_v18  ;;  %v9340_v13 = vor.u32 %v10074_v63, %v9337_v12  ;;  %v15321_v63 = vld [vmem:[#allocation72_spill] sm:$0xff]  ;;  %v15322_v12 = vld [vmem:[#allocation73_spill] sm:$0xff] }
 0x841   : > { %v12927_v58 = vadd.f32 %v5471_v22, %v5383_v59  ;;  %5421 = vmatmul.bf16.gmra.mxu0 %v15311_v33  ;;  %15315 = vst [vmem:[#allocation11_spill] sm:$0xff] %v12933_v46  ;;  %v15327_v46 = vld [vmem:[#allocation198_spill] sm:$0xff] }
 0x842   : > { %v5295_v50 = vpop.f32.mrf.mxu3  ;;  %5510 = vmatmul.bf16.gmra.mxu1 %v15312_v9  ;;  %v15317_v9 = vld [vmem:[#allocation225_spill] sm:$0xff]  ;;  %5552 = vmatpush.bf16.msrb.mxu2 %v9084_v15 }
 0x843   : > { %15310 = vst [vmem:[#allocation10_spill] sm:$0xff] %v12927_v58  ;;  %v5296_v3 = vadd.f32 %v5295_v50, %v5207_v19  ;;  %5641 = vmatpush.bf16.msrb.mxu3 %v9340_v13 }
 0x844   : > { %5248 = vmatmul.bf16.gmra.mxu2 %v15313_v51 }
 0x845   : > { %vm5754_vm9 = vcmp.ge.f32.partialorder %v5296_v3, 0.0  ;;  %v6010_v61 = vmul.f32 0.2, %v5296_v3 }
 0x846   : > { %v5384_v49 = vpop.f32.mrf.mxu0 }
 0x847   : > { %5337 = vmatmul.bf16.gmra.mxu3 %v15314_v25  ;;  %v12935_v59 = vsel %vm5754_vm9, %v5296_v3, %v6010_v61  ;;  %v5385_v22 = vadd.f32 %v5384_v49, %v12902_v38  ;;  %v5473_v50 = vpop.f32.mrf.mxu1  ;;  %v5209_v19 = vpop.f32.mrf.mxu2 }
 0x848   : > { %15316 = vst [vmem:[#allocation162_spill] sm:$0xff] %v12935_v59  ;;  %v5210_v58 = vadd.f32 %v5209_v19, %v15317_v9  ;;  %v15319_v19 = vld [vmem:[#allocation18_spill] sm:$0xff] }
 0x849   : > { %v12941_v25 = vadd.f32 %v5473_v50, %v5385_v22  ;;  %v15320_v50 = vld [vmem:[#allocation19_spill] sm:$0xff] }
 0x84a   : > { %v5298_v51 = vpop.f32.mrf.mxu3 }
 0x84b   : > { %v5299_v39 = vadd.f32 %v5298_v51, %v5210_v58 }
 0x84d   : > { %v6018_v15 = vmul.f32 0.2, %v5299_v39  ;;  %vm5762_vm10 = vcmp.ge.f32.partialorder %v5299_v39, 0.0 }
 0x84e   : > { %v5387_v18 = vpop.f32.mrf.mxu0 }
 0x84f   : > { %v5388_v3 = vadd.f32 %v5387_v18, %v12902_v38  ;;  %v5476_v49 = vpop.f32.mrf.mxu1  ;;  %v5211_v61 = vpop.f32.mrf.mxu2  ;;  %v12951_v9 = vsel %vm5762_vm10, %v5299_v39, %v6018_v15  ;;  %v10132_v39 = vld [vmem:[%s14313_s3 + $0x28] sm:$0xff] }
 0x850   : > { %v5212_v55 = vadd.f32 %v5211_v61, %v12661_v56  ;;  %15323 = vst [vmem:[#allocation14_spill] sm:$0xff] %v12951_v9  ;;  %7138 = vmatpush.bf16.msrb.mxu0 %v10132_v39  ;;  %v15332_v39 = vld [vmem:[#allocation76_spill] sm:$0xff]  ;;  %v9049_v9 = vld [vmem:[#allocation2 + $0x438] sm:$0xf0] }
 0x851   : > { %v12945_v33 = vadd.f32 %v5476_v49, %v5388_v3  ;;  %5426 = vmatmul.bf16.gmra.mxu0 %v15319_v19  ;;  %v15325_v49 = vld [vmem:[#allocation132_spill] sm:$0xff] }
 0x852   : > { %v5300_v21 = vpop.f32.mrf.mxu3  ;;  %5515 = vmatmul.bf16.gmra.mxu1 %v15320_v50 }
 0x853   : > { %15318 = vst [vmem:[#allocation194_spill] sm:$0xff] %v12945_v33  ;;  %v5301_v22 = vadd.f32 %v5300_v21, %v5212_v55 }
 0x854   : > { %5253 = vmatmul.bf16.gmra.mxu2 %v15321_v63  ;;  %v10066_v63 = vld [vmem:[#allocation2 + $0x61c] sm:$0xf] }
 0x855   : > { %vm5770_vm11 = vcmp.ge.f32.partialorder %v5301_v22, 0.0  ;;  %v6026_v58 = vmul.f32 0.2, %v5301_v22 }
 0x856   : > { %v5389_v51 = vpop.f32.mrf.mxu0 }
 0x857   : > { %5342 = vmatmul.bf16.gmra.mxu3 %v15322_v12  ;;  %v12953_v56 = vsel %vm5770_vm11, %v5301_v22, %v6026_v58  ;;  %v5390_v13 = vadd.f32 %v5389_v51, %v12902_v38  ;;  %v5478_v18 = vpop.f32.mrf.mxu1  ;;  %v5214_v3 = vpop.f32.mrf.mxu2 }
 0x858   : > { %15324 = vst [vmem:[#allocation15_spill] sm:$0xff] %v12953_v56  ;;  %v5215_v61 = vadd.f32 %v5214_v3, %v15325_v49  ;;  %v15329_v3 = vld [vmem:[#allocation22_spill] sm:$0xff]  ;;  %v15330_v49 = vld [vmem:[#allocation23_spill] sm:$0xff] }
 0x859   : > { %v12959_v19 = vadd.f32 %v5478_v18, %v5390_v13 }
 0x85a   : > { %v5303_v55 = vpop.f32.mrf.mxu3 }
 0x85b   : > { %15326 = vst [vmem:[#allocation225_spill] sm:$0xff] %v12959_v19  ;;  %v5304_v50 = vadd.f32 %v5303_v55, %v5215_v61  ;;  %v15331_v55 = vld [vmem:[#allocation75_spill] sm:$0xff]  ;;  %v9305_v19 = vld [vmem:[#allocation2 + $0x638] sm:$0xf0] }
 0x85d   : > { %v6034_v13 = vmul.f32 0.2, %v5304_v50  ;;  %vm5778_vm12 = vcmp.ge.f32.partialorder %v5304_v50, 0.0 }
 0x85e   : > { %v5392_v15 = vpop.f32.mrf.mxu0 }
 0x85f   : > { %v5393_v22 = vadd.f32 %v5392_v15, %v12902_v38  ;;  %v5481_v58 = vpop.f32.mrf.mxu1  ;;  %v5216_v51 = vpop.f32.mrf.mxu2  ;;  %v10002_v15 = vld [vmem:[#allocation2 + $0x41c] sm:$0xf] }
 0x860   : > { %v5217_v59 = vadd.f32 %v5216_v51, %v15327_v46  ;;  %v9052_v46 = vor.u32 %v10002_v15, %v9049_v9  ;;  %v12972_v51 = vsel %vm5778_vm12, %v5304_v50, %v6034_v13  ;;  %v9308_v50 = vor.u32 %v10066_v63, %v9305_v19  ;;  %v15337_v63 = vld [vmem:[#allocation27_spill] sm:$0xff] }
 0x861   : > { %v12966_v21 = vadd.f32 %v5481_v58, %v5393_v22  ;;  %5431 = vmatmul.bf16.gmra.mxu0 %v15329_v3  ;;  %15333 = vst [vmem:[#allocation19_spill] sm:$0xff] %v12972_v51 }
 0x862   : > { %v5305_v12 = vpop.f32.mrf.mxu3  ;;  %5520 = vmatmul.bf16.gmra.mxu1 %v15330_v49  ;;  %v15335_v49 = vld [vmem:[#allocation229_spill] sm:$0xff]  ;;  %5553 = vmatpush.bf16.msrb.mxu2 %v9052_v46 }
 0x863   : > { %15328 = vst [vmem:[#allocation18_spill] sm:$0xff] %v12966_v21  ;;  %v5306_v18 = vadd.f32 %v5305_v12, %v5217_v59  ;;  %5642 = vmatpush.bf16.msrb.mxu3 %v9308_v50  ;;  %v10142_v46 = vld [vmem:[%s14313_s3 + $0x78] sm:$0xff] }
 0x864   : > { %5258 = vmatmul.bf16.gmra.mxu2 %v15331_v55  ;;  %7225 = vmatpush.bf16.msrb.mxu1 %v10142_v46 }
 0x865   : > { %vm5786_vm13 = vcmp.ge.f32.partialorder %v5306_v18, 0.0  ;;  %v6042_v61 = vmul.f32 0.2, %v5306_v18 }
 0x866   : > { %v5394_v56 = vpop.f32.mrf.mxu0 }
 0x867   : > { %5347 = vmatmul.bf16.gmra.mxu3 %v15332_v39  ;;  %v12974_v22 = vsel %vm5786_vm13, %v5306_v18, %v6042_v61  ;;  %v5395_v58 = vadd.f32 %v5394_v56, %v12902_v38  ;;  %v5483_v59 = vpop.f32.mrf.mxu1  ;;  %v5219_v12 = vpop.f32.mrf.mxu2 }
 0x868   : > { %15334 = vst [vmem:[#allocation132_spill] sm:$0xff] %v12974_v22  ;;  %v5220_v21 = vadd.f32 %v5219_v12, %v15335_v49  ;;  %v15336_v12 = vld [vmem:[#allocation26_spill] sm:$0xff] }
 0x869   : > { %v12980_v39 = vadd.f32 %v5483_v59, %v5395_v58  ;;  %v10141_v59 = vld [vmem:[%s14313_s3 + $0x70] sm:$0xff] }
 0x86a   : > { %v5308_v55 = vpop.f32.mrf.mxu3  ;;  %7226 = vmatpush.bf16.msrb.mxu1 %v10141_v59 }
 0x86b   : > { %v5309_v9 = vadd.f32 %v5308_v55, %v5220_v21  ;;  %v15338_v55 = vld [vmem:[#allocation78_spill] sm:$0xff] }
 0x86d   : > { %v6050_v58 = vmul.f32 0.2, %v5309_v9  ;;  %vm5794_vm14 = vcmp.ge.f32.partialorder %v5309_v9, 0.0 }
 0x86e   : > { %v5397_v13 = vpop.f32.mrf.mxu0 }
 0x86f   : > { %v5398_v18 = vadd.f32 %v5397_v13, %v12902_v38  ;;  %v5486_v56 = vpop.f32.mrf.mxu1  ;;  %v5221_v61 = vpop.f32.mrf.mxu2  ;;  %v12996_v50 = vsel %vm5794_vm14, %v5309_v9, %v6050_v58  ;;  %v10140_v9 = vld [vmem:[%s14313_s3 + $0x68] sm:$0xff] }
 0x870   : > { %v5222_v15 = vadd.f32 %v5221_v61, %v12697_v28  ;;  %v15339_v28 = vld [vmem:[#allocation79_spill] sm:$0xff]  ;;  %15340 = vst [vmem:[#allocation198_spill] sm:$0xff] %v12996_v50  ;;  %7227 = vmatpush.bf16.msrb.mxu1 %v10140_v9  ;;  %v10130_v9 = vld [vmem:[%s14313_s3 + $0x18] sm:$0xff] }
 0x871   : > { %v12984_v3 = vadd.f32 %v5486_v56, %v5398_v18  ;;  %5436 = vmatmul.bf16.gmra.mxu0 %v15336_v12  ;;  %v15344_v50 = vld [vmem:[#allocation31_spill] sm:$0xff] }
 0x872   : > { %v5310_v33 = vpop.f32.mrf.mxu3  ;;  %5525 = vmatmul.bf16.gmra.mxu1 %v15337_v63 }
 0x873   : > { %v5311_v21 = vadd.f32 %v5310_v33, %v5222_v15  ;;  %v15342_v15 = vld [vmem:[#allocation137_spill] sm:$0xff] }
 0x874   : > { %5263 = vmatmul.bf16.gmra.mxu2 %v15338_v55 }
 0x875   : > { %vm5802_vm15 = vcmp.ge.f32.partialorder %v5311_v21, 0.0  ;;  %v6058_v19 = vmul.f32 0.2, %v5311_v21 }
 0x876   : > { %v5399_v49 = vpop.f32.mrf.mxu0 }
 0x877   : > { %5352 = vmatmul.bf16.gmra.mxu3 %v15339_v28  ;;  %v12998_v13 = vsel %vm5802_vm15, %v5311_v21, %v6058_v19  ;;  %v5400_v33 = vadd.f32 %v5399_v49, %v12902_v38  ;;  %v5488_v18 = vpop.f32.mrf.mxu1  ;;  %v5224_v56 = vpop.f32.mrf.mxu2  ;;  %v10131_v21 = vld [vmem:[%s14313_s3 + $0x20] sm:$0xff] }
 0x878   : > { %15341 = vst [vmem:[#allocation22_spill] sm:$0xff] %v12998_v13  ;;  %v5225_v12 = vadd.f32 %v5224_v56, %v15342_v15  ;;  %v10139_v19 = vld [vmem:[%s14313_s3 + $0x60] sm:$0xff]  ;;  %7139 = vmatpush.bf16.msrb.mxu0 %v10131_v21  ;;  %v10138_v21 = vld [vmem:[%s14313_s3 + $0x58] sm:$0xff] }
 0x879   : > { %v13004_v63 = vadd.f32 %v5488_v18, %v5400_v33  ;;  %7228 = vmatpush.bf16.msrb.mxu1 %v10139_v19  ;;  %v15345_v19 = vld [vmem:[#allocation81_spill] sm:$0xff] }
 0x87a   : > { %v5313_v46 = vpop.f32.mrf.mxu3 }
 0x87b   : > { %v5314_v58 = vadd.f32 %v5313_v46, %v5225_v12  ;;  %v15343_v46 = vld [vmem:[#allocation30_spill] sm:$0xff] }
 0x87c   : > { %7140 = vmatpush.bf16.msrb.mxu0 %v10130_v9 }
 0x87d   : > { %v6066_v61 = vmul.f32 0.2, %v5314_v58  ;;  %vm5810_vm1 = vcmp.ge.f32.partialorder %v5314_v58, 0.0  ;;  %7229 = vmatpush.bf16.msrb.mxu1 %v10138_v21 }
 0x87e   : > { %v5402_v59 = vpop.f32.mrf.mxu0 }
 0x87f   : > { %v5403_v49 = vadd.f32 %v5402_v59, %v12902_v38  ;;  %v5491_v33 = vpop.f32.mrf.mxu1  ;;  %v5226_v18 = vpop.f32.mrf.mxu2 }
 0x880   : > { %v5227_v56 = vadd.f32 %v5226_v18, %v12717_v47  ;;  %v10129_v18 = vld [vmem:[%s14313_s3 + $0x10] sm:$0xff] }
 0x881   : > { %v13017_v12 = vadd.f32 %v5491_v33, %v5403_v49  ;;  %5441 = vmatmul.bf16.gmra.mxu0 %v15343_v46  ;;  %v15346_v49 = vld [vmem:[#allocation82_spill] sm:$0xff]  ;;  %v10150_v33 = vld [vmem:[%s14313_s3 + $0xb8] sm:$0xff] }
 0x882   : > { %v5315_v15 = vpop.f32.mrf.mxu3  ;;  %5530 = vmatmul.bf16.gmra.mxu1 %v15344_v50  ;;  %v10137_v50 = vld [vmem:[%s14313_s3 + $0x50] sm:$0xff]  ;;  %7314 = vmatpush.bf16.msra.mxu2 %v10150_v33 }
 0x883   : > { %v5316_v59 = vadd.f32 %v5315_v15, %v5227_v56  ;;  %v13038_v15 = vsel %vm5810_vm1, %v5314_v58, %v6066_v61  ;;  %7141 = vmatpush.bf16.msrb.mxu0 %v10129_v18  ;;  %7230 = vmatpush.bf16.msrb.mxu1 %v10137_v50  ;;  %v10158_v61 = vld [vmem:[%s14313_s3 + $0xf8] sm:$0xff]  ;;  %v10128_v58 = vld [vmem:[%s14313_s3 + $0x8] sm:$0xff] }
 0x884   : > { %5268 = vmatmul.bf16.gmra.mxu2 %v15345_v19  ;;  %15347 = vst [vmem:[#allocation23_spill] sm:$0xff] %v13038_v15  ;;  %7403 = vmatpush.bf16.msra.mxu3 %v10158_v61 }
 0x885   : > { %vm5818_vm2 = vcmp.ge.f32.partialorder %v5316_v59, 0.0  ;;  %v6074_v47 = vmul.f32 0.2, %v5316_v59 }
 0x886   : > { %v5404_v56 = vpop.f32.mrf.mxu0 }
 0x887   : > { %5357 = vmatmul.bf16.gmra.mxu3 %v15346_v49  ;;  %v13040_v46 = vsel %vm5818_vm2, %v5316_v59, %v6074_v47  ;;  %v5405_v9 = vadd.f32 %v5404_v56, %v12902_v38  ;;  %v5493_v21 = vpop.f32.mrf.mxu1  ;;  %v5229_v13 = vpop.f32.mrf.mxu2  ;;  %v10136_v59 = vld [vmem:[%s14313_s3 + $0x48] sm:$0xff]  ;;  %7142 = vmatpush.bf16.msrb.mxu0 %v10128_v58 }
 0x888   : > { %v5230_v22 = vadd.f32 %v5229_v13, %v12721_v40  ;;  %7231 = vmatpush.bf16.msrb.mxu1 %v10136_v59  ;;  %v10127_v40 = vld [vmem:[%s14313_s3] sm:$0xff] }
 0x889   : > { %v13046_v19 = vadd.f32 %v5493_v21, %v5405_v9  ;;  %v10135_v13 = vld [vmem:[%s14313_s3 + $0x40] sm:$0xff] }
 0x88a   : > { %v5318_v49 = vpop.f32.mrf.mxu3 }
 0x88b   : > { %v5319_v47 = vadd.f32 %v5318_v49, %v5230_v22  ;;  %7143 = vmatpush.bf16.msrb.mxu0 %v10127_v40 }
 0x88c   : > { %7232 = vmatpush.bf16.msrb.mxu1 %v10135_v13 }
 0x88d   : > { %v6082_v21 = vmul.f32 0.2, %v5319_v47  ;;  %vm5826_vm0 = vcmp.ge.f32.partialorder %v5319_v47, 0.0 }
 0x88e   : > { %v5407_v33 = vpop.f32.mrf.mxu0 }
 0x88f   : > { %v5408_v18 = vadd.f32 %v5407_v33, %v12902_v38  ;;  %v5496_v50 = vpop.f32.mrf.mxu1  ;;  %v5231_v56 = vpop.f32.mrf.mxu2  ;;  %v13071_v40 = vsel %vm5826_vm0, %v5319_v47, %v6082_v21 }
 0x890   : > { %v5232_v9 = vadd.f32 %v5231_v56, %v12735_v43  ;;  %15348 = vst [vmem:[#allocation229_spill] sm:$0xff] %v13071_v40  ;;  %v15477_v40 = vld [vmem:[#allocation124_spill] sm:$0xff] }
 0x891   : > { %v13065_v49 = vadd.f32 %v5496_v50, %v5408_v18  ;;  %5446 = vmatmul.bf16.gmra.mxu0 %v10807_v2 }
 0x892   : > { %v5320_v22 = vpop.f32.mrf.mxu3  ;;  %5535 = vmatmul.bf16.gmra.mxu1 %v14788_v1 }
 0x893   : > { %v5321_v61 = vadd.f32 %v5320_v22, %v5232_v9 }
 0x894   : > { %5273 = vmatmul.bf16.gmra.mxu2 %v11138_v8 }
 0x895   : > { %vm5834_vm3 = vcmp.ge.f32.partialorder %v5321_v61, 0.0  ;;  %v6090_v58 = vmul.f32 0.2, %v5321_v61 }
 0x896   : > { %v5409_v59 = vpop.f32.mrf.mxu0 }
 0x897   : > { %5362 = vmatmul.bf16.gmra.mxu3 %v11141_v20  ;;  %v13073_v43 = vsel %vm5834_vm3, %v5321_v61, %v6090_v58  ;;  %v5410_v13 = vadd.f32 %v5409_v59, %v12902_v38  ;;  %v5498_v33 = vpop.f32.mrf.mxu1  ;;  %v5234_v2 = vpop.f32.mrf.mxu2 }
 0x898   : > { %15349 = vst [vmem:[#allocation26_spill] sm:$0xff] %v13073_v43  ;;  %v5235_v1 = vadd.f32 %v5234_v2, %v12739_v60  ;;  %v15478_v43 = vld [vmem:[#allocation123_spill] sm:$0xff] }
 0x899   : > { %v13079_v56 = vadd.f32 %v5498_v33, %v5410_v13 }
 0x89a   : > { %v5323_v50 = vpop.f32.mrf.mxu3 }
 0x89b   : > { %v5324_v9 = vadd.f32 %v5323_v50, %v5235_v1  ;;  %v15356_v1 = vld [vmem:[#allocation36_spill] sm:$0xff] }
 0x89d   : > { %v6098_v15 = vmul.f32 0.2, %v5324_v9  ;;  %vm5842_vm4 = vcmp.ge.f32.partialorder %v5324_v9, 0.0 }
 0x89e   : > { %v5412_v22 = vpop.f32.mrf.mxu0 }
 0x89f   : > { %v5413_v51 = vadd.f32 %v5412_v22, %v12902_v38  ;;  %v5501_v47 = vpop.f32.mrf.mxu1  ;;  %v5236_v21 = vpop.f32.mrf.mxu2 }
 0x8a0   : > { %v5237_v61 = vadd.f32 %v5236_v21, %v12753_v14  ;;  %v10149_v14 = vld [vmem:[%s14313_s3 + $0xb0] sm:$0xff] }
 0x8a1   : > { %v13083_v59 = vadd.f32 %v5501_v47, %v5413_v51  ;;  %5451 = vmatmul.bf16.gmra.mxu0 %v14792_v34  ;;  %v13092_v51 = vsel %vm5842_vm4, %v5324_v9, %v6098_v15  ;;  %7315 = vmatpush.bf16.msra.mxu2 %v10149_v14  ;;  %v10157_v15 = vld [vmem:[%s14313_s3 + $0xf0] sm:$0xff] }
 0x8a2   : > { %v5325_v58 = vpop.f32.mrf.mxu3  ;;  %5540 = vmatmul.bf16.gmra.mxu1 %v14878_v42  ;;  %15350 = vst [vmem:[#allocation27_spill] sm:$0xff] %v13092_v51  ;;  %7404 = vmatpush.bf16.msra.mxu3 %v10157_v15  ;;  %v15353_v14 = vld [vmem:[#allocation84_spill] sm:$0xff] }
 0x8a3   : > { %v5326_v18 = vadd.f32 %v5325_v58, %v5237_v61  ;;  %v15458_v51 = vld [vmem:[#allocation76_spill] sm:$0xff] }
 0x8a4   : > { %5554 = vmatmul.bf16.vlgmr.msrb.gmra.mxu2 %v14879_v5 }
 0x8a5   : > { %vm5850_vm5 = vcmp.ge.f32.partialorder %v5326_v18, 0.0  ;;  %v6106_v60 = vmul.f32 0.2, %v5326_v18 }
 0x8a6   : > { %v5414_v13 = vpop.f32.mrf.mxu0 }
 0x8a7   : > { %5643 = vmatmul.bf16.vlgmr.msrb.gmra.mxu3 %v14971_v0  ;;  %v13094_v33 = vsel %vm5850_vm5, %v5326_v18, %v6106_v60  ;;  %v5415_v34 = vadd.f32 %v5414_v13, %v12902_v38  ;;  %v5503_v2 = vpop.f32.mrf.mxu1  ;;  %v5239_v42 = vpop.f32.mrf.mxu2 }
 0x8a8   : > { %15351 = vst [vmem:[#allocation78_spill] sm:$0xff] %v13094_v33  ;;  %v5240_v5 = vadd.f32 %v5239_v42, %v12757_v36  ;;  %v15352_v36 = vld [vmem:[#allocation85_spill] sm:$0xff] }
 0x8a9   : > { %v13100_v50 = vadd.f32 %v5503_v2, %v5415_v34  ;;  %v15354_v13 = vpack.c.bf16 %v15352_v36, %v15353_v14  ;;  %v15355_v42 = vld [vmem:[#allocation97_spill] sm:$0xff] }
 0x8aa   : > { %v5328_v0 = vpop.f32.mrf.mxu3 }
 0x8ab   : > { %v5329_v9 = vadd.f32 %v5328_v0, %v5240_v5  ;;  %v15357_v5 = vpack.c.bf16 %v15355_v42, %v15356_v1 }
 0x8ad   : > { %v6114_v34 = vmul.f32 0.2, %v5329_v9  ;;  %vm5858_vm6 = vcmp.ge.f32.partialorder %v5329_v9, 0.0 }
 0x8ae   : > { %v5417_v18 = vpop.f32.mrf.mxu0 }
 0x8af   : > { %v5418_v22 = vadd.f32 %v5417_v18, %v12902_v38  ;;  %v5506_v47 = vpop.f32.mrf.mxu1  ;;  %v5241_v21 = vpop.f32.mrf.mxu2  ;;  %v13117_v15 = vsel %vm5858_vm6, %v5329_v9, %v6114_v34 }
 0x8b0   : > { %v5242_v61 = vadd.f32 %v5241_v21, %v12771_v23  ;;  %15358 = vst [vmem:[#allocation79_spill] sm:$0xff] %v13117_v15  ;;  %v15455_v15 = vld [vmem:[#allocation117_spill] sm:$0xff] }
 0x8b1   : > { %v13107_v60 = vadd.f32 %v5506_v47, %v5418_v22  ;;  %7144 = vmatmul.bf16.vlgmr.msrb.gmra.mxu0 %v15354_v13 }
 0x8b2   : > { %v5330_v58 = vpop.f32.mrf.mxu3  ;;  %7233 = vmatmul.bf16.vlgmr.msrb.gmra.mxu1 %v15357_v5  ;;  %v15360_v5 = vld [vmem:[#allocation88_spill] sm:$0xff] }
 0x8b3   : > { %v5331_v2 = vadd.f32 %v5330_v58, %v5242_v61 }
 0x8b4   : > { %5559 = vmatmul.bf16.gmra.mxu2 %v15068_v11 }
 0x8b5   : > { %vm5866_vm7 = vcmp.ge.f32.partialorder %v5331_v2, 0.0  ;;  %v6122_v0 = vmul.f32 0.2, %v5331_v2 }
 0x8b6   : > { %v5419_v23 = vpop.f32.mrf.mxu0 }
 0x8b7   : > { %5648 = vmatmul.bf16.gmra.mxu3 %v15069_v4  ;;  %v13119_v18 = vsel %vm5866_vm7, %v5331_v2, %v6122_v0  ;;  %v5420_v22 = vadd.f32 %v5419_v23, %v12902_v38  ;;  %v5508_v47 = vpop.f32.mrf.mxu1  ;;  %v5244_v21 = vpop.f32.mrf.mxu2  ;;  %v15361_v0 = vld [vmem:[#allocation87_spill] sm:$0xff] }
 0x8b8   : > { %15359 = vst [vmem:[#allocation137_spill] sm:$0xff] %v13119_v18  ;;  %v5245_v61 = vadd.f32 %v5244_v21, %v12775_v16  ;;  %v15362_v23 = vpack.c.bf16 %v15360_v5, %v15361_v0  ;;  %v15363_v21 = vld [vmem:[#allocation99_spill] sm:$0xff] }
 0x8b9   : > { %v13125_v36 = vadd.f32 %v5508_v47, %v5420_v22  ;;  %v15364_v22 = vld [vmem:[#allocation98_spill] sm:$0xff] }
 0x8ba   : > { %v5333_v58 = vpop.f32.mrf.mxu3  ;;  %v15365_v47 = vpack.c.bf16 %v15363_v21, %v15364_v22 }
 0x8bb   : > { %v5334_v11 = vadd.f32 %v5333_v58, %v5245_v61 }
 0x8bd   : > { %v6130_v1 = vmul.f32 0.2, %v5334_v11  ;;  %vm5874_vm8 = vcmp.ge.f32.partialorder %v5334_v11, 0.0 }
 0x8be   : > { %v5422_v14 = vpop.f32.mrf.mxu0 }
 0x8bf   : > { %v5423_v4 = vadd.f32 %v5422_v14, %v12902_v38  ;;  %v5511_v9 = vpop.f32.mrf.mxu1  ;;  %v5246_v13 = vpop.f32.mrf.mxu2  ;;  %v13142_v14 = vsel %vm5874_vm8, %v5334_v11, %v6130_v1  ;;  %v10156_v1 = vld [vmem:[%s14313_s3 + $0xe8] sm:$0xff] }
 0x8c0   : > { %v5247_v34 = vadd.f32 %v5246_v13, %v12789_v37  ;;  %v10148_v37 = vld [vmem:[%s14313_s3 + $0xa8] sm:$0xff]  ;;  %15366 = vst [vmem:[#allocation30_spill] sm:$0xff] %v13142_v14  ;;  %7405 = vmatpush.bf16.msra.mxu3 %v10156_v1 }
 0x8c1   : > { %v13129_v42 = vadd.f32 %v5511_v9, %v5423_v4  ;;  %7149 = vmatmul.bf16.gmra.mxu0 %v15362_v23  ;;  %7316 = vmatpush.bf16.msra.mxu2 %v10148_v37  ;;  %v15369_v37 = vld [vmem:[#allocation43_spill] sm:$0xff] }
 0x8c2   : > { %v5335_v2 = vpop.f32.mrf.mxu3  ;;  %7238 = vmatmul.bf16.gmra.mxu1 %v15365_v47  ;;  %v15445_v14 = vld [vmem:[#allocation115_spill] sm:$0xff] }
 0x8c3   : > { %v5336_v16 = vadd.f32 %v5335_v2, %v5247_v34  ;;  %v15372_v2 = vld [vmem:[#allocation100_spill] sm:$0xff] }
 0x8c4   : > { %5564 = vmatmul.bf16.gmra.mxu2 %v15263_v54 }
 0x8c5   : > { %vm5882_vm9 = vcmp.ge.f32.partialorder %v5336_v16, 0.0  ;;  %v6138_v61 = vmul.f32 0.2, %v5336_v16 }
 0x8c6   : > { %v5424_v58 = vpop.f32.mrf.mxu0 }
 0x8c7   : > { %5653 = vmatmul.bf16.gmra.mxu3 %v15264_v31  ;;  %v13144_v4 = vsel %vm5882_vm9, %v5336_v16, %v6138_v61  ;;  %v5425_v9 = vadd.f32 %v5424_v58, %v12902_v38  ;;  %v5513_v13 = vpop.f32.mrf.mxu1  ;;  %v5249_v34 = vpop.f32.mrf.mxu2 }
 0x8c8   : > { %15367 = vst [vmem:[#allocation31_spill] sm:$0xff] %v13144_v4  ;;  %v5250_v54 = vadd.f32 %v5249_v34, %v12793_v45  ;;  %v15368_v45 = vld [vmem:[#allocation46_spill] sm:$0xff]  ;;  %v15371_v34 = vld [vmem:[#allocation101_spill] sm:$0xff]  ;;  %v15446_v4 = vld [vmem:[#allocation16_spill] sm:$0xff] }
 0x8c9   : > { %v13150_v5 = vadd.f32 %v5513_v13, %v5425_v9  ;;  %v15370_v58 = vpack.c.bf16 %v15368_v45, %v15369_v37 }
 0x8ca   : > { %v5338_v31 = vpop.f32.mrf.mxu3 }
 0x8cb   : > { %v5339_v11 = vadd.f32 %v5338_v31, %v5250_v54  ;;  %v15373_v54 = vpack.c.bf16 %v15371_v34, %v15372_v2 }
 0x8cd   : > { %v6146_v9 = vmul.f32 0.2, %v5339_v11  ;;  %vm5890_vm10 = vcmp.ge.f32.partialorder %v5339_v11, 0.0 }
 0x8ce   : > { %v5427_v0 = vpop.f32.mrf.mxu0 }
 0x8cf   : > { %v5428_v23 = vadd.f32 %v5427_v0, %v12902_v38  ;;  %v5516_v16 = vpop.f32.mrf.mxu1  ;;  %v5251_v21 = vpop.f32.mrf.mxu2  ;;  %v13167_v1 = vsel %vm5890_vm10, %v5339_v11, %v6146_v9 }
 0x8d0   : > { %v5252_v22 = vadd.f32 %v5251_v21, %v12807_v6  ;;  %15374 = vst [vmem:[#allocation85_spill] sm:$0xff] %v13167_v1 }
 0x8d1   : > { %v13157_v61 = vadd.f32 %v5516_v16, %v5428_v23  ;;  %7154 = vmatmul.bf16.gmra.mxu0 %v15370_v58 }
 0x8d2   : > { %v5340_v47 = vpop.f32.mrf.mxu3  ;;  %7243 = vmatmul.bf16.gmra.mxu1 %v15373_v54  ;;  %v15376_v54 = vld [vmem:[#allocation50_spill] sm:$0xff] }
 0x8d3   : > { %v5341_v13 = vadd.f32 %v5340_v47, %v5252_v22 }
 0x8d4   : > { %5569 = vmatmul.bf16.gmra.mxu2 %v15268_v35 }
 0x8d5   : > { %vm5898_vm11 = vcmp.ge.f32.partialorder %v5341_v13, 0.0  ;;  %v6154_v31 = vmul.f32 0.2, %v5341_v13 }
 0x8d6   : > { %v5429_v6 = vpop.f32.mrf.mxu0 }
 0x8d7   : > { %5658 = vmatmul.bf16.gmra.mxu3 %v15269_v41  ;;  %v13169_v0 = vsel %vm5898_vm11, %v5341_v13, %v6154_v31  ;;  %v5430_v23 = vadd.f32 %v5429_v6, %v12902_v38  ;;  %v5518_v16 = vpop.f32.mrf.mxu1  ;;  %v5254_v21 = vpop.f32.mrf.mxu2  ;;  %v15377_v31 = vld [vmem:[#allocation47_spill] sm:$0xff] }
 0x8d8   : > { %15375 = vst [vmem:[#allocation84_spill] sm:$0xff] %v13169_v0  ;;  %v5255_v22 = vadd.f32 %v5254_v21, %v12811_v48  ;;  %v15378_v6 = vpack.c.bf16 %v15376_v54, %v15377_v31  ;;  %v15379_v21 = vld [vmem:[#allocation103_spill] sm:$0xff]  ;;  %v15388_v54 = vld [vmem:[#allocation106_spill] sm:$0xff] }
 0x8d9   : > { %v13175_v45 = vadd.f32 %v5518_v16, %v5430_v23  ;;  %v15380_v23 = vld [vmem:[#allocation102_spill] sm:$0xff] }
 0x8da   : > { %v5343_v47 = vpop.f32.mrf.mxu3  ;;  %v15381_v16 = vpack.c.bf16 %v15379_v21, %v15380_v23 }
 0x8db   : > { %v5344_v35 = vadd.f32 %v5343_v47, %v5255_v22  ;;  %v15382_v47 = vld [vmem:[#allocation53_spill] sm:$0xff] }
 0x8dd   : > { %v6162_v2 = vmul.f32 0.2, %v5344_v35  ;;  %vm5906_vm12 = vcmp.ge.f32.partialorder %v5344_v35, 0.0 }
 0x8de   : > { %v5432_v37 = vpop.f32.mrf.mxu0 }
 0x8df   : > { %v5433_v41 = vadd.f32 %v5432_v37, %v12902_v38  ;;  %v5521_v11 = vpop.f32.mrf.mxu1  ;;  %v5256_v58 = vpop.f32.mrf.mxu2 }
 0x8e0   : > { %v5257_v9 = vadd.f32 %v5256_v58, %v12825_v32  ;;  %v10147_v32 = vld [vmem:[%s14313_s3 + $0xa0] sm:$0xff] }
 0x8e1   : > { %v13179_v34 = vadd.f32 %v5521_v11, %v5433_v41  ;;  %7159 = vmatmul.bf16.gmra.mxu0 %v15378_v6  ;;  %v13192_v41 = vsel %vm5906_vm12, %v5344_v35, %v6162_v2  ;;  %7317 = vmatpush.bf16.msra.mxu2 %v10147_v32  ;;  %v10155_v2 = vld [vmem:[%s14313_s3 + $0xe0] sm:$0xff] }
 0x8e2   : > { %v5345_v13 = vpop.f32.mrf.mxu3  ;;  %7248 = vmatmul.bf16.gmra.mxu1 %v15381_v16  ;;  %15383 = vst [vmem:[#allocation97_spill] sm:$0xff] %v13192_v41  ;;  %7406 = vmatpush.bf16.msra.mxu3 %v10155_v2  ;;  %v15389_v41 = vld [vmem:[#allocation105_spill] sm:$0xff] }
 0x8e3   : > { %v5346_v48 = vadd.f32 %v5345_v13, %v5257_v9  ;;  %v15391_v2 = vld [vmem:[#allocation57_spill] sm:$0xff] }
 0x8e4   : > { %5574 = vmatmul.bf16.gmra.mxu2 %v15275_v62 }
 0x8e5   : > { %vm5914_vm13 = vcmp.ge.f32.partialorder %v5346_v48, 0.0  ;;  %v6170_v22 = vmul.f32 0.2, %v5346_v48 }
 0x8e6   : > { %v5434_v37 = vpop.f32.mrf.mxu0 }
 0x8e7   : > { %5663 = vmatmul.bf16.gmra.mxu3 %v15382_v47  ;;  %v13194_v11 = vsel %vm5914_vm13, %v5346_v48, %v6170_v22  ;;  %v5435_v58 = vadd.f32 %v5434_v37, %v12902_v38  ;;  %v5523_v9 = vpop.f32.mrf.mxu1  ;;  %v5259_v13 = vpop.f32.mrf.mxu2  ;;  %v15386_v37 = vld [vmem:[#allocation51_spill] sm:$0xff] }
 0x8e8   : > { %15384 = vst [vmem:[#allocation36_spill] sm:$0xff] %v13194_v11  ;;  %v5260_v62 = vadd.f32 %v5259_v13, %v12829_v29  ;;  %v15385_v29 = vld [vmem:[#allocation54_spill] sm:$0xff]  ;;  %v15396_v11 = vld [vmem:[#allocation55_spill] sm:$0xff] }
 0x8e9   : > { %v13200_v6 = vadd.f32 %v5523_v9, %v5435_v58  ;;  %v15387_v58 = vpack.c.bf16 %v15385_v29, %v15386_v37 }
 0x8ea   : > { %v5348_v31 = vpop.f32.mrf.mxu3 }
 0x8eb   : > { %v5349_v35 = vadd.f32 %v5348_v31, %v5260_v62  ;;  %v15390_v62 = vpack.c.bf16 %v15388_v54, %v15389_v41  ;;  %v15394_v54 = vld [vmem:[#allocation21_spill] sm:$0xff] }
 0x8ed   : > { %v6178_v9 = vmul.f32 0.2, %v5349_v35  ;;  %vm5922_vm14 = vcmp.ge.f32.partialorder %v5349_v35, 0.0 }
 0x8ee   : > { %v5437_v48 = vpop.f32.mrf.mxu0 }
 0x8ef   : > { %v5438_v21 = vadd.f32 %v5437_v48, %v12902_v38  ;;  %v5526_v23 = vpop.f32.mrf.mxu1  ;;  %v5261_v16 = vpop.f32.mrf.mxu2  ;;  %v13217_v48 = vsel %vm5922_vm14, %v5349_v35, %v6178_v9 }
 0x8f0   : > { %v5262_v22 = vadd.f32 %v5261_v16, %v12843_v26  ;;  %15392 = vst [vmem:[#allocation88_spill] sm:$0xff] %v13217_v48  ;;  %v15439_v48 = vld [vmem:[#allocation70_spill] sm:$0xff] }
 0x8f1   : > { %v13207_v32 = vadd.f32 %v5526_v23, %v5438_v21  ;;  %7164 = vmatmul.bf16.gmra.mxu0 %v15387_v58 }
 0x8f2   : > { %v5350_v47 = vpop.f32.mrf.mxu3  ;;  %7253 = vmatmul.bf16.gmra.mxu1 %v15390_v62 }
 0x8f3   : > { %v5351_v13 = vadd.f32 %v5350_v47, %v5262_v22 }
 0x8f4   : > { %5579 = vmatmul.bf16.gmra.mxu2 %v15280_v52 }
 0x8f5   : > { %vm5930_vm15 = vcmp.ge.f32.partialorder %v5351_v13, 0.0  ;;  %v6186_v31 = vmul.f32 0.2, %v5351_v13 }
 0x8f6   : > { %v5439_v26 = vpop.f32.mrf.mxu0 }
 0x8f7   : > { %5668 = vmatmul.bf16.gmra.mxu3 %v15391_v2  ;;  %v13219_v21 = vsel %vm5930_vm15, %v5351_v13, %v6186_v31  ;;  %v5440_v23 = vadd.f32 %v5439_v26, %v12902_v38  ;;  %v5528_v16 = vpop.f32.mrf.mxu1  ;;  %v5264_v22 = vpop.f32.mrf.mxu2  ;;  %v15395_v26 = vld [vmem:[#allocation89_spill] sm:$0xff] }
 0x8f8   : > { %15393 = vst [vmem:[#allocation87_spill] sm:$0xff] %v13219_v21  ;;  %v5265_v47 = vadd.f32 %v5264_v22, %v15394_v54  ;;  %v15397_v1 = vpack.c.bf16 %v15395_v26, %v15396_v11  ;;  %v15398_v54 = vld [vmem:[#allocation108_spill] sm:$0xff] }
 0x8f9   : > { %v13225_v37 = vadd.f32 %v5528_v16, %v5440_v23  ;;  %v15399_v23 = vld [vmem:[#allocation107_spill] sm:$0xff] }
 0x8fa   : > { %v5353_v29 = vpop.f32.mrf.mxu3  ;;  %v15400_v16 = vpack.c.bf16 %v15398_v54, %v15399_v23 }
 0x8fb   : > { %v5354_v52 = vadd.f32 %v5353_v29, %v5265_v47  ;;  %v15401_v29 = vld [vmem:[#allocation58_spill] sm:$0xff] }
 0x8fd   : > { %v6194_v41 = vmul.f32 0.2, %v5354_v52  ;;  %vm5938_vm1 = vcmp.ge.f32.partialorder %v5354_v52, 0.0 }
 0x8fe   : > { %v5442_v58 = vpop.f32.mrf.mxu0 }
 0x8ff   : > { %v5443_v62 = vadd.f32 %v5442_v58, %v12902_v38  ;;  %v5531_v35 = vpop.f32.mrf.mxu1  ;;  %v5266_v9 = vpop.f32.mrf.mxu2  ;;  %v15402_v58 = vld [vmem:[#allocation59_spill] sm:$0xff]  ;;  %v13242_v11 = vsel %vm5938_vm1, %v5354_v52, %v6194_v41  ;;  %v10154_v41 = vld [vmem:[%s14313_s3 + $0xd8] sm:$0xff] }
 0x900   : > { %v5267_v13 = vadd.f32 %v5266_v9, %v12861_v30  ;;  %v10146_v30 = vld [vmem:[%s14313_s3 + $0x98] sm:$0xff]  ;;  %15403 = vst [vmem:[#allocation99_spill] sm:$0xff] %v13242_v11  ;;  %7407 = vmatpush.bf16.msra.mxu3 %v10154_v41  ;;  %v15408_v11 = vld [vmem:[#allocation110_spill] sm:$0xff] }
 0x901   : > { %v13229_v2 = vadd.f32 %v5531_v35, %v5443_v62  ;;  %7169 = vmatmul.bf16.gmra.mxu0 %v15397_v1  ;;  %7318 = vmatpush.bf16.msra.mxu2 %v10146_v30 }
 0x902   : > { %v5355_v31 = vpop.f32.mrf.mxu3  ;;  %7258 = vmatmul.bf16.gmra.mxu1 %v15400_v16 }
 0x903   : > { %v5356_v22 = vadd.f32 %v5355_v31, %v5267_v13 }
 0x904   : > { %5584 = vmatmul.bf16.gmra.mxu2 %v15401_v29 }
 0x905   : > { %vm5946_vm2 = vcmp.ge.f32.partialorder %v5356_v22, 0.0  ;;  %v6202_v47 = vmul.f32 0.2, %v5356_v22 }
 0x906   : > { %v5444_v62 = vpop.f32.mrf.mxu0 }
 0x907   : > { %5673 = vmatmul.bf16.gmra.mxu3 %v15402_v58  ;;  %v13244_v1 = vsel %vm5946_vm2, %v5356_v22, %v6202_v47  ;;  %v5445_v35 = vadd.f32 %v5444_v62, %v12902_v38  ;;  %v5533_v9 = vpop.f32.mrf.mxu1  ;;  %v5269_v13 = vpop.f32.mrf.mxu2 }
 0x908   : > { %15404 = vst [vmem:[#allocation98_spill] sm:$0xff] %v13244_v1  ;;  %v5270_v26 = vadd.f32 %v5269_v13, %v12865_v17  ;;  %v15405_v17 = vld [vmem:[#allocation90_spill] sm:$0xff]  ;;  %v15409_v1 = vld [vmem:[#allocation109_spill] sm:$0xff] }
 0x909   : > { %v13250_v23 = vadd.f32 %v5533_v9, %v5445_v35  ;;  %v15406_v13 = vld [vmem:[#allocation34_spill] sm:$0xff] }
 0x90a   : > { %v5358_v54 = vpop.f32.mrf.mxu3  ;;  %v15407_v35 = vpack.c.bf16 %v15405_v17, %v15406_v13 }
 0x90b   : > { %v5359_v52 = vadd.f32 %v5358_v54, %v5270_v26  ;;  %v15410_v26 = vpack.c.bf16 %v15408_v11, %v15409_v1 }
 0x90d   : > { %v6210_v9 = vmul.f32 0.2, %v5359_v52  ;;  %vm5954_vm0 = vcmp.ge.f32.partialorder %v5359_v52, 0.0 }
 0x90e   : > { %v5447_v22 = vpop.f32.mrf.mxu0 }
 0x90f   : > { %v5448_v16 = vadd.f32 %v5447_v22, %v12902_v38  ;;  %v5536_v47 = vpop.f32.mrf.mxu1  ;;  %v5271_v29 = vpop.f32.mrf.mxu2  ;;  %v13267_v41 = vsel %vm5954_vm0, %v5359_v52, %v6210_v9 }
 0x910   : > { %v5272_v58 = vadd.f32 %v5271_v29, %v12879_v57  ;;  %15411 = vst [vmem:[#allocation46_spill] sm:$0xff] %v13267_v41  ;;  %v15436_v41 = vld [vmem:[#allocation113_spill] sm:$0xff] }
 0x911   : > { %v13257_v62 = vadd.f32 %v5536_v47, %v5448_v16  ;;  %7174 = vmatmul.bf16.gmra.mxu0 %v15407_v35 }
 0x912   : > { %v5360_v30 = vpop.f32.mrf.mxu3  ;;  %7263 = vmatmul.bf16.gmra.mxu1 %v15410_v26 }
 0x913   : > { %v5361_v31 = vadd.f32 %v5360_v30, %v5272_v58 }
 0x914   : > { %5589 = vmatmul.bf16.gmra.mxu2 %v15293_v7 }
 0x915   : > { %vm5962_vm3 = vcmp.ge.f32.partialorder %v5361_v31, 0.0  ;;  %v6218_v54 = vmul.f32 0.2, %v5361_v31 }
 0x916   : > { %v5449_v57 = vpop.f32.mrf.mxu0 }
 0x917   : > { %5678 = vmatmul.bf16.gmra.mxu3 %v15294_v24  ;;  %v13269_v22 = vsel %vm5962_vm3, %v5361_v31, %v6218_v54  ;;  %v5450_v16 = vadd.f32 %v5449_v57, %v12902_v38  ;;  %v5538_v47 = vpop.f32.mrf.mxu1  ;;  %v5274_v29 = vpop.f32.mrf.mxu2  ;;  %v10166_v24 = vld [vmem:[%s14313_s3 + $0x138] sm:$0xff]  ;;  %v15414_v54 = vld [vmem:[#allocation60_spill] sm:$0xff] }
 0x918   : > { %15412 = vst [vmem:[#allocation43_spill] sm:$0xff] %v13269_v22  ;;  %v5275_v1 = vadd.f32 %v5274_v29, %v12886_v44  ;;  %7492 = vmatpush.bf16.msra.mxu0 %v10166_v24  ;;  %v15413_v44 = vld [vmem:[#allocation37_spill] sm:$0xff]  ;;  %v15416_v29 = vld [vmem:[#allocation39_spill] sm:$0xff] }
 0x919   : > { %v13275_v30 = vadd.f32 %v5538_v47, %v5450_v16  ;;  %v15415_v57 = vpack.c.bf16 %v15413_v44, %v15414_v54 }
 0x91a   : > { %v5363_v58 = vpop.f32.mrf.mxu3 }
 0x91b   : > { %v5364_v7 = vadd.f32 %v5363_v58, %v5275_v1  ;;  %v15417_v1 = vld [vmem:[#allocation38_spill] sm:$0xff] }
 0x91c   : > { %v15418_v58 = vpack.c.bf16 %v15416_v29, %v15417_v1 }
 0x91d   : > { %v6226_v16 = vmul.f32 0.2, %v5364_v7  ;;  %vm5970_vm4 = vcmp.ge.f32.partialorder %v5364_v7, 0.0 }
 0x91e   : > { %v5452_v52 = vpop.f32.mrf.mxu0 }
 0x91f   : > { %v5453_v31 = vadd.f32 %v5452_v52, %v12902_v38  ;;  %v5541_v17 = vpop.f32.mrf.mxu1  ;;  %v5276_v13 = vpop.f32.mrf.mxu2 }
 0x920   : > { %v5277_v35 = vadd.f32 %v5276_v13, %v12900_v10  ;;  %v10145_v10 = vld [vmem:[%s14313_s3 + $0x90] sm:$0xff] }
 0x921   : > { %v13282_v26 = vadd.f32 %v5541_v17, %v5453_v31  ;;  %7179 = vmatmul.bf16.gmra.mxu0 %v15415_v57  ;;  %v13295_v31 = vsel %vm5970_vm4, %v5364_v7, %v6226_v16  ;;  %7319 = vmatpush.bf16.msra.mxu2 %v10145_v10  ;;  %v10153_v7 = vld [vmem:[%s14313_s3 + $0xd0] sm:$0xff] }
 0x922   : > { %v5365_v9 = vpop.f32.mrf.mxu3  ;;  %7268 = vmatmul.bf16.gmra.mxu1 %v15418_v58  ;;  %15419 = vst [vmem:[#allocation101_spill] sm:$0xff] %v13295_v31  ;;  %7408 = vmatpush.bf16.msra.mxu3 %v10153_v7 }
 0x923   : > { %v5366_v47 = vadd.f32 %v5365_v9, %v5277_v35 }
 0x924   : > { %5594 = vmatmul.bf16.gmra.mxu2 %v11012_v27  ;;  %v15421_v27 = vld [vmem:[#allocation33_spill] sm:$0xff] }
 0x925   : > { %vm5978_vm5 = vcmp.ge.f32.partialorder %v5366_v47, 0.0  ;;  %v6234_v24 = vmul.f32 0.2, %v5366_v47 }
 0x926   : > { %v5454_v52 = vpop.f32.mrf.mxu0 }
 0x927   : > { %5683 = vmatmul.bf16.gmra.mxu3 %v14927_v53  ;;  %v13297_v17 = vsel %vm5978_vm5, %v5366_v47, %v6234_v24  ;;  %v5455_v13 = vadd.f32 %v5454_v52, %v12902_v38  ;;  %v5543_v35 = vpop.f32.mrf.mxu1  ;;  %v5555_v9 = vpop.f32.mrf.mxu2  ;;  %v13308_v47 = vld [vmem:[#allocation4 + $0xc] ss:$0 sm:$0xff]  ;;  %v15422_v24 = vld [vmem:[#allocation86_spill] sm:$0xff] }
 0x928   : > { %15420 = vst [vmem:[#allocation100_spill] sm:$0xff] %v13297_v17  ;;  %v5556_v54 = vadd.f32 %v5555_v9, %v15421_v27  ;;  %v15430_v17 = vld [vmem:[#allocation67_spill] sm:$0xff] }
 0x929   : > { %v13303_v57 = vadd.f32 %v5543_v35, %v5455_v13  ;;  %v15423_v13 = vld [vmem:[#allocation91_spill] sm:$0xff] }
 0x92a   : > { %v5644_v53 = vpop.f32.mrf.mxu3  ;;  %v15424_v35 = vld [vmem:[#allocation63_spill] sm:$0xff] }
 0x92b   : > { %v5645_v16 = vadd.f32 %v5644_v53, %v5556_v54  ;;  %v15425_v27 = vpack.c.bf16 %v15423_v13, %v15424_v35  ;;  %v15426_v54 = vld [vmem:[#allocation111_spill] sm:$0xff]  ;;  %v15427_v53 = vld [vmem:[#allocation8_spill] sm:$0xff] }
 0x92c   : > { %v15428_v31 = vpack.c.bf16 %v15426_v54, %v15427_v53 }
 0x92d   : > { %v5987_v44 = vmul.f32 0.2, %v5645_v16  ;;  %vm5731_vm6 = vcmp.ge.f32.partialorder %v5645_v16, 0.0 }
 0x92e   : > { %v7145_v38 = vpop.f32.mrf.mxu0 }
 0x92f   : > { %v7146_v29 = vadd.f32 %v13308_v47, %v7145_v38  ;;  %v7234_v1 = vpop.f32.mrf.mxu1  ;;  %v5557_v58 = vpop.f32.mrf.mxu2  ;;  %v15429_v38 = vld [vmem:[#allocation66_spill] sm:$0xff] }
 0x930   : > { %v5558_v10 = vadd.f32 %v5557_v58, %v15422_v24  ;;  %v13322_v58 = vsel %vm5731_vm6, %v5645_v16, %v5987_v44 }
 0x931   : > { %v13312_v9 = vadd.f32 %v7234_v1, %v7146_v29  ;;  %7184 = vmatmul.bf16.gmra.mxu0 %v15425_v27 }
 0x932   : > { %v5646_v52 = vpop.f32.mrf.mxu3  ;;  %7273 = vmatmul.bf16.gmra.mxu1 %v15428_v31  ;;  %v15431_v31 = vld [vmem:[#allocation10_spill] sm:$0xff] }
 0x933   : > { %v5647_v11 = vadd.f32 %v5646_v52, %v5558_v10 }
 0x934   : > { %5599 = vmatmul.bf16.gmra.mxu2 %v15429_v38 }
 0x935   : > { %vm5739_vm7 = vcmp.ge.f32.partialorder %v5647_v11, 0.0  ;;  %v5995_v7 = vmul.f32 0.2, %v5647_v11 }
 0x936   : > { %v7147_v1 = vpop.f32.mrf.mxu0 }
 0x937   : > { %5688 = vmatmul.bf16.gmra.mxu3 %v15430_v17  ;;  %v13324_v29 = vsel %vm5739_vm7, %v5647_v11, %v5995_v7  ;;  %v7148_v10 = vadd.f32 %v13308_v47, %v7147_v1  ;;  %v7236_v52 = vpop.f32.mrf.mxu1  ;;  %v5560_v13 = vpop.f32.mrf.mxu2  ;;  %v10165_v17 = vld [vmem:[%s14313_s3 + $0x130] sm:$0xff] }
 0x938   : > { %v5561_v35 = vadd.f32 %v5560_v13, %v15431_v31  ;;  %7493 = vmatpush.bf16.msra.mxu0 %v10165_v17  ;;  %v15432_v13 = vld [vmem:[#allocation92_spill] sm:$0xff]  ;;  %v15433_v31 = vld [vmem:[#allocation65_spill] sm:$0xff] }
 0x939   : > { %v13330_v54 = vadd.f32 %v7236_v52, %v7148_v10  ;;  %v15434_v10 = vpack.c.bf16 %v15432_v13, %v15433_v31  ;;  %v15440_v13 = vld [vmem:[#allocation194_spill] sm:$0xff] }
 0x93a   : > { %v5649_v27 = vpop.f32.mrf.mxu3 }
 0x93b   : > { %v5650_v53 = vadd.f32 %v5649_v27, %v5561_v35  ;;  %v15435_v27 = vld [vmem:[#allocation114_spill] sm:$0xff] }
 0x93c   : > { %v15437_v22 = vpack.c.bf16 %v15435_v27, %v15436_v41 }
 0x93d   : > { %v6003_v52 = vmul.f32 0.2, %v5650_v53  ;;  %vm5747_vm8 = vcmp.ge.f32.partialorder %v5650_v53, 0.0 }
 0x93e   : > { %v7150_v11 = vpop.f32.mrf.mxu0 }
 0x93f   : > { %v7151_v44 = vadd.f32 %v13308_v47, %v7150_v11  ;;  %v7239_v16 = vpop.f32.mrf.mxu1  ;;  %v5562_v7 = vpop.f32.mrf.mxu2  ;;  %v15438_v11 = vld [vmem:[#allocation69_spill] sm:$0xff] }
 0x940   : > { %v5563_v38 = vadd.f32 %v5562_v7, %v12941_v25  ;;  %v10144_v25 = vld [vmem:[%s14313_s3 + $0x88] sm:$0xff] }
 0x941   : > { %v13337_v24 = vadd.f32 %v7239_v16, %v7151_v44  ;;  %7189 = vmatmul.bf16.gmra.mxu0 %v15434_v10  ;;  %v13350_v16 = vsel %vm5747_vm8, %v5650_v53, %v6003_v52  ;;  %7320 = vmatpush.bf16.msra.mxu2 %v10144_v25  ;;  %v10152_v53 = vld [vmem:[%s14313_s3 + $0xc8] sm:$0xff]  ;;  %v15441_v25 = vld [vmem:[#allocation225_spill] sm:$0xff] }
 0x942   : > { %v5651_v1 = vpop.f32.mrf.mxu3  ;;  %7278 = vmatmul.bf16.gmra.mxu1 %v15437_v22  ;;  %7409 = vmatpush.bf16.msra.mxu3 %v10152_v53  ;;  %v15448_v53 = vld [vmem:[#allocation72_spill] sm:$0xff] }
 0x943   : > { %v5652_v35 = vadd.f32 %v5651_v1, %v5563_v38 }
 0x944   : > { %5604 = vmatmul.bf16.gmra.mxu2 %v15438_v11 }
 0x945   : > { %vm5755_vm9 = vcmp.ge.f32.partialorder %v5652_v35, 0.0  ;;  %v6011_v17 = vmul.f32 0.2, %v5652_v35 }
 0x946   : > { %v7152_v44 = vpop.f32.mrf.mxu0 }
 0x947   : > { %5693 = vmatmul.bf16.gmra.mxu3 %v15439_v48  ;;  %v13352_v7 = vsel %vm5755_vm9, %v5652_v35, %v6011_v17  ;;  %v7153_v38 = vadd.f32 %v13308_v47, %v7152_v44  ;;  %v7241_v41 = vpop.f32.mrf.mxu1  ;;  %v5565_v22 = vpop.f32.mrf.mxu2 }
 0x948   : > { %v5566_v31 = vadd.f32 %v5565_v22, %v15440_v13  ;;  %v15442_v22 = vld [vmem:[#allocation93_spill] sm:$0xff]  ;;  %v15443_v13 = vld [vmem:[#allocation68_spill] sm:$0xff] }
 0x949   : > { %v13358_v10 = vadd.f32 %v7241_v41, %v7153_v38  ;;  %v15444_v38 = vpack.c.bf16 %v15442_v22, %v15443_v13 }
 0x94a   : > { %v5654_v48 = vpop.f32.mrf.mxu3 }
 0x94b   : > { %v5655_v52 = vadd.f32 %v5654_v48, %v5566_v31  ;;  %v15447_v31 = vpack.c.bf16 %v15445_v14, %v15446_v4  ;;  %v15450_v4 = vld [vmem:[#allocation18_spill] sm:$0xff] }
 0x94d   : > { %v6019_v41 = vmul.f32 0.2, %v5655_v52  ;;  %vm5763_vm10 = vcmp.ge.f32.partialorder %v5655_v52, 0.0 }
 0x94e   : > { %v7155_v35 = vpop.f32.mrf.mxu0 }
 0x94f   : > { %v7156_v27 = vadd.f32 %v13308_v47, %v7155_v35  ;;  %v7244_v17 = vpop.f32.mrf.mxu1  ;;  %v5567_v11 = vpop.f32.mrf.mxu2  ;;  %v15449_v35 = vld [vmem:[#allocation73_spill] sm:$0xff] }
 0x950   : > { %v5568_v44 = vadd.f32 %v5567_v11, %v15441_v25 }
 0x951   : > { %v13365_v1 = vadd.f32 %v7244_v17, %v7156_v27  ;;  %7194 = vmatmul.bf16.gmra.mxu0 %v15444_v38  ;;  %v13375_v27 = vsel %vm5763_vm10, %v5655_v52, %v6019_v41  ;;  %v10164_v52 = vld [vmem:[%s14313_s3 + $0x128] sm:$0xff] }
 0x952   : > { %v5656_v21 = vpop.f32.mrf.mxu3  ;;  %7283 = vmatmul.bf16.gmra.mxu1 %v15447_v31  ;;  %7494 = vmatpush.bf16.msra.mxu0 %v10164_v52 }
 0x953   : > { %v5657_v0 = vadd.f32 %v5656_v21, %v5568_v44 }
 0x954   : > { %5609 = vmatmul.bf16.gmra.mxu2 %v15448_v53 }
 0x955   : > { %vm5771_vm11 = vcmp.ge.f32.partialorder %v5657_v0, 0.0  ;;  %v6027_v48 = vmul.f32 0.2, %v5657_v0 }
 0x956   : > { %v7157_v11 = vpop.f32.mrf.mxu0 }
 0x957   : > { %5698 = vmatmul.bf16.gmra.mxu3 %v15449_v35  ;;  %v13377_v17 = vsel %vm5771_vm11, %v5657_v0, %v6027_v48  ;;  %v7158_v25 = vadd.f32 %v13308_v47, %v7157_v11  ;;  %v7246_v22 = vpop.f32.mrf.mxu1  ;;  %v5570_v21 = vpop.f32.mrf.mxu2 }
 0x958   : > { %v5571_v44 = vadd.f32 %v5570_v21, %v15450_v4  ;;  %v15451_v21 = vld [vmem:[#allocation94_spill] sm:$0xff]  ;;  %v15452_v4 = vld [vmem:[#allocation71_spill] sm:$0xff] }
 0x959   : > { %v13383_v38 = vadd.f32 %v7246_v22, %v7158_v25  ;;  %v15453_v25 = vpack.c.bf16 %v15451_v21, %v15452_v4 }
 0x95a   : > { %v5659_v13 = vpop.f32.mrf.mxu3 }
 0x95b   : > { %v5660_v31 = vadd.f32 %v5659_v13, %v5571_v44  ;;  %v15454_v13 = vld [vmem:[#allocation118_spill] sm:$0xff] }
 0x95c   : > { %v15456_v18 = vpack.c.bf16 %v15454_v13, %v15455_v15 }
 0x95d   : > { %v6035_v22 = vmul.f32 0.2, %v5660_v31  ;;  %vm5779_vm12 = vcmp.ge.f32.partialorder %v5660_v31, 0.0 }
 0x95e   : > { %v7160_v41 = vpop.f32.mrf.mxu0 }
 0x95f   : > { %v7161_v0 = vadd.f32 %v13308_v47, %v7160_v41  ;;  %v7249_v48 = vpop.f32.mrf.mxu1  ;;  %v5572_v53 = vpop.f32.mrf.mxu2  ;;  %v15457_v41 = vld [vmem:[#allocation75_spill] sm:$0xff] }
 0x960   : > { %v5573_v35 = vadd.f32 %v5572_v53, %v12980_v39  ;;  %v10143_v39 = vld [vmem:[%s14313_s3 + $0x80] sm:$0xff] }
 0x961   : > { %v13390_v14 = vadd.f32 %v7249_v48, %v7161_v0  ;;  %7199 = vmatmul.bf16.gmra.mxu0 %v15453_v25  ;;  %v13403_v48 = vsel %vm5779_vm12, %v5660_v31, %v6035_v22  ;;  %7321 = vmatpush.bf16.msra.mxu2 %v10143_v39  ;;  %v10151_v31 = vld [vmem:[%s14313_s3 + $0xc0] sm:$0xff] }
 0x962   : > { %v5661_v11 = vpop.f32.mrf.mxu3  ;;  %7288 = vmatmul.bf16.gmra.mxu1 %v15456_v18  ;;  %7410 = vmatpush.bf16.msra.mxu3 %v10151_v31  ;;  %v15462_v31 = vld [vmem:[#allocation119_spill] sm:$0xff] }
 0x963   : > { %v5662_v44 = vadd.f32 %v5661_v11, %v5573_v35  ;;  %v15463_v11 = vld [vmem:[#allocation24_spill] sm:$0xff] }
 0x964   : > { %5614 = vmatmul.bf16.gmra.mxu2 %v15457_v41 }
 0x965   : > { %vm5787_vm13 = vcmp.ge.f32.partialorder %v5662_v44, 0.0  ;;  %v6043_v52 = vmul.f32 0.2, %v5662_v44 }
 0x966   : > { %v7162_v0 = vpop.f32.mrf.mxu0 }
 0x967   : > { %5703 = vmatmul.bf16.gmra.mxu3 %v15458_v51  ;;  %v13405_v53 = vsel %vm5787_vm13, %v5662_v44, %v6043_v52  ;;  %v7163_v35 = vadd.f32 %v13308_v47, %v7162_v0  ;;  %v7251_v15 = vpop.f32.mrf.mxu1  ;;  %v5575_v18 = vpop.f32.mrf.mxu2 }
 0x968   : > { %v5576_v21 = vadd.f32 %v5575_v18, %v12984_v3  ;;  %v15459_v3 = vld [vmem:[#allocation95_spill] sm:$0xff]  ;;  %v15460_v18 = vld [vmem:[#allocation74_spill] sm:$0xff] }
 0x969   : > { %v13411_v4 = vadd.f32 %v7251_v15, %v7163_v35  ;;  %v15461_v35 = vpack.c.bf16 %v15459_v3, %v15460_v18  ;;  %v10174_v15 = vld [vmem:[%s14313_s3 + $0x178] sm:$0xff] }
 0x96a   : > { %v5664_v51 = vpop.f32.mrf.mxu3  ;;  %7581 = vmatpush.bf16.msra.mxu1 %v10174_v15  ;;  %v15469_v18 = vld [vmem:[#allocation121_spill] sm:$0xff] }
 0x96b   : > { %v5665_v25 = vadd.f32 %v5664_v51, %v5576_v21 }
 0x96d   : > { %v6051_v21 = vmul.f32 0.2, %v5665_v25  ;;  %vm5795_vm14 = vcmp.ge.f32.partialorder %v5665_v25, 0.0 }
 0x96e   : > { %v7165_v22 = vpop.f32.mrf.mxu0 }
 0x96f   : > { %v7166_v44 = vadd.f32 %v13308_v47, %v7165_v22  ;;  %v7254_v13 = vpop.f32.mrf.mxu1  ;;  %v5577_v52 = vpop.f32.mrf.mxu2  ;;  %v15464_v22 = vpack.c.bf16 %v15462_v31, %v15463_v11 }
 0x970   : > { %v5578_v41 = vadd.f32 %v5577_v52, %v13004_v63  ;;  %v13434_v52 = vsel %vm5795_vm14, %v5665_v25, %v6051_v21  ;;  %v10172_v25 = vld [vmem:[%s14313_s3 + $0x168] sm:$0xff]  ;;  %v10163_v21 = vld [vmem:[%s14313_s3 + $0x120] sm:$0xff] }
 0x971   : > { %v13418_v0 = vadd.f32 %v7254_v13, %v7166_v44  ;;  %7204 = vmatmul.bf16.gmra.mxu0 %v15461_v35  ;;  %v10173_v44 = vld [vmem:[%s14313_s3 + $0x170] sm:$0xff] }
 0x972   : > { %v5666_v39 = vpop.f32.mrf.mxu3  ;;  %7293 = vmatmul.bf16.gmra.mxu1 %v15464_v22  ;;  %7495 = vmatpush.bf16.msra.mxu0 %v10163_v21 }
 0x973   : > { %v5667_v51 = vadd.f32 %v5666_v39, %v5578_v41  ;;  %7582 = vmatpush.bf16.msra.mxu1 %v10173_v44 }
 0x974   : > { %5619 = vmatmul.bf16.gmra.mxu2 %v15338_v55 }
 0x975   : > { %vm5803_vm15 = vcmp.ge.f32.partialorder %v5667_v51, 0.0  ;;  %v6059_v63 = vmul.f32 0.2, %v5667_v51 }
 0x976   : > { %v7167_v13 = vpop.f32.mrf.mxu0 }
 0x977   : > { %5708 = vmatmul.bf16.gmra.mxu3 %v15339_v28  ;;  %v13436_v41 = vsel %vm5803_vm15, %v5667_v51, %v6059_v63  ;;  %v7168_v11 = vadd.f32 %v13308_v47, %v7167_v13  ;;  %v7256_v39 = vpop.f32.mrf.mxu1  ;;  %v5580_v3 = vpop.f32.mrf.mxu2  ;;  %7583 = vmatpush.bf16.msra.mxu1 %v10172_v25  ;;  %v10171_v51 = vld [vmem:[%s14313_s3 + $0x160] sm:$0xff]  ;;  %v10170_v25 = vld [vmem:[%s14313_s3 + $0x158] sm:$0xff] }
 0x978   : > { %v5581_v55 = vadd.f32 %v5580_v3, %v13017_v12  ;;  %v15466_v3 = vld [vmem:[#allocation77_spill] sm:$0xff] }
 0x979   : > { %v13442_v35 = vadd.f32 %v7256_v39, %v7168_v11  ;;  %v15465_v39 = vld [vmem:[#allocation96_spill] sm:$0xff] }
 0x97a   : > { %v5669_v28 = vpop.f32.mrf.mxu3 }
 0x97b   : > { %v5670_v15 = vadd.f32 %v5669_v28, %v5581_v55  ;;  %7584 = vmatpush.bf16.msra.mxu1 %v10171_v51  ;;  %v15467_v55 = vpack.c.bf16 %v15465_v39, %v15466_v3  ;;  %v10162_v28 = vld [vmem:[%s14313_s3 + $0x118] sm:$0xff]  ;;  %v15468_v51 = vld [vmem:[#allocation122_spill] sm:$0xff] }
 0x97c   : > { %7496 = vmatpush.bf16.msra.mxu0 %v10162_v28  ;;  %v10182_v39 = vld [vmem:[%s14313_s3 + $0x1b8] sm:$0xff] }
 0x97d   : > { %v6067_v21 = vmul.f32 0.2, %v5670_v15  ;;  %vm5811_vm1 = vcmp.ge.f32.partialorder %v5670_v15, 0.0  ;;  %7670 = vmatpush.bf16.msrb.mxu2 %v10182_v39  ;;  %v10167_v39 = vld [vmem:[%s14313_s3 + $0x140] sm:$0xff] }
 0x97e   : > { %v7170_v31 = vpop.f32.mrf.mxu0 }
 0x97f   : > { %v7171_v12 = vadd.f32 %v13308_v47, %v7170_v31  ;;  %v7259_v22 = vpop.f32.mrf.mxu1  ;;  %v5582_v63 = vpop.f32.mrf.mxu2  ;;  %7585 = vmatpush.bf16.msra.mxu1 %v10170_v25  ;;  %v13480_v3 = vsel %vm5811_vm1, %v5670_v15, %v6067_v21  ;;  %v10190_v15 = vld [vmem:[%s14313_s3 + $0x1f8] sm:$0xff]  ;;  %v10160_v21 = vld [vmem:[%s14313_s3 + $0x108] sm:$0xff] }
 0x980   : > { %v5583_v44 = vadd.f32 %v5582_v63, %v13046_v19  ;;  %v15470_v19 = vpack.c.bf16 %v15468_v51, %v15469_v18  ;;  %v15472_v63 = vld [vmem:[#allocation82_spill] sm:$0xff]  ;;  %v10169_v18 = vld [vmem:[%s14313_s3 + $0x150] sm:$0xff]  ;;  %15473 = vst [vmem:[#allocation50_spill] sm:$0xff] %v13480_v3  ;;  %7759 = vmatpush.bf16.msrb.mxu3 %v10190_v15  ;;  %v15479_v3 = vpack.c.bf16 %v15477_v40, %v15478_v43 }
 0x981   : > { %v13455_v11 = vadd.f32 %v7259_v22, %v7171_v12  ;;  %7209 = vmatmul.bf16.gmra.mxu0 %v15467_v55  ;;  %v15471_v22 = vld [vmem:[#allocation81_spill] sm:$0xff]  ;;  %v15475_v15 = vld [vmem:[#allocation80_spill] sm:$0xff] }
 0x982   : > { %v5671_v13 = vpop.f32.mrf.mxu3  ;;  %7298 = vmatmul.bf16.gmra.mxu1 %v15470_v19 }
 0x983   : > { %v5672_v31 = vadd.f32 %v5671_v13, %v5583_v44  ;;  %v10161_v44 = vld [vmem:[%s14313_s3 + $0x110] sm:$0xff]  ;;  %7586 = vmatpush.bf16.msra.mxu1 %v10169_v18 }
 0x984   : > { %5624 = vmatmul.bf16.gmra.mxu2 %v15471_v22  ;;  %7497 = vmatpush.bf16.msra.mxu0 %v10161_v44 }
 0x985   : > { %vm5819_vm2 = vcmp.ge.f32.partialorder %v5672_v31, 0.0  ;;  %v6075_v12 = vmul.f32 0.2, %v5672_v31 }
 0x986   : > { %v7172_v13 = vpop.f32.mrf.mxu0 }
 0x987   : > { %5713 = vmatmul.bf16.gmra.mxu3 %v15472_v63  ;;  %v13482_v55 = vsel %vm5819_vm2, %v5672_v31, %v6075_v12  ;;  %v7173_v28 = vadd.f32 %v13308_v47, %v7172_v13  ;;  %v7261_v25 = vpop.f32.mrf.mxu1  ;;  %v5585_v51 = vpop.f32.mrf.mxu2  ;;  %v10168_v31 = vld [vmem:[%s14313_s3 + $0x148] sm:$0xff] }
 0x988   : > { %v5586_v22 = vadd.f32 %v5585_v51, %v13065_v49  ;;  %7498 = vmatpush.bf16.msra.mxu0 %v10160_v21  ;;  %7587 = vmatpush.bf16.msra.mxu1 %v10168_v31  ;;  %v10159_v49 = vld [vmem:[%s14313_s3 + $0x100] sm:$0xff] }
 0x989   : > { %v13488_v33 = vadd.f32 %v7261_v25, %v7173_v28 }
 0x98a   : > { %v5674_v63 = vpop.f32.mrf.mxu3 }
 0x98b   : > { %v5675_v12 = vadd.f32 %v5674_v63, %v5586_v22  ;;  %v15474_v63 = vld [vmem:[#allocation32_spill] sm:$0xff] }
 0x98c   : > { %7499 = vmatpush.bf16.msra.mxu0 %v10159_v49  ;;  %7588 = vmatpush.bf16.msra.mxu1 %v10167_v39  ;;  %v15476_v21 = vpack.c.bf16 %v15474_v63, %v15475_v15 }
 0x98d   : > { %v6083_v31 = vmul.f32 0.2, %v5675_v12  ;;  %vm5827_vm0 = vcmp.ge.f32.partialorder %v5675_v12, 0.0 }
 0x98e   : > { %v7175_v44 = vpop.f32.mrf.mxu0 }
 0x98f   : > { %v7176_v18 = vadd.f32 %v13308_v47, %v7175_v44  ;;  %v7264_v13 = vpop.f32.mrf.mxu1  ;;  %v5587_v28 = vpop.f32.mrf.mxu2  ;;  %v13517_v49 = vsel %vm5827_vm0, %v5675_v12, %v6083_v31  ;;  %v15482_v31 = vld [vmem:[#allocation35_spill] sm:$0xff] }
 0x990   : > { %v5588_v25 = vadd.f32 %v5587_v28, %v13079_v56  ;;  %15480 = vst [vmem:[#allocation47_spill] sm:$0xff] %v13517_v49 }
 0x991   : > { %v13507_v22 = vadd.f32 %v7264_v13, %v7176_v18  ;;  %7214 = vmatmul.bf16.gmra.mxu0 %v15476_v21 }
 0x992   : > { %v5676_v51 = vpop.f32.mrf.mxu3  ;;  %7303 = vmatmul.bf16.gmra.mxu1 %v15479_v3 }
 0x993   : > { %v5677_v19 = vadd.f32 %v5676_v51, %v5588_v25 }
 0x994   : > { %5629 = vmatmul.bf16.gmra.mxu2 %v11138_v8 }
 0x995   : > { %vm5835_vm3 = vcmp.ge.f32.partialorder %v5677_v19, 0.0  ;;  %v6091_v44 = vmul.f32 0.2, %v5677_v19 }
 0x996   : > { %v7177_v56 = vpop.f32.mrf.mxu0 }
 0x997   : > { %5718 = vmatmul.bf16.gmra.mxu3 %v11141_v20  ;;  %v13519_v39 = vsel %vm5835_vm3, %v5677_v19, %v6091_v44  ;;  %v7178_v18 = vadd.f32 %v13308_v47, %v7177_v56  ;;  %v7266_v13 = vpop.f32.mrf.mxu1  ;;  %v5590_v28 = vpop.f32.mrf.mxu2  ;;  %v15483_v44 = vld [vmem:[#allocation83_spill] sm:$0xff] }
 0x998   : > { %15481 = vst [vmem:[#allocation103_spill] sm:$0xff] %v13519_v39  ;;  %v5591_v43 = vadd.f32 %v5590_v28, %v13083_v59  ;;  %v15484_v56 = vpack.c.bf16 %v15482_v31, %v15483_v44  ;;  %v15485_v28 = vld [vmem:[#allocation125_spill] sm:$0xff] }
 0x999   : > { %v13525_v25 = vadd.f32 %v7266_v13, %v7178_v18  ;;  %v15486_v18 = vld [vmem:[#allocation64_spill] sm:$0xff] }
 0x99a   : > { %v5679_v3 = vpop.f32.mrf.mxu3  ;;  %v15487_v13 = vpack.c.bf16 %v15485_v28, %v15486_v18 }
 0x99b   : > { %v5680_v8 = vadd.f32 %v5679_v3, %v5591_v43  ;;  %v15488_v3 = vld [vmem:[#allocation127_spill] sm:$0xff] }
 0x99d   : > { %v6099_v40 = vmul.f32 0.2, %v5680_v8  ;;  %vm5843_vm4 = vcmp.ge.f32.partialorder %v5680_v8, 0.0 }
 0x99e   : > { %v7180_v51 = vpop.f32.mrf.mxu0 }
 0x99f   : > { %v7181_v20 = vadd.f32 %v13308_v47, %v7180_v51  ;;  %v7269_v12 = vpop.f32.mrf.mxu1  ;;  %v5592_v63 = vpop.f32.mrf.mxu2  ;;  %v15489_v51 = vld [vmem:[#allocation126_spill] sm:$0xff] }
 0x9a0   : > { %v5593_v19 = vadd.f32 %v5592_v63, %v13100_v50  ;;  %v15490_v49 = vpack.c.bf16 %v15488_v3, %v15489_v51  ;;  %v15491_v50 = vld [vmem:[#allocation159_spill] sm:$0xff]  ;;  %v10181_v63 = vld [vmem:[%s14313_s3 + $0x1b0] sm:$0xff] }
 0x9a1   : > { %v13529_v21 = vadd.f32 %v7269_v12, %v7181_v20  ;;  %7219 = vmatmul.bf16.gmra.mxu0 %v15484_v56  ;;  %v15492_v20 = vld [vmem:[#allocation158_spill] sm:$0xff]  ;;  %7671 = vmatpush.bf16.msrb.mxu2 %v10181_v63 }
 0x9a2   : > { %v5681_v15 = vpop.f32.mrf.mxu3  ;;  %7308 = vmatmul.bf16.gmra.mxu1 %v15487_v13  ;;  %v15493_v12 = vpack.c.bf16 %v15491_v50, %v15492_v20 }
 0x9a3   : > { %v5682_v59 = vadd.f32 %v5681_v15, %v5593_v19  ;;  %v13546_v15 = vsel %vm5843_vm4, %v5680_v8, %v6099_v40  ;;  %v10189_v40 = vld [vmem:[%s14313_s3 + $0x1f0] sm:$0xff] }
 0x9a4   : > { %7322 = vmatmul.bf16.vlgmr.msra.gmra.mxu2 %v15490_v49  ;;  %15494 = vst [vmem:[#allocation102_spill] sm:$0xff] %v13546_v15  ;;  %7760 = vmatpush.bf16.msrb.mxu3 %v10189_v40  ;;  %v15499_v49 = vld [vmem:[#allocation222_spill] sm:$0xff]  ;;  %v15500_v15 = vld [vmem:[#allocation221_spill] sm:$0xff] }
 0x9a5   : > { %vm5851_vm5 = vcmp.ge.f32.partialorder %v5682_v59, 0.0  ;;  %v6107_v43 = vmul.f32 0.2, %v5682_v59  ;;  %v15502_v40 = vld [vmem:[#allocation129_spill] sm:$0xff] }
 0x9a6   : > { %v7182_v19 = vpop.f32.mrf.mxu0 }
 0x9a7   : > { %7411 = vmatmul.bf16.vlgmr.msra.gmra.mxu3 %v15493_v12  ;;  %v13548_v31 = vsel %vm5851_vm5, %v5682_v59, %v6107_v43  ;;  %v7183_v44 = vadd.f32 %v13308_v47, %v7182_v19  ;;  %v7271_v56 = vpop.f32.mrf.mxu1  ;;  %v5595_v28 = vpop.f32.mrf.mxu2  ;;  %v15497_v19 = vld [vmem:[#allocation190_spill] sm:$0xff] }
 0x9a8   : > { %15495 = vst [vmem:[#allocation53_spill] sm:$0xff] %v13548_v31  ;;  %v5596_v18 = vadd.f32 %v5595_v28, %v13107_v60  ;;  %v15496_v60 = vld [vmem:[#allocation191_spill] sm:$0xff] }
 0x9a9   : > { %v13554_v3 = vadd.f32 %v7271_v56, %v7183_v44  ;;  %v15498_v44 = vpack.c.bf16 %v15496_v60, %v15497_v19 }
 0x9aa   : > { %v5684_v13 = vpop.f32.mrf.mxu3 }
 0x9ab   : > { %v5685_v8 = vadd.f32 %v5684_v13, %v5596_v18  ;;  %v15501_v18 = vpack.c.bf16 %v15499_v49, %v15500_v15 }
 0x9ad   : > { %v6115_v56 = vmul.f32 0.2, %v5685_v8  ;;  %vm5859_vm6 = vcmp.ge.f32.partialorder %v5685_v8, 0.0 }
 0x9ae   : > { %v7185_v59 = vpop.f32.mrf.mxu0 }
 0x9af   : > { %v7186_v43 = vadd.f32 %v13308_v47, %v7185_v59  ;;  %v7274_v51 = vpop.f32.mrf.mxu1  ;;  %v5597_v50 = vpop.f32.mrf.mxu2  ;;  %v15503_v59 = vld [vmem:[#allocation128_spill] sm:$0xff]  ;;  %v13575_v60 = vsel %vm5859_vm6, %v5685_v8, %v6115_v56 }
 0x9b0   : > { %v5598_v20 = vadd.f32 %v5597_v50, %v13125_v36  ;;  %v15504_v31 = vpack.c.bf16 %v15502_v40, %v15503_v59  ;;  %v15505_v36 = vld [vmem:[#allocation161_spill] sm:$0xff]  ;;  %15508 = vst [vmem:[#allocation54_spill] sm:$0xff] %v13575_v60 }
 0x9b1   : > { %v13561_v63 = vadd.f32 %v7274_v51, %v7186_v43  ;;  %7500 = vmatmul.bf16.vlgmr.msra.gmra.mxu0 %v15498_v44  ;;  %v15506_v43 = vld [vmem:[#allocation160_spill] sm:$0xff] }
 0x9b2   : > { %v5686_v12 = vpop.f32.mrf.mxu3  ;;  %7589 = vmatmul.bf16.vlgmr.msra.gmra.mxu1 %v15501_v18  ;;  %v15507_v51 = vpack.c.bf16 %v15505_v36, %v15506_v43 }
 0x9b3   : > { %v5687_v28 = vadd.f32 %v5686_v12, %v5598_v20 }
 0x9b4   : > { %7327 = vmatmul.bf16.gmra.mxu2 %v15504_v31 }
 0x9b5   : > { %vm5867_vm7 = vcmp.ge.f32.partialorder %v5687_v28, 0.0  ;;  %v6123_v13 = vmul.f32 0.2, %v5687_v28 }
 0x9b6   : > { %v7187_v50 = vpop.f32.mrf.mxu0 }
 0x9b7   : > { %7416 = vmatmul.bf16.gmra.mxu3 %v15507_v51  ;;  %v13577_v19 = vsel %vm5867_vm7, %v5687_v28, %v6123_v13  ;;  %v7188_v20 = vadd.f32 %v13308_v47, %v7187_v50  ;;  %v7276_v15 = vpop.f32.mrf.mxu1  ;;  %v5600_v49 = vpop.f32.mrf.mxu2  ;;  %v15510_v51 = vld [vmem:[#allocation193_spill] sm:$0xff]  ;;  %v15511_v50 = vld [vmem:[#allocation192_spill] sm:$0xff] }
 0x9b8   : > { %15509 = vst [vmem:[#allocation51_spill] sm:$0xff] %v13577_v19  ;;  %v5601_v44 = vadd.f32 %v5600_v49, %v13129_v42  ;;  %v15512_v39 = vpack.c.bf16 %v15510_v51, %v15511_v50  ;;  %v15513_v49 = vld [vmem:[#allocation224_spill] sm:$0xff] }
 0x9b9   : > { %v13583_v31 = vadd.f32 %v7276_v15, %v7188_v20  ;;  %v15514_v20 = vld [vmem:[#allocation223_spill] sm:$0xff] }
 0x9ba   : > { %v5689_v18 = vpop.f32.mrf.mxu3  ;;  %v15515_v15 = vpack.c.bf16 %v15513_v49, %v15514_v20 }
 0x9bb   : > { %v5690_v40 = vadd.f32 %v5689_v18, %v5601_v44  ;;  %v15516_v18 = vld [vmem:[#allocation131_spill] sm:$0xff] }
 0x9bd   : > { %v6131_v12 = vmul.f32 0.2, %v5690_v40  ;;  %vm5875_vm8 = vcmp.ge.f32.partialorder %v5690_v40, 0.0 }
 0x9be   : > { %v7190_v59 = vpop.f32.mrf.mxu0 }
 0x9bf   : > { %v7191_v36 = vadd.f32 %v13308_v47, %v7190_v59  ;;  %v7279_v8 = vpop.f32.mrf.mxu1  ;;  %v5602_v56 = vpop.f32.mrf.mxu2  ;;  %v15517_v59 = vld [vmem:[#allocation130_spill] sm:$0xff] }
 0x9c0   : > { %v5603_v28 = vadd.f32 %v5602_v56, %v13150_v5  ;;  %v15518_v60 = vpack.c.bf16 %v15516_v18, %v15517_v59  ;;  %v15519_v5 = vld [vmem:[#allocation164_spill] sm:$0xff] }
 0x9c1   : > { %v13587_v43 = vadd.f32 %v7279_v8, %v7191_v36  ;;  %7505 = vmatmul.bf16.gmra.mxu0 %v15512_v39  ;;  %v15520_v36 = vld [vmem:[#allocation163_spill] sm:$0xff] }
 0x9c2   : > { %v5691_v13 = vpop.f32.mrf.mxu3  ;;  %7594 = vmatmul.bf16.gmra.mxu1 %v15515_v15  ;;  %v15521_v8 = vpack.c.bf16 %v15519_v5, %v15520_v36  ;;  %v10180_v39 = vld [vmem:[%s14313_s3 + $0x1a8] sm:$0xff] }
 0x9c3   : > { %v5692_v42 = vadd.f32 %v5691_v13, %v5603_v28  ;;  %v13604_v28 = vsel %vm5875_vm8, %v5690_v40, %v6131_v12  ;;  %7672 = vmatpush.bf16.msrb.mxu2 %v10180_v39  ;;  %v10188_v12 = vld [vmem:[%s14313_s3 + $0x1e8] sm:$0xff] }
 0x9c4   : > { %7332 = vmatmul.bf16.gmra.mxu2 %v15518_v60  ;;  %15522 = vst [vmem:[#allocation106_spill] sm:$0xff] %v13604_v28  ;;  %7761 = vmatpush.bf16.msrb.mxu3 %v10188_v12  ;;  %v15527_v60 = vld [vmem:[#allocation227_spill] sm:$0xff]  ;;  %v15528_v28 = vld [vmem:[#allocation226_spill] sm:$0xff] }
 0x9c5   : > { %vm5883_vm9 = vcmp.ge.f32.partialorder %v5692_v42, 0.0  ;;  %v6139_v44 = vmul.f32 0.2, %v5692_v42  ;;  %v15530_v12 = vld [vmem:[#allocation134_spill] sm:$0xff] }
 0x9c6   : > { %v7192_v56 = vpop.f32.mrf.mxu0 }
 0x9c7   : > { %7421 = vmatmul.bf16.gmra.mxu3 %v15521_v8  ;;  %v13606_v13 = vsel %vm5883_vm9, %v5692_v42, %v6139_v44  ;;  %v7193_v51 = vadd.f32 %v13308_v47, %v7192_v56  ;;  %v7281_v50 = vpop.f32.mrf.mxu1  ;;  %v5605_v49 = vpop.f32.mrf.mxu2  ;;  %v15525_v56 = vld [vmem:[#allocation195_spill] sm:$0xff] }
 0x9c8   : > { %15523 = vst [vmem:[#allocation105_spill] sm:$0xff] %v13606_v13  ;;  %v5606_v20 = vadd.f32 %v5605_v49, %v13157_v61  ;;  %v15524_v61 = vld [vmem:[#allocation196_spill] sm:$0xff] }
 0x9c9   : > { %v13612_v18 = vadd.f32 %v7281_v50, %v7193_v51  ;;  %v15526_v51 = vpack.c.bf16 %v15524_v61, %v15525_v56 }
 0x9ca   : > { %v5694_v15 = vpop.f32.mrf.mxu3 }
 0x9cb   : > { %v5695_v40 = vadd.f32 %v5694_v15, %v5606_v20  ;;  %v15529_v20 = vpack.c.bf16 %v15527_v60, %v15528_v28 }
 0x9cd   : > { %v6147_v50 = vmul.f32 0.2, %v5695_v40  ;;  %vm5891_vm10 = vcmp.ge.f32.partialorder %v5695_v40, 0.0 }
 0x9ce   : > { %v7195_v42 = vpop.f32.mrf.mxu0 }
 0x9cf   : > { %v7196_v44 = vadd.f32 %v13308_v47, %v7195_v42  ;;  %v7284_v59 = vpop.f32.mrf.mxu1  ;;  %v5607_v5 = vpop.f32.mrf.mxu2  ;;  %v15531_v42 = vld [vmem:[#allocation133_spill] sm:$0xff]  ;;  %v13633_v61 = vsel %vm5891_vm10, %v5695_v40, %v6147_v50 }
 0x9d0   : > { %v5608_v36 = vadd.f32 %v5607_v5, %v13175_v45  ;;  %v15532_v13 = vpack.c.bf16 %v15530_v12, %v15531_v42  ;;  %v15533_v45 = vld [vmem:[#allocation166_spill] sm:$0xff]  ;;  %15536 = vst [vmem:[#allocation57_spill] sm:$0xff] %v13633_v61 }
 0x9d1   : > { %v13619_v39 = vadd.f32 %v7284_v59, %v7196_v44  ;;  %7510 = vmatmul.bf16.gmra.mxu0 %v15526_v51  ;;  %v15534_v44 = vld [vmem:[#allocation165_spill] sm:$0xff] }
 0x9d2   : > { %v5696_v8 = vpop.f32.mrf.mxu3  ;;  %7599 = vmatmul.bf16.gmra.mxu1 %v15529_v20  ;;  %v15535_v59 = vpack.c.bf16 %v15533_v45, %v15534_v44 }
 0x9d3   : > { %v5697_v49 = vadd.f32 %v5696_v8, %v5608_v36 }
 0x9d4   : > { %7337 = vmatmul.bf16.gmra.mxu2 %v15532_v13 }
 0x9d5   : > { %vm5899_vm11 = vcmp.ge.f32.partialorder %v5697_v49, 0.0  ;;  %v6155_v15 = vmul.f32 0.2, %v5697_v49 }
 0x9d6   : > { %v7197_v5 = vpop.f32.mrf.mxu0 }
 0x9d7   : > { %7426 = vmatmul.bf16.gmra.mxu3 %v15535_v59  ;;  %v13635_v56 = vsel %vm5899_vm11, %v5697_v49, %v6155_v15  ;;  %v7198_v36 = vadd.f32 %v13308_v47, %v7197_v5  ;;  %v7286_v28 = vpop.f32.mrf.mxu1  ;;  %v5610_v60 = vpop.f32.mrf.mxu2  ;;  %v15538_v59 = vld [vmem:[#allocation197_spill] sm:$0xff]  ;;  %v15539_v5 = vld [vmem:[#allocation104_spill] sm:$0xff] }
 0x9d8   : > { %15537 = vst [vmem:[#allocation21_spill] sm:$0xff] %v13635_v56  ;;  %v5611_v51 = vadd.f32 %v5610_v60, %v13179_v34  ;;  %v15540_v19 = vpack.c.bf16 %v15538_v59, %v15539_v5  ;;  %v15541_v60 = vld [vmem:[#allocation228_spill] sm:$0xff] }
 0x9d9   : > { %v13641_v13 = vadd.f32 %v7286_v28, %v7198_v36  ;;  %v15542_v36 = vld [vmem:[#allocation167_spill] sm:$0xff] }
 0x9da   : > { %v5699_v20 = vpop.f32.mrf.mxu3  ;;  %v15543_v28 = vpack.c.bf16 %v15541_v60, %v15542_v36 }
 0x9db   : > { %v5700_v12 = vadd.f32 %v5699_v20, %v5611_v51  ;;  %v15544_v20 = vld [vmem:[#allocation136_spill] sm:$0xff] }
 0x9dd   : > { %v6163_v8 = vmul.f32 0.2, %v5700_v12  ;;  %vm5907_vm12 = vcmp.ge.f32.partialorder %v5700_v12, 0.0 }
 0x9de   : > { %v7200_v42 = vpop.f32.mrf.mxu0 }
 0x9df   : > { %v7201_v45 = vadd.f32 %v13308_v47, %v7200_v42  ;;  %v7289_v40 = vpop.f32.mrf.mxu1  ;;  %v5612_v50 = vpop.f32.mrf.mxu2  ;;  %v15545_v42 = vld [vmem:[#allocation135_spill] sm:$0xff] }
 0x9e0   : > { %v5613_v49 = vadd.f32 %v5612_v50, %v13200_v6  ;;  %v15546_v61 = vpack.c.bf16 %v15544_v20, %v15545_v42  ;;  %v15547_v6 = vld [vmem:[#allocation169_spill] sm:$0xff] }
 0x9e1   : > { %v13645_v44 = vadd.f32 %v7289_v40, %v7201_v45  ;;  %7515 = vmatmul.bf16.gmra.mxu0 %v15540_v19  ;;  %v15548_v45 = vld [vmem:[#allocation168_spill] sm:$0xff]  ;;  %v10179_v19 = vld [vmem:[%s14313_s3 + $0x1a0] sm:$0xff] }
 0x9e2   : > { %v5701_v15 = vpop.f32.mrf.mxu3  ;;  %7604 = vmatmul.bf16.gmra.mxu1 %v15543_v28  ;;  %v15549_v40 = vpack.c.bf16 %v15547_v6, %v15548_v45  ;;  %7673 = vmatpush.bf16.msrb.mxu2 %v10179_v19 }
 0x9e3   : > { %v5702_v34 = vadd.f32 %v5701_v15, %v5613_v49  ;;  %v13662_v49 = vsel %vm5907_vm12, %v5700_v12, %v6163_v8  ;;  %v10187_v8 = vld [vmem:[%s14313_s3 + $0x1e0] sm:$0xff] }
 0x9e4   : > { %7342 = vmatmul.bf16.gmra.mxu2 %v15546_v61  ;;  %15550 = vst [vmem:[#allocation89_spill] sm:$0xff] %v13662_v49  ;;  %7762 = vmatpush.bf16.msrb.mxu3 %v10187_v8  ;;  %v15555_v61 = vld [vmem:[#allocation231_spill] sm:$0xff]  ;;  %v15556_v49 = vld [vmem:[#allocation230_spill] sm:$0xff] }
 0x9e5   : > { %vm5915_vm13 = vcmp.ge.f32.partialorder %v5702_v34, 0.0  ;;  %v6171_v51 = vmul.f32 0.2, %v5702_v34  ;;  %v15558_v8 = vld [vmem:[#allocation139_spill] sm:$0xff] }
 0x9e6   : > { %v7202_v50 = vpop.f32.mrf.mxu0 }
 0x9e7   : > { %7431 = vmatmul.bf16.gmra.mxu3 %v15549_v40  ;;  %v13664_v15 = vsel %vm5915_vm13, %v5702_v34, %v6171_v51  ;;  %v7203_v59 = vadd.f32 %v13308_v47, %v7202_v50  ;;  %v7291_v5 = vpop.f32.mrf.mxu1  ;;  %v5615_v60 = vpop.f32.mrf.mxu2  ;;  %v15553_v50 = vld [vmem:[#allocation199_spill] sm:$0xff] }
 0x9e8   : > { %15551 = vst [vmem:[#allocation55_spill] sm:$0xff] %v13664_v15  ;;  %v5616_v36 = vadd.f32 %v5615_v60, %v13207_v32  ;;  %v15552_v32 = vld [vmem:[#allocation200_spill] sm:$0xff] }
 0x9e9   : > { %v13670_v20 = vadd.f32 %v7291_v5, %v7203_v59  ;;  %v15554_v59 = vpack.c.bf16 %v15552_v32, %v15553_v50 }
 0x9ea   : > { %v5704_v28 = vpop.f32.mrf.mxu3 }
 0x9eb   : > { %v5705_v12 = vadd.f32 %v5704_v28, %v5616_v36  ;;  %v15557_v36 = vpack.c.bf16 %v15555_v61, %v15556_v49 }
 0x9ed   : > { %v6179_v5 = vmul.f32 0.2, %v5705_v12  ;;  %vm5923_vm14 = vcmp.ge.f32.partialorder %v5705_v12, 0.0 }
 0x9ee   : > { %v7205_v34 = vpop.f32.mrf.mxu0 }
 0x9ef   : > { %v7206_v51 = vadd.f32 %v13308_v47, %v7205_v34  ;;  %v7294_v42 = vpop.f32.mrf.mxu1  ;;  %v5617_v6 = vpop.f32.mrf.mxu2  ;;  %v15559_v34 = vld [vmem:[#allocation138_spill] sm:$0xff]  ;;  %v13691_v32 = vsel %vm5923_vm14, %v5705_v12, %v6179_v5 }
 0x9f0   : > { %v5618_v45 = vadd.f32 %v5617_v6, %v13225_v37  ;;  %v15560_v15 = vpack.c.bf16 %v15558_v8, %v15559_v34  ;;  %v15561_v37 = vld [vmem:[#allocation171_spill] sm:$0xff]  ;;  %15564 = vst [vmem:[#allocation108_spill] sm:$0xff] %v13691_v32 }
 0x9f1   : > { %v13677_v19 = vadd.f32 %v7294_v42, %v7206_v51  ;;  %7520 = vmatmul.bf16.gmra.mxu0 %v15554_v59  ;;  %v15562_v51 = vld [vmem:[#allocation170_spill] sm:$0xff] }
 0x9f2   : > { %v5706_v40 = vpop.f32.mrf.mxu3  ;;  %7609 = vmatmul.bf16.gmra.mxu1 %v15557_v36  ;;  %v15563_v42 = vpack.c.bf16 %v15561_v37, %v15562_v51 }
 0x9f3   : > { %v5707_v60 = vadd.f32 %v5706_v40, %v5618_v45 }
 0x9f4   : > { %7347 = vmatmul.bf16.gmra.mxu2 %v15560_v15 }
 0x9f5   : > { %vm5931_vm15 = vcmp.ge.f32.partialorder %v5707_v60, 0.0  ;;  %v6187_v28 = vmul.f32 0.2, %v5707_v60 }
 0x9f6   : > { %v7207_v6 = vpop.f32.mrf.mxu0 }
 0x9f7   : > { %7436 = vmatmul.bf16.gmra.mxu3 %v15563_v42  ;;  %v13693_v50 = vsel %vm5931_vm15, %v5707_v60, %v6187_v28  ;;  %v7208_v45 = vadd.f32 %v13308_v47, %v7207_v6  ;;  %v7296_v49 = vpop.f32.mrf.mxu1  ;;  %v5620_v61 = vpop.f32.mrf.mxu2  ;;  %v15565_v42 = vld [vmem:[#allocation202_spill] sm:$0xff]  ;;  %v15566_v6 = vld [vmem:[#allocation201_spill] sm:$0xff] }
 0x9f8   : > { %v5621_v59 = vadd.f32 %v5620_v61, %v13229_v2  ;;  %v15567_v56 = vpack.c.bf16 %v15565_v42, %v15566_v6  ;;  %v15568_v61 = vld [vmem:[#allocation233_spill] sm:$0xff] }
 0x9f9   : > { %v13699_v15 = vadd.f32 %v7296_v49, %v7208_v45  ;;  %v15569_v45 = vld [vmem:[#allocation232_spill] sm:$0xff] }
 0x9fa   : > { %v5709_v36 = vpop.f32.mrf.mxu3  ;;  %v15570_v49 = vpack.c.bf16 %v15568_v61, %v15569_v45 }
 0x9fb   : > { %v5710_v8 = vadd.f32 %v5709_v36, %v5621_v59  ;;  %v15571_v36 = vld [vmem:[#allocation141_spill] sm:$0xff] }
 0x9fd   : > { %v6195_v40 = vmul.f32 0.2, %v5710_v8  ;;  %vm5939_vm1 = vcmp.ge.f32.partialorder %v5710_v8, 0.0 }
 0x9fe   : > { %v7210_v34 = vpop.f32.mrf.mxu0 }
 0x9ff   : > { %v7211_v37 = vadd.f32 %v13308_v47, %v7210_v34  ;;  %v7299_v12 = vpop.f32.mrf.mxu1  ;;  %v5622_v5 = vpop.f32.mrf.mxu2  ;;  %v15572_v34 = vld [vmem:[#allocation140_spill] sm:$0xff] }
 0xa00   : > { %v5623_v60 = vadd.f32 %v5622_v5, %v13250_v23  ;;  %v15573_v32 = vpack.c.bf16 %v15571_v36, %v15572_v34  ;;  %v15574_v23 = vld [vmem:[#allocation173_spill] sm:$0xff] }
 0xa01   : > { %v13703_v51 = vadd.f32 %v7299_v12, %v7211_v37  ;;  %7525 = vmatmul.bf16.gmra.mxu0 %v15567_v56  ;;  %v15575_v37 = vld [vmem:[#allocation172_spill] sm:$0xff]  ;;  %v10178_v56 = vld [vmem:[%s14313_s3 + $0x198] sm:$0xff] }
 0xa02   : > { %v5711_v28 = vpop.f32.mrf.mxu3  ;;  %7614 = vmatmul.bf16.gmra.mxu1 %v15570_v49  ;;  %v15576_v12 = vpack.c.bf16 %v15574_v23, %v15575_v37  ;;  %7674 = vmatpush.bf16.msrb.mxu2 %v10178_v56 }
 0xa03   : > { %v5712_v2 = vadd.f32 %v5711_v28, %v5623_v60  ;;  %v13720_v60 = vsel %vm5939_vm1, %v5710_v8, %v6195_v40  ;;  %v10186_v40 = vld [vmem:[%s14313_s3 + $0x1d8] sm:$0xff] }
 0xa04   : > { %7352 = vmatmul.bf16.gmra.mxu2 %v15573_v32  ;;  %15577 = vst [vmem:[#allocation107_spill] sm:$0xff] %v13720_v60  ;;  %7763 = vmatpush.bf16.msrb.mxu3 %v10186_v40  ;;  %v15582_v32 = vld [vmem:[#allocation235_spill] sm:$0xff]  ;;  %v15583_v60 = vld [vmem:[#allocation234_spill] sm:$0xff] }
 0xa05   : > { %vm5947_vm2 = vcmp.ge.f32.partialorder %v5712_v2, 0.0  ;;  %v6203_v59 = vmul.f32 0.2, %v5712_v2  ;;  %v15585_v40 = vld [vmem:[#allocation142_spill] sm:$0xff] }
 0xa06   : > { %v7212_v5 = vpop.f32.mrf.mxu0 }
 0xa07   : > { %7441 = vmatmul.bf16.gmra.mxu3 %v15576_v12  ;;  %v13722_v28 = vsel %vm5947_vm2, %v5712_v2, %v6203_v59  ;;  %v7213_v42 = vadd.f32 %v13308_v47, %v7212_v5  ;;  %v7301_v6 = vpop.f32.mrf.mxu1  ;;  %v5625_v61 = vpop.f32.mrf.mxu2  ;;  %v15580_v5 = vld [vmem:[#allocation203_spill] sm:$0xff] }
 0xa08   : > { %15578 = vst [vmem:[#allocation58_spill] sm:$0xff] %v13722_v28  ;;  %v5626_v45 = vadd.f32 %v5625_v61, %v13257_v62  ;;  %v15579_v62 = vld [vmem:[#allocation204_spill] sm:$0xff] }
 0xa09   : > { %v13728_v36 = vadd.f32 %v7301_v6, %v7213_v42  ;;  %v15581_v42 = vpack.c.bf16 %v15579_v62, %v15580_v5 }
 0xa0a   : > { %v5714_v49 = vpop.f32.mrf.mxu3 }
 0xa0b   : > { %v5715_v8 = vadd.f32 %v5714_v49, %v5626_v45  ;;  %v15584_v45 = vpack.c.bf16 %v15582_v32, %v15583_v60 }
 0xa0d   : > { %v6211_v6 = vmul.f32 0.2, %v5715_v8  ;;  %vm5955_vm0 = vcmp.ge.f32.partialorder %v5715_v8, 0.0 }
 0xa0e   : > { %v7215_v2 = vpop.f32.mrf.mxu0 }
 0xa0f   : > { %v7216_v59 = vadd.f32 %v13308_v47, %v7215_v2  ;;  %v7304_v34 = vpop.f32.mrf.mxu1  ;;  %v5627_v23 = vpop.f32.mrf.mxu2  ;;  %v15586_v2 = vld [vmem:[#allocation40_spill] sm:$0xff]  ;;  %v13749_v62 = vsel %vm5955_vm0, %v5715_v8, %v6211_v6  ;;  %v10198_v8 = vld [vmem:[%s14314_s4 + $0x38] sm:$0xff] }
 0xa10   : > { %v5628_v37 = vadd.f32 %v5627_v23, %v13275_v30  ;;  %v15587_v28 = vpack.c.bf16 %v15585_v40, %v15586_v2  ;;  %v15588_v30 = vld [vmem:[#allocation175_spill] sm:$0xff]  ;;  %15591 = vst [vmem:[#allocation59_spill] sm:$0xff] %v13749_v62  ;;  %7964 = vmatpush.bf16.msrb.mxu0 %v10198_v8  ;;  %v15600_v62 = vld [vmem:[#allocation9_spill] sm:$0xff] }
 0xa11   : > { %v13735_v56 = vadd.f32 %v7304_v34, %v7216_v59  ;;  %7530 = vmatmul.bf16.gmra.mxu0 %v15581_v42  ;;  %v15589_v59 = vld [vmem:[#allocation174_spill] sm:$0xff] }
 0xa12   : > { %v5716_v12 = vpop.f32.mrf.mxu3  ;;  %7619 = vmatmul.bf16.gmra.mxu1 %v15584_v45  ;;  %v15590_v34 = vpack.c.bf16 %v15588_v30, %v15589_v59 }
 0xa13   : > { %v5717_v61 = vadd.f32 %v5716_v12, %v5628_v37 }
 0xa14   : > { %7357 = vmatmul.bf16.gmra.mxu2 %v15587_v28 }
 0xa15   : > { %vm5963_vm3 = vcmp.ge.f32.partialorder %v5717_v61, 0.0  ;;  %v6219_v49 = vmul.f32 0.2, %v5717_v61 }
 0xa16   : > { %v7217_v23 = vpop.f32.mrf.mxu0 }
 0xa17   : > { %7446 = vmatmul.bf16.gmra.mxu3 %v15590_v34  ;;  %v13751_v5 = vsel %vm5963_vm3, %v5717_v61, %v6219_v49  ;;  %v7218_v37 = vadd.f32 %v13308_v47, %v7217_v23  ;;  %v7306_v60 = vpop.f32.mrf.mxu1  ;;  %v5630_v32 = vpop.f32.mrf.mxu2  ;;  %v15594_v23 = vld [vmem:[#allocation205_spill] sm:$0xff] }
 0xa18   : > { %15592 = vst [vmem:[#allocation90_spill] sm:$0xff] %v13751_v5  ;;  %v5631_v42 = vadd.f32 %v5630_v32, %v13282_v26  ;;  %v15593_v26 = vld [vmem:[#allocation206_spill] sm:$0xff] }
 0xa19   : > { %v13757_v28 = vadd.f32 %v7306_v60, %v7218_v37  ;;  %v15595_v37 = vpack.c.bf16 %v15593_v26, %v15594_v23 }
 0xa1a   : > { %v5719_v45 = vpop.f32.mrf.mxu3 }
 0xa1b   : > { %v5720_v40 = vadd.f32 %v5719_v45, %v5631_v42  ;;  %v15596_v42 = vld [vmem:[#allocation237_spill] sm:$0xff]  ;;  %v15597_v45 = vld [vmem:[#allocation236_spill] sm:$0xff] }
 0xa1c   : > { %v15598_v12 = vpack.c.bf16 %v15596_v42, %v15597_v45 }
 0xa1d   : > { %v6227_v60 = vmul.f32 0.2, %v5720_v40  ;;  %vm5971_vm4 = vcmp.ge.f32.partialorder %v5720_v40, 0.0 }
 0xa1e   : > { %v7220_v6 = vpop.f32.mrf.mxu0 }
 0xa1f   : > { %v7221_v61 = vadd.f32 %v13308_v47, %v7220_v6  ;;  %v7309_v49 = vpop.f32.mrf.mxu1  ;;  %v5632_v2 = vpop.f32.mrf.mxu2  ;;  %v15599_v6 = vld [vmem:[#allocation143_spill] sm:$0xff] }
 0xa20   : > { %v5633_v30 = vadd.f32 %v5632_v2, %v13303_v57  ;;  %v15601_v5 = vpack.c.bf16 %v15599_v6, %v15600_v62  ;;  %v15602_v57 = vld [vmem:[#allocation42_spill] sm:$0xff]  ;;  %v10177_v2 = vld [vmem:[%s14313_s3 + $0x190] sm:$0xff] }
 0xa21   : > { %v13764_v34 = vadd.f32 %v7309_v49, %v7221_v61  ;;  %7535 = vmatmul.bf16.gmra.mxu0 %v15595_v37  ;;  %v15603_v61 = vld [vmem:[#allocation41_spill] sm:$0xff]  ;;  %7675 = vmatpush.bf16.msrb.mxu2 %v10177_v2  ;;  %v15606_v2 = vld [vmem:[#allocation208_spill] sm:$0xff] }
 0xa22   : > { %v5721_v59 = vpop.f32.mrf.mxu3  ;;  %7624 = vmatmul.bf16.gmra.mxu1 %v15598_v12  ;;  %v15604_v49 = vpack.c.bf16 %v15602_v57, %v15603_v61 }
 0xa23   : > { %v5722_v32 = vadd.f32 %v5721_v59, %v5633_v30  ;;  %v13781_v59 = vsel %vm5971_vm4, %v5720_v40, %v6227_v60  ;;  %v10185_v40 = vld [vmem:[%s14313_s3 + $0x1d0] sm:$0xff] }
 0xa24   : > { %7362 = vmatmul.bf16.gmra.mxu2 %v15601_v5  ;;  %15605 = vst [vmem:[#allocation34_spill] sm:$0xff] %v13781_v59  ;;  %7764 = vmatpush.bf16.msrb.mxu3 %v10185_v40 }
 0xa25   : > { %vm5979_vm5 = vcmp.ge.f32.partialorder %v5722_v32, 0.0  ;;  %v6235_v8 = vmul.f32 0.2, %v5722_v32 }
 0xa26   : > { %v7222_v30 = vpop.f32.mrf.mxu0 }
 0xa27   : > { %7451 = vmatmul.bf16.gmra.mxu3 %v15604_v49  ;;  %v13783_v26 = vsel %vm5979_vm5, %v5722_v32, %v6235_v8  ;;  %v7223_v12 = vadd.f32 %v13308_v47, %v7222_v30  ;;  %v7311_v23 = vpop.f32.mrf.mxu1  ;;  %v7323_v37 = vpop.f32.mrf.mxu2 }
 0xa28   : > { %v7324_v5 = vadd.f32 %v7323_v37, %v13312_v9  ;;  %v15607_v9 = vld [vmem:[#allocation207_spill] sm:$0xff]  ;;  %v15610_v37 = vld [vmem:[#allocation238_spill] sm:$0xff] }
 0xa29   : > { %v13789_v45 = vadd.f32 %v7311_v23, %v7223_v12  ;;  %v15608_v30 = vpack.c.bf16 %v15606_v2, %v15607_v9  ;;  %v15609_v23 = vld [vmem:[#allocation239_spill] sm:$0xff] }
 0xa2a   : > { %v7412_v42 = vpop.f32.mrf.mxu3  ;;  %v15611_v62 = vpack.c.bf16 %v15609_v23, %v15610_v37 }
 0xa2b   : > { %v7413_v60 = vadd.f32 %v7412_v42, %v7324_v5  ;;  %v15612_v5 = vld [vmem:[#allocation145_spill] sm:$0xff]  ;;  %v15613_v42 = vld [vmem:[#allocation144_spill] sm:$0xff] }
 0xa2c   : > { %v15614_v40 = vpack.c.bf16 %v15612_v5, %v15613_v42 }
 0xa2e   : > { %v7501_v32 = vpop.f32.mrf.mxu0 }
 0xa2f   : > { %v7502_v8 = vadd.f32 %v7501_v32, %v7413_v60  ;;  %v7590_v47 = vpop.f32.mrf.mxu1  ;;  %v7325_v6 = vpop.f32.mrf.mxu2  ;;  %v15615_v60 = vld [vmem:[#allocation177_spill] sm:$0xff]  ;;  %v15616_v32 = vld [vmem:[#allocation176_spill] sm:$0xff] }
 0xa30   : > { %v7326_v57 = vadd.f32 %v7325_v6, %v13330_v54  ;;  %v15617_v59 = vpack.c.bf16 %v15615_v60, %v15616_v32 }
 0xa31   : > { %v13795_v49 = vadd.f32 %v7590_v47, %v7502_v8  ;;  %7540 = vmatmul.bf16.gmra.mxu0 %v15608_v30 }
 0xa32   : > { %v7414_v61 = vpop.f32.mrf.mxu3  ;;  %7629 = vmatmul.bf16.gmra.mxu1 %v15611_v62  ;;  %v10197_v62 = vld [vmem:[%s14314_s4 + $0x30] sm:$0xff] }
 0xa33   : > { %v7415_v12 = vadd.f32 %v7414_v61, %v7326_v57  ;;  %7965 = vmatpush.bf16.msrb.mxu0 %v10197_v62  ;;  %v15628_v62 = vld [vmem:[#allocation178_spill] sm:$0xff] }
 0xa34   : > { %7367 = vmatmul.bf16.gmra.mxu2 %v15614_v40  ;;  %v15618_v40 = vld [vmem:[#allocation12_spill] sm:$0xff] }
 0xa36   : > { %v7503_v54 = vpop.f32.mrf.mxu0 }
 0xa37   : > { %7456 = vmatmul.bf16.gmra.mxu3 %v15617_v59  ;;  %v7504_v8 = vadd.f32 %v7503_v54, %v7415_v12  ;;  %v7592_v47 = vpop.f32.mrf.mxu1  ;;  %v7328_v6 = vpop.f32.mrf.mxu2  ;;  %v15621_v54 = vld [vmem:[#allocation44_spill] sm:$0xff] }
 0xa38   : > { %v7329_v2 = vadd.f32 %v7328_v6, %v13337_v24  ;;  %v15619_v24 = vld [vmem:[#allocation112_spill] sm:$0xff]  ;;  %v15624_v6 = vld [vmem:[#allocation147_spill] sm:$0xff] }
 0xa39   : > { %v13810_v57 = vadd.f32 %v7592_v47, %v7504_v8  ;;  %v15620_v60 = vpack.c.bf16 %v15618_v40, %v15619_v24  ;;  %v15622_v8 = vld [vmem:[#allocation13_spill] sm:$0xff] }
 0xa3a   : > { %v7417_v9 = vpop.f32.mrf.mxu3  ;;  %v15623_v47 = vpack.c.bf16 %v15621_v54, %v15622_v8 }
 0xa3b   : > { %v7418_v61 = vadd.f32 %v7417_v9, %v7329_v2  ;;  %v15625_v2 = vld [vmem:[#allocation146_spill] sm:$0xff] }
 0xa3c   : > { %v15626_v9 = vpack.c.bf16 %v15624_v6, %v15625_v2 }
 0xa3e   : > { %v7506_v30 = vpop.f32.mrf.mxu0 }
 0xa3f   : > { %v7507_v23 = vadd.f32 %v7506_v30, %v7418_v61  ;;  %v7595_v37 = vpop.f32.mrf.mxu1  ;;  %v7330_v5 = vpop.f32.mrf.mxu2  ;;  %v15627_v61 = vld [vmem:[#allocation179_spill] sm:$0xff] }
 0xa40   : > { %v7331_v59 = vadd.f32 %v7330_v5, %v13358_v10  ;;  %v15629_v30 = vpack.c.bf16 %v15627_v61, %v15628_v62  ;;  %v10176_v10 = vld [vmem:[%s14313_s3 + $0x188] sm:$0xff]  ;;  %v15630_v62 = vld [vmem:[#allocation210_spill] sm:$0xff] }
 0xa41   : > { %v13816_v42 = vadd.f32 %v7595_v37, %v7507_v23  ;;  %7545 = vmatmul.bf16.gmra.mxu0 %v15620_v60  ;;  %7676 = vmatpush.bf16.msrb.mxu2 %v10176_v10  ;;  %v10184_v60 = vld [vmem:[%s14313_s3 + $0x1c8] sm:$0xff] }
 0xa42   : > { %v7419_v12 = vpop.f32.mrf.mxu3  ;;  %7634 = vmatmul.bf16.gmra.mxu1 %v15623_v47  ;;  %7765 = vmatpush.bf16.msrb.mxu3 %v10184_v60  ;;  %v15639_v60 = vld [vmem:[#allocation181_spill] sm:$0xff] }
 0xa43   : > { %v7420_v32 = vadd.f32 %v7419_v12, %v7331_v59 }
 0xa44   : > { %7372 = vmatmul.bf16.gmra.mxu2 %v15626_v9 }
 0xa46   : > { %v7508_v23 = vpop.f32.mrf.mxu0 }
 0xa47   : > { %7461 = vmatmul.bf16.gmra.mxu3 %v15629_v30  ;;  %v7509_v37 = vadd.f32 %v7508_v23, %v7420_v32  ;;  %v7597_v5 = vpop.f32.mrf.mxu1  ;;  %v7333_v59 = vpop.f32.mrf.mxu2  ;;  %v15633_v23 = vld [vmem:[#allocation17_spill] sm:$0xff] }
 0xa48   : > { %v7334_v12 = vadd.f32 %v7333_v59, %v13365_v1  ;;  %v15631_v1 = vld [vmem:[#allocation209_spill] sm:$0xff] }
 0xa49   : > { %v13834_v24 = vadd.f32 %v7597_v5, %v7509_v37  ;;  %v15632_v30 = vpack.c.bf16 %v15630_v62, %v15631_v1  ;;  %v15634_v37 = vld [vmem:[#allocation45_spill] sm:$0xff] }
 0xa4a   : > { %v7422_v40 = vpop.f32.mrf.mxu3  ;;  %v15635_v5 = vpack.c.bf16 %v15633_v23, %v15634_v37  ;;  %v15636_v59 = vld [vmem:[#allocation149_spill] sm:$0xff] }
 0xa4b   : > { %v7423_v54 = vadd.f32 %v7422_v40, %v7334_v12  ;;  %v15637_v12 = vld [vmem:[#allocation148_spill] sm:$0xff] }
 0xa4c   : > { %v15638_v40 = vpack.c.bf16 %v15636_v59, %v15637_v12 }
 0xa4e   : > { %v7511_v8 = vpop.f32.mrf.mxu0 }
 0xa4f   : > { %v7512_v47 = vadd.f32 %v7511_v8, %v7423_v54  ;;  %v7600_v6 = vpop.f32.mrf.mxu1  ;;  %v7335_v2 = vpop.f32.mrf.mxu2  ;;  %v15640_v54 = vld [vmem:[#allocation180_spill] sm:$0xff] }
 0xa50   : > { %v7336_v32 = vadd.f32 %v7335_v2, %v13383_v38  ;;  %v15641_v8 = vpack.c.bf16 %v15639_v60, %v15640_v54  ;;  %v15642_v60 = vld [vmem:[#allocation212_spill] sm:$0xff] }
 0xa51   : > { %v13840_v61 = vadd.f32 %v7600_v6, %v7512_v47  ;;  %7550 = vmatmul.bf16.gmra.mxu0 %v15632_v30  ;;  %v10196_v30 = vld [vmem:[%s14314_s4 + $0x28] sm:$0xff] }
 0xa52   : > { %v7424_v9 = vpop.f32.mrf.mxu3  ;;  %7639 = vmatmul.bf16.gmra.mxu1 %v15635_v5  ;;  %7966 = vmatpush.bf16.msrb.mxu0 %v10196_v30  ;;  %v15652_v30 = vld [vmem:[#allocation182_spill] sm:$0xff] }
 0xa53   : > { %v7425_v10 = vadd.f32 %v7424_v9, %v7336_v32 }
 0xa54   : > { %7377 = vmatmul.bf16.gmra.mxu2 %v15638_v40 }
 0xa56   : > { %v7513_v38 = vpop.f32.mrf.mxu0 }
 0xa57   : > { %7466 = vmatmul.bf16.gmra.mxu3 %v15641_v8  ;;  %v7514_v47 = vadd.f32 %v7513_v38, %v7425_v10  ;;  %v7602_v6 = vpop.f32.mrf.mxu1  ;;  %v7338_v2 = vpop.f32.mrf.mxu2  ;;  %v15645_v38 = vld [vmem:[#allocation49_spill] sm:$0xff] }
 0xa58   : > { %v7339_v62 = vadd.f32 %v7338_v2, %v13390_v14  ;;  %v15643_v14 = vld [vmem:[#allocation211_spill] sm:$0xff] }
 0xa59   : > { %v13855_v32 = vadd.f32 %v7602_v6, %v7514_v47  ;;  %v15644_v54 = vpack.c.bf16 %v15642_v60, %v15643_v14  ;;  %v15646_v47 = vld [vmem:[#allocation48_spill] sm:$0xff]  ;;  %v15648_v2 = vld [vmem:[#allocation151_spill] sm:$0xff] }
 0xa5a   : > { %v7427_v1 = vpop.f32.mrf.mxu3  ;;  %v15647_v6 = vpack.c.bf16 %v15645_v38, %v15646_v47 }
 0xa5b   : > { %v7428_v9 = vadd.f32 %v7427_v1, %v7339_v62  ;;  %v15649_v62 = vld [vmem:[#allocation150_spill] sm:$0xff] }
 0xa5c   : > { %v15650_v1 = vpack.c.bf16 %v15648_v2, %v15649_v62 }
 0xa5e   : > { %v7516_v23 = vpop.f32.mrf.mxu0 }
 0xa5f   : > { %v7517_v37 = vadd.f32 %v7516_v23, %v7428_v9  ;;  %v7605_v5 = vpop.f32.mrf.mxu1  ;;  %v7340_v59 = vpop.f32.mrf.mxu2  ;;  %v15651_v9 = vld [vmem:[#allocation183_spill] sm:$0xff] }
 0xa60   : > { %v7341_v12 = vadd.f32 %v7340_v59, %v13411_v4  ;;  %v15653_v23 = vpack.c.bf16 %v15651_v9, %v15652_v30  ;;  %v10175_v4 = vld [vmem:[%s14313_s3 + $0x180] sm:$0xff]  ;;  %v15655_v9 = vld [vmem:[#allocation213_spill] sm:$0xff] }
 0xa61   : > { %v13861_v40 = vadd.f32 %v7605_v5, %v7517_v37  ;;  %7555 = vmatmul.bf16.gmra.mxu0 %v15644_v54  ;;  %7677 = vmatpush.bf16.msrb.mxu2 %v10175_v4  ;;  %v10183_v54 = vld [vmem:[%s14313_s3 + $0x1c0] sm:$0xff]  ;;  %v15658_v4 = vld [vmem:[#allocation116_spill] sm:$0xff] }
 0xa62   : > { %v7429_v10 = vpop.f32.mrf.mxu3  ;;  %7644 = vmatmul.bf16.gmra.mxu1 %v15647_v6  ;;  %7766 = vmatpush.bf16.msrb.mxu3 %v10183_v54 }
 0xa63   : > { %v7430_v8 = vadd.f32 %v7429_v10, %v7341_v12 }
 0xa64   : > { %7382 = vmatmul.bf16.gmra.mxu2 %v15650_v1  ;;  %v15654_v1 = vld [vmem:[#allocation214_spill] sm:$0xff] }
 0xa65   : > { %v15656_v30 = vpack.c.bf16 %v15654_v1, %v15655_v9 }
 0xa66   : > { %v7518_v37 = vpop.f32.mrf.mxu0 }
 0xa67   : > { %7471 = vmatmul.bf16.gmra.mxu3 %v15653_v23  ;;  %v7519_v5 = vadd.f32 %v7518_v37, %v7430_v8  ;;  %v7343_v59 = vpop.f32.mrf.mxu2  ;;  %v7607_v12 = vpop.f32.mrf.mxu1  ;;  %v15657_v23 = vld [vmem:[#allocation20_spill] sm:$0xff] }
 0xa68   : > { %v7344_v10 = vadd.f32 %v7343_v59, %v13418_v0  ;;  %v15659_v37 = vpack.c.bf16 %v15657_v23, %v15658_v4  ;;  %v15661_v59 = vld [vmem:[#allocation152_spill] sm:$0xff] }
 0xa69   : > { %v13879_v14 = vadd.f32 %v7607_v12, %v7519_v5  ;;  %v15660_v5 = vld [vmem:[#allocation153_spill] sm:$0xff] }
 0xa6a   : > { %v7432_v60 = vpop.f32.mrf.mxu3  ;;  %v15662_v12 = vpack.c.bf16 %v15660_v5, %v15661_v59  ;;  %v15667_v5 = vld [vmem:[#allocation215_spill] sm:$0xff] }
 0xa6b   : > { %v7433_v38 = vadd.f32 %v7432_v60, %v7344_v10  ;;  %v15663_v10 = vld [vmem:[#allocation185_spill] sm:$0xff]  ;;  %v15664_v60 = vld [vmem:[#allocation184_spill] sm:$0xff] }
 0xa6c   : > { %v15665_v54 = vpack.c.bf16 %v15663_v10, %v15664_v60  ;;  %v15670_v10 = vld [vmem:[#allocation52_spill] sm:$0xff] }
 0xa6e   : > { %v7521_v47 = vpop.f32.mrf.mxu0 }
 0xa6f   : > { %v13884_v6 = vadd.f32 %v7521_v47, %v7433_v38  ;;  %v7345_v2 = vpop.f32.mrf.mxu2 }
 0xa70   : > { %v7346_v8 = vadd.f32 %v7345_v2, %v13442_v35 }
 0xa71   : > { %7560 = vmatmul.bf16.gmra.mxu0 %v15656_v30 }
 0xa72   : > { %v7434_v62 = vpop.f32.mrf.mxu3  ;;  %7649 = vmatmul.bf16.gmra.mxu1 %v15659_v37  ;;  %v15666_v37 = vld [vmem:[#allocation216_spill] sm:$0xff] }
 0xa73   : > { %v13890_v0 = vadd.f32 %v7434_v62, %v7346_v8  ;;  %v10195_v62 = vld [vmem:[%s14314_s4 + $0x20] sm:$0xff]  ;;  %v15668_v59 = vpack.c.bf16 %v15666_v37, %v15667_v5 }
 0xa74   : > { %7387 = vmatmul.bf16.gmra.mxu2 %v15662_v12  ;;  %7967 = vmatpush.bf16.msrb.mxu0 %v10195_v62 }
 0xa76   : > { %v13901_v35 = vpop.f32.mrf.mxu0 }
 0xa77   : > { %7476 = vmatmul.bf16.gmra.mxu3 %v15665_v54  ;;  %v7348_v38 = vpop.f32.mrf.mxu2  ;;  %v15672_v54 = vld [vmem:[#allocation155_spill] sm:$0xff] }
 0xa78   : > { %v7349_v47 = vadd.f32 %v7348_v38, %v13455_v11  ;;  %v15669_v11 = vld [vmem:[#allocation25_spill] sm:$0xff]  ;;  %v15673_v38 = vld [vmem:[#allocation154_spill] sm:$0xff] }
 0xa79   : > { %v15671_v60 = vpack.c.bf16 %v15669_v11, %v15670_v10 }
 0xa7a   : > { %v7437_v2 = vpop.f32.mrf.mxu3 }
 0xa7b   : > { %v7438_v8 = vadd.f32 %v7437_v2, %v7349_v47  ;;  %v15674_v47 = vpack.c.bf16 %v15672_v54, %v15673_v38  ;;  %v15675_v2 = vld [vmem:[#allocation187_spill] sm:$0xff]  ;;  %v15679_v54 = vld [vmem:[#allocation217_spill] sm:$0xff] }
 0xa7e   : > { %v7526_v1 = vpop.f32.mrf.mxu0 }
 0xa7f   : > { %v13907_v9 = vadd.f32 %v7526_v1, %v7438_v8  ;;  %v7350_v30 = vpop.f32.mrf.mxu2  ;;  %v15676_v8 = vld [vmem:[#allocation186_spill] sm:$0xff] }
 0xa80   : > { %v7351_v23 = vadd.f32 %v7350_v30, %v13488_v33  ;;  %v15677_v62 = vpack.c.bf16 %v15675_v2, %v15676_v8  ;;  %v15681_v2 = vld [vmem:[#allocation120_spill] sm:$0xff] }
 0xa81   : > { %7565 = vmatmul.bf16.gmra.mxu0 %v15668_v59  ;;  %v15682_v8 = vld [vmem:[#allocation56_spill] sm:$0xff] }
 0xa82   : > { %v7439_v4 = vpop.f32.mrf.mxu3  ;;  %7654 = vmatmul.bf16.gmra.mxu1 %v15671_v60  ;;  %v15678_v60 = vld [vmem:[#allocation218_spill] sm:$0xff] }
 0xa83   : > { %v13913_v12 = vadd.f32 %v7439_v4, %v7351_v23  ;;  %v15680_v38 = vpack.c.bf16 %v15678_v60, %v15679_v54 }
 0xa84   : > { %7392 = vmatmul.bf16.gmra.mxu2 %v15674_v47 }
 0xa86   : > { %v13924_v33 = vpop.f32.mrf.mxu0 }
 0xa87   : > { %7481 = vmatmul.bf16.gmra.mxu3 %v15677_v62  ;;  %v7353_v1 = vpop.f32.mrf.mxu2  ;;  %v15683_v62 = vpack.c.bf16 %v15681_v2, %v15682_v8 }
 0xa88   : > { %v7354_v30 = vadd.f32 %v7353_v1, %v13507_v22  ;;  %v15684_v22 = vld [vmem:[#allocation157_spill] sm:$0xff]  ;;  %v15685_v1 = vld [vmem:[#allocation156_spill] sm:$0xff] }
 0xa8a   : > { %v7442_v37 = vpop.f32.mrf.mxu3 }
 0xa8b   : > { %v7443_v23 = vadd.f32 %v7442_v37, %v7354_v30  ;;  %v15686_v30 = vpack.c.bf16 %v15684_v22, %v15685_v1  ;;  %v15687_v37 = vld [vmem:[#allocation189_spill] sm:$0xff]  ;;  %v15690_v1 = vld [vmem:[#allocation220_spill] sm:$0xff] }
 0xa8e   : > { %v7531_v4 = vpop.f32.mrf.mxu0 }
 0xa8f   : > { %v13927_v5 = vadd.f32 %v7531_v4, %v7443_v23  ;;  %v7355_v59 = vpop.f32.mrf.mxu2  ;;  %v15688_v23 = vld [vmem:[#allocation188_spill] sm:$0xff] }
 0xa90   : > { %v7356_v11 = vadd.f32 %v7355_v59, %v13525_v25  ;;  %v15689_v4 = vpack.c.bf16 %v15687_v37, %v15688_v23 }
 0xa91   : > { %7570 = vmatmul.bf16.gmra.mxu0 %v15680_v38 }
 0xa92   : > { %v7444_v10 = vpop.f32.mrf.mxu3  ;;  %7659 = vmatmul.bf16.gmra.mxu1 %v15683_v62 }
 0xa93   : > { %v13933_v47 = vadd.f32 %v7444_v10, %v7356_v11  ;;  %v10194_v10 = vld [vmem:[%s14314_s4 + $0x18] sm:$0xff] }
 0xa94   : > { %7397 = vmatmul.bf16.gmra.mxu2 %v15686_v30  ;;  %7968 = vmatpush.bf16.msrb.mxu0 %v10194_v10  ;;  %v15691_v30 = vld [vmem:[#allocation219_spill] sm:$0xff] }
 0xa95   : > { %v15692_v37 = vpack.c.bf16 %v15690_v1, %v15691_v30 }
 0xa96   : > { %v13944_v25 = vpop.f32.mrf.mxu0 }
 0xa97   : > { %7486 = vmatmul.bf16.gmra.mxu3 %v15689_v4  ;;  %v7358_v59 = vpop.f32.mrf.mxu2  ;;  %v15694_v4 = vld [vmem:[#allocation28_spill] sm:$0xff] }
 0xa98   : > { %v7359_v60 = vadd.f32 %v7358_v59, %v13529_v21  ;;  %v15693_v21 = vld [vmem:[#allocation29_spill] sm:$0xff] }
 0xa99   : > { %v15695_v59 = vpack.c.bf16 %v15693_v21, %v15694_v4 }
 0xa9a   : > { %v7447_v54 = vpop.f32.mrf.mxu3 }
 0xa9b   : > { %v7448_v11 = vadd.f32 %v7447_v54, %v7359_v60  ;;  %v15696_v60 = vld [vmem:[#allocation62_spill] sm:$0xff]  ;;  %v15697_v54 = vld [vmem:[#allocation61_spill] sm:$0xff] }
 0xa9c   : > { %v15698_v10 = vpack.c.bf16 %v15696_v60, %v15697_v54  ;;  %v15701_v60 = vld [vmem:[#allocation11_spill] sm:$0xff] }
 0xa9e   : > { %v7536_v38 = vpop.f32.mrf.mxu0 }
 0xa9f   : > { %v13950_v2 = vadd.f32 %v7536_v38, %v7448_v11  ;;  %v7360_v8 = vpop.f32.mrf.mxu2  ;;  %v15699_v11 = vpack.c.bf16 %v13324_v29, %v13322_v58 }
 0xaa0   : > { %v7361_v62 = vadd.f32 %v7360_v8, %v13554_v3  ;;  %v10206_v3 = vld [vmem:[%s14315_s5 + $0x38] sm:$0xff] }
 0xaa1   : > { %7575 = vmatmul.bf16.gmra.mxu0 %v15692_v37  ;;  %8169 = vmatpush.bf16.msrb.mxu1 %v10206_v3 }
 0xaa2   : > { %v7449_v22 = vpop.f32.mrf.mxu3  ;;  %7664 = vmatmul.bf16.gmra.mxu1 %v15695_v59  ;;  %v15700_v59 = vld [vmem:[#allocation162_spill] sm:$0xff] }
 0xaa3   : > { %v13956_v23 = vadd.f32 %v7449_v22, %v7361_v62  ;;  %v15702_v54 = vpack.c.bf16 %v15700_v59, %v15701_v60  ;;  %v10205_v60 = vld [vmem:[%s14315_s5 + $0x30] sm:$0xff] }
 0xaa4   : > { %7678 = vmatmul.bf16.vlgmr.msrb.gmra.mxu2 %v15698_v10  ;;  %v15703_v10 = vpack.c.bf16 %v13352_v7, %v13350_v16 }
 0xaa5   : > { %8170 = vmatpush.bf16.msrb.mxu1 %v10205_v60 }
 0xaa6   : > { %v13970_v38 = vpop.f32.mrf.mxu0 }
 0xaa7   : > { %7767 = vmatmul.bf16.vlgmr.msrb.gmra.mxu3 %v15699_v11  ;;  %v7363_v8 = vpop.f32.mrf.mxu2 }
 0xaa8   : > { %v7364_v62 = vadd.f32 %v7363_v8, %v13561_v63 }
 0xaaa   : > { %v7452_v22 = vpop.f32.mrf.mxu3 }
 0xaab   : > { %v7453_v1 = vadd.f32 %v7452_v22, %v7364_v62 }
 0xaae   : > { %v7541_v30 = vpop.f32.mrf.mxu0 }
 0xaaf   : > { %v13973_v37 = vadd.f32 %v7541_v30, %v7453_v1  ;;  %v7365_v21 = vpop.f32.mrf.mxu2 }
 0xab0   : > { %v7366_v4 = vadd.f32 %v7365_v21, %v13583_v31  ;;  %v10193_v31 = vld [vmem:[%s14314_s4 + $0x10] sm:$0xff] }
 0xab1   : > { %7969 = vmatpush.bf16.msrb.mxu0 %v10193_v31 }
 0xab2   : > { %v7454_v58 = vpop.f32.mrf.mxu3 }
 0xab3   : > { %v13976_v29 = vadd.f32 %v7454_v58, %v7366_v4  ;;  %v15704_v4 = vld [vmem:[#allocation15_spill] sm:$0xff]  ;;  %v15705_v58 = vld [vmem:[#allocation14_spill] sm:$0xff] }
 0xab4   : > { %7683 = vmatmul.bf16.gmra.mxu2 %v15702_v54  ;;  %v15706_v59 = vpack.c.bf16 %v15704_v4, %v15705_v58  ;;  %v15711_v4 = vpack.c.bf16 %v13405_v53, %v13403_v48 }
 0xab6   : > { %v13984_v63 = vpop.f32.mrf.mxu0 }
 0xab7   : > { %7772 = vmatmul.bf16.gmra.mxu3 %v15703_v10  ;;  %v7368_v11 = vpop.f32.mrf.mxu2 }
 0xab8   : > { %v7369_v3 = vadd.f32 %v7368_v11, %v13587_v43  ;;  %v15707_v43 = vpack.c.bf16 %v13377_v17, %v13375_v27 }
 0xaba   : > { %v7457_v8 = vpop.f32.mrf.mxu3 }
 0xabb   : > { %v7458_v62 = vadd.f32 %v7457_v8, %v7369_v3 }
 0xabe   : > { %v7546_v22 = vpop.f32.mrf.mxu0 }
 0xabf   : > { %v13990_v1 = vadd.f32 %v7546_v22, %v7458_v62  ;;  %v7370_v30 = vpop.f32.mrf.mxu2 }
 0xac0   : > { %v7371_v21 = vadd.f32 %v7370_v30, %v13612_v18  ;;  %v15708_v30 = vld [vmem:[#allocation132_spill] sm:$0xff] }
 0xac2   : > { %v7459_v16 = vpop.f32.mrf.mxu3 }
 0xac3   : > { %v13993_v7 = vadd.f32 %v7459_v16, %v7371_v21  ;;  %v15709_v21 = vld [vmem:[#allocation19_spill] sm:$0xff] }
 0xac4   : > { %7688 = vmatmul.bf16.gmra.mxu2 %v15706_v59  ;;  %v15710_v16 = vpack.c.bf16 %v15708_v30, %v15709_v21 }
 0xac6   : > { %v14004_v54 = vpop.f32.mrf.mxu0 }
 0xac7   : > { %7777 = vmatmul.bf16.gmra.mxu3 %v15707_v43  ;;  %v7373_v10 = vpop.f32.mrf.mxu2 }
 0xac8   : > { %v7374_v18 = vadd.f32 %v7373_v10, %v13619_v39 }
 0xaca   : > { %v7462_v11 = vpop.f32.mrf.mxu3 }
 0xacb   : > { %v7463_v3 = vadd.f32 %v7462_v11, %v7374_v18 }
 0xace   : > { %v7551_v8 = vpop.f32.mrf.mxu0 }
 0xacf   : > { %v14007_v62 = vadd.f32 %v7551_v8, %v7463_v3  ;;  %v7375_v31 = vpop.f32.mrf.mxu2  ;;  %v15712_v8 = vld [vmem:[#allocation22_spill] sm:$0xff] }
 0xad0   : > { %v7376_v22 = vadd.f32 %v7375_v31, %v13641_v13  ;;  %v10192_v13 = vld [vmem:[%s14314_s4 + $0x8] sm:$0xff]  ;;  %v15713_v31 = vld [vmem:[#allocation198_spill] sm:$0xff] }
 0xad1   : > { %7970 = vmatpush.bf16.msrb.mxu0 %v10192_v13  ;;  %v15716_v13 = vld [vmem:[#allocation23_spill] sm:$0xff] }
 0xad2   : > { %v7464_v27 = vpop.f32.mrf.mxu3 }
 0xad3   : > { %v14010_v17 = vadd.f32 %v7464_v27, %v7376_v22  ;;  %v15714_v22 = vpack.c.bf16 %v15712_v8, %v15713_v31  ;;  %v10204_v27 = vld [vmem:[%s14315_s5 + $0x28] sm:$0xff] }
 0xad4   : > { %7693 = vmatmul.bf16.gmra.mxu2 %v15710_v16  ;;  %8171 = vmatpush.bf16.msrb.mxu1 %v10204_v27 }
 0xad6   : > { %v14018_v39 = vpop.f32.mrf.mxu0 }
 0xad7   : > { %7782 = vmatmul.bf16.gmra.mxu3 %v15711_v4  ;;  %v7378_v58 = vpop.f32.mrf.mxu2 }
 0xad8   : > { %v7379_v59 = vadd.f32 %v7378_v58, %v13645_v44  ;;  %v15715_v44 = vpack.c.bf16 %v13436_v41, %v13434_v52 }
 0xada   : > { %v7467_v43 = vpop.f32.mrf.mxu3 }
 0xadb   : > { %v7468_v60 = vadd.f32 %v7467_v43, %v7379_v59 }
 0xade   : > { %v7556_v10 = vpop.f32.mrf.mxu0 }
 0xadf   : > { %v14024_v18 = vadd.f32 %v7556_v10, %v7468_v60  ;;  %v7380_v11 = vpop.f32.mrf.mxu2  ;;  %v15717_v10 = vpack.c.bf16 %v13040_v46, %v15716_v13 }
 0xae0   : > { %v7381_v3 = vadd.f32 %v7380_v11, %v13670_v20  ;;  %v15718_v11 = vld [vmem:[#allocation50_spill] sm:$0xff] }
 0xae2   : > { %v7469_v48 = vpop.f32.mrf.mxu3 }
 0xae3   : > { %v14027_v53 = vadd.f32 %v7469_v48, %v7381_v3  ;;  %v15719_v3 = vpack.c.bf16 %v13482_v55, %v15718_v11 }
 0xae4   : > { %7698 = vmatmul.bf16.gmra.mxu2 %v15714_v22 }
 0xae6   : > { %v14038_v30 = vpop.f32.mrf.mxu0 }
 0xae7   : > { %7787 = vmatmul.bf16.gmra.mxu3 %v15715_v44  ;;  %v7383_v21 = vpop.f32.mrf.mxu2 }
 0xae8   : > { %v7384_v20 = vadd.f32 %v7383_v21, %v13677_v19 }
 0xaea   : > { %v7472_v16 = vpop.f32.mrf.mxu3 }
 0xaeb   : > { %v7473_v4 = vadd.f32 %v7472_v16, %v7384_v20  ;;  %v15720_v16 = vld [vmem:[#allocation26_spill] sm:$0xff] }
 0xaee   : > { %v7561_v58 = vpop.f32.mrf.mxu0 }
 0xaef   : > { %v14041_v59 = vadd.f32 %v7561_v58, %v7473_v4  ;;  %v7385_v43 = vpop.f32.mrf.mxu2  ;;  %v15721_v4 = vld [vmem:[#allocation229_spill] sm:$0xff] }
 0xaf0   : > { %v7386_v60 = vadd.f32 %v7385_v43, %v13699_v15  ;;  %v10191_v15 = vld [vmem:[%s14314_s4] sm:$0xff]  ;;  %v15722_v58 = vpack.c.bf16 %v15720_v16, %v15721_v4  ;;  %v15724_v43 = vld [vmem:[#allocation47_spill] sm:$0xff]  ;;  %v15729_v16 = vld [vmem:[#allocation53_spill] sm:$0xff] }
 0xaf1   : > { %7971 = vmatpush.bf16.msrb.mxu0 %v10191_v15  ;;  %v15730_v4 = vld [vmem:[#allocation102_spill] sm:$0xff] }
 0xaf2   : > { %v7474_v52 = vpop.f32.mrf.mxu3 }
 0xaf3   : > { %v14044_v41 = vadd.f32 %v7474_v52, %v7386_v60  ;;  %v10203_v52 = vld [vmem:[%s14315_s5 + $0x20] sm:$0xff] }
 0xaf4   : > { %7703 = vmatmul.bf16.gmra.mxu2 %v15717_v10  ;;  %8172 = vmatpush.bf16.msrb.mxu1 %v10203_v52 }
 0xaf6   : > { %v14052_v19 = vpop.f32.mrf.mxu0 }
 0xaf7   : > { %7792 = vmatmul.bf16.gmra.mxu3 %v15719_v3  ;;  %v7388_v48 = vpop.f32.mrf.mxu2 }
 0xaf8   : > { %v7389_v8 = vadd.f32 %v7388_v48, %v13703_v51  ;;  %v15723_v51 = vld [vmem:[#allocation103_spill] sm:$0xff] }
 0xaf9   : > { %v15725_v60 = vpack.c.bf16 %v15723_v51, %v15724_v43 }
 0xafa   : > { %v7477_v31 = vpop.f32.mrf.mxu3 }
 0xafb   : > { %v7478_v22 = vadd.f32 %v7477_v31, %v7389_v8 }
 0xafe   : > { %v7566_v44 = vpop.f32.mrf.mxu0 }
 0xaff   : > { %v14058_v27 = vadd.f32 %v7566_v44, %v7478_v22  ;;  %v7390_v46 = vpop.f32.mrf.mxu2 }
 0xb00   : > { %v7391_v21 = vadd.f32 %v7390_v46, %v13728_v36  ;;  %v15726_v46 = vld [vmem:[#allocation78_spill] sm:$0xff] }
 0xb02   : > { %v7479_v55 = vpop.f32.mrf.mxu3 }
 0xb03   : > { %v14061_v20 = vadd.f32 %v7479_v55, %v7391_v21  ;;  %v15727_v21 = vld [vmem:[#allocation27_spill] sm:$0xff] }
 0xb04   : > { %7708 = vmatmul.bf16.gmra.mxu2 %v15722_v58  ;;  %v15728_v55 = vpack.c.bf16 %v15726_v46, %v15727_v21  ;;  %v15731_v58 = vpack.c.bf16 %v15729_v16, %v15730_v4  ;;  %v15735_v46 = vld [vmem:[#allocation51_spill] sm:$0xff]  ;;  %v15736_v21 = vld [vmem:[#allocation54_spill] sm:$0xff] }
 0xb06   : > { %v14072_v13 = vpop.f32.mrf.mxu0 }
 0xb07   : > { %7797 = vmatmul.bf16.gmra.mxu3 %v15725_v60  ;;  %v7393_v10 = vpop.f32.mrf.mxu2 }
 0xb08   : > { %v7394_v36 = vadd.f32 %v7393_v10, %v13735_v56 }
 0xb0a   : > { %v7482_v11 = vpop.f32.mrf.mxu3 }
 0xb0b   : > { %v7483_v3 = vadd.f32 %v7482_v11, %v7394_v36 }
 0xb0e   : > { %v7571_v48 = vpop.f32.mrf.mxu0 }
 0xb0f   : > { %v14075_v8 = vadd.f32 %v7571_v48, %v7483_v3  ;;  %v7395_v31 = vpop.f32.mrf.mxu2 }
 0xb10   : > { %v7396_v22 = vadd.f32 %v7395_v31, %v13757_v28  ;;  %v15732_v31 = vld [vmem:[#allocation137_spill] sm:$0xff] }
 0xb12   : > { %v7484_v15 = vpop.f32.mrf.mxu3 }
 0xb13   : > { %v14078_v44 = vadd.f32 %v7484_v15, %v7396_v22  ;;  %v15733_v22 = vld [vmem:[#allocation79_spill] sm:$0xff] }
 0xb14   : > { %7713 = vmatmul.bf16.gmra.mxu2 %v15728_v55  ;;  %v15734_v15 = vpack.c.bf16 %v15732_v31, %v15733_v22  ;;  %v15737_v55 = vpack.c.bf16 %v15735_v46, %v15736_v21  ;;  %v15741_v22 = vld [vmem:[#allocation105_spill] sm:$0xff] }
 0xb16   : > { %v14086_v56 = vpop.f32.mrf.mxu0 }
 0xb17   : > { %7802 = vmatmul.bf16.gmra.mxu3 %v15731_v58  ;;  %v7398_v51 = vpop.f32.mrf.mxu2 }
 0xb18   : > { %v7399_v43 = vadd.f32 %v7398_v51, %v13764_v34  ;;  %v10202_v34 = vld [vmem:[%s14315_s5 + $0x18] sm:$0xff] }
 0xb19   : > { %8173 = vmatpush.bf16.msrb.mxu1 %v10202_v34 }
 0xb1a   : > { %v7487_v60 = vpop.f32.mrf.mxu3 }
 0xb1b   : > { %v7488_v52 = vadd.f32 %v7487_v60, %v7399_v43 }
 0xb1e   : > { %v7576_v10 = vpop.f32.mrf.mxu0 }
 0xb1f   : > { %v14089_v28 = vadd.f32 %v7576_v10, %v7488_v52  ;;  %v7400_v36 = vpop.f32.mrf.mxu2 }
 0xb20   : > { %v7401_v11 = vadd.f32 %v7400_v36, %v13789_v45 }
 0xb22   : > { %v7489_v3 = vpop.f32.mrf.mxu3 }
 0xb23   : > { %v14092_v48 = vadd.f32 %v7489_v3, %v7401_v11  ;;  %v15738_v11 = vld [vmem:[#allocation31_spill] sm:$0xff]  ;;  %v15739_v3 = vld [vmem:[#allocation30_spill] sm:$0xff] }
 0xb24   : > { %7718 = vmatmul.bf16.gmra.mxu2 %v15734_v15  ;;  %v15740_v31 = vpack.c.bf16 %v15738_v11, %v15739_v3  ;;  %v15742_v15 = vld [vmem:[#allocation106_spill] sm:$0xff]  ;;  %v15744_v11 = vld [vmem:[#allocation84_spill] sm:$0xff]  ;;  %v15745_v3 = vld [vmem:[#allocation85_spill] sm:$0xff] }
 0xb25   : > { %v15743_v46 = vpack.c.bf16 %v15741_v22, %v15742_v15 }
 0xb27   : > { %7807 = vmatmul.bf16.gmra.mxu3 %v15737_v55  ;;  %v7679_v16 = vpop.f32.mrf.mxu2  ;;  %v7610_v55 = vpop.f32.mrf.mxu1 }
 0xb28   : > { %v7680_v45 = vadd.f32 %v7679_v16, %v13795_v49 }
 0xb2a   : > { %v7768_v4 = vpop.f32.mrf.mxu3 }
 0xb2b   : > { %v7769_v51 = vadd.f32 %v7768_v4, %v7680_v45 }
 0xb2d   : > { %v7848_v10 = vmax.f32 %v7769_v51, 0.0 }
 0xb2f   : > { %v7681_v58 = vpop.f32.mrf.mxu2  ;;  %v7612_v51 = vpop.f32.mrf.mxu1 }
 0xb30   : > { %v7682_v43 = vadd.f32 %v7681_v58, %v13810_v57 }
 0xb32   : > { %v7770_v60 = vpop.f32.mrf.mxu3 }
 0xb33   : > { %v7771_v52 = vadd.f32 %v7770_v60, %v7682_v43 }
 0xb34   : > { %7723 = vmatmul.bf16.gmra.mxu2 %v15740_v31  ;;  %v15746_v31 = vpack.c.bf16 %v15744_v11, %v15745_v3  ;;  %v15750_v11 = vld [vmem:[#allocation36_spill] sm:$0xff]  ;;  %v15751_v3 = vld [vmem:[#allocation97_spill] sm:$0xff] }
 0xb35   : > { %v7849_v36 = vmax.f32 %v7771_v52, 0.0 }
 0xb37   : > { %7812 = vmatmul.bf16.gmra.mxu3 %v15743_v46  ;;  %v7897_v21 = vpack.c.bf16 %v7849_v36, %v7848_v10  ;;  %v7684_v34 = vpop.f32.mrf.mxu2  ;;  %v15747_v10 = vld [vmem:[#allocation21_spill] sm:$0xff] }
 0xb38   : > { %v7685_v16 = vadd.f32 %v7684_v34, %v13816_v42  ;;  %v15748_v36 = vld [vmem:[#allocation57_spill] sm:$0xff]  ;;  %v10201_v42 = vld [vmem:[%s14315_s5 + $0x10] sm:$0xff] }
 0xb39   : > { %7972 = vmatmul.bf16.vlgmr.msrb.gmra.mxu0 %v7897_v21  ;;  %v15749_v22 = vpack.c.bf16 %v15747_v10, %v15748_v36  ;;  %8174 = vmatpush.bf16.msrb.mxu1 %v10201_v42  ;;  %v7615_v21 = vpop.f32.mrf.mxu1  ;;  %v15754_v10 = vld [vmem:[#allocation89_spill] sm:$0xff] }
 0xb3a   : > { %v7773_v49 = vpop.f32.mrf.mxu3 }
 0xb3b   : > { %v7774_v4 = vadd.f32 %v7773_v49, %v7685_v16 }
 0xb3d   : > { %v7850_v60 = vmax.f32 %v7774_v4, 0.0 }
 0xb3f   : > { %v7686_v57 = vpop.f32.mrf.mxu2 }
 0xb40   : > { %v7687_v45 = vadd.f32 %v7686_v57, %v13834_v24 }
 0xb42   : > { %v7775_v58 = vpop.f32.mrf.mxu3 }
 0xb43   : > { %v7776_v43 = vadd.f32 %v7775_v58, %v7687_v45 }
 0xb44   : > { %7728 = vmatmul.bf16.gmra.mxu2 %v15746_v31  ;;  %v15752_v31 = vpack.c.bf16 %v15750_v11, %v15751_v3  ;;  %v15757_v11 = vld [vmem:[#allocation88_spill] sm:$0xff] }
 0xb45   : > { %v7851_v52 = vmax.f32 %v7776_v43, 0.0 }
 0xb47   : > { %7817 = vmatmul.bf16.gmra.mxu3 %v15749_v22  ;;  %v7898_v15 = vpack.c.bf16 %v7851_v52, %v7850_v60  ;;  %v7689_v46 = vpop.f32.mrf.mxu2  ;;  %v7617_v60 = vpop.f32.mrf.mxu1  ;;  %v15753_v52 = vld [vmem:[#allocation55_spill] sm:$0xff] }
 0xb48   : > { %v7690_v34 = vadd.f32 %v7689_v46, %v13840_v61  ;;  %v15755_v36 = vpack.c.bf16 %v15753_v52, %v15754_v10 }
 0xb49   : > { %7977 = vmatmul.bf16.gmra.mxu0 %v7898_v15 }
 0xb4a   : > { %v7778_v24 = vpop.f32.mrf.mxu3 }
 0xb4b   : > { %v7779_v16 = vadd.f32 %v7778_v24, %v7690_v34 }
 0xb4d   : > { %v7852_v58 = vmax.f32 %v7779_v16, 0.0 }
 0xb4f   : > { %v7691_v49 = vpop.f32.mrf.mxu2 }
 0xb50   : > { %v7692_v57 = vadd.f32 %v7691_v49, %v13855_v32  ;;  %v7620_v32 = vpop.f32.mrf.mxu1 }
 0xb52   : > { %v7780_v4 = vpop.f32.mrf.mxu3 }
 0xb53   : > { %v7781_v45 = vadd.f32 %v7780_v4, %v7692_v57 }
 0xb54   : > { %7733 = vmatmul.bf16.gmra.mxu2 %v15752_v31 }
 0xb55   : > { %v7853_v43 = vmax.f32 %v7781_v45, 0.0  ;;  %v15756_v45 = vld [vmem:[#allocation87_spill] sm:$0xff] }
 0xb56   : > { %v15758_v3 = vpack.c.bf16 %v15756_v45, %v15757_v11  ;;  %v15762_v45 = vld [vmem:[#allocation99_spill] sm:$0xff] }
 0xb57   : > { %7822 = vmatmul.bf16.gmra.mxu3 %v15755_v36  ;;  %v7899_v22 = vpack.c.bf16 %v7853_v43, %v7852_v58  ;;  %v7694_v42 = vpop.f32.mrf.mxu2  ;;  %v15759_v58 = vld [vmem:[#allocation108_spill] sm:$0xff]  ;;  %v7611_v36 = vadd.f32 %v7610_v55, %v13884_v6 }
 0xb58   : > { %v7695_v15 = vadd.f32 %v7694_v42, %v13861_v40  ;;  %v15760_v43 = vpack.c.bf16 %v13693_v50, %v15759_v58  ;;  %v10200_v40 = vld [vmem:[%s14315_s5 + $0x8] sm:$0xff] }
 0xb59   : > { %7982 = vmatmul.bf16.gmra.mxu0 %v7899_v22  ;;  %8175 = vmatpush.bf16.msrb.mxu1 %v10200_v40  ;;  %v7524_v22 = vadd.f32 %v13901_v35, %v13890_v0  ;;  %v15765_v58 = vld [vmem:[#allocation107_spill] sm:$0xff] }
 0xb5a   : > { %v7783_v61 = vpop.f32.mrf.mxu3 }
 0xb5b   : > { %v7784_v24 = vadd.f32 %v7783_v61, %v7695_v15  ;;  %v7613_v61 = vadd.f32 %v7612_v51, %v7524_v22  ;;  %v7616_v51 = vadd.f32 %v7615_v21, %v13907_v9 }
 0xb5d   : > { %v7854_v57 = vmax.f32 %v7784_v24, 0.0 }
 0xb5f   : > { %v7696_v46 = vpop.f32.mrf.mxu2 }
 0xb60   : > { %v7697_v34 = vadd.f32 %v7696_v46, %v13879_v14  ;;  %v7622_v14 = vpop.f32.mrf.mxu1 }
 0xb62   : > { %v7785_v49 = vpop.f32.mrf.mxu3 }
 0xb63   : > { %v7786_v16 = vadd.f32 %v7785_v49, %v7697_v34 }
 0xb64   : > { %7738 = vmatmul.bf16.gmra.mxu2 %v15758_v3  ;;  %v15764_v3 = vld [vmem:[#allocation58_spill] sm:$0xff] }
 0xb65   : > { %v7855_v4 = vmax.f32 %v7786_v16, 0.0  ;;  %v15766_v6 = vpack.c.bf16 %v15764_v3, %v15765_v58 }
 0xb67   : > { %7827 = vmatmul.bf16.gmra.mxu3 %v15760_v43  ;;  %v7900_v31 = vpack.c.bf16 %v7855_v4, %v7854_v57  ;;  %v7699_v52 = vpop.f32.mrf.mxu2  ;;  %v15761_v4 = vld [vmem:[#allocation98_spill] sm:$0xff]  ;;  %v7529_v43 = vadd.f32 %v13924_v33, %v13913_v12 }
 0xb68   : > { %v7700_v42 = vadd.f32 %v7699_v52, %v7611_v36  ;;  %v7625_v49 = vpop.f32.mrf.mxu1  ;;  %v15763_v11 = vpack.c.bf16 %v15761_v4, %v15762_v45  ;;  %v10199_v12 = vld [vmem:[%s14315_s5] sm:$0xff]  ;;  %v7621_v45 = vadd.f32 %v7620_v32, %v13927_v5 }
 0xb69   : > { %7987 = vmatmul.bf16.gmra.mxu0 %v7900_v31  ;;  %v7618_v52 = vadd.f32 %v7617_v60, %v7529_v43  ;;  %8176 = vmatpush.bf16.msrb.mxu1 %v10199_v12 }
 0xb6a   : > { %v7788_v10 = vpop.f32.mrf.mxu3 }
 0xb6b   : > { %v7789_v50 = vadd.f32 %v7788_v10, %v7700_v42 }
 0xb6d   : > { %v7856_v16 = vmax.f32 %v7789_v50, 0.0 }
 0xb6f   : > { %v7701_v15 = vpop.f32.mrf.mxu2 }
 0xb70   : > { %v7702_v46 = vadd.f32 %v7701_v15, %v7613_v61  ;;  %v7627_v40 = vpop.f32.mrf.mxu1 }
 0xb72   : > { %v7790_v24 = vpop.f32.mrf.mxu3 }
 0xb73   : > { %v7791_v34 = vadd.f32 %v7790_v24, %v7702_v46  ;;  %v15767_v46 = vld [vmem:[#allocation43_spill] sm:$0xff]  ;;  %v15768_v24 = vld [vmem:[#allocation46_spill] sm:$0xff] }
 0xb74   : > { %7743 = vmatmul.bf16.gmra.mxu2 %v15763_v11  ;;  %v7534_v11 = vadd.f32 %v13944_v25, %v13933_v47 }
 0xb75   : > { %v7857_v57 = vmax.f32 %v7791_v34, 0.0  ;;  %v15769_v34 = vpack.c.bf16 %v15767_v46, %v15768_v24 }
 0xb76   : > { %v7623_v58 = vadd.f32 %v7622_v14, %v7534_v11  ;;  %v7626_v14 = vadd.f32 %v7625_v49, %v13950_v2  ;;  %v14177_v49 = vpop.f32.mrf.mxu0 }
 0xb77   : > { %7832 = vmatmul.bf16.gmra.mxu3 %v15766_v6  ;;  %v7901_v55 = vpack.c.bf16 %v7857_v57, %v7856_v16  ;;  %v7704_v0 = vpop.f32.mrf.mxu2  ;;  %v15770_v16 = vld [vmem:[#allocation90_spill] sm:$0xff]  ;;  %v15771_v57 = vld [vmem:[#allocation59_spill] sm:$0xff] }
 0xb78   : > { %v7705_v31 = vadd.f32 %v7704_v0, %v7616_v51  ;;  %v15772_v9 = vpack.c.bf16 %v15770_v16, %v15771_v57  ;;  %v7630_v33 = vpop.f32.mrf.mxu1 }
 0xb79   : > { %7992 = vmatmul.bf16.gmra.mxu0 %v7901_v55  ;;  %v7631_v2 = vadd.f32 %v7630_v33, %v13973_v37  ;;  %v7549_v33 = vadd.f32 %v14004_v54, %v13993_v7 }
 0xb7a   : > { %v7793_v35 = vpop.f32.mrf.mxu3 }
 0xb7b   : > { %v7794_v36 = vadd.f32 %v7793_v35, %v7705_v31 }
 0xb7d   : > { %v7858_v15 = vmax.f32 %v7794_v36, 0.0  ;;  %v15774_v36 = vld [vmem:[#allocation101_spill] sm:$0xff] }
 0xb7f   : > { %v7706_v10 = vpop.f32.mrf.mxu2 }
 0xb80   : > { %v7707_v22 = vadd.f32 %v7706_v10, %v7618_v52  ;;  %v7632_v51 = vpop.f32.mrf.mxu1  ;;  %v15773_v10 = vld [vmem:[#allocation100_spill] sm:$0xff] }
 0xb82   : > { %v7795_v42 = vpop.f32.mrf.mxu3 }
 0xb83   : > { %v7796_v61 = vadd.f32 %v7795_v42, %v7707_v22  ;;  %v15775_v22 = vpack.c.bf16 %v15773_v10, %v15774_v36  ;;  %v15776_v42 = vld [vmem:[#allocation34_spill] sm:$0xff]  ;;  %v14179_v36 = vld [vmem:[#allocation4 + $0xd] ss:$0 sm:$0xff] }
 0xb84   : > { %7748 = vmatmul.bf16.gmra.mxu2 %v15769_v34  ;;  %v15777_v5 = vpack.c.bf16 %v13783_v26, %v15776_v42 }
 0xb85   : > { %v7859_v50 = vmax.f32 %v7796_v61, 0.0  ;;  %v7539_v61 = vadd.f32 %v13970_v38, %v13956_v23  ;;  %v7544_v23 = vadd.f32 %v13984_v63, %v13976_v29 }
 0xb87   : > { %7837 = vmatmul.bf16.gmra.mxu3 %v15772_v9  ;;  %v7902_v21 = vpack.c.bf16 %v7859_v50, %v7858_v15  ;;  %v7709_v60 = vpop.f32.mrf.mxu2  ;;  %v7628_v46 = vadd.f32 %v7627_v40, %v7539_v61  ;;  %v7633_v40 = vadd.f32 %v7632_v51, %v7544_v23 }
 0xb88   : > { %v7710_v3 = vadd.f32 %v7709_v60, %v7621_v45  ;;  %v7635_v15 = vpop.f32.mrf.mxu1 }
 0xb89   : > { %7997 = vmatmul.bf16.gmra.mxu0 %v7902_v21  ;;  %v7636_v63 = vadd.f32 %v7635_v15, %v13990_v1 }
 0xb8a   : > { %v7798_v4 = vpop.f32.mrf.mxu3 }
 0xb8b   : > { %v7799_v55 = vadd.f32 %v7798_v4, %v7710_v3 }
 0xb8d   : > { %v7860_v31 = vmax.f32 %v7799_v55, 0.0 }
 0xb8f   : > { %v7711_v6 = vpop.f32.mrf.mxu2 }
 0xb90   : > { %v7712_v0 = vadd.f32 %v7711_v6, %v7623_v58  ;;  %v7637_v12 = vpop.f32.mrf.mxu1 }
 0xb92   : > { %v7800_v35 = vpop.f32.mrf.mxu3 }
 0xb93   : > { %v7801_v43 = vadd.f32 %v7800_v35, %v7712_v0 }
 0xb94   : > { %7753 = vmatmul.bf16.gmra.mxu2 %v15775_v22 }
 0xb95   : > { %v7861_v52 = vmax.f32 %v7801_v43, 0.0 }
 0xb97   : > { %7842 = vmatmul.bf16.gmra.mxu3 %v15777_v5  ;;  %v7903_v32 = vpack.c.bf16 %v7861_v52, %v7860_v31  ;;  %v7714_v47 = vpop.f32.mrf.mxu2  ;;  %v7638_v5 = vadd.f32 %v7637_v12, %v7549_v33 }
 0xb98   : > { %v7715_v50 = vadd.f32 %v7714_v47, %v7626_v14  ;;  %v7640_v11 = vpop.f32.mrf.mxu1 }
 0xb99   : > { %8002 = vmatmul.bf16.gmra.mxu0 %v7903_v32 }
 0xb9a   : > { %v7803_v25 = vpop.f32.mrf.mxu3 }
 0xb9b   : > { %v7804_v34 = vadd.f32 %v7803_v25, %v7715_v50 }
 0xb9d   : > { %v7862_v21 = vmax.f32 %v7804_v34, 0.0 }
 0xb9f   : > { %v7716_v24 = vpop.f32.mrf.mxu2 }
 0xba0   : > { %v7717_v16 = vadd.f32 %v7716_v24, %v7628_v46  ;;  %v7642_v29 = vpop.f32.mrf.mxu1 }
 0xba2   : > { %v7805_v57 = vpop.f32.mrf.mxu3 }
 0xba3   : > { %v7806_v9 = vadd.f32 %v7805_v57, %v7717_v16 }
 0xba5   : > { %v7863_v26 = vmax.f32 %v7806_v9, 0.0 }
 0xba7   : > { %v7904_v60 = vpack.c.bf16 %v7863_v26, %v7862_v21  ;;  %v7719_v4 = vpop.f32.mrf.mxu2  ;;  %v7641_v21 = vadd.f32 %v7640_v11, %v14007_v62  ;;  %v7554_v26 = vadd.f32 %v14018_v39, %v14010_v17 }
 0xba8   : > { %v7720_v38 = vadd.f32 %v7719_v4, %v7631_v2  ;;  %v7645_v16 = vpop.f32.mrf.mxu1 }
 0xba9   : > { %8007 = vmatmul.bf16.gmra.mxu0 %v7904_v60  ;;  %v7643_v2 = vadd.f32 %v7642_v29, %v7554_v26 }
 0xbaa   : > { %v7808_v45 = vpop.f32.mrf.mxu3 }
 0xbab   : > { %v7809_v58 = vadd.f32 %v7808_v45, %v7720_v38 }
 0xbad   : > { %v7864_v35 = vmax.f32 %v7809_v58, 0.0 }
 0xbaf   : > { %v7721_v3 = vpop.f32.mrf.mxu2 }
 0xbb0   : > { %v7722_v6 = vadd.f32 %v7721_v3, %v7633_v40  ;;  %v7647_v4 = vpop.f32.mrf.mxu1 }
 0xbb2   : > { %v7810_v55 = vpop.f32.mrf.mxu3 }
 0xbb3   : > { %v7811_v0 = vadd.f32 %v7810_v55, %v7722_v6 }
 0xbb5   : > { %v7865_v43 = vmax.f32 %v7811_v0, 0.0 }
 0xbb6   : > { %v7973_v31 = vpop.f32.mrf.mxu0 }
 0xbb7   : > { %v7905_v52 = vpack.c.bf16 %v7865_v43, %v7864_v35  ;;  %v7724_v10 = vpop.f32.mrf.mxu2  ;;  %v7974_v51 = vadd.f32 %v14179_v36, %v7973_v31 }
 0xbb8   : > { %v7725_v22 = vadd.f32 %v7724_v10, %v7636_v63  ;;  %v7650_v43 = vpop.f32.mrf.mxu1  ;;  %v7646_v10 = vadd.f32 %v7645_v16, %v14024_v18 }
 0xbb9   : > { %8012 = vmatmul.bf16.gmra.mxu0 %v7905_v52  ;;  %v8053_v25 = vmax.f32 %v7974_v51, 0.0 }
 0xbba   : > { %v7813_v37 = vpop.f32.mrf.mxu3 }
 0xbbb   : > { %v7814_v14 = vadd.f32 %v7813_v37, %v7725_v22  ;;  %v7559_v37 = vadd.f32 %v14038_v30, %v14027_v53 }
 0xbbd   : > { %v7866_v1 = vmax.f32 %v7814_v14, 0.0  ;;  %v7648_v51 = vadd.f32 %v7647_v4, %v7559_v37 }
 0xbbe   : > { %v7975_v42 = vpop.f32.mrf.mxu0 }
 0xbbf   : > { %v7976_v32 = vadd.f32 %v14179_v36, %v7975_v42  ;;  %v7726_v47 = vpop.f32.mrf.mxu2 }
 0xbc0   : > { %v7727_v50 = vadd.f32 %v7726_v47, %v7638_v5 }
 0xbc1   : > { %v8054_v61 = vmax.f32 %v7976_v32, 0.0 }
 0xbc2   : > { %v7815_v46 = vpop.f32.mrf.mxu3 }
 0xbc3   : > { %v8102_v24 = vpack.c.bf16 %v8054_v61, %v8053_v25  ;;  %v7816_v34 = vadd.f32 %v7815_v46, %v7727_v50  ;;  %v7652_v61 = vpop.f32.mrf.mxu1 }
 0xbc5   : > { %v7867_v15 = vmax.f32 %v7816_v34, 0.0  ;;  %8177 = vmatmul.bf16.vlgmr.msrb.gmra.mxu1 %v8102_v24 }
 0xbc6   : > { %v7978_v7 = vpop.f32.mrf.mxu0 }
 0xbc7   : > { %v7906_v54 = vpack.c.bf16 %v7867_v15, %v7866_v1  ;;  %v7729_v57 = vpop.f32.mrf.mxu2  ;;  %v7979_v12 = vadd.f32 %v14179_v36, %v7978_v7  ;;  %v7651_v1 = vadd.f32 %v7650_v43, %v14041_v59  ;;  %v7564_v15 = vadd.f32 %v14052_v19, %v14044_v41 }
 0xbc8   : > { %v7730_v60 = vadd.f32 %v7729_v57, %v7641_v21 }
 0xbc9   : > { %8017 = vmatmul.bf16.gmra.mxu0 %v7906_v54  ;;  %v8055_v40 = vmax.f32 %v7979_v12, 0.0  ;;  %v7653_v21 = vadd.f32 %v7652_v61, %v7564_v15 }
 0xbca   : > { %v7818_v9 = vpop.f32.mrf.mxu3 }
 0xbcb   : > { %v7819_v3 = vadd.f32 %v7818_v9, %v7730_v60  ;;  %v7655_v7 = vpop.f32.mrf.mxu1 }
 0xbcd   : > { %v7868_v62 = vmax.f32 %v7819_v3, 0.0 }
 0xbce   : > { %v7980_v45 = vpop.f32.mrf.mxu0 }
 0xbcf   : > { %v7981_v23 = vadd.f32 %v14179_v36, %v7980_v45  ;;  %v7731_v38 = vpop.f32.mrf.mxu2 }
 0xbd0   : > { %v7732_v6 = vadd.f32 %v7731_v38, %v7643_v2 }
 0xbd1   : > { %v8056_v58 = vmax.f32 %v7981_v23, 0.0 }
 0xbd2   : > { %v7820_v55 = vpop.f32.mrf.mxu3 }
 0xbd3   : > { %v7821_v0 = vadd.f32 %v7820_v55, %v7732_v6  ;;  %v8103_v35 = vpack.c.bf16 %v8056_v58, %v8055_v40  ;;  %v7657_v41 = vpop.f32.mrf.mxu1 }
 0xbd5   : > { %v7869_v11 = vmax.f32 %v7821_v0, 0.0  ;;  %8182 = vmatmul.bf16.gmra.mxu1 %v8103_v35  ;;  %v7656_v0 = vadd.f32 %v7655_v7, %v14058_v27  ;;  %v7569_v35 = vadd.f32 %v14072_v13, %v14061_v20 }
 0xbd6   : > { %v7983_v17 = vpop.f32.mrf.mxu0 }
 0xbd7   : > { %v7907_v39 = vpack.c.bf16 %v7869_v11, %v7868_v62  ;;  %v7734_v31 = vpop.f32.mrf.mxu2  ;;  %v7984_v29 = vadd.f32 %v14179_v36, %v7983_v17 }
 0xbd8   : > { %v7735_v63 = vadd.f32 %v7734_v31, %v7646_v10 }
 0xbd9   : > { %8022 = vmatmul.bf16.gmra.mxu0 %v7907_v39  ;;  %v8057_v5 = vmax.f32 %v7984_v29, 0.0  ;;  %v7658_v39 = vadd.f32 %v7657_v41, %v7569_v35 }
 0xbda   : > { %v7823_v52 = vpop.f32.mrf.mxu3 }
 0xbdb   : > { %v7824_v32 = vadd.f32 %v7823_v52, %v7735_v63  ;;  %v7660_v31 = vpop.f32.mrf.mxu1 }
 0xbdd   : > { %v7870_v18 = vmax.f32 %v7824_v32, 0.0 }
 0xbde   : > { %v7985_v33 = vpop.f32.mrf.mxu0 }
 0xbdf   : > { %v7986_v22 = vadd.f32 %v14179_v36, %v7985_v33  ;;  %v7736_v42 = vpop.f32.mrf.mxu2 }
 0xbe0   : > { %v7737_v25 = vadd.f32 %v7736_v42, %v7648_v51 }
 0xbe1   : > { %v8058_v47 = vmax.f32 %v7986_v22, 0.0 }
 0xbe2   : > { %v7825_v14 = vpop.f32.mrf.mxu3 }
 0xbe3   : > { %v7826_v50 = vadd.f32 %v7825_v14, %v7737_v25  ;;  %v8104_v46 = vpack.c.bf16 %v8058_v47, %v8057_v5  ;;  %v7662_v47 = vpop.f32.mrf.mxu1  ;;  %v7661_v25 = vadd.f32 %v7660_v31, %v14075_v8  ;;  %v7574_v14 = vadd.f32 %v14086_v56, %v14078_v44 }
 0xbe5   : > { %v7871_v24 = vmax.f32 %v7826_v50, 0.0  ;;  %8187 = vmatmul.bf16.gmra.mxu1 %v8104_v46 }
 0xbe6   : > { %v7988_v53 = vpop.f32.mrf.mxu0 }
 0xbe7   : > { %v7908_v30 = vpack.c.bf16 %v7871_v24, %v7870_v18  ;;  %v7739_v34 = vpop.f32.mrf.mxu2  ;;  %v7989_v54 = vadd.f32 %v14179_v36, %v7988_v53  ;;  %v7663_v18 = vadd.f32 %v7662_v47, %v7574_v14 }
 0xbe8   : > { %v7740_v57 = vadd.f32 %v7739_v34, %v7651_v1 }
 0xbe9   : > { %8027 = vmatmul.bf16.gmra.mxu0 %v7908_v30  ;;  %v8059_v60 = vmax.f32 %v7989_v54, 0.0 }
 0xbea   : > { %v7828_v16 = vpop.f32.mrf.mxu3 }
 0xbeb   : > { %v7829_v4 = vadd.f32 %v7828_v16, %v7740_v57  ;;  %v7665_v57 = vpop.f32.mrf.mxu1 }
 0xbed   : > { %v7872_v59 = vmax.f32 %v7829_v4, 0.0 }
 0xbee   : > { %v7990_v9 = vpop.f32.mrf.mxu0 }
 0xbef   : > { %v7991_v26 = vadd.f32 %v14179_v36, %v7990_v9  ;;  %v7741_v12 = vpop.f32.mrf.mxu2 }
 0xbf0   : > { %v7742_v2 = vadd.f32 %v7741_v12, %v7653_v21  ;;  %v7666_v12 = vadd.f32 %v7665_v57, %v14089_v28 }
 0xbf1   : > { %v8060_v45 = vmax.f32 %v7991_v26, 0.0 }
 0xbf2   : > { %v7830_v23 = vpop.f32.mrf.mxu3 }
 0xbf3   : > { %v7831_v38 = vadd.f32 %v7830_v23, %v7742_v2  ;;  %v8105_v40 = vpack.c.bf16 %v8060_v45, %v8059_v60  ;;  %v7579_v60 = vadd.f32 %v14177_v49, %v14092_v48  ;;  %v7667_v2 = vpop.f32.mrf.mxu1 }
 0xbf5   : > { %v7873_v3 = vmax.f32 %v7831_v38, 0.0  ;;  %8192 = vmatmul.bf16.gmra.mxu1 %v8105_v40  ;;  %v7668_v38 = vadd.f32 %v7667_v2, %v7579_v60 }
 0xbf6   : > { %v7993_v19 = vpop.f32.mrf.mxu0 }
 0xbf7   : > { %v7909_v58 = vpack.c.bf16 %v7873_v3, %v7872_v59  ;;  %v7744_v6 = vpop.f32.mrf.mxu2  ;;  %v7994_v62 = vadd.f32 %v14179_v36, %v7993_v19 }
 0xbf8   : > { %v7745_v11 = vadd.f32 %v7744_v6, %v7656_v0 }
 0xbf9   : > { %8032 = vmatmul.bf16.gmra.mxu0 %v7909_v58  ;;  %v8061_v10 = vmax.f32 %v7994_v62, 0.0 }
 0xbfa   : > { %v7833_v55 = vpop.f32.mrf.mxu3 }
 0xbfb   : > { %v7834_v37 = vadd.f32 %v7833_v55, %v7745_v11 }
 0xbfd   : > { %v7874_v27 = vmax.f32 %v7834_v37, 0.0 }
 0xbfe   : > { %v7995_v17 = vpop.f32.mrf.mxu0 }
 0xbff   : > { %v7996_v43 = vadd.f32 %v14179_v36, %v7995_v17  ;;  %v7746_v52 = vpop.f32.mrf.mxu2 }
 0xc00   : > { %v7747_v63 = vadd.f32 %v7746_v52, %v7658_v39 }
 0xc01   : > { %v8062_v29 = vmax.f32 %v7996_v43, 0.0 }
 0xc02   : > { %v7835_v33 = vpop.f32.mrf.mxu3 }
 0xc03   : > { %v8106_v51 = vpack.c.bf16 %v8062_v29, %v8061_v10  ;;  %v7836_v22 = vadd.f32 %v7835_v33, %v7747_v63  ;;  %v14220_v63 = vld [vmem:[#allocation4 + $0xe] ss:$0 sm:$0xff] }
 0xc05   : > { %v7875_v42 = vmax.f32 %v7836_v22, 0.0  ;;  %8197 = vmatmul.bf16.gmra.mxu1 %v8106_v51 }
 0xc06   : > { %v7998_v20 = vpop.f32.mrf.mxu0 }
 0xc07   : > { %v7910_v13 = vpack.c.bf16 %v7875_v42, %v7874_v27  ;;  %v7749_v5 = vpop.f32.mrf.mxu2  ;;  %v7999_v61 = vadd.f32 %v14179_v36, %v7998_v20 }
 0xc08   : > { %v7750_v50 = vadd.f32 %v7749_v5, %v7661_v25 }
 0xc09   : > { %8037 = vmatmul.bf16.gmra.mxu0 %v7910_v13  ;;  %v8063_v30 = vmax.f32 %v7999_v61, 0.0 }
 0xc0a   : > { %v7838_v32 = vpop.f32.mrf.mxu3 }
 0xc0b   : > { %v7839_v34 = vadd.f32 %v7838_v32, %v7750_v50 }
 0xc0d   : > { %v7876_v8 = vmax.f32 %v7839_v34, 0.0 }
 0xc0e   : > { %v8000_v46 = vpop.f32.mrf.mxu0 }
 0xc0f   : > { %v8001_v24 = vadd.f32 %v14179_v36, %v8000_v46  ;;  %v7751_v53 = vpop.f32.mrf.mxu2 }
 0xc10   : > { %v7752_v1 = vadd.f32 %v7751_v53, %v7663_v18 }
 0xc11   : > { %v8064_v16 = vmax.f32 %v8001_v24, 0.0 }
 0xc12   : > { %v7840_v15 = vpop.f32.mrf.mxu3 }
 0xc13   : > { %v8107_v7 = vpack.c.bf16 %v8064_v16, %v8063_v30  ;;  %v7841_v54 = vadd.f32 %v7840_v15, %v7752_v1 }
 0xc15   : > { %v7877_v9 = vmax.f32 %v7841_v54, 0.0  ;;  %8202 = vmatmul.bf16.gmra.mxu1 %v8107_v7 }
 0xc16   : > { %v8003_v44 = vpop.f32.mrf.mxu0 }
 0xc17   : > { %v7911_v56 = vpack.c.bf16 %v7877_v9, %v7876_v8  ;;  %v7754_v21 = vpop.f32.mrf.mxu2  ;;  %v8004_v4 = vadd.f32 %v14179_v36, %v8003_v44 }
 0xc18   : > { %v7755_v45 = vadd.f32 %v7754_v21, %v7666_v12 }
 0xc19   : > { %8042 = vmatmul.bf16.gmra.mxu0 %v7911_v56  ;;  %v8065_v3 = vmax.f32 %v8004_v4, 0.0 }
 0xc1a   : > { %v7843_v26 = vpop.f32.mrf.mxu3 }
 0xc1b   : > { %v7844_v41 = vadd.f32 %v7843_v26, %v7755_v45 }
 0xc1d   : > { %v7878_v28 = vmax.f32 %v7844_v41, 0.0 }
 0xc1e   : > { %v8005_v23 = vpop.f32.mrf.mxu0 }
 0xc1f   : > { %v8006_v40 = vadd.f32 %v14179_v36, %v8005_v23  ;;  %v7756_v59 = vpop.f32.mrf.mxu2 }
 0xc20   : > { %v7757_v58 = vadd.f32 %v7756_v59, %v7668_v38 }
 0xc21   : > { %v8066_v19 = vmax.f32 %v8006_v40, 0.0 }
 0xc22   : > { %v7845_v6 = vpop.f32.mrf.mxu3 }
 0xc23   : > { %v8108_v55 = vpack.c.bf16 %v8066_v19, %v8065_v3  ;;  %v7846_v0 = vadd.f32 %v7845_v6, %v7757_v58 }
 0xc25   : > { %v7879_v35 = vmax.f32 %v7846_v0, 0.0  ;;  %8207 = vmatmul.bf16.gmra.mxu1 %v8108_v55 }
 0xc26   : > { %v8008_v48 = vpop.f32.mrf.mxu0 }
 0xc27   : > { %v7912_v49 = vpack.c.bf16 %v7879_v35, %v7878_v28  ;;  %v8009_v62 = vadd.f32 %v14179_v36, %v8008_v48 }
 0xc29   : > { %8047 = vmatmul.bf16.gmra.mxu0 %v7912_v49  ;;  %v8067_v39 = vmax.f32 %v8009_v62, 0.0 }
 0xc2e   : > { %v8010_v11 = vpop.f32.mrf.mxu0 }
 0xc2f   : > { %v8011_v17 = vadd.f32 %v14179_v36, %v8010_v11 }
 0xc31   : > { %v8068_v43 = vmax.f32 %v8011_v17, 0.0 }
 0xc33   : > { %v8109_v31 = vpack.c.bf16 %v8068_v43, %v8067_v39 }
 0xc35   : > { %8212 = vmatmul.bf16.gmra.mxu1 %v8109_v31 }
 0xc36   : > { %v8013_v52 = vpop.f32.mrf.mxu0 }
 0xc37   : > { %v8014_v10 = vadd.f32 %v14179_v36, %v8013_v52 }
 0xc39   : > { %v8069_v33 = vmax.f32 %v8014_v10, 0.0 }
 0xc3e   : > { %v8015_v37 = vpop.f32.mrf.mxu0 }
 0xc3f   : > { %v8016_v29 = vadd.f32 %v14179_v36, %v8015_v37 }
 0xc41   : > { %v8070_v51 = vmax.f32 %v8016_v29, 0.0 }
 0xc42   : > { %v8178_v22 = vpop.f32.mrf.mxu1 }
 0xc43   : > { %v8110_v27 = vpack.c.bf16 %v8070_v51, %v8069_v33  ;;  %v8179_v42 = vadd.f32 %v14220_v63, %v8178_v22 }
 0xc45   : > { %8258 = vst [vmem:[%s14227_s29] sm:$0xff] %v8179_v42  ;;  %8217 = vmatmul.bf16.gmra.mxu1 %v8110_v27 }
 0xc46   : > { %v8018_v20 = vpop.f32.mrf.mxu0 }
 0xc47   : > { %v8019_v32 = vadd.f32 %v14179_v36, %v8018_v20 }
 0xc49   : > { %v8071_v14 = vmax.f32 %v8019_v32, 0.0 }
 0xc4a   : > { %v8180_v13 = vpop.f32.mrf.mxu1 }
 0xc4b   : > { %v8181_v5 = vadd.f32 %v14220_v63, %v8180_v13 }
 0xc4d   : > { %8259 = vst [vmem:[%s14227_s29 + $0x8] sm:$0xff] %v8181_v5 }
 0xc4e   : > { %v8020_v47 = vpop.f32.mrf.mxu0 }
 0xc4f   : > { %v8021_v25 = vadd.f32 %v14179_v36, %v8020_v47 }
 0xc51   : > { %v8072_v61 = vmax.f32 %v8021_v25, 0.0 }
 0xc52   : > { %v8183_v50 = vpop.f32.mrf.mxu1 }
 0xc53   : > { %v8111_v46 = vpack.c.bf16 %v8072_v61, %v8071_v14  ;;  %v8184_v18 = vadd.f32 %v14220_v63, %v8183_v50 }
 0xc55   : > { %8260 = vst [vmem:[%s14227_s29 + $0x10] sm:$0xff] %v8184_v18  ;;  %8222 = vmatmul.bf16.gmra.mxu1 %v8111_v46 }
 0xc56   : > { %v8023_v24 = vpop.f32.mrf.mxu0 }
 0xc57   : > { %v8024_v34 = vadd.f32 %v14179_v36, %v8023_v24 }
 0xc59   : > { %v8073_v15 = vmax.f32 %v8024_v34, 0.0 }
 0xc5a   : > { %v8185_v53 = vpop.f32.mrf.mxu1 }
 0xc5b   : > { %v8186_v30 = vadd.f32 %v14220_v63, %v8185_v53 }
 0xc5d   : > { %8261 = vst [vmem:[%s14227_s29 + $0x18] sm:$0xff] %v8186_v30 }
 0xc5e   : > { %v8025_v16 = vpop.f32.mrf.mxu0 }
 0xc5f   : > { %v8026_v1 = vadd.f32 %v14179_v36, %v8025_v16 }
 0xc61   : > { %v8074_v7 = vmax.f32 %v8026_v1, 0.0 }
 0xc62   : > { %v8188_v54 = vpop.f32.mrf.mxu1 }
 0xc63   : > { %v8112_v57 = vpack.c.bf16 %v8074_v7, %v8073_v15  ;;  %v8189_v8 = vadd.f32 %v14220_v63, %v8188_v54 }
 0xc65   : > { %8262 = vst [vmem:[%s14227_s29 + $0x20] sm:$0xff] %v8189_v8  ;;  %8227 = vmatmul.bf16.gmra.mxu1 %v8112_v57 }
 0xc66   : > { %v8028_v9 = vpop.f32.mrf.mxu0 }
 0xc67   : > { %v8029_v21 = vadd.f32 %v14179_v36, %v8028_v9 }
 0xc69   : > { %v8075_v60 = vmax.f32 %v8029_v21, 0.0 }
 0xc6a   : > { %v8190_v44 = vpop.f32.mrf.mxu1 }
 0xc6b   : > { %v8191_v56 = vadd.f32 %v14220_v63, %v8190_v44 }
 0xc6d   : > { %8263 = vst [vmem:[%s14227_s29 + $0x28] sm:$0xff] %v8191_v56 }
 0xc6e   : > { %v8030_v26 = vpop.f32.mrf.mxu0 }
 0xc6f   : > { %v8031_v12 = vadd.f32 %v14179_v36, %v8030_v26 }
 0xc71   : > { %v8076_v4 = vmax.f32 %v8031_v12, 0.0 }
 0xc72   : > { %v8193_v45 = vpop.f32.mrf.mxu1 }
 0xc73   : > { %v8113_v2 = vpack.c.bf16 %v8076_v4, %v8075_v60  ;;  %v8194_v23 = vadd.f32 %v14220_v63, %v8193_v45 }
 0xc75   : > { %8264 = vst [vmem:[%s14227_s29 + $0x30] sm:$0xff] %v8194_v23  ;;  %8232 = vmatmul.bf16.gmra.mxu1 %v8113_v2 }
 0xc76   : > { %v8033_v38 = vpop.f32.mrf.mxu0 }
 0xc77   : > { %v8034_v3 = vadd.f32 %v14179_v36, %v8033_v38 }
 0xc79   : > { %v8077_v58 = vmax.f32 %v8034_v3, 0.0 }
 0xc7a   : > { %v8195_v40 = vpop.f32.mrf.mxu1 }
 0xc7b   : > { %v8196_v59 = vadd.f32 %v14220_v63, %v8195_v40 }
 0xc7d   : > { %8265 = vst [vmem:[%s14227_s29 + $0x38] sm:$0xff] %v8196_v59 }
 0xc7e   : > { %v8035_v41 = vpop.f32.mrf.mxu0 }
 0xc7f   : > { %v8036_v19 = vadd.f32 %v14179_v36, %v8035_v41 }
 0xc81   : > { %v8078_v6 = vmax.f32 %v8036_v19, 0.0 }
 0xc82   : > { %v8198_v55 = vpop.f32.mrf.mxu1 }
 0xc83   : > { %v8114_v0 = vpack.c.bf16 %v8078_v6, %v8077_v58  ;;  %v8199_v28 = vadd.f32 %v14220_v63, %v8198_v55 }
 0xc85   : > { %8266 = vst [vmem:[%s14227_s29 + $0x40] sm:$0xff] %v8199_v28  ;;  %8237 = vmatmul.bf16.gmra.mxu1 %v8114_v0 }
 0xc86   : > { %v8038_v35 = vpop.f32.mrf.mxu0 }
 0xc87   : > { %v8039_v62 = vadd.f32 %v14179_v36, %v8038_v35 }
 0xc89   : > { %v8079_v39 = vmax.f32 %v8039_v62, 0.0 }
 0xc8a   : > { %v8200_v48 = vpop.f32.mrf.mxu1 }
 0xc8b   : > { %v8201_v49 = vadd.f32 %v14220_v63, %v8200_v48 }
 0xc8d   : > { %8267 = vst [vmem:[%s14227_s29 + $0x48] sm:$0xff] %v8201_v49 }
 0xc8e   : > { %v8040_v11 = vpop.f32.mrf.mxu0 }
 0xc8f   : > { %v8041_v17 = vadd.f32 %v14179_v36, %v8040_v11 }
 0xc91   : > { %v8080_v43 = vmax.f32 %v8041_v17, 0.0 }
 0xc92   : > { %v8203_v31 = vpop.f32.mrf.mxu1 }
 0xc93   : > { %v8115_v52 = vpack.c.bf16 %v8080_v43, %v8079_v39  ;;  %v8204_v10 = vadd.f32 %v14220_v63, %v8203_v31 }
 0xc95   : > { %8268 = vst [vmem:[%s14227_s29 + $0x50] sm:$0xff] %v8204_v10  ;;  %8242 = vmatmul.bf16.gmra.mxu1 %v8115_v52 }
 0xc96   : > { %v8043_v37 = vpop.f32.mrf.mxu0 }
 0xc97   : > { %v8044_v51 = vadd.f32 %v14179_v36, %v8043_v37 }
 0xc99   : > { %v8081_v42 = vmax.f32 %v8044_v51, 0.0 }
 0xc9a   : > { %v8205_v29 = vpop.f32.mrf.mxu1 }
 0xc9b   : > { %v8206_v33 = vadd.f32 %v14220_v63, %v8205_v29 }
 0xc9d   : > { %8269 = vst [vmem:[%s14227_s29 + $0x58] sm:$0xff] %v8206_v33 }
 0xc9e   : > { %v8045_v22 = vpop.f32.mrf.mxu0 }
 0xc9f   : > { %v8046_v27 = vadd.f32 %v14179_v36, %v8045_v22 }
 0xca1   : > { %v8082_v20 = vmax.f32 %v8046_v27, 0.0 }
 0xca2   : > { %v8208_v13 = vpop.f32.mrf.mxu1 }
 0xca3   : > { %v8116_v5 = vpack.c.bf16 %v8082_v20, %v8081_v42  ;;  %v8209_v32 = vadd.f32 %v14220_v63, %v8208_v13 }
 0xca5   : > { %8270 = vst [vmem:[%s14227_s29 + $0x60] sm:$0xff] %v8209_v32  ;;  %8247 = vmatmul.bf16.gmra.mxu1 %v8116_v5 }
 0xca6   : > { %v8048_v47 = vpop.f32.mrf.mxu0 }
 0xca7   : > { %v8049_v61 = vadd.f32 %v14179_v36, %v8048_v47 }
 0xca9   : > { %v8083_v18 = vmax.f32 %v8049_v61, 0.0 }
 0xcaa   : > { %v8210_v25 = vpop.f32.mrf.mxu1 }
 0xcab   : > { %v8211_v14 = vadd.f32 %v14220_v63, %v8210_v25 }
 0xcad   : > { %8271 = vst [vmem:[%s14227_s29 + $0x68] sm:$0xff] %v8211_v14 }
 0xcae   : > { %v8050_v50 = vpop.f32.mrf.mxu0 }
 0xcaf   : > { %v8051_v46 = vadd.f32 %v14179_v36, %v8050_v50 }
 0xcb1   : > { %v8084_v24 = vmax.f32 %v8051_v46, 0.0 }
 0xcb2   : > { %v8213_v53 = vpop.f32.mrf.mxu1 }
 0xcb3   : > { %v8117_v30 = vpack.c.bf16 %v8084_v24, %v8083_v18  ;;  %v8214_v34 = vadd.f32 %v14220_v63, %v8213_v53 }
 0xcb5   : > { %8272 = vst [vmem:[%s14227_s29 + $0x70] sm:$0xff] %v8214_v34  ;;  %8252 = vmatmul.bf16.gmra.mxu1 %v8117_v30 }
 0xcba   : > { %v8215_v16 = vpop.f32.mrf.mxu1 }
 0xcbb   : > { %v8216_v1 = vadd.f32 %v14220_v63, %v8215_v16 }
 0xcbd   : > { %8273 = vst [vmem:[%s14227_s29 + $0x78] sm:$0xff] %v8216_v1 }
 0xcc2   : > { %v8218_v15 = vpop.f32.mrf.mxu1 }
 0xcc3   : > { %v8219_v7 = vadd.f32 %v14220_v63, %v8218_v15 }
 0xcc5   : > { %8274 = vst [vmem:[%s14227_s29 + $0x80] sm:$0xff] %v8219_v7 }
 0xcca   : > { %v8220_v36 = vpop.f32.mrf.mxu1 }
 0xccb   : > { %v8221_v54 = vadd.f32 %v14220_v63, %v8220_v36 }
 0xccd   : > { %8275 = vst [vmem:[%s14227_s29 + $0x88] sm:$0xff] %v8221_v54 }
 0xcd2   : > { %v8223_v57 = vpop.f32.mrf.mxu1 }
 0xcd3   : > { %v8224_v8 = vadd.f32 %v14220_v63, %v8223_v57 }
 0xcd5   : > { %8276 = vst [vmem:[%s14227_s29 + $0x90] sm:$0xff] %v8224_v8 }
 0xcda   : > { %v8225_v9 = vpop.f32.mrf.mxu1 }
 0xcdb   : > { %v8226_v44 = vadd.f32 %v14220_v63, %v8225_v9 }
 0xcdd   : > { %8277 = vst [vmem:[%s14227_s29 + $0x98] sm:$0xff] %v8226_v44 }
 0xce2   : > { %v8228_v56 = vpop.f32.mrf.mxu1 }
 0xce3   : > { %v8229_v21 = vadd.f32 %v14220_v63, %v8228_v56 }
 0xce5   : > { %8278 = vst [vmem:[%s14227_s29 + $0xa0] sm:$0xff] %v8229_v21 }
 0xcea   : > { %v8230_v26 = vpop.f32.mrf.mxu1 }
 0xceb   : > { %v8231_v12 = vadd.f32 %v14220_v63, %v8230_v26 }
 0xced   : > { %8279 = vst [vmem:[%s14227_s29 + $0xa8] sm:$0xff] %v8231_v12 }
 0xcf2   : > { %v8233_v60 = vpop.f32.mrf.mxu1 }
 0xcf3   : > { %v8234_v4 = vadd.f32 %v14220_v63, %v8233_v60 }
 0xcf5   : > { %8280 = vst [vmem:[%s14227_s29 + $0xb0] sm:$0xff] %v8234_v4 }
 0xcfa   : > { %v8235_v45 = vpop.f32.mrf.mxu1 }
 0xcfb   : > { %v8236_v2 = vadd.f32 %v14220_v63, %v8235_v45 }
 0xcfd   : > { %8281 = vst [vmem:[%s14227_s29 + $0xb8] sm:$0xff] %v8236_v2 }
 0xd02   : > { %v8238_v23 = vpop.f32.mrf.mxu1 }
 0xd03   : > { %v8239_v38 = vadd.f32 %v14220_v63, %v8238_v23 }
 0xd05   : > { %8282 = vst [vmem:[%s14227_s29 + $0xc0] sm:$0xff] %v8239_v38 }
 0xd0a   : > { %v8240_v40 = vpop.f32.mrf.mxu1 }
 0xd0b   : > { %v8241_v59 = vadd.f32 %v14220_v63, %v8240_v40 }
 0xd0d   : > { %8283 = vst [vmem:[%s14227_s29 + $0xc8] sm:$0xff] %v8241_v59 }
 0xd12   : > { %v8243_v3 = vpop.f32.mrf.mxu1 }
 0xd13   : > { %v8244_v41 = vadd.f32 %v14220_v63, %v8243_v3 }
 0xd15   : > { %8284 = vst [vmem:[%s14227_s29 + $0xd0] sm:$0xff] %v8244_v41 }
 0xd1a   : > { %v8245_v19 = vpop.f32.mrf.mxu1 }
 0xd1b   : > { %v8246_v58 = vadd.f32 %v14220_v63, %v8245_v19 }
 0xd1d   : > { %8285 = vst [vmem:[%s14227_s29 + $0xd8] sm:$0xff] %v8246_v58 }
 0xd22   : > { %v8248_v6 = vpop.f32.mrf.mxu1 }
 0xd23   : > { %v8249_v55 = vadd.f32 %v14220_v63, %v8248_v6 }
 0xd25   : > { %8286 = vst [vmem:[%s14227_s29 + $0xe0] sm:$0xff] %v8249_v55 }
 0xd2a   : > { %v8250_v0 = vpop.f32.mrf.mxu1 }
 0xd2b   : > { %v8251_v28 = vadd.f32 %v14220_v63, %v8250_v0 }
 0xd2d   : > { %8287 = vst [vmem:[%s14227_s29 + $0xe8] sm:$0xff] %v8251_v28 }
 0xd32   : > { %v8253_v35 = vpop.f32.mrf.mxu1 }
 0xd33   : > { %v8254_v48 = vadd.f32 %v14220_v63, %v8253_v35 }
 0xd35   : > { %8288 = vst [vmem:[%s14227_s29 + $0xf0] sm:$0xff] %v8254_v48 }
 0xd3a   : > { %v8255_v49 = vpop.f32.mrf.mxu1 }
 0xd3b   : > { %v8256_v62 = vadd.f32 %v14220_v63, %v8255_v49 }
 0xd3d   : > { %8289 = vst [vmem:[%s14227_s29 + $0xf8] sm:$0xff] %v8256_v62 }
 0xd3e PF: > { %s19_s24 = sadd.s32 1, %s10330_s24  }
 0xd3f   : > { %p16_p7 = scmp.ge.s32.totalorder %s19_s24, 4  }
 0xd41   :  { %18 = sbr.rel (!%p16_p7) target bundleno = 2 (0x2), region = 87 }
 0xd46   :  { %8312 = vsyncpa [#allocation3], 1 }
 0xd47   :  { %8314 = vsyncpa [#allocation3 + $0x1], 1 }
 0xd48   :  { %8315 = vsyncpa [#allocation5], 1 }

</bundles_post_ra>
